<compile_context>
chip_gen: v5e
topology: v5e:2x2
jax: 0.10.0
libtpu: 0.0.40
codegen_flags: <defaults>
</compile_context>

<pallas_src>
import functools

import jax
import jax.numpy as jnp
from jax import lax
from jax.experimental import pallas as pl
from jax.experimental.pallas import tpu as pltpu


def _fused_kernel(
    # inputs
    x_ref,        # (1, S, ch)   f32   one study's instance stack, channels-last
    enc_w_ref,    # (ch, nc)     f32   stand-in 1x1-conv encoder weight
    wq_ref,       # (nc, d8p)    bf16  query proj (zero-padded to >=128 lanes)
    bq_ref,       # (1, d8p)     f32
    wk_ref,       # (nc, d8p)    bf16
    bk_ref,       # (1, d8p)     f32
    wv_ref,       # (nc, nc)     bf16
    bv_ref,       # (1, nc)      f32
    w1_ref,       # (2*nc, H)    bf16  head Linear(2nc, 512)
    b1_ref,       # (1, H)       f32
    w2_ref,       # (H, ncls)    bf16  fc Linear(512, num_classes)
    b2_ref,       # (1, ncls)    f32
    gamma_ref,    # (1, 1)       f32   SMEM scalar
    # outputs
    feat_ref,     # (1, 1, H)    f32
    logit_ref,    # (1, 1, ncls) f32
    # scratch
    enc_sc,       # (S, nc)      bf16  encoder output, resident across KV steps
    q_sc,         # (S, d8p)     bf16
    m_sc,         # (S, 1)       f32   online-softmax running max
    l_sc,         # (S, 1)       f32   online-softmax running sum
    acc_sc,       # (S, nc)      f32   online-softmax accumulator
    *, tk: int):
    t = pl.program_id(1)
    n_kv = pl.num_programs(1)
    nc = enc_sc.shape[1]

    # ---- stage 1 (first KV step): encoder + Q projection, init flash stats --
    @pl.when(t == 0)
    def _prologue():
        x = x_ref[0]                                              # (S, ch) f32
        # stand-in backbone: 1x1 conv + ReLU (K = ch is tiny -> keep f32).
        enc = jnp.maximum(
            jnp.dot(x, enc_w_ref[...], preferred_element_type=jnp.float32),
            0.0)
        enc_bf = enc.astype(jnp.bfloat16)
        enc_sc[...] = enc_bf
        q = jnp.dot(enc_bf, wq_ref[...],
                    preferred_element_type=jnp.float32) + bq_ref[...]
        q_sc[...] = q.astype(jnp.bfloat16)
        m_sc[...] = jnp.full(m_sc.shape, -jnp.inf, m_sc.dtype)
        l_sc[...] = jnp.zeros(l_sc.shape, l_sc.dtype)
        acc_sc[...] = jnp.zeros(acc_sc.shape, acc_sc.dtype)

    # ---- stage 2: flash-style online softmax over one KV tile ---------------
    start = pl.multiple_of(t * tk, tk)
    e_t = enc_sc[pl.ds(start, tk), :]                             # (tk, nc) bf16
    k_t = jnp.dot(e_t, wk_ref[...],
                  preferred_element_type=jnp.float32) + bk_ref[...]
    v_t = jnp.dot(e_t, wv_ref[...],
                  preferred_element_type=jnp.float32) + bv_ref[...]
    # energy: contract last dims directly (no explicit XLU transpose of K).
    s = lax.dot_general(q_sc[...], k_t.astype(jnp.bfloat16),
                        dimension_numbers=(((1,), (1,)), ((), ())),
                        preferred_element_type=jnp.float32)       # (S, tk) f32
    m_prev = m_sc[...]
    m_new = jnp.maximum(m_prev, jnp.max(s, axis=-1, keepdims=True))
    alpha = jnp.exp(m_prev - m_new)
    p = jnp.exp(s - m_new)
    l_sc[...] = alpha * l_sc[...] + jnp.sum(p, axis=-1, keepdims=True)
    acc_sc[...] = alpha * acc_sc[...] + jnp.dot(
        p.astype(jnp.bfloat16), v_t.astype(jnp.bfloat16),
        preferred_element_type=jnp.float32)
    m_sc[...] = m_new

    # ---- stage 3 (last KV step): gamma gate + residual + head + fc ----------
    @pl.when(t == n_kv - 1)
    def _epilogue():
        g = jax.nn.sigmoid(jnp.full((1, 1), gamma_ref[0, 0], jnp.float32))
        enc_f32 = enc_sc[...].astype(jnp.float32)
        o = acc_sc[...] * pl.reciprocal(l_sc[...], approx=True)
        att = g * o + enc_f32                                     # (S, nc) f32
        mx = jnp.max(att, axis=0, keepdims=True)                  # (1, nc)
        av = jnp.mean(att, axis=0, keepdims=True)                 # (1, nc)
        # AdaptiveConcatPool2d order is [max, avg]; split the Linear(2nc, H)
        # weight instead of concatenating (keeps both operands lane-dense).
        feat = jnp.maximum(
            jnp.dot(mx.astype(jnp.bfloat16), w1_ref[0:nc, :],
                    preferred_element_type=jnp.float32)
            + jnp.dot(av.astype(jnp.bfloat16), w1_ref[nc:2 * nc, :],
                      preferred_element_type=jnp.float32)
            + b1_ref[...], 0.0)                                   # (1, H) f32
        feat_ref[0] = feat
        logit_ref[0] = jnp.dot(feat.astype(jnp.bfloat16), w2_ref[...],
                               preferred_element_type=jnp.float32) + b2_ref[...]


def multi_instance_forward(x, params, *, kv_tile=128):
    bs, n, ch, w, h = x.shape
    nc = params["enc_w"].shape[1]
    d8 = params["wq"].shape[1]
    H = params["w1"].shape[1]
    ncls = params["w2"].shape[1]
    S = n * w * h

    tk = min(kv_tile, S)
    assert S % tk == 0, "n*w2*h2 must be divisible by the KV tile size"
    n_kv = S // tk

    # (bs, n, ch, w, h) -> channels-last (bs, S=n*w*h, ch); this is exactly the
    # PyTorch permute/view that merges the instances into the spatial axis.
    x_cl = jnp.transpose(x, (0, 1, 3, 4, 2)).reshape(bs, S, ch).astype(jnp.float32)

    # Lane-dense padding of the query/key dim (exact: zero pads on both q and k
    # contribute zero to the energy).
    d8p = max(128, ((d8 + 127) // 128) * 128)
    pq = d8p - d8
    wq = jnp.pad(params["wq"], ((0, 0), (0, pq))).astype(jnp.bfloat16)
    wk = jnp.pad(params["wk"], ((0, 0), (0, pq))).astype(jnp.bfloat16)
    bq = jnp.pad(params["bq"], ((0, 0), (0, pq))).astype(jnp.float32)
    bk = jnp.pad(params["bk"], ((0, 0), (0, pq))).astype(jnp.float32)
    wv = params["wv"].astype(jnp.bfloat16)
    w1 = params["w1"].astype(jnp.bfloat16)
    w2 = params["w2"].astype(jnp.bfloat16)
    gamma = params["gamma"].reshape(1, 1).astype(jnp.float32)

    kernel = functools.partial(_fused_kernel, tk=tk)

    feat, logits = pl.pallas_call(
        kernel,
        out_shape=(
            jax.ShapeDtypeStruct((bs, 1, H), jnp.float32),
            jax.ShapeDtypeStruct((bs, 1, ncls), jnp.float32),
        ),
        grid=(bs, n_kv),
        in_specs=[
            pl.BlockSpec((1, S, ch), lambda b, t: (b, 0, 0)),
            pl.BlockSpec((ch, nc), lambda b, t: (0, 0)),
            pl.BlockSpec((nc, d8p), lambda b, t: (0, 0)),
            pl.BlockSpec((1, d8p), lambda b, t: (0, 0)),
            pl.BlockSpec((nc, d8p), lambda b, t: (0, 0)),
            pl.BlockSpec((1, d8p), lambda b, t: (0, 0)),
            pl.BlockSpec((nc, nc), lambda b, t: (0, 0)),
            pl.BlockSpec((1, nc), lambda b, t: (0, 0)),
            pl.BlockSpec((2 * nc, H), lambda b, t: (0, 0)),
            pl.BlockSpec((1, H), lambda b, t: (0, 0)),
            pl.BlockSpec((H, ncls), lambda b, t: (0, 0)),
            pl.BlockSpec((1, ncls), lambda b, t: (0, 0)),
            pl.BlockSpec(memory_space=pltpu.MemorySpace.SMEM),   # gamma scalar
        ],
        out_specs=(
            pl.BlockSpec((1, 1, H), lambda b, t: (b, 0, 0)),
            pl.BlockSpec((1, 1, ncls), lambda b, t: (b, 0, 0)),
        ),
        scratch_shapes=[
            pltpu.VMEM((S, nc), jnp.bfloat16),    # enc
            pltpu.VMEM((S, d8p), jnp.bfloat16),   # q
            pltpu.VMEM((S, 1), jnp.float32),      # m
            pltpu.VMEM((S, 1), jnp.float32),      # l
            pltpu.VMEM((S, nc), jnp.float32),     # acc
        ],
        compiler_params=pltpu.CompilerParams(
            dimension_semantics=("parallel", "arbitrary"),
            vmem_limit_bytes=32 * 1024 * 1024,
        ),
    )(x_cl, params["enc_w"].astype(jnp.float32), wq, bq, wk, bk, wv,
      params["bv"].astype(jnp.float32), w1, params["b1"].astype(jnp.float32),
      w2, params["b2"].astype(jnp.float32), gamma)

    return feat[:, 0, :], logits[:, 0, :]


# ---------------------------------------------------------------------------
# pure-JAX f32 reference for correctness check
# ---------------------------------------------------------------------------
def _ref_forward(x, params):
    bs, n, ch, w, h = x.shape
    xf = jnp.transpose(x, (0, 1, 3, 4, 2)).reshape(bs, n * w * h, ch)
    enc = jnp.maximum(jnp.einsum("bsc,cd->bsd", xf, params["enc_w"]), 0.0)
    q = enc @ params["wq"] + params["bq"]
    k = enc @ params["wk"] + params["bk"]
    v = enc @ params["wv"] + params["bv"]
    energy = jnp.einsum("bsc,btc->bst", q, k)
    attn = jax.nn.softmax(energy, axis=-1)
    o = jnp.einsum("bst,btc->bsc", attn, v)
    att = jax.nn.sigmoid(params["gamma"][0, 0]) * o + enc
    pooled = jnp.concatenate([att.max(axis=1), att.mean(axis=1)], axis=-1)
    feat = jnp.maximum(pooled @ params["w1"] + params["b1"], 0.0)
    logits = feat @ params["w2"] + params["b2"]
    return feat, logits


if __name__ == "__main__":
    # bs=2 studies, n=4 instances each, 3 channels, 8x8 images -> S = 256
    bs, n, ch, w, h = 2, 4, 3, 8, 8
    nc = 512                    # stand-in backbone feature channels (lane-dense)
    num_classes = 2

    key = jax.random.PRNGKey(0)
    kx, ke, kq, kk, kv, k1, k2 = jax.random.split(key, 7)

    x = jax.random.normal(kx, (bs, n, ch, w, h), dtype=jnp.float32)

    params = dict(
        enc_w=0.1 * jax.random.normal(ke, (ch, nc), dtype=jnp.float32),
        wq=0.1 * jax.random.normal(kq, (nc, nc // 8), dtype=jnp.float32),
        bq=jnp.zeros((1, nc // 8), jnp.float32),
        wk=0.1 * jax.random.normal(kk, (nc, nc // 8), dtype=jnp.float32),
        bk=jnp.zeros((1, nc // 8), jnp.float32),
        wv=0.1 * jax.random.normal(kv, (nc, nc), dtype=jnp.float32),
        bv=jnp.zeros((1, nc), jnp.float32),
        gamma=jnp.full((1, 1), -8.0, jnp.float32),   # initial_gamma = -8
        w1=0.05 * jax.random.normal(k1, (2 * nc, 512), dtype=jnp.float32),
        b1=jnp.zeros((1, 512), jnp.float32),
        w2=0.05 * jax.random.normal(k2, (512, num_classes), dtype=jnp.float32),
        b2=jnp.zeros((1, num_classes), jnp.float32),
    )

    feat, logits = jax.jit(multi_instance_forward)(x, params)
    jax.block_until_ready((feat, logits))

    feat_ref, logits_ref = _ref_forward(x, params)
    assert feat.shape == (bs, 512) and logits.shape == (bs, num_classes)
    assert jnp.allclose(feat, feat_ref, rtol=2e-2, atol=2e-2), (
        float(jnp.max(jnp.abs(feat - feat_ref))))
    assert jnp.allclose(logits, logits_ref, rtol=2e-2, atol=2e-2), (
        float(jnp.max(jnp.abs(logits - logits_ref))))

    print("KERNEL_OK")
</pallas_src>

<mosaic_0001>
module attributes {stable_mosaic.version = 11 : i64} {
  func.func @_fused_kernel(%arg0: i32, %arg1: i32, %arg2: memref<1x256x3xf32, #tpu.memory_space<vmem>>, %arg3: memref<3x512xf32, #tpu.memory_space<vmem>>, %arg4: memref<512x128xbf16, #tpu.memory_space<vmem>>, %arg5: memref<1x128xf32, #tpu.memory_space<vmem>>, %arg6: memref<512x128xbf16, #tpu.memory_space<vmem>>, %arg7: memref<1x128xf32, #tpu.memory_space<vmem>>, %arg8: memref<512x512xbf16, #tpu.memory_space<vmem>>, %arg9: memref<1x512xf32, #tpu.memory_space<vmem>>, %arg10: memref<1024x512xbf16, #tpu.memory_space<vmem>>, %arg11: memref<1x512xf32, #tpu.memory_space<vmem>>, %arg12: memref<512x2xbf16, #tpu.memory_space<vmem>>, %arg13: memref<1x2xf32, #tpu.memory_space<vmem>>, %arg14: memref<1x1xf32, #tpu.memory_space<smem>>, %arg15: memref<1x1x512xf32, #tpu.memory_space<vmem>>, %arg16: memref<1x1x2xf32, #tpu.memory_space<vmem>>, %arg17: memref<256x512xbf16, #tpu.memory_space<vmem>>, %arg18: memref<256x128xbf16, #tpu.memory_space<vmem>>, %arg19: memref<256x1xf32, #tpu.memory_space<vmem>>, %arg20: memref<256x1xf32, #tpu.memory_space<vmem>>, %arg21: memref<256x512xf32, #tpu.memory_space<vmem>>) attributes {dimension_semantics = [#tpu.dimension_semantics<parallel>, #tpu.dimension_semantics<arbitrary>], iteration_bounds = array<i64: 2, 2>, scalar_prefetch = 0 : i64, scratch_operands = 5 : i64, tpu.core_type = #tpu.core_type<tc>, window_params = [{transform_indices = @transform_0, window_bounds = array<i64: 1, 256, 3>}, {pipeline_mode = #tpu.pipeline_mode<synchronous>, transform_indices = @transform_1, window_bounds = array<i64: 3, 512>}, {pipeline_mode = #tpu.pipeline_mode<synchronous>, transform_indices = @transform_2, window_bounds = array<i64: 512, 128>}, {pipeline_mode = #tpu.pipeline_mode<synchronous>, transform_indices = @transform_3, window_bounds = array<i64: 1, 128>}, {pipeline_mode = #tpu.pipeline_mode<synchronous>, transform_indices = @transform_4, window_bounds = array<i64: 512, 128>}, {pipeline_mode = #tpu.pipeline_mode<synchronous>, transform_indices = @transform_5, window_bounds = array<i64: 1, 128>}, {pipeline_mode = #tpu.pipeline_mode<synchronous>, transform_indices = @transform_6, window_bounds = array<i64: 512, 512>}, {pipeline_mode = #tpu.pipeline_mode<synchronous>, transform_indices = @transform_7, window_bounds = array<i64: 1, 512>}, {pipeline_mode = #tpu.pipeline_mode<synchronous>, transform_indices = @transform_8, window_bounds = array<i64: 1024, 512>}, {pipeline_mode = #tpu.pipeline_mode<synchronous>, transform_indices = @transform_9, window_bounds = array<i64: 1, 512>}, {pipeline_mode = #tpu.pipeline_mode<synchronous>, transform_indices = @transform_10, window_bounds = array<i64: 512, 2>}, {pipeline_mode = #tpu.pipeline_mode<synchronous>, transform_indices = @transform_11, window_bounds = array<i64: 1, 2>}, {transform_indices = @transform_12, window_bounds = array<i64: 1, 1>}, {transform_indices = @transform_13, window_bounds = array<i64: 1, 1, 512>}, {transform_indices = @transform_14, window_bounds = array<i64: 1, 1, 2>}]} {
    %c0_i32 = arith.constant 0 : i32
    %0 = arith.cmpi eq, %arg1, %c0_i32 : i32
    %1 = arith.extui %0 : i1 to i32
    %c0_i32_0 = arith.constant 0 : i32
    %2 = arith.cmpi ne, %1, %c0_i32_0 : i32
    scf.if %2 {
      %c0_29 = arith.constant 0 : index
      %c0_30 = arith.constant 0 : index
      %c0_31 = arith.constant 0 : index
      %47 = vector.load %arg2[%c0_29, %c0_30, %c0_31] : memref<1x256x3xf32, #tpu.memory_space<vmem>>, vector<1x256x3xf32>
      %48 = vector.shape_cast %47 : vector<1x256x3xf32> to vector<256x3xf32>
      %c0_32 = arith.constant 0 : index
      %c0_33 = arith.constant 0 : index
      %49 = vector.load %arg3[%c0_32, %c0_33] : memref<3x512xf32, #tpu.memory_space<vmem>>, vector<3x512xf32>
      %cst_34 = arith.constant dense<0.000000e+00> : vector<256x512xf32>
      %50 = tpu.matmul %48, %49, %cst_34 {dimension_numbers = #tpu.dot_dimension_numbers<[1], [0], [0], [1], [0, 0, 1, 1], [], []>} : vector<256x3xf32>, vector<3x512xf32>, vector<256x512xf32> -> vector<256x512xf32>
      %cst_35 = arith.constant 0.000000e+00 : f32
      %51 = vector.broadcast %cst_35 : f32 to vector<256x512xf32>
      %52 = arith.maximumf %50, %51 : vector<256x512xf32>
      %53 = arith.truncf %52 : vector<256x512xf32> to vector<256x512xbf16>
      %c0_36 = arith.constant 0 : index
      %c0_37 = arith.constant 0 : index
      %54 = vector.load %arg17[%c0_36, %c0_37] : memref<256x512xbf16, #tpu.memory_space<vmem>>, vector<256x512xbf16>
      tpu.vector_store %arg17[%c0_36, %c0_37], %53 {strides = array<i32>} : memref<256x512xbf16, #tpu.memory_space<vmem>>, vector<256x512xbf16>,
      %c0_38 = arith.constant 0 : index
      %c0_39 = arith.constant 0 : index
      %55 = vector.load %arg4[%c0_38, %c0_39] : memref<512x128xbf16, #tpu.memory_space<vmem>>, vector<512x128xbf16>
      %cst_40 = arith.constant dense<0.000000e+00> : vector<256x128xf32>
      %56 = tpu.matmul %53, %55, %cst_40 {dimension_numbers = #tpu.dot_dimension_numbers<[1], [0], [0], [1], [0, 0, 1, 1], [], []>} : vector<256x512xbf16>, vector<512x128xbf16>, vector<256x128xf32> -> vector<256x128xf32>
      %c0_41 = arith.constant 0 : index
      %c0_42 = arith.constant 0 : index
      %57 = vector.load %arg5[%c0_41, %c0_42] : memref<1x128xf32, #tpu.memory_space<vmem>>, vector<1x128xf32>
      %58 = vector.broadcast %57 : vector<1x128xf32> to vector<256x128xf32>
      %59 = arith.addf %56, %58 : vector<256x128xf32>
      %60 = arith.truncf %59 : vector<256x128xf32> to vector<256x128xbf16>
      %c0_43 = arith.constant 0 : index
      %c0_44 = arith.constant 0 : index
      %61 = vector.load %arg18[%c0_43, %c0_44] : memref<256x128xbf16, #tpu.memory_space<vmem>>, vector<256x128xbf16>
      tpu.vector_store %arg18[%c0_43, %c0_44], %60 {strides = array<i32>} : memref<256x128xbf16, #tpu.memory_space<vmem>>, vector<256x128xbf16>,
      %cst_45 = arith.constant 0xFF800000 : f32
      %62 = vector.broadcast %cst_45 : f32 to vector<256x1xf32>
      %c0_46 = arith.constant 0 : index
      %c0_47 = arith.constant 0 : index
      %63 = vector.load %arg19[%c0_46, %c0_47] : memref<256x1xf32, #tpu.memory_space<vmem>>, vector<256x1xf32>
      tpu.vector_store %arg19[%c0_46, %c0_47], %62 {strides = array<i32>} : memref<256x1xf32, #tpu.memory_space<vmem>>, vector<256x1xf32>,
      %cst_48 = arith.constant 0.000000e+00 : f32
      %64 = vector.broadcast %cst_48 : f32 to vector<256x1xf32>
      %c0_49 = arith.constant 0 : index
      %c0_50 = arith.constant 0 : index
      %65 = vector.load %arg20[%c0_49, %c0_50] : memref<256x1xf32, #tpu.memory_space<vmem>>, vector<256x1xf32>
      tpu.vector_store %arg20[%c0_49, %c0_50], %64 {strides = array<i32>} : memref<256x1xf32, #tpu.memory_space<vmem>>, vector<256x1xf32>,
      %cst_51 = arith.constant 0.000000e+00 : f32
      %66 = vector.broadcast %cst_51 : f32 to vector<256x512xf32>
      %c0_52 = arith.constant 0 : index
      %c0_53 = arith.constant 0 : index
      %67 = vector.load %arg21[%c0_52, %c0_53] : memref<256x512xf32, #tpu.memory_space<vmem>>, vector<256x512xf32>
      tpu.vector_store %arg21[%c0_52, %c0_53], %66 {strides = array<i32>} : memref<256x512xf32, #tpu.memory_space<vmem>>, vector<256x512xf32>,
    } else {
    }
    %c128_i32 = arith.constant 128 : i32
    %3 = arith.muli %arg1, %c128_i32 : i32
    %4 = tpu.assume_multiple %3, 128 : i32
    %5 = arith.index_cast %4 : i32 to index
    %c0 = arith.constant 0 : index
    %6 = vector.load %arg17[%5, %c0] : memref<256x512xbf16, #tpu.memory_space<vmem>>, vector<128x512xbf16>
    %c0_1 = arith.constant 0 : index
    %c0_2 = arith.constant 0 : index
    %7 = vector.load %arg6[%c0_1, %c0_2] : memref<512x128xbf16, #tpu.memory_space<vmem>>, vector<512x128xbf16>
    %cst = arith.constant dense<0.000000e+00> : vector<128x128xf32>
    %8 = tpu.matmul %6, %7, %cst {dimension_numbers = #tpu.dot_dimension_numbers<[1], [0], [0], [1], [0, 0, 1, 1], [], []>} : vector<128x512xbf16>, vector<512x128xbf16>, vector<128x128xf32> -> vector<128x128xf32>
    %c0_3 = arith.constant 0 : index
    %c0_4 = arith.constant 0 : index
    %9 = vector.load %arg7[%c0_3, %c0_4] : memref<1x128xf32, #tpu.memory_space<vmem>>, vector<1x128xf32>
    %10 = vector.broadcast %9 : vector<1x128xf32> to vector<128x128xf32>
    %11 = arith.addf %8, %10 : vector<128x128xf32>
    %c0_5 = arith.constant 0 : index
    %c0_6 = arith.constant 0 : index
    %12 = vector.load %arg8[%c0_5, %c0_6] : memref<512x512xbf16, #tpu.memory_space<vmem>>, vector<512x512xbf16>
    %cst_7 = arith.constant dense<0.000000e+00> : vector<128x512xf32>
    %13 = tpu.matmul %6, %12, %cst_7 {dimension_numbers = #tpu.dot_dimension_numbers<[1], [0], [0], [1], [0, 0, 1, 1], [], []>} : vector<128x512xbf16>, vector<512x512xbf16>, vector<128x512xf32> -> vector<128x512xf32>
    %c0_8 = arith.constant 0 : index
    %c0_9 = arith.constant 0 : index
    %14 = vector.load %arg9[%c0_8, %c0_9] : memref<1x512xf32, #tpu.memory_space<vmem>>, vector<1x512xf32>
    %15 = vector.broadcast %14 : vector<1x512xf32> to vector<128x512xf32>
    %16 = arith.addf %13, %15 : vector<128x512xf32>
    %c0_10 = arith.constant 0 : index
    %c0_11 = arith.constant 0 : index
    %17 = vector.load %arg18[%c0_10, %c0_11] : memref<256x128xbf16, #tpu.memory_space<vmem>>, vector<256x128xbf16>
    %18 = arith.truncf %11 : vector<128x128xf32> to vector<128x128xbf16>
    %cst_12 = arith.constant dense<0.000000e+00> : vector<256x128xf32>
    %19 = tpu.matmul %17, %18, %cst_12 {dimension_numbers = #tpu.dot_dimension_numbers<[1], [1], [0], [0], [0, 0, 1, 0], [], []>} : vector<256x128xbf16>, vector<128x128xbf16>, vector<256x128xf32> -> vector<256x128xf32>
    %c0_13 = arith.constant 0 : index
    %c0_14 = arith.constant 0 : index
    %20 = vector.load %arg19[%c0_13, %c0_14] : memref<256x1xf32, #tpu.memory_space<vmem>>, vector<256x1xf32>
    %cst_15 = arith.constant dense<0xFF800000> : vector<256xf32>
    %21 = vector.multi_reduction <maximumf>, %19, %cst_15 [1] : vector<256x128xf32> to vector<256xf32>
    %22 = vector.shape_cast %21 : vector<256xf32> to vector<256x1xf32>
    %23 = arith.maximumf %20, %22 : vector<256x1xf32>
    %24 = arith.subf %20, %23 : vector<256x1xf32>
    %25 = math.exp %24 : vector<256x1xf32>
    %26 = vector.broadcast %23 : vector<256x1xf32> to vector<256x128xf32>
    %27 = arith.subf %19, %26 : vector<256x128xf32>
    %28 = math.exp %27 : vector<256x128xf32>
    %c0_16 = arith.constant 0 : index
    %c0_17 = arith.constant 0 : index
    %29 = vector.load %arg20[%c0_16, %c0_17] : memref<256x1xf32, #tpu.memory_space<vmem>>, vector<256x1xf32>
    %30 = arith.mulf %25, %29 : vector<256x1xf32>
    %cst_18 = arith.constant dense<0.000000e+00> : vector<256xf32>
    %31 = vector.multi_reduction <add>, %28, %cst_18 [1] : vector<256x128xf32> to vector<256xf32>
    %32 = vector.shape_cast %31 : vector<256xf32> to vector<256x1xf32>
    %33 = arith.addf %30, %32 : vector<256x1xf32>
    %c0_19 = arith.constant 0 : index
    %c0_20 = arith.constant 0 : index
    %34 = vector.load %arg20[%c0_19, %c0_20] : memref<256x1xf32, #tpu.memory_space<vmem>>, vector<256x1xf32>
    tpu.vector_store %arg20[%c0_19, %c0_20], %33 {strides = array<i32>} : memref<256x1xf32, #tpu.memory_space<vmem>>, vector<256x1xf32>,
    %c0_21 = arith.constant 0 : index
    %c0_22 = arith.constant 0 : index
    %35 = vector.load %arg21[%c0_21, %c0_22] : memref<256x512xf32, #tpu.memory_space<vmem>>, vector<256x512xf32>
    %36 = vector.broadcast %25 : vector<256x1xf32> to vector<256x512xf32>
    %37 = arith.mulf %36, %35 : vector<256x512xf32>
    %38 = arith.truncf %28 : vector<256x128xf32> to vector<256x128xbf16>
    %39 = arith.truncf %16 : vector<128x512xf32> to vector<128x512xbf16>
    %cst_23 = arith.constant dense<0.000000e+00> : vector<256x512xf32>
    %40 = tpu.matmul %38, %39, %cst_23 {dimension_numbers = #tpu.dot_dimension_numbers<[1], [0], [0], [1], [0, 0, 1, 1], [], []>} : vector<256x128xbf16>, vector<128x512xbf16>, vector<256x512xf32> -> vector<256x512xf32>
    %41 = arith.addf %37, %40 : vector<256x512xf32>
    %c0_24 = arith.constant 0 : index
    %c0_25 = arith.constant 0 : index
    %42 = vector.load %arg21[%c0_24, %c0_25] : memref<256x512xf32, #tpu.memory_space<vmem>>, vector<256x512xf32>
    tpu.vector_store %arg21[%c0_24, %c0_25], %41 {strides = array<i32>} : memref<256x512xf32, #tpu.memory_space<vmem>>, vector<256x512xf32>,
    %c0_26 = arith.constant 0 : index
    %c0_27 = arith.constant 0 : index
    %43 = vector.load %arg19[%c0_26, %c0_27] : memref<256x1xf32, #tpu.memory_space<vmem>>, vector<256x1xf32>
    tpu.vector_store %arg19[%c0_26, %c0_27], %23 {strides = array<i32>} : memref<256x1xf32, #tpu.memory_space<vmem>>, vector<256x1xf32>,
    %c1_i32 = arith.constant 1 : i32
    %44 = arith.cmpi eq, %arg1, %c1_i32 : i32
    %45 = arith.extui %44 : i1 to i32
    %c0_i32_28 = arith.constant 0 : i32
    %46 = arith.cmpi ne, %45, %c0_i32_28 : i32
    scf.if %46 {
      %c0_29 = arith.constant 0 : index
      %c0_30 = arith.constant 0 : index
      %47 = memref.load %arg14[%c0_29, %c0_30] : memref<1x1xf32, #tpu.memory_space<smem>>
      %48 = vector.broadcast %47 : f32 to vector<1x1xf32>
      %49 = arith.negf %48 : vector<1x1xf32>
      %50 = math.exp %49 : vector<1x1xf32>
      %cst_31 = arith.constant 1.000000e+00 : f32
      %51 = vector.broadcast %cst_31 : f32 to vector<1x1xf32>
      %52 = arith.addf %51, %50 : vector<1x1xf32>
      %53 = arith.divf %51, %52 : vector<1x1xf32>
      %c0_32 = arith.constant 0 : index
      %c0_33 = arith.constant 0 : index
      %54 = vector.load %arg17[%c0_32, %c0_33] : memref<256x512xbf16, #tpu.memory_space<vmem>>, vector<256x512xbf16>
      %55 = arith.extf %54 : vector<256x512xbf16> to vector<256x512xf32>
      %c0_34 = arith.constant 0 : index
      %c0_35 = arith.constant 0 : index
      %56 = vector.load %arg21[%c0_34, %c0_35] : memref<256x512xf32, #tpu.memory_space<vmem>>, vector<256x512xf32>
      %c0_36 = arith.constant 0 : index
      %c0_37 = arith.constant 0 : index
      %57 = vector.load %arg20[%c0_36, %c0_37] : memref<256x1xf32, #tpu.memory_space<vmem>>, vector<256x1xf32>
      %58 = tpu.reciprocal %57 {approx = true} : vector<256x1xf32> -> vector<256x1xf32>
      %59 = vector.broadcast %58 : vector<256x1xf32> to vector<256x512xf32>
      %60 = arith.mulf %56, %59 : vector<256x512xf32>
      %61 = vector.broadcast %53 : vector<1x1xf32> to vector<256x512xf32>
      %62 = arith.mulf %61, %60 : vector<256x512xf32>
      %63 = arith.addf %62, %55 : vector<256x512xf32>
      %cst_38 = arith.constant dense<0xFF800000> : vector<512xf32>
      %64 = vector.multi_reduction <maximumf>, %63, %cst_38 [0] : vector<256x512xf32> to vector<512xf32>
      %65 = vector.shape_cast %64 : vector<512xf32> to vector<1x512xf32>
      %cst_39 = arith.constant dense<0.000000e+00> : vector<512xf32>
      %66 = vector.multi_reduction <add>, %63, %cst_39 [0] : vector<256x512xf32> to vector<512xf32>
      %67 = vector.shape_cast %66 : vector<512xf32> to vector<1x512xf32>
      %cst_40 = arith.constant 2.560000e+02 : f32
      %68 = vector.broadcast %cst_40 : f32 to vector<1x512xf32>
      %69 = arith.divf %67, %68 : vector<1x512xf32>
      %70 = arith.truncf %65 : vector<1x512xf32> to vector<1x512xbf16>
      %c0_41 = arith.constant 0 : index
      %c0_42 = arith.constant 0 : index
      %71 = vector.load %arg10[%c0_41, %c0_42] : memref<1024x512xbf16, #tpu.memory_space<vmem>>, vector<512x512xbf16>
      %cst_43 = arith.constant dense<0.000000e+00> : vector<1x512xf32>
      %72 = tpu.matmul %70, %71, %cst_43 {dimension_numbers = #tpu.dot_dimension_numbers<[1], [0], [0], [1], [0, 0, 1, 1], [], []>} : vector<1x512xbf16>, vector<512x512xbf16>, vector<1x512xf32> -> vector<1x512xf32>
      %73 = arith.truncf %69 : vector<1x512xf32> to vector<1x512xbf16>
      %c512 = arith.constant 512 : index
      %c0_44 = arith.constant 0 : index
      %74 = vector.load %arg10[%c512, %c0_44] : memref<1024x512xbf16, #tpu.memory_space<vmem>>, vector<512x512xbf16>
      %cst_45 = arith.constant dense<0.000000e+00> : vector<1x512xf32>
      %75 = tpu.matmul %73, %74, %cst_45 {dimension_numbers = #tpu.dot_dimension_numbers<[1], [0], [0], [1], [0, 0, 1, 1], [], []>} : vector<1x512xbf16>, vector<512x512xbf16>, vector<1x512xf32> -> vector<1x512xf32>
      %76 = arith.addf %72, %75 : vector<1x512xf32>
      %c0_46 = arith.constant 0 : index
      %c0_47 = arith.constant 0 : index
      %77 = vector.load %arg11[%c0_46, %c0_47] : memref<1x512xf32, #tpu.memory_space<vmem>>, vector<1x512xf32>
      %78 = arith.addf %76, %77 : vector<1x512xf32>
      %cst_48 = arith.constant 0.000000e+00 : f32
      %79 = vector.broadcast %cst_48 : f32 to vector<1x512xf32>
      %80 = arith.maximumf %78, %79 : vector<1x512xf32>
      %c0_49 = arith.constant 0 : index
      %c0_50 = arith.constant 0 : index
      %c0_51 = arith.constant 0 : index
      %81 = vector.load %arg15[%c0_49, %c0_50, %c0_51] : memref<1x1x512xf32, #tpu.memory_space<vmem>>, vector<1x1x512xf32>
      %82 = vector.shape_cast %81 : vector<1x1x512xf32> to vector<1x512xf32>
      %83 = vector.shape_cast %80 : vector<1x512xf32> to vector<1x1x512xf32>
      tpu.vector_store %arg15[%c0_49, %c0_50, %c0_51], %83 {strides = array<i32>} : memref<1x1x512xf32, #tpu.memory_space<vmem>>, vector<1x1x512xf32>,
      %84 = arith.truncf %80 : vector<1x512xf32> to vector<1x512xbf16>
      %c0_52 = arith.constant 0 : index
      %c0_53 = arith.constant 0 : index
      %85 = vector.load %arg12[%c0_52, %c0_53] : memref<512x2xbf16, #tpu.memory_space<vmem>>, vector<512x2xbf16>
      %cst_54 = arith.constant dense<0.000000e+00> : vector<1x2xf32>
      %86 = tpu.matmul %84, %85, %cst_54 {dimension_numbers = #tpu.dot_dimension_numbers<[1], [0], [0], [1], [0, 0, 1, 1], [], []>} : vector<1x512xbf16>, vector<512x2xbf16>, vector<1x2xf32> -> vector<1x2xf32>
      %c0_55 = arith.constant 0 : index
      %c0_56 = arith.constant 0 : index
      %87 = vector.load %arg13[%c0_55, %c0_56] : memref<1x2xf32, #tpu.memory_space<vmem>>, vector<1x2xf32>
      %88 = arith.addf %86, %87 : vector<1x2xf32>
      %c0_57 = arith.constant 0 : index
      %c0_58 = arith.constant 0 : index
      %c0_59 = arith.constant 0 : index
      %89 = vector.load %arg16[%c0_57, %c0_58, %c0_59] : memref<1x1x2xf32, #tpu.memory_space<vmem>>, vector<1x1x2xf32>
      %90 = vector.shape_cast %89 : vector<1x1x2xf32> to vector<1x2xf32>
      %91 = vector.shape_cast %88 : vector<1x2xf32> to vector<1x1x2xf32>
      tpu.vector_store %arg16[%c0_57, %c0_58, %c0_59], %91 {strides = array<i32>} : memref<1x1x2xf32, #tpu.memory_space<vmem>>, vector<1x1x2xf32>,
    } else {
    }
    return
  }
  func.func @transform_0(%arg0: i32, %arg1: i32) -> (i32, i32, i32) {
    %c0_i32 = arith.constant 0 : i32
    %c0_i32_0 = arith.constant 0 : i32
    %c0_i32_1 = arith.constant 0 : i32
    return %arg0, %c0_i32, %c0_i32_0 : i32, i32, i32
  }
  func.func @transform_1(%arg0: i32, %arg1: i32) -> (i32, i32) {
    %c0_i32 = arith.constant 0 : i32
    %c0_i32_0 = arith.constant 0 : i32
    %c0_i32_1 = arith.constant 0 : i32
    return %c0_i32, %c0_i32_0 : i32, i32
  }
  func.func @transform_2(%arg0: i32, %arg1: i32) -> (i32, i32) {
    %c0_i32 = arith.constant 0 : i32
    %c0_i32_0 = arith.constant 0 : i32
    %c0_i32_1 = arith.constant 0 : i32
    return %c0_i32, %c0_i32_0 : i32, i32
  }
  func.func @transform_3(%arg0: i32, %arg1: i32) -> (i32, i32) {
    %c0_i32 = arith.constant 0 : i32
    %c0_i32_0 = arith.constant 0 : i32
    %c0_i32_1 = arith.constant 0 : i32
    return %c0_i32, %c0_i32_0 : i32, i32
  }
  func.func @transform_4(%arg0: i32, %arg1: i32) -> (i32, i32) {
    %c0_i32 = arith.constant 0 : i32
    %c0_i32_0 = arith.constant 0 : i32
    %c0_i32_1 = arith.constant 0 : i32
    return %c0_i32, %c0_i32_0 : i32, i32
  }
  func.func @transform_5(%arg0: i32, %arg1: i32) -> (i32, i32) {
    %c0_i32 = arith.constant 0 : i32
    %c0_i32_0 = arith.constant 0 : i32
    %c0_i32_1 = arith.constant 0 : i32
    return %c0_i32, %c0_i32_0 : i32, i32
  }
  func.func @transform_6(%arg0: i32, %arg1: i32) -> (i32, i32) {
    %c0_i32 = arith.constant 0 : i32
    %c0_i32_0 = arith.constant 0 : i32
    %c0_i32_1 = arith.constant 0 : i32
    return %c0_i32, %c0_i32_0 : i32, i32
  }
  func.func @transform_7(%arg0: i32, %arg1: i32) -> (i32, i32) {
    %c0_i32 = arith.constant 0 : i32
    %c0_i32_0 = arith.constant 0 : i32
    %c0_i32_1 = arith.constant 0 : i32
    return %c0_i32, %c0_i32_0 : i32, i32
  }
  func.func @transform_8(%arg0: i32, %arg1: i32) -> (i32, i32) {
    %c0_i32 = arith.constant 0 : i32
    %c0_i32_0 = arith.constant 0 : i32
    %c0_i32_1 = arith.constant 0 : i32
    return %c0_i32, %c0_i32_0 : i32, i32
  }
  func.func @transform_9(%arg0: i32, %arg1: i32) -> (i32, i32) {
    %c0_i32 = arith.constant 0 : i32
    %c0_i32_0 = arith.constant 0 : i32
    %c0_i32_1 = arith.constant 0 : i32
    return %c0_i32, %c0_i32_0 : i32, i32
  }
  func.func @transform_10(%arg0: i32, %arg1: i32) -> (i32, i32) {
    %c0_i32 = arith.constant 0 : i32
    %c0_i32_0 = arith.constant 0 : i32
    %c0_i32_1 = arith.constant 0 : i32
    return %c0_i32, %c0_i32_0 : i32, i32
  }
  func.func @transform_11(%arg0: i32, %arg1: i32) -> (i32, i32) {
    %c0_i32 = arith.constant 0 : i32
    %c0_i32_0 = arith.constant 0 : i32
    %c0_i32_1 = arith.constant 0 : i32
    return %c0_i32, %c0_i32_0 : i32, i32
  }
  func.func @transform_12(%arg0: i32, %arg1: i32) -> (i32, i32) {
    %c0_i32 = arith.constant 0 : i32
    %c0_i32_0 = arith.constant 0 : i32
    %c0_i32_1 = arith.constant 0 : i32
    return %c0_i32, %c0_i32_0 : i32, i32
  }
  func.func @transform_13(%arg0: i32, %arg1: i32) -> (i32, i32, i32) {
    %c0_i32 = arith.constant 0 : i32
    %c0_i32_0 = arith.constant 0 : i32
    %c0_i32_1 = arith.constant 0 : i32
    return %arg0, %c0_i32, %c0_i32_0 : i32, i32, i32
  }
  func.func @transform_14(%arg0: i32, %arg1: i32) -> (i32, i32, i32) {
    %c0_i32 = arith.constant 0 : i32
    %c0_i32_0 = arith.constant 0 : i32
    %c0_i32_1 = arith.constant 0 : i32
    return %arg0, %c0_i32, %c0_i32_0 : i32, i32, i32
  }
}

</mosaic_0001>

<bundles_post_ra>
// kernel: multi_instance_forward.1
= control target key start
LH: loop header
LB: loop body
LE: loop exit
PB: predicated region body
PF: predicated region fallthrough
CT: control target
= control target key end

     0   :  { %s20092_s0 = inlined_call_operand.vmem [shape: f32[2,256,3], index: 0, kind: input, shape index: {}]   ;;  %s20093_s1 = inlined_call_operand.vmem [shape: f32[3,512], index: 1, kind: input, shape index: {}]   ;;  %s20094_s2 = inlined_call_operand.vmem [shape: bf16[512,128], index: 2, kind: input, shape index: {}]   ;;  %s20095_s3 = inlined_call_operand.vmem [shape: f32[1,128], index: 3, kind: input, shape index: {}]   ;;  %s20096_s4 = inlined_call_operand.vmem [shape: bf16[512,128], index: 4, kind: input, shape index: {}]   ;;  %s20097_s5 = inlined_call_operand.vmem [shape: f32[1,128], index: 5, kind: input, shape index: {}]   ;;  %s20098_s6 = inlined_call_operand.vmem [shape: bf16[512,512], index: 6, kind: input, shape index: {}]   ;;  %s20099_s7 = inlined_call_operand.vmem [shape: f32[1,512], index: 7, kind: input, shape index: {}]   ;;  %s20100_s8 = inlined_call_operand.vmem [shape: bf16[1024,512], index: 8, kind: input, shape index: {}]   ;;  %s20101_s9 = inlined_call_operand.vmem [shape: f32[1,512], index: 9, kind: input, shape index: {}]   ;;  %s20102_s10 = inlined_call_operand.vmem [shape: bf16[512,2], index: 10, kind: input, shape index: {}]   ;;  %s20103_s11 = inlined_call_operand.vmem [shape: f32[1,2], index: 11, kind: input, shape index: {}]   ;;  %s20104_s12 = inlined_call_operand.<no memory space> [shape: f32[1,1], index: 12, kind: input, shape index: {}]   ;;  %s20105_s13 = inlined_call_operand.vmem [shape: f32[2,1,512], index: 13, kind: output, shape index: {0}]   ;;  %s20106_s14 = inlined_call_operand.hbm [shape: f32[2,1,2], index: 14, kind: output, shape index: {1}]  }
   0x1   :  { %20 = sst [smem:[#allocation7]] %s20104_s12 }
   0x2   :  { %21 = vsyncpa [#allocation9], 0 }
   0x3   :  { %23 = vsyncpa [#allocation9 + $0x1], 0  ;;  %s13812_s15 = smov 0   ;;  %s13814_s16 = smov 0  }
   0x4   :  { %s13816_s17 = smov 0   ;;  %s13818_s18 = smov 0  }
   0x5   :  { %s13820_s19 = smov 0   ;;  %s13822_s20 = smov 0  }
   0x6   :  { %s13824_s21 = smov 0   ;;  %s13826_s22 = smov 0  }
   0x7 LB: > { %20201 = sst [smem:[#allocation11_spill]] %s13699_s15  ;;  %s10449_s12 = sadd.s32 4294967295, %s13727_s22   ;;  %s13727_s22 = sphi %s13826_s22, %s29_s22   ;;  %s13723_s21 = sphi %s13824_s21, %s20577_s21   ;;  %s13719_s20 = sphi %s13822_s20, %s20576_s20   ;;  %s13715_s19 = sphi %s13820_s19, %s20575_s19   ;;  %s13711_s18 = sphi %s13818_s18, %s20574_s18   ;;  %s13707_s17 = sphi %s13816_s17, %s20580_s17   ;;  %s13703_s16 = sphi %s13814_s16, %s20579_s16   ;;  %s13699_s15 = sphi %s13812_s15, %s20578_s15  }
   0x8   : > { %20202 = sst [smem:[#allocation12_spill]] %s13707_s17  ;;  %s10450_s23 = sadd.s32 4294967294, %s13727_s22  }
   0x9   : > { %20203 = sst [smem:[#allocation13_spill]] %s13719_s20  ;;  %s38_s24 = sadd.s32 1, %s13719_s20 }
   0xa   : > { %20204 = sst [smem:[#allocation14_spill]] %s13723_s21  ;;  %p39_p0 = scmp.ge.s32.totalorder %s38_s24, 2 }
   0xb   : > { %20205 = sst [smem:[#allocation15_spill]] %s13727_s22  ;;  %s41_s25 = sadd.s32 1, %s13723_s21 }
   0xc   : > { %p362_p1 = scmp.ne.s32.totalorder %s13707_s17, %s13703_s16  ;;  %p363_p2 = scmp.eq.s32.totalorder %s10449_s12, 3 }
   0xd   : > { %s20582_s24 = smov (%p39_p0, %s38_s24), 0  ;;  %s20584_s25 = smov (!%p39_p0, %s41_s25), %s13723_s21 }
   0xe   : > { %20206 = sst [smem:[#allocation16_spill]] %s20582_s24  ;;  %p13861_p3 = por %p363_p2, %p362_p1 }
   0xf   : > { %p368_p4 = scmp.ne.s32.totalorder %s13703_s16, %s13699_s15  ;;  %p43_p5 = scmp.ge.s32.totalorder %s20584_s25, 2 }
  0x10   : > { %p369_p6 = scmp.eq.s32.totalorder %s10450_s23, 3  ;;  %p10453_p7 = scmp.ge.s32.totalorder %s13727_s22, 1 }
  0x11   : > { %p431_p8 = scmp.lt.s32.totalorder %s13727_s22, 5  ;;  %s20586_s25 = smov (%p43_p5, %s20584_s25), 0 }
  0x12   : > { %20208 = sst [smem:[#allocation17_spill]] %s20586_s25  ;;  %p13871_p9 = por %p369_p6, %p368_p4 }
  0x13   : > { %p432_p10 = pnand %p10453_p7, %p431_p8  ;;  %s349_s28 = ssub.s32 %s13723_s21, %s20586_s25 }
  0x14   : > { %s20209_s27 = scalar_select %p13871_p9, 1, 0 }
  0x15   : > { %s352_s29 = sadd.s32 1, %s13707_s17  ;;  %p350_p11 = scmp.eq.s32.totalorder %s349_s28, 0 }
  0x16   : > { %20210 = sst [smem:[#allocation18_spill]] %s20209_s27  ;;  %435 = sbr.rel (%p432_p10) target bundleno = 3359 (0xd1f), region = 72 }
  0x17   : > { %s13879_s30 = scalar_select %p350_p11, %s13707_s17, %s352_s29  }
  0x19   : > { %20211 = sst [smem:[#allocation19_spill]] %s13879_s30 }
  0x1b   : > { %s20115_s12 = sand.u32 1, %s13703_s16   ;;  %p480_p12 = scmp.lt.s32.totalorder %s13715_s19, 1 }
  0x1c   : > { %s13896_s29 = scalar_lea.vmem [#allocation8], %s20115_s12  ;;  %p10457_p13 = scmp.ne.s32.totalorder %s13711_s18, 0 }
  0x1d   : > { %s481_s23 = scalar_select %p480_p12, %s13715_s19, 1 }
  0x1e   : > { %492 = sbr.rel (%p10457_p13) target bundleno = 796 (0x31c), region = 76 }
  0x1f   : > { %s12709_s24 = sshll.u32 %s481_s23, 8  ;;  %s10456_s20 = sshll.u32 %s481_s23, 2 }
  0x20   : > { %s13887_s27 = scalar_lea.vmem %s20092_s0, %s12709_s24  ;;  %s13892_s28 = scalar_lea.vmem %s20105_s13, %s10456_s20 }
  0x23   : > { %v525_v0 = vld [vmem:[%s20093_s1] sm:$0x77]  ;;  %v526_v1 = vld [vmem:[%s20093_s1 + $0x8] sm:$0x77]  ;;  %vm633_vm0 = vcmask 1042432   ;;  %vm536_vm1 = vcmask 23552  }
  0x24   : > { %529 = vst [vmem:[#allocation1] ss:$2 sm:$0xff] %v525_v0  ;;  %v493_v2 = vld [vmem:[%s13887_s27] sm:$0xff]  ;;  %v12733_v3 = vld [vmem:[%s20094_s2 + $0xb8] sm:$0xff]  ;;  %v12732_v11 = vld [vmem:[%s20094_s2 + $0xb0] sm:$0xff]  ;;  %vm2350_vm2 = vcmask 7168  }
  0x25   : > { %531 = vst [vmem:[#allocation1 + $0x10] ss:$2 sm:$0xff] %v526_v1  ;;  %v12717_v4 = vld [vmem:[%s20094_s2 + $0x38] sm:$0xff]  ;;  %v12716_v12 = vld [vmem:[%s20094_s2 + $0x30] sm:$0xff]  ;;  %v494_v15 = vld [vmem:[%s13887_s27 + $0x8] sm:$0xff] }
  0x26   : > { %v12741_v9 = vld [vmem:[%s20094_s2 + $0xf8] sm:$0xff]  ;;  %v12740_v13 = vld [vmem:[%s20094_s2 + $0xf0] sm:$0xff]  ;;  %v497_v18 = vld [vmem:[%s13887_s27 + $0x20] sm:$0xff] }
  0x27   : > { %v12725_v10 = vld [vmem:[%s20094_s2 + $0x78] sm:$0xff]  ;;  %v12724_v14 = vld [vmem:[%s20094_s2 + $0x70] sm:$0xff]  ;;  %v12731_v19 = vld [vmem:[%s20094_s2 + $0xa8] sm:$0xff] }
  0x28   : > { %v495_v16 = vld [vmem:[%s13887_s27 + $0x10] sm:$0xff]  ;;  %v496_v17 = vld [vmem:[%s13887_s27 + $0x18] sm:$0xff]  ;;  %v12715_v20 = vld [vmem:[%s20094_s2 + $0x28] sm:$0xff] }
  0x29   : > { %v12739_v21 = vld [vmem:[%s20094_s2 + $0xe8] sm:$0xff]  ;;  %v499_v24 = vld [vmem:[%s13887_s27 + $0x30] sm:$0xff]  ;;  %v500_v25 = vld [vmem:[%s13887_s27 + $0x38] sm:$0xff] }
  0x2a   : > { %v12723_v22 = vld [vmem:[%s20094_s2 + $0x68] sm:$0xff]  ;;  %v501_v26 = vld [vmem:[%s13887_s27 + $0x40] sm:$0xff]  ;;  %v503_v32 = vld [vmem:[%s13887_s27 + $0x50] sm:$0xff] }
  0x2b   : > { %v532_v5 = vld.sshfl [vmem:[#allocation1] sm:$0xff pattern:$0x75316420]  ;;  %v533_v6 = vld.sshfl [vmem:[#allocation1 + $0x8] sm:$0xff pattern:$0x75316420] }
  0x2c   : > { %10458 = vmatpush.msk.msra.mxu0 %vm633_vm0, %v532_v5  ;;  %10491 = vmatpush.msk.msra.mxu1 %vm633_vm0, %v533_v6  ;;  %v534_v7 = vld.sshfl [vmem:[#allocation1 + $0x10] sm:$0xff pattern:$0x75316420]  ;;  %v535_v8 = vld.sshfl [vmem:[#allocation1 + $0x18] sm:$0xff pattern:$0x75316420] }
  0x2d   : > { %10524 = vmatpush.msk.msra.mxu2 %vm633_vm0, %v534_v7  ;;  %10557 = vmatpush.msk.msra.mxu3 %vm633_vm0, %v535_v8  ;;  %v498_v23 = vld [vmem:[%s13887_s27 + $0x28] sm:$0xff]  ;;  %v12730_v27 = vld [vmem:[%s20094_s2 + $0xa0] sm:$0xff]  ;;  %v504_v33 = vld [vmem:[%s13887_s27 + $0x58] sm:$0xff] }
  0x2e   : > { %10459 = vmatmul.msk.f32.vlgmr.msra.gmra.mxu0 %vm536_vm1, %v493_v2  ;;  %10492 = vmatmul.msk.f32.vlgmr.msra.gmra.mxu1 %vm536_vm1, %v493_v2  ;;  %v12714_v28 = vld [vmem:[%s20094_s2 + $0x20] sm:$0xff]  ;;  %v502_v31 = vld [vmem:[%s13887_s27 + $0x48] sm:$0xff]  ;;  %v12729_v35 = vld [vmem:[%s20094_s2 + $0x98] sm:$0xff] }
  0x2f   : > { %10525 = vmatmul.msk.f32.vlgmr.msra.gmra.mxu2 %vm536_vm1, %v493_v2  ;;  %10558 = vmatmul.msk.f32.vlgmr.msra.gmra.mxu3 %vm536_vm1, %v493_v2  ;;  %v12738_v29 = vld [vmem:[%s20094_s2 + $0xe0] sm:$0xff]  ;;  %v12713_v36 = vld [vmem:[%s20094_s2 + $0x18] sm:$0xff]  ;;  %v506_v38 = vld [vmem:[%s13887_s27 + $0x68] sm:$0xff] }
  0x30   : > { %2108 = vmatpush.bf16.msrb.mxu2 %v12733_v3  ;;  %1930 = vmatpush.bf16.msrb.mxu0 %v12717_v4  ;;  %v12722_v30 = vld [vmem:[%s20094_s2 + $0x60] sm:$0xff]  ;;  %v12737_v37 = vld [vmem:[%s20094_s2 + $0xd8] sm:$0xff]  ;;  %v507_v40 = vld [vmem:[%s13887_s27 + $0x70] sm:$0xff] }
  0x31   : > { %2197 = vmatpush.bf16.msrb.mxu3 %v12741_v9  ;;  %2019 = vmatpush.bf16.msrb.mxu1 %v12725_v10  ;;  %v505_v34 = vld [vmem:[%s13887_s27 + $0x60] sm:$0xff]  ;;  %v12721_v39 = vld [vmem:[%s20094_s2 + $0x58] sm:$0xff]  ;;  %v12728_v48 = vld [vmem:[%s20094_s2 + $0x90] sm:$0xff] }
  0x32   : > { %v508_v41 = vld [vmem:[%s13887_s27 + $0x78] sm:$0xff]  ;;  %v509_v44 = vld [vmem:[%s13887_s27 + $0x80] sm:$0xff]  ;;  %v12712_v49 = vld [vmem:[%s20094_s2 + $0x10] sm:$0xff] }
  0x33   : > { %v12736_v50 = vld [vmem:[%s20094_s2 + $0xd0] sm:$0xff]  ;;  %v510_v57 = vld [vmem:[%s13887_s27 + $0x88] sm:$0xff] }
  0x34   : > { %2109 = vmatpush.bf16.msrb.mxu2 %v12732_v11  ;;  %1931 = vmatpush.bf16.msrb.mxu0 %v12716_v12  ;;  %v12720_v62 = vld [vmem:[%s20094_s2 + $0x50] sm:$0xff] }
  0x35   : > { %2198 = vmatpush.bf16.msrb.mxu3 %v12740_v13  ;;  %2020 = vmatpush.bf16.msrb.mxu1 %v12724_v14  ;;  %v511_v11 = vld [vmem:[%s13887_s27 + $0x90] sm:$0xff] }
  0x36   : > { %10460 = vmatmul.msk.f32.gmra.mxu0 %vm536_vm1, %v494_v15  ;;  %10493 = vmatmul.msk.f32.gmra.mxu1 %vm536_vm1, %v494_v15 }
  0x37   : > { %10526 = vmatmul.msk.f32.gmra.mxu2 %vm536_vm1, %v494_v15  ;;  %10559 = vmatmul.msk.f32.gmra.mxu3 %vm536_vm1, %v494_v15 }
  0x38   : > { %2110 = vmatpush.bf16.msrb.mxu2 %v12731_v19  ;;  %1932 = vmatpush.bf16.msrb.mxu0 %v12715_v20 }
  0x39   : > { %2199 = vmatpush.bf16.msrb.mxu3 %v12739_v21  ;;  %2021 = vmatpush.bf16.msrb.mxu1 %v12723_v22 }
  0x3c   : > { %2111 = vmatpush.bf16.msrb.mxu2 %v12730_v27  ;;  %1933 = vmatpush.bf16.msrb.mxu0 %v12714_v28  ;;  %v512_v28 = vld [vmem:[%s13887_s27 + $0x98] sm:$0xff] }
  0x3d   : > { %2200 = vmatpush.bf16.msrb.mxu3 %v12738_v29  ;;  %2022 = vmatpush.bf16.msrb.mxu1 %v12722_v30 }
  0x3e   : > { %10461 = vmatmul.msk.f32.gmra.mxu0 %vm536_vm1, %v495_v16  ;;  %10494 = vmatmul.msk.f32.gmra.mxu1 %vm536_vm1, %v495_v16 }
  0x3f   : > { %10527 = vmatmul.msk.f32.gmra.mxu2 %vm536_vm1, %v495_v16  ;;  %10560 = vmatmul.msk.f32.gmra.mxu3 %vm536_vm1, %v495_v16 }
  0x40   : > { %2112 = vmatpush.bf16.msrb.mxu2 %v12729_v35  ;;  %1934 = vmatpush.bf16.msrb.mxu0 %v12713_v36 }
  0x41   : > { %2201 = vmatpush.bf16.msrb.mxu3 %v12737_v37  ;;  %2023 = vmatpush.bf16.msrb.mxu1 %v12721_v39 }
  0x44   : > { %2113 = vmatpush.bf16.msrb.mxu2 %v12728_v48  ;;  %1935 = vmatpush.bf16.msrb.mxu0 %v12712_v49 }
  0x45   : > { %2202 = vmatpush.bf16.msrb.mxu3 %v12736_v50  ;;  %2024 = vmatpush.bf16.msrb.mxu1 %v12720_v62 }
  0x46   : > { %10462 = vmatmul.msk.f32.gmra.mxu0 %vm536_vm1, %v496_v17  ;;  %10495 = vmatmul.msk.f32.gmra.mxu1 %vm536_vm1, %v496_v17 }
  0x47   : > { %10528 = vmatmul.msk.f32.gmra.mxu2 %vm536_vm1, %v496_v17  ;;  %10561 = vmatmul.msk.f32.gmra.mxu3 %vm536_vm1, %v496_v17 }
  0x4e   : > { %10463 = vmatmul.msk.f32.gmra.mxu0 %vm536_vm1, %v497_v18  ;;  %10496 = vmatmul.msk.f32.gmra.mxu1 %vm536_vm1, %v497_v18 }
  0x4f   : > { %10529 = vmatmul.msk.f32.gmra.mxu2 %vm536_vm1, %v497_v18  ;;  %10562 = vmatmul.msk.f32.gmra.mxu3 %vm536_vm1, %v497_v18 }
  0x56   : > { %10464 = vmatmul.msk.f32.gmra.mxu0 %vm536_vm1, %v498_v23  ;;  %10497 = vmatmul.msk.f32.gmra.mxu1 %vm536_vm1, %v498_v23 }
  0x57   : > { %10530 = vmatmul.msk.f32.gmra.mxu2 %vm536_vm1, %v498_v23  ;;  %10563 = vmatmul.msk.f32.gmra.mxu3 %vm536_vm1, %v498_v23 }
  0x5e   : > { %10465 = vmatmul.msk.f32.gmra.mxu0 %vm536_vm1, %v499_v24  ;;  %10498 = vmatmul.msk.f32.gmra.mxu1 %vm536_vm1, %v499_v24 }
  0x5f   : > { %10531 = vmatmul.msk.f32.gmra.mxu2 %vm536_vm1, %v499_v24  ;;  %10564 = vmatmul.msk.f32.gmra.mxu3 %vm536_vm1, %v499_v24 }
  0x66   : > { %10466 = vmatmul.msk.f32.gmra.mxu0 %vm536_vm1, %v500_v25  ;;  %10499 = vmatmul.msk.f32.gmra.mxu1 %vm536_vm1, %v500_v25 }
  0x67   : > { %10532 = vmatmul.msk.f32.gmra.mxu2 %vm536_vm1, %v500_v25  ;;  %10565 = vmatmul.msk.f32.gmra.mxu3 %vm536_vm1, %v500_v25 }
  0x6e   : > { %10467 = vmatmul.msk.f32.gmra.mxu0 %vm536_vm1, %v501_v26  ;;  %10500 = vmatmul.msk.f32.gmra.mxu1 %vm536_vm1, %v501_v26 }
  0x6f   : > { %10533 = vmatmul.msk.f32.gmra.mxu2 %vm536_vm1, %v501_v26  ;;  %10566 = vmatmul.msk.f32.gmra.mxu3 %vm536_vm1, %v501_v26 }
  0x76   : > { %10468 = vmatmul.msk.f32.gmra.mxu0 %vm536_vm1, %v502_v31  ;;  %10501 = vmatmul.msk.f32.gmra.mxu1 %vm536_vm1, %v502_v31 }
  0x77   : > { %10534 = vmatmul.msk.f32.gmra.mxu2 %vm536_vm1, %v502_v31  ;;  %10567 = vmatmul.msk.f32.gmra.mxu3 %vm536_vm1, %v502_v31 }
  0x7e   : > { %10469 = vmatmul.msk.f32.gmra.mxu0 %vm536_vm1, %v503_v32  ;;  %10502 = vmatmul.msk.f32.gmra.mxu1 %vm536_vm1, %v503_v32 }
  0x7f   : > { %10535 = vmatmul.msk.f32.gmra.mxu2 %vm536_vm1, %v503_v32  ;;  %10568 = vmatmul.msk.f32.gmra.mxu3 %vm536_vm1, %v503_v32 }
  0x86   : > { %10470 = vmatmul.msk.f32.gmra.mxu0 %vm536_vm1, %v504_v33  ;;  %10503 = vmatmul.msk.f32.gmra.mxu1 %vm536_vm1, %v504_v33 }
  0x87   : > { %10536 = vmatmul.msk.f32.gmra.mxu2 %vm536_vm1, %v504_v33  ;;  %10569 = vmatmul.msk.f32.gmra.mxu3 %vm536_vm1, %v504_v33 }
  0x8e   : > { %10471 = vmatmul.msk.f32.gmra.mxu0 %vm536_vm1, %v505_v34  ;;  %10504 = vmatmul.msk.f32.gmra.mxu1 %vm536_vm1, %v505_v34 }
  0x8f   : > { %10537 = vmatmul.msk.f32.gmra.mxu2 %vm536_vm1, %v505_v34  ;;  %10570 = vmatmul.msk.f32.gmra.mxu3 %vm536_vm1, %v505_v34 }
  0x96   : > { %10472 = vmatmul.msk.f32.gmra.mxu0 %vm536_vm1, %v506_v38  ;;  %10505 = vmatmul.msk.f32.gmra.mxu1 %vm536_vm1, %v506_v38 }
  0x97   : > { %10538 = vmatmul.msk.f32.gmra.mxu2 %vm536_vm1, %v506_v38  ;;  %10571 = vmatmul.msk.f32.gmra.mxu3 %vm536_vm1, %v506_v38 }
  0x9e   : > { %10473 = vmatmul.msk.f32.gmra.mxu0 %vm536_vm1, %v507_v40  ;;  %10506 = vmatmul.msk.f32.gmra.mxu1 %vm536_vm1, %v507_v40 }
  0x9f   : > { %10539 = vmatmul.msk.f32.gmra.mxu2 %vm536_vm1, %v507_v40  ;;  %10572 = vmatmul.msk.f32.gmra.mxu3 %vm536_vm1, %v507_v40 }
  0xa6   : > { %10474 = vmatmul.msk.f32.gmra.mxu0 %vm536_vm1, %v508_v41  ;;  %10507 = vmatmul.msk.f32.gmra.mxu1 %vm536_vm1, %v508_v41 }
  0xa7   : > { %10540 = vmatmul.msk.f32.gmra.mxu2 %vm536_vm1, %v508_v41  ;;  %10573 = vmatmul.msk.f32.gmra.mxu3 %vm536_vm1, %v508_v41 }
  0xab   : > { %v659_v42 = vpop.f32.mrf.mxu0  ;;  %v772_v43 = vpop.f32.mrf.mxu1 }
  0xac   : > { %v1094_v45 = vmax.f32 %v659_v42, 0.0  ;;  %v1095_v46 = vmax.f32 %v772_v43, 0.0 }
  0xae   : > { %v1222_v47 = vpack.c.bf16 %v1095_v46, %v1094_v45  ;;  %10475 = vmatmul.msk.f32.gmra.mxu0 %vm536_vm1, %v509_v44  ;;  %10508 = vmatmul.msk.f32.gmra.mxu1 %vm536_vm1, %v509_v44  ;;  %v513_v45 = vld [vmem:[%s13887_s27 + $0xa0] sm:$0xff] }
  0xaf   : > { %10541 = vmatmul.msk.f32.gmra.mxu2 %vm536_vm1, %v509_v44  ;;  %10574 = vmatmul.msk.f32.gmra.mxu3 %vm536_vm1, %v509_v44 }
  0xb0   : > { %1286 = vst [vmem:[#allocation2] sm:$0xff] %v1222_v47  ;;  %v1482_v63 = vunpack.c.l.b16 %v1222_v47  ;;  %v1483_v0 = vunpack.c.h.b16 %v1222_v47 }
  0xb2   : > { %v885_v51 = vpop.f32.mrf.mxu2  ;;  %v998_v52 = vpop.f32.mrf.mxu3 }
  0xb3   : > { %v1096_v53 = vmax.f32 %v885_v51, 0.0  ;;  %v1097_v54 = vmax.f32 %v998_v52, 0.0  ;;  %v662_v55 = vpop.f32.mrf.mxu0  ;;  %v775_v56 = vpop.f32.mrf.mxu1 }
  0xb4   : > { %v1098_v58 = vmax.f32 %v662_v55, 0.0  ;;  %v1099_v59 = vmax.f32 %v775_v56, 0.0  ;;  %v12711_v55 = vld [vmem:[%s20094_s2 + $0x8] sm:$0xff] }
  0xb5   : > { %v1223_v60 = vpack.c.bf16 %v1097_v54, %v1096_v53  ;;  %v12727_v54 = vld [vmem:[%s20094_s2 + $0x88] sm:$0xff]  ;;  %1936 = vmatpush.bf16.msrb.mxu0 %v12711_v55 }
  0xb6   : > { %v1224_v61 = vpack.c.bf16 %v1099_v59, %v1098_v58  ;;  %10476 = vmatmul.msk.f32.gmra.mxu0 %vm536_vm1, %v510_v57  ;;  %10509 = vmatmul.msk.f32.gmra.mxu1 %vm536_vm1, %v510_v57  ;;  %v12735_v56 = vld [vmem:[%s20094_s2 + $0xc8] sm:$0xff] }
  0xb7   : > { %1287 = vst [vmem:[#allocation2 + $0x8] sm:$0xff] %v1223_v60  ;;  %10542 = vmatmul.msk.f32.gmra.mxu2 %vm536_vm1, %v510_v57  ;;  %10575 = vmatmul.msk.f32.gmra.mxu3 %vm536_vm1, %v510_v57  ;;  %v1484_v16 = vunpack.c.l.b16 %v1223_v60  ;;  %v1485_v17 = vunpack.c.h.b16 %v1223_v60 }
  0xb8   : > { %1288 = vst [vmem:[#allocation2 + $0x10] sm:$0xff] %v1224_v61  ;;  %v1486_v1 = vunpack.c.l.b16 %v1224_v61  ;;  %v1487_v2 = vunpack.c.h.b16 %v1224_v61  ;;  %2114 = vmatpush.bf16.msrb.mxu2 %v12727_v54  ;;  %2203 = vmatpush.bf16.msrb.mxu3 %v12735_v56 }
  0xba   : > { %v888_v3 = vpop.f32.mrf.mxu2  ;;  %v1001_v4 = vpop.f32.mrf.mxu3  ;;  %v14067_v5 = vpack.c.b16 %v1486_v1, %v1482_v63  ;;  %v14069_v6 = vpack.c.b16 %v1487_v2, %v1483_v0  ;;  %v514_v1 = vld [vmem:[%s13887_s27 + $0xa8] sm:$0xff] }
  0xbb   : > { %v1100_v7 = vmax.f32 %v888_v3, 0.0  ;;  %v1101_v8 = vmax.f32 %v1001_v4, 0.0  ;;  %v665_v9 = vpop.f32.mrf.mxu0  ;;  %v778_v10 = vpop.f32.mrf.mxu1 }
  0xbc   : > { %v1102_v12 = vmax.f32 %v665_v9, 0.0  ;;  %v1103_v13 = vmax.f32 %v778_v10, 0.0 }
  0xbd   : > { %v1225_v14 = vpack.c.bf16 %v1101_v8, %v1100_v7  ;;  %v12719_v8 = vld [vmem:[%s20094_s2 + $0x48] sm:$0xff] }
  0xbe   : > { %v1226_v15 = vpack.c.bf16 %v1103_v13, %v1102_v12  ;;  %10477 = vmatmul.msk.f32.gmra.mxu0 %vm536_vm1, %v511_v11  ;;  %10510 = vmatmul.msk.f32.gmra.mxu1 %vm536_vm1, %v511_v11 }
  0xbf   : > { %1289 = vst [vmem:[#allocation2 + $0x18] sm:$0xff] %v1225_v14  ;;  %v1488_v18 = vunpack.c.l.b16 %v1225_v14  ;;  %v1489_v19 = vunpack.c.h.b16 %v1225_v14  ;;  %10543 = vmatmul.msk.f32.gmra.mxu2 %vm536_vm1, %v511_v11  ;;  %10576 = vmatmul.msk.f32.gmra.mxu3 %vm536_vm1, %v511_v11 }
  0xc0   : > { %1290 = vst [vmem:[#allocation2 + $0x20] sm:$0xff] %v1226_v15  ;;  %v1490_v33 = vunpack.c.l.b16 %v1226_v15  ;;  %v1491_v35 = vunpack.c.h.b16 %v1226_v15  ;;  %2025 = vmatpush.bf16.msrb.mxu1 %v12719_v8  ;;  %v12726_v8 = vld [vmem:[%s20094_s2 + $0x80] sm:$0xff] }
  0xc1   : > { %v14076_v20 = vpack.c.b16 %v1488_v18, %v1484_v16  ;;  %v14078_v21 = vpack.c.b16 %v1489_v19, %v1485_v17  ;;  %2115 = vmatpush.bf16.msrb.mxu2 %v12726_v8 }
  0xc2   : > { %v891_v22 = vpop.f32.mrf.mxu2  ;;  %v1004_v23 = vpop.f32.mrf.mxu3 }
  0xc3   : > { %v1104_v24 = vmax.f32 %v891_v22, 0.0  ;;  %v1105_v25 = vmax.f32 %v1004_v23, 0.0  ;;  %v668_v26 = vpop.f32.mrf.mxu0  ;;  %v781_v27 = vpop.f32.mrf.mxu1  ;;  %v515_v23 = vld [vmem:[%s13887_s27 + $0xb0] sm:$0xff] }
  0xc4   : > { %v1106_v29 = vmax.f32 %v668_v26, 0.0  ;;  %v1107_v30 = vmax.f32 %v781_v27, 0.0 }
  0xc5   : > { %v1227_v31 = vpack.c.bf16 %v1105_v25, %v1104_v24 }
  0xc6   : > { %v1228_v32 = vpack.c.bf16 %v1107_v30, %v1106_v29  ;;  %10478 = vmatmul.msk.f32.gmra.mxu0 %vm536_vm1, %v512_v28  ;;  %10511 = vmatmul.msk.f32.gmra.mxu1 %vm536_vm1, %v512_v28 }
  0xc7   : > { %1291 = vst [vmem:[#allocation2 + $0x28] sm:$0xff] %v1227_v31  ;;  %10544 = vmatmul.msk.f32.gmra.mxu2 %vm536_vm1, %v512_v28  ;;  %10577 = vmatmul.msk.f32.gmra.mxu3 %vm536_vm1, %v512_v28  ;;  %v1492_v50 = vunpack.c.l.b16 %v1227_v31  ;;  %v1493_v52 = vunpack.c.h.b16 %v1227_v31 }
  0xc8   : > { %1292 = vst [vmem:[#allocation2 + $0x30] sm:$0xff] %v1228_v32  ;;  %v1494_v34 = vunpack.c.l.b16 %v1228_v32  ;;  %v1495_v36 = vunpack.c.h.b16 %v1228_v32 }
  0xca   : > { %v894_v37 = vpop.f32.mrf.mxu2  ;;  %v1007_v38 = vpop.f32.mrf.mxu3  ;;  %v14085_v39 = vpack.c.b16 %v1494_v34, %v1490_v33  ;;  %v14087_v40 = vpack.c.b16 %v1495_v36, %v1491_v35 }
  0xcb   : > { %v1108_v41 = vmax.f32 %v894_v37, 0.0  ;;  %v1109_v42 = vmax.f32 %v1007_v38, 0.0  ;;  %v671_v43 = vpop.f32.mrf.mxu0  ;;  %v784_v44 = vpop.f32.mrf.mxu1 }
  0xcc   : > { %v1110_v46 = vmax.f32 %v671_v43, 0.0  ;;  %v1111_v47 = vmax.f32 %v784_v44, 0.0 }
  0xcd   : > { %v1229_v48 = vpack.c.bf16 %v1109_v42, %v1108_v41  ;;  %v516_v42 = vld [vmem:[%s13887_s27 + $0xb8] sm:$0xff] }
  0xce   : > { %v1230_v49 = vpack.c.bf16 %v1111_v47, %v1110_v46  ;;  %10479 = vmatmul.msk.f32.gmra.mxu0 %vm536_vm1, %v513_v45  ;;  %10512 = vmatmul.msk.f32.gmra.mxu1 %vm536_vm1, %v513_v45 }
  0xcf   : > { %1293 = vst [vmem:[#allocation2 + $0x38] sm:$0xff] %v1229_v48  ;;  %10545 = vmatmul.msk.f32.gmra.mxu2 %vm536_vm1, %v513_v45  ;;  %10578 = vmatmul.msk.f32.gmra.mxu3 %vm536_vm1, %v513_v45  ;;  %v1496_v51 = vunpack.c.l.b16 %v1229_v48  ;;  %v1497_v53 = vunpack.c.h.b16 %v1229_v48 }
  0xd0   : > { %1294 = vst [vmem:[#allocation2 + $0x40] sm:$0xff] %v1230_v49  ;;  %v1498_v9 = vunpack.c.l.b16 %v1230_v49  ;;  %v1499_v11 = vunpack.c.h.b16 %v1230_v49 }
  0xd1   : > { %v14103_v57 = vpack.c.b16 %v1496_v51, %v1492_v50  ;;  %v14105_v58 = vpack.c.b16 %v1497_v53, %v1493_v52 }
  0xd2   : > { %v897_v59 = vpop.f32.mrf.mxu2  ;;  %v1010_v60 = vpop.f32.mrf.mxu3 }
  0xd3   : > { %v1112_v61 = vmax.f32 %v897_v59, 0.0  ;;  %v1113_v62 = vmax.f32 %v1010_v60, 0.0  ;;  %v674_v63 = vpop.f32.mrf.mxu0  ;;  %v787_v0 = vpop.f32.mrf.mxu1 }
  0xd4   : > { %v1114_v2 = vmax.f32 %v674_v63, 0.0  ;;  %v1115_v3 = vmax.f32 %v787_v0, 0.0 }
  0xd5   : > { %v1231_v4 = vpack.c.bf16 %v1113_v62, %v1112_v61  ;;  %v517_v61 = vld [vmem:[%s13887_s27 + $0xc0] sm:$0xff] }
  0xd6   : > { %v1232_v7 = vpack.c.bf16 %v1115_v3, %v1114_v2  ;;  %10480 = vmatmul.msk.f32.gmra.mxu0 %vm536_vm1, %v514_v1  ;;  %10513 = vmatmul.msk.f32.gmra.mxu1 %vm536_vm1, %v514_v1 }
  0xd7   : > { %1295 = vst [vmem:[#allocation2 + $0x48] sm:$0xff] %v1231_v4  ;;  %10546 = vmatmul.msk.f32.gmra.mxu2 %vm536_vm1, %v514_v1  ;;  %10579 = vmatmul.msk.f32.gmra.mxu3 %vm536_vm1, %v514_v1  ;;  %v1500_v28 = vunpack.c.l.b16 %v1231_v4  ;;  %v1501_v30 = vunpack.c.h.b16 %v1231_v4 }
  0xd8   : > { %1296 = vst [vmem:[#allocation2 + $0x50] sm:$0xff] %v1232_v7  ;;  %v1502_v10 = vunpack.c.l.b16 %v1232_v7  ;;  %v1503_v12 = vunpack.c.h.b16 %v1232_v7 }
  0xda   : > { %v900_v13 = vpop.f32.mrf.mxu2  ;;  %v1013_v14 = vpop.f32.mrf.mxu3  ;;  %v14115_v15 = vpack.c.b16 %v1502_v10, %v1498_v9  ;;  %v14117_v16 = vpack.c.b16 %v1503_v12, %v1499_v11  ;;  %v12710_v9 = vld [vmem:[%s20094_s2] sm:$0xff] }
  0xdb   : > { %v1116_v17 = vmax.f32 %v900_v13, 0.0  ;;  %v1117_v18 = vmax.f32 %v1013_v14, 0.0  ;;  %v677_v19 = vpop.f32.mrf.mxu0  ;;  %v790_v22 = vpop.f32.mrf.mxu1  ;;  %v12734_v10 = vld [vmem:[%s20094_s2 + $0xc0] sm:$0xff]  ;;  %1937 = vmatpush.bf16.msrb.mxu0 %v12710_v9 }
  0xdc   : > { %v1118_v24 = vmax.f32 %v677_v19, 0.0  ;;  %v1119_v25 = vmax.f32 %v790_v22, 0.0  ;;  %2204 = vmatpush.bf16.msrb.mxu3 %v12734_v10 }
  0xdd   : > { %v1233_v26 = vpack.c.bf16 %v1117_v18, %v1116_v17 }
  0xde   : > { %v1234_v27 = vpack.c.bf16 %v1119_v25, %v1118_v24  ;;  %10481 = vmatmul.msk.f32.gmra.mxu0 %vm536_vm1, %v515_v23  ;;  %10514 = vmatmul.msk.f32.gmra.mxu1 %vm536_vm1, %v515_v23 }
  0xdf   : > { %1297 = vst [vmem:[#allocation2 + $0x58] sm:$0xff] %v1233_v26  ;;  %10547 = vmatmul.msk.f32.gmra.mxu2 %vm536_vm1, %v515_v23  ;;  %10580 = vmatmul.msk.f32.gmra.mxu3 %vm536_vm1, %v515_v23  ;;  %v1504_v29 = vunpack.c.l.b16 %v1233_v26  ;;  %v1505_v31 = vunpack.c.h.b16 %v1233_v26  ;;  %v518_v23 = vld [vmem:[%s13887_s27 + $0xc8] sm:$0xff] }
  0xe0   : > { %1298 = vst [vmem:[#allocation2 + $0x60] sm:$0xff] %v1234_v27  ;;  %v1506_v47 = vunpack.c.l.b16 %v1234_v27  ;;  %v1507_v49 = vunpack.c.h.b16 %v1234_v27 }
  0xe1   : > { %v14124_v32 = vpack.c.b16 %v1504_v29, %v1500_v28  ;;  %v14126_v33 = vpack.c.b16 %v1505_v31, %v1501_v30  ;;  %v12718_v28 = vld [vmem:[%s20094_s2 + $0x40] sm:$0xff] }
  0xe2   : > { %v903_v34 = vpop.f32.mrf.mxu2  ;;  %v1016_v35 = vpop.f32.mrf.mxu3  ;;  %2026 = vmatpush.bf16.msrb.mxu1 %v12718_v28 }
  0xe3   : > { %v1120_v36 = vmax.f32 %v903_v34, 0.0  ;;  %v1121_v37 = vmax.f32 %v1016_v35, 0.0  ;;  %v680_v38 = vpop.f32.mrf.mxu0  ;;  %v793_v41 = vpop.f32.mrf.mxu1 }
  0xe4   : > { %v1122_v43 = vmax.f32 %v680_v38, 0.0  ;;  %v1123_v44 = vmax.f32 %v793_v41, 0.0 }
  0xe5   : > { %v1235_v45 = vpack.c.bf16 %v1121_v37, %v1120_v36 }
  0xe6   : > { %v1236_v46 = vpack.c.bf16 %v1123_v44, %v1122_v43  ;;  %10482 = vmatmul.msk.f32.gmra.mxu0 %vm536_vm1, %v516_v42  ;;  %10515 = vmatmul.msk.f32.gmra.mxu1 %vm536_vm1, %v516_v42 }
  0xe7   : > { %1299 = vst [vmem:[#allocation2 + $0x68] sm:$0xff] %v1235_v45  ;;  %10548 = vmatmul.msk.f32.gmra.mxu2 %vm536_vm1, %v516_v42  ;;  %10581 = vmatmul.msk.f32.gmra.mxu3 %vm536_vm1, %v516_v42  ;;  %v1508_v2 = vunpack.c.l.b16 %v1235_v45  ;;  %v1509_v4 = vunpack.c.h.b16 %v1235_v45  ;;  %v519_v45 = vld [vmem:[%s13887_s27 + $0xd0] sm:$0xff] }
  0xe8   : > { %1300 = vst [vmem:[#allocation2 + $0x70] sm:$0xff] %v1236_v46  ;;  %v1510_v48 = vunpack.c.l.b16 %v1236_v46  ;;  %v1511_v50 = vunpack.c.h.b16 %v1236_v46 }
  0xea   : > { %v906_v51 = vpop.f32.mrf.mxu2  ;;  %v1019_v52 = vpop.f32.mrf.mxu3  ;;  %v14133_v53 = vpack.c.b16 %v1510_v48, %v1506_v47  ;;  %v14135_v54 = vpack.c.b16 %v1511_v50, %v1507_v49 }
  0xeb   : > { %v1124_v55 = vmax.f32 %v906_v51, 0.0  ;;  %v1125_v56 = vmax.f32 %v1019_v52, 0.0  ;;  %v683_v59 = vpop.f32.mrf.mxu0  ;;  %v796_v60 = vpop.f32.mrf.mxu1 }
  0xec   : > { %v1126_v62 = vmax.f32 %v683_v59, 0.0  ;;  %v1127_v63 = vmax.f32 %v796_v60, 0.0 }
  0xed   : > { %v1237_v0 = vpack.c.bf16 %v1125_v56, %v1124_v55 }
  0xee   : > { %v1238_v1 = vpack.c.bf16 %v1127_v63, %v1126_v62  ;;  %10483 = vmatmul.msk.f32.gmra.mxu0 %vm536_vm1, %v517_v61  ;;  %10516 = vmatmul.msk.f32.gmra.mxu1 %vm536_vm1, %v517_v61 }
  0xef   : > { %1301 = vst [vmem:[#allocation2 + $0x78] sm:$0xff] %v1237_v0  ;;  %10549 = vmatmul.msk.f32.gmra.mxu2 %vm536_vm1, %v517_v61  ;;  %10582 = vmatmul.msk.f32.gmra.mxu3 %vm536_vm1, %v517_v61  ;;  %v1512_v3 = vunpack.c.l.b16 %v1237_v0  ;;  %v1513_v7 = vunpack.c.h.b16 %v1237_v0 }
  0xf0   : > { %1302 = vst [vmem:[#allocation2 + $0x80] sm:$0xff] %v1238_v1  ;;  %v1514_v29 = vunpack.c.l.b16 %v1238_v1  ;;  %v1515_v31 = vunpack.c.h.b16 %v1238_v1 }
  0xf1   : > { %v14151_v11 = vpack.c.b16 %v1512_v3, %v1508_v2  ;;  %v14153_v12 = vpack.c.b16 %v1513_v7, %v1509_v4  ;;  %v520_v2 = vld [vmem:[%s13887_s27 + $0xd8] sm:$0xff] }
  0xf2   : > { %v909_v13 = vpop.f32.mrf.mxu2  ;;  %v1022_v14 = vpop.f32.mrf.mxu3 }
  0xf3   : > { %v1128_v17 = vmax.f32 %v909_v13, 0.0  ;;  %v1129_v18 = vmax.f32 %v1022_v14, 0.0  ;;  %v686_v19 = vpop.f32.mrf.mxu0  ;;  %v799_v22 = vpop.f32.mrf.mxu1 }
  0xf4   : > { %v1130_v24 = vmax.f32 %v686_v19, 0.0  ;;  %v1131_v25 = vmax.f32 %v799_v22, 0.0 }
  0xf5   : > { %v1239_v26 = vpack.c.bf16 %v1129_v18, %v1128_v17 }
  0xf6   : > { %v1240_v27 = vpack.c.bf16 %v1131_v25, %v1130_v24  ;;  %10484 = vmatmul.msk.f32.gmra.mxu0 %vm536_vm1, %v518_v23  ;;  %10517 = vmatmul.msk.f32.gmra.mxu1 %vm536_vm1, %v518_v23 }
  0xf7   : > { %1303 = vst [vmem:[#allocation2 + $0x88] sm:$0xff] %v1239_v26  ;;  %10550 = vmatmul.msk.f32.gmra.mxu2 %vm536_vm1, %v518_v23  ;;  %10583 = vmatmul.msk.f32.gmra.mxu3 %vm536_vm1, %v518_v23  ;;  %v1516_v50 = vunpack.c.l.b16 %v1239_v26  ;;  %v1517_v52 = vunpack.c.h.b16 %v1239_v26 }
  0xf8   : > { %1304 = vst [vmem:[#allocation2 + $0x90] sm:$0xff] %v1240_v27  ;;  %v1518_v30 = vunpack.c.l.b16 %v1240_v27  ;;  %v1519_v34 = vunpack.c.h.b16 %v1240_v27  ;;  %v521_v27 = vld [vmem:[%s13887_s27 + $0xe0] sm:$0xff] }
  0xfa   : > { %v912_v35 = vpop.f32.mrf.mxu2  ;;  %v1025_v36 = vpop.f32.mrf.mxu3  ;;  %v14163_v37 = vpack.c.b16 %v1518_v30, %v1514_v29  ;;  %v14165_v38 = vpack.c.b16 %v1519_v34, %v1515_v31 }
  0xfb   : > { %v1132_v41 = vmax.f32 %v912_v35, 0.0  ;;  %v1133_v42 = vmax.f32 %v1025_v36, 0.0  ;;  %v689_v43 = vpop.f32.mrf.mxu0  ;;  %v802_v44 = vpop.f32.mrf.mxu1 }
  0xfc   : > { %v1134_v46 = vmax.f32 %v689_v43, 0.0  ;;  %v1135_v47 = vmax.f32 %v802_v44, 0.0 }
  0xfd   : > { %v1241_v48 = vpack.c.bf16 %v1133_v42, %v1132_v41 }
  0xfe   : > { %v1242_v49 = vpack.c.bf16 %v1135_v47, %v1134_v46  ;;  %10485 = vmatmul.msk.f32.gmra.mxu0 %vm536_vm1, %v519_v45  ;;  %10518 = vmatmul.msk.f32.gmra.mxu1 %vm536_vm1, %v519_v45 }
  0xff   : > { %1305 = vst [vmem:[#allocation2 + $0x98] sm:$0xff] %v1241_v48  ;;  %10551 = vmatmul.msk.f32.gmra.mxu2 %vm536_vm1, %v519_v45  ;;  %10584 = vmatmul.msk.f32.gmra.mxu3 %vm536_vm1, %v519_v45  ;;  %v1520_v51 = vunpack.c.l.b16 %v1241_v48  ;;  %v1521_v55 = vunpack.c.h.b16 %v1241_v48 }
 0x100   : > { %1306 = vst [vmem:[#allocation2 + $0xa0] sm:$0xff] %v1242_v49  ;;  %v1522_v9 = vunpack.c.l.b16 %v1242_v49  ;;  %v1523_v13 = vunpack.c.h.b16 %v1242_v49 }
 0x101   : > { %v14172_v56 = vpack.c.b16 %v1520_v51, %v1516_v50  ;;  %v14174_v59 = vpack.c.b16 %v1521_v55, %v1517_v52  ;;  %v522_v50 = vld [vmem:[%s13887_s27 + $0xe8] sm:$0xff] }
 0x102   : > { %v915_v60 = vpop.f32.mrf.mxu2  ;;  %v1028_v61 = vpop.f32.mrf.mxu3 }
 0x103   : > { %v1136_v62 = vmax.f32 %v915_v60, 0.0  ;;  %v1137_v63 = vmax.f32 %v1028_v61, 0.0  ;;  %v692_v0 = vpop.f32.mrf.mxu0  ;;  %v805_v1 = vpop.f32.mrf.mxu1 }
 0x104   : > { %v1138_v3 = vmax.f32 %v692_v0, 0.0  ;;  %v1139_v4 = vmax.f32 %v805_v1, 0.0 }
 0x105   : > { %v1243_v7 = vpack.c.bf16 %v1137_v63, %v1136_v62 }
 0x106   : > { %v1244_v8 = vpack.c.bf16 %v1139_v4, %v1138_v3  ;;  %10486 = vmatmul.msk.f32.gmra.mxu0 %vm536_vm1, %v520_v2  ;;  %10519 = vmatmul.msk.f32.gmra.mxu1 %vm536_vm1, %v520_v2 }
 0x107   : > { %1307 = vst [vmem:[#allocation2 + $0xa8] sm:$0xff] %v1243_v7  ;;  %10552 = vmatmul.msk.f32.gmra.mxu2 %vm536_vm1, %v520_v2  ;;  %10585 = vmatmul.msk.f32.gmra.mxu3 %vm536_vm1, %v520_v2  ;;  %v1524_v34 = vunpack.c.l.b16 %v1243_v7  ;;  %v1525_v36 = vunpack.c.h.b16 %v1243_v7 }
 0x108   : > { %1308 = vst [vmem:[#allocation2 + $0xb0] sm:$0xff] %v1244_v8  ;;  %v1526_v10 = vunpack.c.l.b16 %v1244_v8  ;;  %v1527_v14 = vunpack.c.h.b16 %v1244_v8 }
 0x10a   : > { %v918_v17 = vpop.f32.mrf.mxu2  ;;  %v1031_v18 = vpop.f32.mrf.mxu3  ;;  %v14181_v19 = vpack.c.b16 %v1526_v10, %v1522_v9  ;;  %v14183_v22 = vpack.c.b16 %v1527_v14, %v1523_v13  ;;  %v523_v13 = vld [vmem:[%s13887_s27 + $0xf0] sm:$0xff] }
 0x10b   : > { %v1140_v23 = vmax.f32 %v918_v17, 0.0  ;;  %v1141_v24 = vmax.f32 %v1031_v18, 0.0  ;;  %v695_v25 = vpop.f32.mrf.mxu0  ;;  %v808_v26 = vpop.f32.mrf.mxu1 }
 0x10c   : > { %v1142_v28 = vmax.f32 %v695_v25, 0.0  ;;  %v1143_v29 = vmax.f32 %v808_v26, 0.0 }
 0x10d   : > { %v1245_v30 = vpack.c.bf16 %v1141_v24, %v1140_v23 }
 0x10e   : > { %v1246_v31 = vpack.c.bf16 %v1143_v29, %v1142_v28  ;;  %10487 = vmatmul.msk.f32.gmra.mxu0 %vm536_vm1, %v521_v27  ;;  %10520 = vmatmul.msk.f32.gmra.mxu1 %vm536_vm1, %v521_v27 }
 0x10f   : > { %1309 = vst [vmem:[#allocation2 + $0xb8] sm:$0xff] %v1245_v30  ;;  %10553 = vmatmul.msk.f32.gmra.mxu2 %vm536_vm1, %v521_v27  ;;  %10586 = vmatmul.msk.f32.gmra.mxu3 %vm536_vm1, %v521_v27  ;;  %v1528_v35 = vunpack.c.l.b16 %v1245_v30  ;;  %v1529_v41 = vunpack.c.h.b16 %v1245_v30 }
 0x110   : > { %1310 = vst [vmem:[#allocation2 + $0xc0] sm:$0xff] %v1246_v31  ;;  %v1530_v61 = vunpack.c.l.b16 %v1246_v31  ;;  %v1531_v63 = vunpack.c.h.b16 %v1246_v31 }
 0x111   : > { %v14190_v42 = vpack.c.b16 %v1528_v35, %v1524_v34  ;;  %v14192_v43 = vpack.c.b16 %v1529_v41, %v1525_v36 }
 0x112   : > { %v921_v44 = vpop.f32.mrf.mxu2  ;;  %v1034_v45 = vpop.f32.mrf.mxu3 }
 0x113   : > { %v1144_v46 = vmax.f32 %v921_v44, 0.0  ;;  %v1145_v47 = vmax.f32 %v1034_v45, 0.0  ;;  %v698_v48 = vpop.f32.mrf.mxu0  ;;  %v811_v49 = vpop.f32.mrf.mxu1  ;;  %v524_v44 = vld [vmem:[%s13887_s27 + $0xf8] sm:$0xff] }
 0x114   : > { %v1146_v51 = vmax.f32 %v698_v48, 0.0  ;;  %v1147_v52 = vmax.f32 %v811_v49, 0.0 }
 0x115   : > { %v1247_v55 = vpack.c.bf16 %v1145_v47, %v1144_v46 }
 0x116   : > { %v1248_v60 = vpack.c.bf16 %v1147_v52, %v1146_v51  ;;  %10488 = vmatmul.msk.f32.gmra.mxu0 %vm536_vm1, %v522_v50  ;;  %10521 = vmatmul.msk.f32.gmra.mxu1 %vm536_vm1, %v522_v50 }
 0x117   : > { %1311 = vst [vmem:[#allocation2 + $0xc8] sm:$0xff] %v1247_v55  ;;  %10554 = vmatmul.msk.f32.gmra.mxu2 %vm536_vm1, %v522_v50  ;;  %10587 = vmatmul.msk.f32.gmra.mxu3 %vm536_vm1, %v522_v50  ;;  %v1532_v24 = vunpack.c.l.b16 %v1247_v55  ;;  %v1533_v26 = vunpack.c.h.b16 %v1247_v55 }
 0x118   : > { %1312 = vst [vmem:[#allocation2 + $0xd0] sm:$0xff] %v1248_v60  ;;  %v1534_v62 = vunpack.c.l.b16 %v1248_v60  ;;  %v1535_v0 = vunpack.c.h.b16 %v1248_v60 }
 0x11a   : > { %v924_v1 = vpop.f32.mrf.mxu2  ;;  %v1037_v2 = vpop.f32.mrf.mxu3  ;;  %v14199_v3 = vpack.c.b16 %v1534_v62, %v1530_v61  ;;  %v14201_v4 = vpack.c.b16 %v1535_v0, %v1531_v63 }
 0x11b   : > { %v1148_v7 = vmax.f32 %v924_v1, 0.0  ;;  %v1149_v8 = vmax.f32 %v1037_v2, 0.0  ;;  %v701_v9 = vpop.f32.mrf.mxu0  ;;  %v814_v10 = vpop.f32.mrf.mxu1 }
 0x11c   : > { %v1150_v14 = vmax.f32 %v701_v9, 0.0  ;;  %v1151_v17 = vmax.f32 %v814_v10, 0.0 }
 0x11d   : > { %v1249_v18 = vpack.c.bf16 %v1149_v8, %v1148_v7 }
 0x11e   : > { %v1250_v23 = vpack.c.bf16 %v1151_v17, %v1150_v14  ;;  %10489 = vmatmul.msk.f32.gmra.mxu0 %vm536_vm1, %v523_v13  ;;  %10522 = vmatmul.msk.f32.gmra.mxu1 %vm536_vm1, %v523_v13 }
 0x11f   : > { %1313 = vst [vmem:[#allocation2 + $0xd8] sm:$0xff] %v1249_v18  ;;  %10555 = vmatmul.msk.f32.gmra.mxu2 %vm536_vm1, %v523_v13  ;;  %10588 = vmatmul.msk.f32.gmra.mxu3 %vm536_vm1, %v523_v13  ;;  %v1536_v25 = vunpack.c.l.b16 %v1249_v18  ;;  %v1537_v27 = vunpack.c.h.b16 %v1249_v18 }
 0x120   : > { %1314 = vst [vmem:[#allocation2 + $0xe0] sm:$0xff] %v1250_v23  ;;  %v1538_v49 = vunpack.c.l.b16 %v1250_v23  ;;  %v1539_v51 = vunpack.c.h.b16 %v1250_v23 }
 0x121   : > { %v14208_v28 = vpack.c.b16 %v1536_v25, %v1532_v24  ;;  %v14210_v29 = vpack.c.b16 %v1537_v27, %v1533_v26 }
 0x122   : > { %v927_v30 = vpop.f32.mrf.mxu2  ;;  %v1040_v31 = vpop.f32.mrf.mxu3 }
 0x123   : > { %v1152_v34 = vmax.f32 %v927_v30, 0.0  ;;  %v1153_v35 = vmax.f32 %v1040_v31, 0.0  ;;  %v704_v36 = vpop.f32.mrf.mxu0  ;;  %v817_v41 = vpop.f32.mrf.mxu1 }
 0x124   : > { %v1154_v45 = vmax.f32 %v704_v36, 0.0  ;;  %v1155_v46 = vmax.f32 %v817_v41, 0.0 }
 0x125   : > { %v1251_v47 = vpack.c.bf16 %v1153_v35, %v1152_v34 }
 0x126   : > { %v1252_v48 = vpack.c.bf16 %v1155_v46, %v1154_v45  ;;  %10490 = vmatmul.msk.f32.gmra.mxu0 %vm536_vm1, %v524_v44  ;;  %10523 = vmatmul.msk.f32.gmra.mxu1 %vm536_vm1, %v524_v44 }
 0x127   : > { %1315 = vst [vmem:[#allocation2 + $0xe8] sm:$0xff] %v1251_v47  ;;  %10556 = vmatmul.msk.f32.gmra.mxu2 %vm536_vm1, %v524_v44  ;;  %10589 = vmatmul.msk.f32.gmra.mxu3 %vm536_vm1, %v524_v44  ;;  %v1540_v13 = vunpack.c.l.b16 %v1251_v47  ;;  %v1541_v17 = vunpack.c.h.b16 %v1251_v47 }
 0x128   : > { %1316 = vst [vmem:[#allocation2 + $0xf0] sm:$0xff] %v1252_v48  ;;  %v1542_v50 = vunpack.c.l.b16 %v1252_v48  ;;  %v1543_v52 = vunpack.c.h.b16 %v1252_v48 }
 0x12a   : > { %v930_v55 = vpop.f32.mrf.mxu2  ;;  %v1043_v60 = vpop.f32.mrf.mxu3  ;;  %v14217_v61 = vpack.c.b16 %v1542_v50, %v1538_v49  ;;  %v14219_v62 = vpack.c.b16 %v1543_v52, %v1539_v51 }
 0x12b   : > { %v1156_v63 = vmax.f32 %v930_v55, 0.0  ;;  %v1157_v0 = vmax.f32 %v1043_v60, 0.0  ;;  %v707_v1 = vpop.f32.mrf.mxu0  ;;  %v820_v2 = vpop.f32.mrf.mxu1 }
 0x12c   : > { %v1158_v7 = vmax.f32 %v707_v1, 0.0  ;;  %v1159_v8 = vmax.f32 %v820_v2, 0.0 }
 0x12d   : > { %v1253_v9 = vpack.c.bf16 %v1157_v0, %v1156_v63 }
 0x12e   : > { %v1254_v10 = vpack.c.bf16 %v1159_v8, %v1158_v7  ;;  %1938 = vmatmul.bf16.vlgmr.msrb.gmra.mxu0 %v14067_v5  ;;  %2027 = vmatmul.bf16.vlgmr.msrb.gmra.mxu1 %v14069_v6 }
 0x12f   : > { %1317 = vst [vmem:[#allocation2 + $0xf8] sm:$0xff] %v1253_v9  ;;  %2116 = vmatmul.bf16.vlgmr.msrb.gmra.mxu2 %v14076_v20  ;;  %2205 = vmatmul.bf16.vlgmr.msrb.gmra.mxu3 %v14078_v21  ;;  %v1544_v14 = vunpack.c.l.b16 %v1253_v9  ;;  %v1545_v18 = vunpack.c.h.b16 %v1253_v9 }
 0x130   : > { %1318 = vst [vmem:[#allocation2 + $0x100] sm:$0xff] %v1254_v10  ;;  %v1546_v21 = vunpack.c.l.b16 %v1254_v10  ;;  %v1547_v41 = vunpack.c.h.b16 %v1254_v10 }
 0x131   : > { %v14225_v23 = vpack.c.b16 %v1544_v14, %v1540_v13  ;;  %v14227_v24 = vpack.c.b16 %v1545_v18, %v1541_v17 }
 0x132   : > { %v933_v25 = vpop.f32.mrf.mxu2  ;;  %v1046_v26 = vpop.f32.mrf.mxu3 }
 0x133   : > { %v1160_v27 = vmax.f32 %v933_v25, 0.0  ;;  %v1161_v5 = vmax.f32 %v1046_v26, 0.0  ;;  %v710_v30 = vpop.f32.mrf.mxu0  ;;  %v823_v6 = vpop.f32.mrf.mxu1 }
 0x134   : > { %v1162_v31 = vmax.f32 %v710_v30, 0.0  ;;  %v1163_v34 = vmax.f32 %v823_v6, 0.0 }
 0x135   : > { %v1255_v20 = vpack.c.bf16 %v1161_v5, %v1160_v27 }
 0x136   : > { %v1256_v35 = vpack.c.bf16 %v1163_v34, %v1162_v31 }
 0x137   : > { %1319 = vst [vmem:[#allocation2 + $0x108] sm:$0xff] %v1255_v20  ;;  %v1548_v1 = vunpack.c.l.b16 %v1255_v20  ;;  %v1549_v7 = vunpack.c.h.b16 %v1255_v20 }
 0x138   : > { %1320 = vst [vmem:[#allocation2 + $0x110] sm:$0xff] %v1256_v35  ;;  %v1550_v36 = vunpack.c.l.b16 %v1256_v35  ;;  %v1551_v44 = vunpack.c.h.b16 %v1256_v35 }
 0x13a   : > { %v936_v45 = vpop.f32.mrf.mxu2  ;;  %v1049_v46 = vpop.f32.mrf.mxu3  ;;  %v14229_v47 = vpack.c.b16 %v1550_v36, %v1546_v21  ;;  %v14231_v48 = vpack.c.b16 %v1551_v44, %v1547_v41 }
 0x13b   : > { %v1164_v49 = vmax.f32 %v936_v45, 0.0  ;;  %v1165_v50 = vmax.f32 %v1049_v46, 0.0  ;;  %v713_v51 = vpop.f32.mrf.mxu0  ;;  %v826_v52 = vpop.f32.mrf.mxu1 }
 0x13c   : > { %v1166_v55 = vmax.f32 %v713_v51, 0.0  ;;  %v1167_v60 = vmax.f32 %v826_v52, 0.0 }
 0x13d   : > { %v1257_v63 = vpack.c.bf16 %v1165_v50, %v1164_v49 }
 0x13e   : > { %v1258_v0 = vpack.c.bf16 %v1167_v60, %v1166_v55  ;;  %1943 = vmatmul.bf16.gmra.mxu0 %v14085_v39  ;;  %2032 = vmatmul.bf16.gmra.mxu1 %v14087_v40 }
 0x13f   : > { %1321 = vst [vmem:[#allocation2 + $0x118] sm:$0xff] %v1257_v63  ;;  %2121 = vmatmul.bf16.gmra.mxu2 %v14103_v57  ;;  %2210 = vmatmul.bf16.gmra.mxu3 %v14105_v58  ;;  %v1552_v2 = vunpack.c.l.b16 %v1257_v63  ;;  %v1553_v8 = vunpack.c.h.b16 %v1257_v63 }
 0x140   : > { %1322 = vst [vmem:[#allocation2 + $0x120] sm:$0xff] %v1258_v0  ;;  %v1554_v58 = vunpack.c.l.b16 %v1258_v0  ;;  %v1555_v30 = vunpack.c.h.b16 %v1258_v0 }
 0x141   : > { %v14237_v9 = vpack.c.b16 %v1552_v2, %v1548_v1  ;;  %v14239_v10 = vpack.c.b16 %v1553_v8, %v1549_v7 }
 0x142   : > { %v939_v13 = vpop.f32.mrf.mxu2  ;;  %v1052_v14 = vpop.f32.mrf.mxu3 }
 0x143   : > { %v1168_v17 = vmax.f32 %v939_v13, 0.0  ;;  %v1169_v39 = vmax.f32 %v1052_v14, 0.0  ;;  %v716_v18 = vpop.f32.mrf.mxu0  ;;  %v829_v40 = vpop.f32.mrf.mxu1 }
 0x144   : > { %v1170_v25 = vmax.f32 %v716_v18, 0.0  ;;  %v1171_v26 = vmax.f32 %v829_v40, 0.0 }
 0x145   : > { %v1259_v57 = vpack.c.bf16 %v1169_v39, %v1168_v17 }
 0x146   : > { %v1260_v27 = vpack.c.bf16 %v1171_v26, %v1170_v25 }
 0x147   : > { %1323 = vst [vmem:[#allocation2 + $0x128] sm:$0xff] %v1259_v57  ;;  %v1556_v51 = vunpack.c.l.b16 %v1259_v57  ;;  %v1557_v55 = vunpack.c.h.b16 %v1259_v57 }
 0x148   : > { %1324 = vst [vmem:[#allocation2 + $0x130] sm:$0xff] %v1260_v27  ;;  %v1558_v5 = vunpack.c.l.b16 %v1260_v27  ;;  %v1559_v6 = vunpack.c.h.b16 %v1260_v27 }
 0x14a   : > { %v942_v31 = vpop.f32.mrf.mxu2  ;;  %v1055_v34 = vpop.f32.mrf.mxu3  ;;  %v14241_v20 = vpack.c.b16 %v1558_v5, %v1554_v58  ;;  %v14243_v35 = vpack.c.b16 %v1559_v6, %v1555_v30 }
 0x14b   : > { %v1172_v21 = vmax.f32 %v942_v31, 0.0  ;;  %v1173_v36 = vmax.f32 %v1055_v34, 0.0  ;;  %v719_v41 = vpop.f32.mrf.mxu0  ;;  %v832_v44 = vpop.f32.mrf.mxu1 }
 0x14c   : > { %v1174_v45 = vmax.f32 %v719_v41, 0.0  ;;  %v1175_v46 = vmax.f32 %v832_v44, 0.0 }
 0x14d   : > { %v1261_v49 = vpack.c.bf16 %v1173_v36, %v1172_v21 }
 0x14e   : > { %v1262_v50 = vpack.c.bf16 %v1175_v46, %v1174_v45  ;;  %1948 = vmatmul.bf16.gmra.mxu0 %v14115_v15  ;;  %2037 = vmatmul.bf16.gmra.mxu1 %v14117_v16 }
 0x14f   : > { %1325 = vst [vmem:[#allocation2 + $0x138] sm:$0xff] %v1261_v49  ;;  %2126 = vmatmul.bf16.gmra.mxu2 %v14124_v32  ;;  %2215 = vmatmul.bf16.gmra.mxu3 %v14126_v33  ;;  %v1560_v52 = vunpack.c.l.b16 %v1261_v49  ;;  %v1561_v60 = vunpack.c.h.b16 %v1261_v49 }
 0x150   : > { %1326 = vst [vmem:[#allocation2 + $0x140] sm:$0xff] %v1262_v50  ;;  %v1562_v33 = vunpack.c.l.b16 %v1262_v50  ;;  %v1563_v18 = vunpack.c.h.b16 %v1262_v50 }
 0x151   : > { %v14249_v63 = vpack.c.b16 %v1560_v52, %v1556_v51  ;;  %v14251_v0 = vpack.c.b16 %v1561_v60, %v1557_v55 }
 0x152   : > { %v945_v1 = vpop.f32.mrf.mxu2  ;;  %v1058_v2 = vpop.f32.mrf.mxu3 }
 0x153   : > { %v1176_v7 = vmax.f32 %v945_v1, 0.0  ;;  %v1177_v15 = vmax.f32 %v1058_v2, 0.0  ;;  %v722_v8 = vpop.f32.mrf.mxu0  ;;  %v835_v16 = vpop.f32.mrf.mxu1 }
 0x154   : > { %v1178_v13 = vmax.f32 %v722_v8, 0.0  ;;  %v1179_v14 = vmax.f32 %v835_v16, 0.0 }
 0x155   : > { %v1263_v32 = vpack.c.bf16 %v1177_v15, %v1176_v7 }
 0x156   : > { %v1264_v17 = vpack.c.bf16 %v1179_v14, %v1178_v13 }
 0x157   : > { %1327 = vst [vmem:[#allocation2 + $0x148] sm:$0xff] %v1263_v32  ;;  %v1564_v41 = vunpack.c.l.b16 %v1263_v32  ;;  %v1565_v45 = vunpack.c.h.b16 %v1263_v32 }
 0x158   : > { %1328 = vst [vmem:[#allocation2 + $0x150] sm:$0xff] %v1264_v17  ;;  %v1566_v39 = vunpack.c.l.b16 %v1264_v17  ;;  %v1567_v40 = vunpack.c.h.b16 %v1264_v17 }
 0x15a   : > { %v948_v25 = vpop.f32.mrf.mxu2  ;;  %v1061_v26 = vpop.f32.mrf.mxu3  ;;  %v14253_v57 = vpack.c.b16 %v1566_v39, %v1562_v33  ;;  %v14255_v27 = vpack.c.b16 %v1567_v40, %v1563_v18 }
 0x15b   : > { %v1180_v58 = vmax.f32 %v948_v25, 0.0  ;;  %v1181_v5 = vmax.f32 %v1061_v26, 0.0  ;;  %v725_v30 = vpop.f32.mrf.mxu0  ;;  %v838_v6 = vpop.f32.mrf.mxu1 }
 0x15c   : > { %v1182_v31 = vmax.f32 %v725_v30, 0.0  ;;  %v1183_v34 = vmax.f32 %v838_v6, 0.0 }
 0x15d   : > { %v1265_v21 = vpack.c.bf16 %v1181_v5, %v1180_v58 }
 0x15e   : > { %v1266_v36 = vpack.c.bf16 %v1183_v34, %v1182_v31  ;;  %1953 = vmatmul.bf16.gmra.mxu0 %v14133_v53  ;;  %2042 = vmatmul.bf16.gmra.mxu1 %v14135_v54 }
 0x15f   : > { %1329 = vst [vmem:[#allocation2 + $0x158] sm:$0xff] %v1265_v21  ;;  %2131 = vmatmul.bf16.gmra.mxu2 %v14151_v11  ;;  %2220 = vmatmul.bf16.gmra.mxu3 %v14153_v12  ;;  %v1568_v44 = vunpack.c.l.b16 %v1265_v21  ;;  %v1569_v46 = vunpack.c.h.b16 %v1265_v21 }
 0x160   : > { %1330 = vst [vmem:[#allocation2 + $0x160] sm:$0xff] %v1266_v36  ;;  %v1570_v12 = vunpack.c.l.b16 %v1266_v36  ;;  %v1571_v8 = vunpack.c.h.b16 %v1266_v36 }
 0x161   : > { %v14261_v49 = vpack.c.b16 %v1568_v44, %v1564_v41  ;;  %v14263_v50 = vpack.c.b16 %v1569_v46, %v1565_v45 }
 0x162   : > { %v951_v51 = vpop.f32.mrf.mxu2  ;;  %v1064_v52 = vpop.f32.mrf.mxu3 }
 0x163   : > { %v1184_v55 = vmax.f32 %v951_v51, 0.0  ;;  %v1185_v53 = vmax.f32 %v1064_v52, 0.0  ;;  %v728_v60 = vpop.f32.mrf.mxu0  ;;  %v841_v54 = vpop.f32.mrf.mxu1 }
 0x164   : > { %v1186_v1 = vmax.f32 %v728_v60, 0.0  ;;  %v1187_v2 = vmax.f32 %v841_v54, 0.0 }
 0x165   : > { %v1267_v11 = vpack.c.bf16 %v1185_v53, %v1184_v55 }
 0x166   : > { %v1268_v7 = vpack.c.bf16 %v1187_v2, %v1186_v1 }
 0x167   : > { %1331 = vst [vmem:[#allocation2 + $0x168] sm:$0xff] %v1267_v11  ;;  %v1572_v30 = vunpack.c.l.b16 %v1267_v11  ;;  %v1573_v31 = vunpack.c.h.b16 %v1267_v11 }
 0x168   : > { %1332 = vst [vmem:[#allocation2 + $0x170] sm:$0xff] %v1268_v7  ;;  %v1574_v15 = vunpack.c.l.b16 %v1268_v7  ;;  %v1575_v16 = vunpack.c.h.b16 %v1268_v7 }
 0x16a   : > { %v954_v13 = vpop.f32.mrf.mxu2  ;;  %v1067_v14 = vpop.f32.mrf.mxu3  ;;  %v14265_v32 = vpack.c.b16 %v1574_v15, %v1570_v12  ;;  %v14267_v17 = vpack.c.b16 %v1575_v16, %v1571_v8 }
 0x16b   : > { %v1188_v33 = vmax.f32 %v954_v13, 0.0  ;;  %v1189_v39 = vmax.f32 %v1067_v14, 0.0  ;;  %v731_v18 = vpop.f32.mrf.mxu0  ;;  %v844_v40 = vpop.f32.mrf.mxu1 }
 0x16c   : > { %v1190_v25 = vmax.f32 %v731_v18, 0.0  ;;  %v1191_v26 = vmax.f32 %v844_v40, 0.0 }
 0x16d   : > { %v1269_v58 = vpack.c.bf16 %v1189_v39, %v1188_v33 }
 0x16e   : > { %v1270_v5 = vpack.c.bf16 %v1191_v26, %v1190_v25  ;;  %1958 = vmatmul.bf16.gmra.mxu0 %v14163_v37  ;;  %2047 = vmatmul.bf16.gmra.mxu1 %v14165_v38 }
 0x16f   : > { %1333 = vst [vmem:[#allocation2 + $0x178] sm:$0xff] %v1269_v58  ;;  %2136 = vmatmul.bf16.gmra.mxu2 %v14172_v56  ;;  %2225 = vmatmul.bf16.gmra.mxu3 %v14174_v59  ;;  %v1576_v6 = vunpack.c.l.b16 %v1269_v58  ;;  %v1577_v34 = vunpack.c.h.b16 %v1269_v58 }
 0x170   : > { %1334 = vst [vmem:[#allocation2 + $0x180] sm:$0xff] %v1270_v5  ;;  %v1578_v59 = vunpack.c.l.b16 %v1270_v5  ;;  %v1579_v60 = vunpack.c.h.b16 %v1270_v5 }
 0x171   : > { %v14273_v21 = vpack.c.b16 %v1576_v6, %v1572_v30  ;;  %v14275_v36 = vpack.c.b16 %v1577_v34, %v1573_v31 }
 0x172   : > { %v957_v41 = vpop.f32.mrf.mxu2  ;;  %v1070_v44 = vpop.f32.mrf.mxu3 }
 0x173   : > { %v1192_v45 = vmax.f32 %v957_v41, 0.0  ;;  %v1193_v37 = vmax.f32 %v1070_v44, 0.0  ;;  %v734_v46 = vpop.f32.mrf.mxu0  ;;  %v847_v38 = vpop.f32.mrf.mxu1 }
 0x174   : > { %v1194_v51 = vmax.f32 %v734_v46, 0.0  ;;  %v1195_v52 = vmax.f32 %v847_v38, 0.0 }
 0x175   : > { %v1271_v56 = vpack.c.bf16 %v1193_v37, %v1192_v45 }
 0x176   : > { %v1272_v55 = vpack.c.bf16 %v1195_v52, %v1194_v51 }
 0x177   : > { %1335 = vst [vmem:[#allocation2 + $0x188] sm:$0xff] %v1271_v56  ;;  %v1580_v18 = vunpack.c.l.b16 %v1271_v56  ;;  %v1581_v25 = vunpack.c.h.b16 %v1271_v56 }
 0x178   : > { %1336 = vst [vmem:[#allocation2 + $0x190] sm:$0xff] %v1272_v55  ;;  %v1582_v53 = vunpack.c.l.b16 %v1272_v55  ;;  %v1583_v54 = vunpack.c.h.b16 %v1272_v55 }
 0x17a   : > { %v960_v1 = vpop.f32.mrf.mxu2  ;;  %v1073_v2 = vpop.f32.mrf.mxu3  ;;  %v14277_v11 = vpack.c.b16 %v1582_v53, %v1578_v59  ;;  %v14279_v7 = vpack.c.b16 %v1583_v54, %v1579_v60 }
 0x17b   : > { %v1196_v12 = vmax.f32 %v960_v1, 0.0  ;;  %v1197_v15 = vmax.f32 %v1073_v2, 0.0  ;;  %v737_v8 = vpop.f32.mrf.mxu0  ;;  %v850_v16 = vpop.f32.mrf.mxu1 }
 0x17c   : > { %v1198_v13 = vmax.f32 %v737_v8, 0.0  ;;  %v1199_v14 = vmax.f32 %v850_v16, 0.0 }
 0x17d   : > { %v1273_v33 = vpack.c.bf16 %v1197_v15, %v1196_v12 }
 0x17e   : > { %v1274_v39 = vpack.c.bf16 %v1199_v14, %v1198_v13  ;;  %1963 = vmatmul.bf16.gmra.mxu0 %v14181_v19  ;;  %2052 = vmatmul.bf16.gmra.mxu1 %v14183_v22 }
 0x17f   : > { %1337 = vst [vmem:[#allocation2 + $0x198] sm:$0xff] %v1273_v33  ;;  %2141 = vmatmul.bf16.gmra.mxu2 %v14190_v42  ;;  %2230 = vmatmul.bf16.gmra.mxu3 %v14192_v43  ;;  %v1584_v40 = vunpack.c.l.b16 %v1273_v33  ;;  %v1585_v26 = vunpack.c.h.b16 %v1273_v33 }
 0x180   : > { %1338 = vst [vmem:[#allocation2 + $0x1a0] sm:$0xff] %v1274_v39  ;;  %v1586_v43 = vunpack.c.l.b16 %v1274_v39  ;;  %v1587_v46 = vunpack.c.h.b16 %v1274_v39 }
 0x181   : > { %v14285_v58 = vpack.c.b16 %v1584_v40, %v1580_v18  ;;  %v14287_v5 = vpack.c.b16 %v1585_v26, %v1581_v25 }
 0x182   : > { %v963_v30 = vpop.f32.mrf.mxu2  ;;  %v1076_v6 = vpop.f32.mrf.mxu3 }
 0x183   : > { %v1200_v31 = vmax.f32 %v963_v30, 0.0  ;;  %v1201_v19 = vmax.f32 %v1076_v6, 0.0  ;;  %v740_v34 = vpop.f32.mrf.mxu0  ;;  %v853_v22 = vpop.f32.mrf.mxu1 }
 0x184   : > { %v1202_v41 = vmax.f32 %v740_v34, 0.0  ;;  %v1203_v44 = vmax.f32 %v853_v22, 0.0 }
 0x185   : > { %v1275_v42 = vpack.c.bf16 %v1201_v19, %v1200_v31 }
 0x186   : > { %v1276_v45 = vpack.c.bf16 %v1203_v44, %v1202_v41 }
 0x187   : > { %1339 = vst [vmem:[#allocation2 + $0x1a8] sm:$0xff] %v1275_v42  ;;  %v1588_v8 = vunpack.c.l.b16 %v1275_v42  ;;  %v1589_v13 = vunpack.c.h.b16 %v1275_v42 }
 0x188   : > { %1340 = vst [vmem:[#allocation2 + $0x1b0] sm:$0xff] %v1276_v45  ;;  %v1590_v37 = vunpack.c.l.b16 %v1276_v45  ;;  %v1591_v38 = vunpack.c.h.b16 %v1276_v45 }
 0x18a   : > { %v966_v51 = vpop.f32.mrf.mxu2  ;;  %v1079_v52 = vpop.f32.mrf.mxu3  ;;  %v14289_v56 = vpack.c.b16 %v1590_v37, %v1586_v43  ;;  %v14291_v55 = vpack.c.b16 %v1591_v38, %v1587_v46 }
 0x18b   : > { %v1204_v59 = vmax.f32 %v966_v51, 0.0  ;;  %v1205_v53 = vmax.f32 %v1079_v52, 0.0  ;;  %v743_v60 = vpop.f32.mrf.mxu0  ;;  %v856_v54 = vpop.f32.mrf.mxu1 }
 0x18c   : > { %v1206_v1 = vmax.f32 %v743_v60, 0.0  ;;  %v1207_v2 = vmax.f32 %v856_v54, 0.0 }
 0x18d   : > { %v1277_v12 = vpack.c.bf16 %v1205_v53, %v1204_v59 }
 0x18e   : > { %v1278_v15 = vpack.c.bf16 %v1207_v2, %v1206_v1  ;;  %1968 = vmatmul.bf16.gmra.mxu0 %v14199_v3  ;;  %2057 = vmatmul.bf16.gmra.mxu1 %v14201_v4 }
 0x18f   : > { %1341 = vst [vmem:[#allocation2 + $0x1b8] sm:$0xff] %v1277_v12  ;;  %2146 = vmatmul.bf16.gmra.mxu2 %v14208_v28  ;;  %2235 = vmatmul.bf16.gmra.mxu3 %v14210_v29  ;;  %v1592_v16 = vunpack.c.l.b16 %v1277_v12  ;;  %v1593_v14 = vunpack.c.h.b16 %v1277_v12 }
 0x190   : > { %1342 = vst [vmem:[#allocation2 + $0x1c0] sm:$0xff] %v1278_v15  ;;  %v1594_v29 = vunpack.c.l.b16 %v1278_v15  ;;  %v1595_v34 = vunpack.c.h.b16 %v1278_v15 }
 0x191   : > { %v14297_v33 = vpack.c.b16 %v1592_v16, %v1588_v8  ;;  %v14299_v39 = vpack.c.b16 %v1593_v14, %v1589_v13 }
 0x192   : > { %v969_v18 = vpop.f32.mrf.mxu2  ;;  %v1082_v40 = vpop.f32.mrf.mxu3 }
 0x193   : > { %v1208_v25 = vmax.f32 %v969_v18, 0.0  ;;  %v1209_v3 = vmax.f32 %v1082_v40, 0.0  ;;  %v746_v26 = vpop.f32.mrf.mxu0  ;;  %v859_v4 = vpop.f32.mrf.mxu1 }
 0x194   : > { %v1210_v30 = vmax.f32 %v746_v26, 0.0  ;;  %v1211_v6 = vmax.f32 %v859_v4, 0.0 }
 0x195   : > { %v1279_v28 = vpack.c.bf16 %v1209_v3, %v1208_v25 }
 0x196   : > { %v1280_v31 = vpack.c.bf16 %v1211_v6, %v1210_v30 }
 0x197   : > { %1343 = vst [vmem:[#allocation2 + $0x1c8] sm:$0xff] %v1279_v28  ;;  %v1596_v60 = vunpack.c.l.b16 %v1279_v28  ;;  %v1597_v1 = vunpack.c.h.b16 %v1279_v28 }
 0x198   : > { %1344 = vst [vmem:[#allocation2 + $0x1d0] sm:$0xff] %v1280_v31  ;;  %v1598_v19 = vunpack.c.l.b16 %v1280_v31  ;;  %v1599_v22 = vunpack.c.h.b16 %v1280_v31 }
 0x19a   : > { %v972_v41 = vpop.f32.mrf.mxu2  ;;  %v1085_v44 = vpop.f32.mrf.mxu3  ;;  %v14301_v42 = vpack.c.b16 %v1598_v19, %v1594_v29  ;;  %v14303_v45 = vpack.c.b16 %v1599_v22, %v1595_v34 }
 0x19b   : > { %v1212_v43 = vmax.f32 %v972_v41, 0.0  ;;  %v1213_v37 = vmax.f32 %v1085_v44, 0.0  ;;  %v749_v46 = vpop.f32.mrf.mxu0  ;;  %v862_v38 = vpop.f32.mrf.mxu1  ;;  %v14322_v44 = vld [vmem:[%s20095_s3] ss:$0 sm:$0xff] }
 0x19c   : > { %v1214_v51 = vmax.f32 %v749_v46, 0.0  ;;  %v1215_v52 = vmax.f32 %v862_v38, 0.0 }
 0x19d   : > { %v1281_v59 = vpack.c.bf16 %v1213_v37, %v1212_v43 }
 0x19e   : > { %v1282_v53 = vpack.c.bf16 %v1215_v52, %v1214_v51  ;;  %1973 = vmatmul.bf16.gmra.mxu0 %v14217_v61  ;;  %2062 = vmatmul.bf16.gmra.mxu1 %v14219_v62 }
 0x19f   : > { %1345 = vst [vmem:[#allocation2 + $0x1d8] sm:$0xff] %v1281_v59  ;;  %2151 = vmatmul.bf16.gmra.mxu2 %v14225_v23  ;;  %2240 = vmatmul.bf16.gmra.mxu3 %v14227_v24  ;;  %v1600_v54 = vunpack.c.l.b16 %v1281_v59  ;;  %v1601_v2 = vunpack.c.h.b16 %v1281_v59 }
 0x1a0   : > { %1346 = vst [vmem:[#allocation2 + $0x1e0] sm:$0xff] %v1282_v53  ;;  %v1602_v24 = vunpack.c.l.b16 %v1282_v53  ;;  %v1603_v26 = vunpack.c.h.b16 %v1282_v53 }
 0x1a1   : > { %v14309_v12 = vpack.c.b16 %v1600_v54, %v1596_v60  ;;  %v14311_v15 = vpack.c.b16 %v1601_v2, %v1597_v1 }
 0x1a2   : > { %v975_v8 = vpop.f32.mrf.mxu2  ;;  %v1088_v16 = vpop.f32.mrf.mxu3 }
 0x1a3   : > { %v1216_v13 = vmax.f32 %v975_v8, 0.0  ;;  %v1217_v61 = vmax.f32 %v1088_v16, 0.0  ;;  %v752_v14 = vpop.f32.mrf.mxu0  ;;  %v865_v62 = vpop.f32.mrf.mxu1 }
 0x1a4   : > { %v1218_v18 = vmax.f32 %v752_v14, 0.0  ;;  %v1219_v40 = vmax.f32 %v865_v62, 0.0 }
 0x1a5   : > { %v1283_v23 = vpack.c.bf16 %v1217_v61, %v1216_v13 }
 0x1a6   : > { %v1284_v25 = vpack.c.bf16 %v1219_v40, %v1218_v18 }
 0x1a7   : > { %1347 = vst [vmem:[#allocation2 + $0x1e8] sm:$0xff] %v1283_v23  ;;  %v1604_v43 = vunpack.c.l.b16 %v1283_v23  ;;  %v1605_v46 = vunpack.c.h.b16 %v1283_v23 }
 0x1a8   : > { %1348 = vst [vmem:[#allocation2 + $0x1f0] sm:$0xff] %v1284_v25  ;;  %v1606_v3 = vunpack.c.l.b16 %v1284_v25  ;;  %v1607_v4 = vunpack.c.h.b16 %v1284_v25 }
 0x1aa   : > { %v978_v30 = vpop.f32.mrf.mxu2  ;;  %v1091_v6 = vpop.f32.mrf.mxu3  ;;  %v14313_v28 = vpack.c.b16 %v1606_v3, %v1602_v24  ;;  %v14315_v31 = vpack.c.b16 %v1607_v4, %v1603_v26 }
 0x1ab   : > { %v1220_v29 = vmax.f32 %v978_v30, 0.0  ;;  %v1221_v19 = vmax.f32 %v1091_v6, 0.0  ;;  %v1939_v34 = vpop.f32.mrf.mxu0  ;;  %v2028_v22 = vpop.f32.mrf.mxu1 }
 0x1ac   : > { %v1940_v59 = vadd.f32 %v14322_v44, %v1939_v34 }
 0x1ad   : > { %v1285_v41 = vpack.c.bf16 %v1221_v19, %v1220_v29 }
 0x1ae   : > { %1978 = vmatmul.bf16.gmra.mxu0 %v14229_v47  ;;  %2067 = vmatmul.bf16.gmra.mxu1 %v14231_v48  ;;  %v2029_v1 = vadd.f32 %v2028_v22, %v1940_v59 }
 0x1af   : > { %1349 = vst [vmem:[#allocation2 + $0x1f8] sm:$0xff] %v1285_v41  ;;  %2156 = vmatmul.bf16.gmra.mxu2 %v14237_v9  ;;  %2245 = vmatmul.bf16.gmra.mxu3 %v14239_v10  ;;  %v1608_v37 = vunpack.c.l.b16 %v1285_v41  ;;  %v1609_v38 = vunpack.c.h.b16 %v1285_v41 }
 0x1b1   : > { %v14326_v51 = vpack.c.b16 %v1608_v37, %v1604_v43  ;;  %v14328_v52 = vpack.c.b16 %v1609_v38, %v1605_v46 }
 0x1b2   : > { %v2117_v47 = vpop.f32.mrf.mxu2  ;;  %v2206_v48 = vpop.f32.mrf.mxu3 }
 0x1b3   : > { %v1941_v53 = vpop.f32.mrf.mxu0  ;;  %v2030_v60 = vpop.f32.mrf.mxu1  ;;  %v2118_v9 = vadd.f32 %v2117_v47, %v2029_v1 }
 0x1b4   : > { %v1942_v54 = vadd.f32 %v14322_v44, %v1941_v53 }
 0x1b5   : > { %v2207_v14 = vadd.f32 %v2206_v48, %v2118_v9 }
 0x1b6   : > { %v2031_v2 = vadd.f32 %v2030_v60, %v1942_v54 }
 0x1ba   : > { %v2119_v10 = vpop.f32.mrf.mxu2  ;;  %v2208_v8 = vpop.f32.mrf.mxu3 }
 0x1bb   : > { %v2120_v16 = vadd.f32 %v2119_v10, %v2031_v2  ;;  %v1944_v13 = vpop.f32.mrf.mxu0  ;;  %v2033_v61 = vpop.f32.mrf.mxu1 }
 0x1bc   : > { %v1945_v25 = vadd.f32 %v14322_v44, %v1944_v13 }
 0x1bd   : > { %v2209_v62 = vadd.f32 %v2208_v8, %v2120_v16 }
 0x1be   : > { %1983 = vmatmul.bf16.gmra.mxu0 %v14241_v20  ;;  %2072 = vmatmul.bf16.gmra.mxu1 %v14243_v35  ;;  %v2034_v4 = vadd.f32 %v2033_v61, %v1945_v25 }
 0x1bf   : > { %v13242_v18 = vpack.c.bf16 %v2209_v62, %v2207_v14  ;;  %2161 = vmatmul.bf16.gmra.mxu2 %v14249_v63  ;;  %2250 = vmatmul.bf16.gmra.mxu3 %v14251_v0 }
 0x1c1   : > { %13243 = vst [vmem:[#allocation3 + $0x30] sm:$0xff] %v13242_v18  }
 0x1c2   : > { %v2122_v40 = vpop.f32.mrf.mxu2  ;;  %v2211_v23 = vpop.f32.mrf.mxu3 }
 0x1c3   : > { %v1946_v24 = vpop.f32.mrf.mxu0  ;;  %v2035_v3 = vpop.f32.mrf.mxu1  ;;  %v2123_v30 = vadd.f32 %v2122_v40, %v2034_v4 }
 0x1c4   : > { %v1947_v26 = vadd.f32 %v14322_v44, %v1946_v24 }
 0x1c5   : > { %v2212_v63 = vadd.f32 %v2211_v23, %v2123_v30 }
 0x1c6   : > { %v2036_v6 = vadd.f32 %v2035_v3, %v1947_v26 }
 0x1ca   : > { %v2124_v20 = vpop.f32.mrf.mxu2  ;;  %v2213_v29 = vpop.f32.mrf.mxu3 }
 0x1cb   : > { %v2125_v35 = vadd.f32 %v2124_v20, %v2036_v6  ;;  %v1949_v19 = vpop.f32.mrf.mxu0  ;;  %v2038_v34 = vpop.f32.mrf.mxu1 }
 0x1cc   : > { %v1950_v37 = vadd.f32 %v14322_v44, %v1949_v19 }
 0x1cd   : > { %v2214_v22 = vadd.f32 %v2213_v29, %v2125_v35 }
 0x1ce   : > { %1988 = vmatmul.bf16.gmra.mxu0 %v14253_v57  ;;  %2077 = vmatmul.bf16.gmra.mxu1 %v14255_v27  ;;  %v2039_v48 = vadd.f32 %v2038_v34, %v1950_v37 }
 0x1cf   : > { %v13247_v0 = vpack.c.bf16 %v2214_v22, %v2212_v63  ;;  %2166 = vmatmul.bf16.gmra.mxu2 %v14261_v49  ;;  %2255 = vmatmul.bf16.gmra.mxu3 %v14263_v50 }
 0x1d1   : > { %13319 = vst [vmem:[#allocation3] sm:$0xff] %v13247_v0  }
 0x1d2   : > { %v2127_v41 = vpop.f32.mrf.mxu2  ;;  %v2216_v43 = vpop.f32.mrf.mxu3 }
 0x1d3   : > { %v1951_v46 = vpop.f32.mrf.mxu0  ;;  %v2040_v38 = vpop.f32.mrf.mxu1  ;;  %v2128_v59 = vadd.f32 %v2127_v41, %v2039_v48 }
 0x1d4   : > { %v1952_v47 = vadd.f32 %v14322_v44, %v1951_v46 }
 0x1d5   : > { %v2217_v49 = vadd.f32 %v2216_v43, %v2128_v59 }
 0x1d6   : > { %v2041_v53 = vadd.f32 %v2040_v38, %v1952_v47 }
 0x1da   : > { %v2129_v57 = vpop.f32.mrf.mxu2  ;;  %v2218_v60 = vpop.f32.mrf.mxu3 }
 0x1db   : > { %v2130_v27 = vadd.f32 %v2129_v57, %v2041_v53  ;;  %v1954_v54 = vpop.f32.mrf.mxu0  ;;  %v2043_v1 = vpop.f32.mrf.mxu1 }
 0x1dc   : > { %v1955_v8 = vadd.f32 %v14322_v44, %v1954_v54 }
 0x1dd   : > { %v2219_v9 = vadd.f32 %v2218_v60, %v2130_v27 }
 0x1de   : > { %1993 = vmatmul.bf16.gmra.mxu0 %v14265_v32  ;;  %2082 = vmatmul.bf16.gmra.mxu1 %v14267_v17  ;;  %v2044_v14 = vadd.f32 %v2043_v1, %v1955_v8 }
 0x1df   : > { %v13252_v50 = vpack.c.bf16 %v2219_v9, %v2217_v49  ;;  %2171 = vmatmul.bf16.gmra.mxu2 %v14273_v21  ;;  %2260 = vmatmul.bf16.gmra.mxu3 %v14275_v36 }
 0x1e1   : > { %13320 = vst [vmem:[#allocation3 + $0x58] sm:$0xff] %v13252_v50  }
 0x1e2   : > { %v2132_v2 = vpop.f32.mrf.mxu2  ;;  %v2221_v10 = vpop.f32.mrf.mxu3 }
 0x1e3   : > { %v1956_v16 = vpop.f32.mrf.mxu0  ;;  %v2045_v13 = vpop.f32.mrf.mxu1  ;;  %v2133_v62 = vadd.f32 %v2132_v2, %v2044_v14 }
 0x1e4   : > { %v1957_v61 = vadd.f32 %v14322_v44, %v1956_v16 }
 0x1e5   : > { %v2222_v21 = vadd.f32 %v2221_v10, %v2133_v62 }
 0x1e6   : > { %v2046_v18 = vadd.f32 %v2045_v13, %v1957_v61 }
 0x1ea   : > { %v2134_v32 = vpop.f32.mrf.mxu2  ;;  %v2223_v40 = vpop.f32.mrf.mxu3 }
 0x1eb   : > { %v2135_v17 = vadd.f32 %v2134_v32, %v2046_v18  ;;  %v1959_v23 = vpop.f32.mrf.mxu0  ;;  %v2048_v25 = vpop.f32.mrf.mxu1 }
 0x1ec   : > { %v1960_v4 = vadd.f32 %v14322_v44, %v1959_v23 }
 0x1ed   : > { %v2224_v24 = vadd.f32 %v2223_v40, %v2135_v17 }
 0x1ee   : > { %1998 = vmatmul.bf16.gmra.mxu0 %v14277_v11  ;;  %2087 = vmatmul.bf16.gmra.mxu1 %v14279_v7  ;;  %v2049_v29 = vadd.f32 %v2048_v25, %v1960_v4 }
 0x1ef   : > { %v13257_v36 = vpack.c.bf16 %v2224_v24, %v2222_v21  ;;  %2176 = vmatmul.bf16.gmra.mxu2 %v14285_v58  ;;  %2265 = vmatmul.bf16.gmra.mxu3 %v14287_v5 }
 0x1f1   : > { %13321 = vst [vmem:[#allocation3 + $0x18] sm:$0xff] %v13257_v36  }
 0x1f2   : > { %v2137_v3 = vpop.f32.mrf.mxu2  ;;  %v2226_v26 = vpop.f32.mrf.mxu3 }
 0x1f3   : > { %v1961_v30 = vpop.f32.mrf.mxu0  ;;  %v2050_v6 = vpop.f32.mrf.mxu1  ;;  %v2138_v35 = vadd.f32 %v2137_v3, %v2049_v29 }
 0x1f4   : > { %v1962_v20 = vadd.f32 %v14322_v44, %v1961_v30 }
 0x1f5   : > { %v2227_v58 = vadd.f32 %v2226_v26, %v2138_v35 }
 0x1f6   : > { %v2051_v19 = vadd.f32 %v2050_v6, %v1962_v20 }
 0x1fa   : > { %v2139_v11 = vpop.f32.mrf.mxu2  ;;  %v2228_v34 = vpop.f32.mrf.mxu3 }
 0x1fb   : > { %v2140_v7 = vadd.f32 %v2139_v11, %v2051_v19  ;;  %v1964_v63 = vpop.f32.mrf.mxu0  ;;  %v2053_v22 = vpop.f32.mrf.mxu1 }
 0x1fc   : > { %v1965_v37 = vadd.f32 %v14322_v44, %v1964_v63 }
 0x1fd   : > { %v2229_v0 = vadd.f32 %v2228_v34, %v2140_v7 }
 0x1fe   : > { %2003 = vmatmul.bf16.gmra.mxu0 %v14289_v56  ;;  %2092 = vmatmul.bf16.gmra.mxu1 %v14291_v55  ;;  %v2054_v48 = vadd.f32 %v2053_v22, %v1965_v37 }
 0x1ff   : > { %v13262_v5 = vpack.c.bf16 %v2229_v0, %v2227_v58  ;;  %2181 = vmatmul.bf16.gmra.mxu2 %v14297_v33  ;;  %2270 = vmatmul.bf16.gmra.mxu3 %v14299_v39 }
 0x201   : > { %13322 = vst [vmem:[#allocation3 + $0x50] sm:$0xff] %v13262_v5  }
 0x202   : > { %v2142_v41 = vpop.f32.mrf.mxu2  ;;  %v2231_v43 = vpop.f32.mrf.mxu3 }
 0x203   : > { %v1966_v46 = vpop.f32.mrf.mxu0  ;;  %v2055_v38 = vpop.f32.mrf.mxu1  ;;  %v2143_v59 = vadd.f32 %v2142_v41, %v2054_v48 }
 0x204   : > { %v1967_v47 = vadd.f32 %v14322_v44, %v1966_v46 }
 0x205   : > { %v2232_v33 = vadd.f32 %v2231_v43, %v2143_v59 }
 0x206   : > { %v2056_v53 = vadd.f32 %v2055_v38, %v1967_v47 }
 0x20a   : > { %v2144_v56 = vpop.f32.mrf.mxu2  ;;  %v2233_v57 = vpop.f32.mrf.mxu3 }
 0x20b   : > { %v2145_v55 = vadd.f32 %v2144_v56, %v2056_v53  ;;  %v1969_v60 = vpop.f32.mrf.mxu0  ;;  %v2058_v27 = vpop.f32.mrf.mxu1 }
 0x20c   : > { %v1970_v9 = vadd.f32 %v14322_v44, %v1969_v60 }
 0x20d   : > { %v2234_v54 = vadd.f32 %v2233_v57, %v2145_v55 }
 0x20e   : > { %2008 = vmatmul.bf16.gmra.mxu0 %v14301_v42  ;;  %2097 = vmatmul.bf16.gmra.mxu1 %v14303_v45  ;;  %v2059_v8 = vadd.f32 %v2058_v27, %v1970_v9 }
 0x20f   : > { %v13267_v39 = vpack.c.bf16 %v2234_v54, %v2232_v33  ;;  %2186 = vmatmul.bf16.gmra.mxu2 %v14309_v12  ;;  %2275 = vmatmul.bf16.gmra.mxu3 %v14311_v15 }
 0x211   : > { %13323 = vst [vmem:[#allocation3 + $0x68] sm:$0xff] %v13267_v39  }
 0x212   : > { %v2147_v1 = vpop.f32.mrf.mxu2  ;;  %v2236_v49 = vpop.f32.mrf.mxu3 }
 0x213   : > { %v1971_v50 = vpop.f32.mrf.mxu0  ;;  %v2060_v2 = vpop.f32.mrf.mxu1  ;;  %v2148_v16 = vadd.f32 %v2147_v1, %v2059_v8 }
 0x214   : > { %v1972_v10 = vadd.f32 %v14322_v44, %v1971_v50 }
 0x215   : > { %v2237_v12 = vadd.f32 %v2236_v49, %v2148_v16 }
 0x216   : > { %v2061_v13 = vadd.f32 %v2060_v2, %v1972_v10 }
 0x21a   : > { %v2149_v42 = vpop.f32.mrf.mxu2  ;;  %v2238_v61 = vpop.f32.mrf.mxu3 }
 0x21b   : > { %v2150_v45 = vadd.f32 %v2149_v42, %v2061_v13  ;;  %v1974_v14 = vpop.f32.mrf.mxu0  ;;  %v2063_v62 = vpop.f32.mrf.mxu1 }
 0x21c   : > { %v1975_v17 = vadd.f32 %v14322_v44, %v1974_v14 }
 0x21d   : > { %v2239_v18 = vadd.f32 %v2238_v61, %v2150_v45 }
 0x21e   : > { %2013 = vmatmul.bf16.gmra.mxu0 %v14313_v28  ;;  %2102 = vmatmul.bf16.gmra.mxu1 %v14315_v31  ;;  %v2064_v24 = vadd.f32 %v2063_v62, %v1975_v17 }
 0x21f   : > { %v13272_v15 = vpack.c.bf16 %v2239_v18, %v2237_v12  ;;  %2191 = vmatmul.bf16.gmra.mxu2 %v14326_v51  ;;  %2280 = vmatmul.bf16.gmra.mxu3 %v14328_v52 }
 0x221   : > { %13324 = vst [vmem:[#allocation3 + $0x8] sm:$0xff] %v13272_v15  }
 0x222   : > { %v2152_v32 = vpop.f32.mrf.mxu2  ;;  %v2241_v40 = vpop.f32.mrf.mxu3 }
 0x223   : > { %v1976_v23 = vpop.f32.mrf.mxu0  ;;  %v2065_v25 = vpop.f32.mrf.mxu1  ;;  %v2153_v36 = vadd.f32 %v2152_v32, %v2064_v24 }
 0x224   : > { %v1977_v21 = vadd.f32 %v14322_v44, %v1976_v23 }
 0x225   : > { %v2242_v51 = vadd.f32 %v2241_v40, %v2153_v36 }
 0x226   : > { %v2066_v3 = vadd.f32 %v2065_v25, %v1977_v21 }
 0x22a   : > { %v2154_v28 = vpop.f32.mrf.mxu2  ;;  %v2243_v26 = vpop.f32.mrf.mxu3 }
 0x22b   : > { %v2155_v31 = vadd.f32 %v2154_v28, %v2066_v3  ;;  %v1979_v4 = vpop.f32.mrf.mxu0  ;;  %v2068_v30 = vpop.f32.mrf.mxu1 }
 0x22c   : > { %v1980_v35 = vadd.f32 %v14322_v44, %v1979_v4 }
 0x22d   : > { %v2244_v6 = vadd.f32 %v2243_v26, %v2155_v31 }
 0x22e   : > { %v2069_v7 = vadd.f32 %v2068_v30, %v1980_v35 }
 0x22f   : > { %v13277_v52 = vpack.c.bf16 %v2244_v6, %v2242_v51 }
 0x231   : > { %13325 = vst [vmem:[#allocation3 + $0x48] sm:$0xff] %v13277_v52  }
 0x232   : > { %v2157_v20 = vpop.f32.mrf.mxu2  ;;  %v2246_v29 = vpop.f32.mrf.mxu3 }
 0x233   : > { %v1981_v19 = vpop.f32.mrf.mxu0  ;;  %v2070_v11 = vpop.f32.mrf.mxu1  ;;  %v2158_v63 = vadd.f32 %v2157_v20, %v2069_v7 }
 0x234   : > { %v1982_v34 = vadd.f32 %v14322_v44, %v1981_v19 }
 0x235   : > { %v2247_v37 = vadd.f32 %v2246_v29, %v2158_v63 }
 0x236   : > { %v2071_v22 = vadd.f32 %v2070_v11, %v1982_v34 }
 0x23a   : > { %v2159_v58 = vpop.f32.mrf.mxu2  ;;  %v2248_v0 = vpop.f32.mrf.mxu3 }
 0x23b   : > { %v2160_v5 = vadd.f32 %v2159_v58, %v2071_v22  ;;  %v1984_v41 = vpop.f32.mrf.mxu0  ;;  %v2073_v43 = vpop.f32.mrf.mxu1 }
 0x23c   : > { %v1985_v59 = vadd.f32 %v14322_v44, %v1984_v41 }
 0x23d   : > { %v2249_v46 = vadd.f32 %v2248_v0, %v2160_v5 }
 0x23e   : > { %v2074_v55 = vadd.f32 %v2073_v43, %v1985_v59 }
 0x23f   : > { %v13282_v38 = vpack.c.bf16 %v2249_v46, %v2247_v37 }
 0x241   : > { %13326 = vst [vmem:[#allocation3 + $0x40] sm:$0xff] %v13282_v38  }
 0x242   : > { %v2162_v47 = vpop.f32.mrf.mxu2  ;;  %v2251_v48 = vpop.f32.mrf.mxu3 }
 0x243   : > { %v1986_v53 = vpop.f32.mrf.mxu0  ;;  %v2075_v56 = vpop.f32.mrf.mxu1  ;;  %v2163_v60 = vadd.f32 %v2162_v47, %v2074_v55 }
 0x244   : > { %v1987_v57 = vadd.f32 %v14322_v44, %v1986_v53 }
 0x245   : > { %v2252_v9 = vadd.f32 %v2251_v48, %v2163_v60 }
 0x246   : > { %v2076_v27 = vadd.f32 %v2075_v56, %v1987_v57 }
 0x24a   : > { %v2164_v33 = vpop.f32.mrf.mxu2  ;;  %v2253_v54 = vpop.f32.mrf.mxu3 }
 0x24b   : > { %v2165_v39 = vadd.f32 %v2164_v33, %v2076_v27  ;;  %v1989_v1 = vpop.f32.mrf.mxu0  ;;  %v2078_v49 = vpop.f32.mrf.mxu1 }
 0x24c   : > { %v1990_v16 = vadd.f32 %v14322_v44, %v1989_v1 }
 0x24d   : > { %v2254_v50 = vadd.f32 %v2253_v54, %v2165_v39 }
 0x24e   : > { %v2079_v45 = vadd.f32 %v2078_v49, %v1990_v16 }
 0x24f   : > { %v13287_v2 = vpack.c.bf16 %v2254_v50, %v2252_v9 }
 0x251   : > { %13327 = vst [vmem:[#allocation3 + $0x20] sm:$0xff] %v13287_v2  }
 0x252   : > { %v2167_v10 = vpop.f32.mrf.mxu2  ;;  %v2256_v8 = vpop.f32.mrf.mxu3 }
 0x253   : > { %v1991_v13 = vpop.f32.mrf.mxu0  ;;  %v2080_v42 = vpop.f32.mrf.mxu1  ;;  %v2168_v14 = vadd.f32 %v2167_v10, %v2079_v45 }
 0x254   : > { %v1992_v61 = vadd.f32 %v14322_v44, %v1991_v13 }
 0x255   : > { %v2257_v17 = vadd.f32 %v2256_v8, %v2168_v14  ;;  %v13729_v14 = vmov -inf  }
 0x256   : > { %v2081_v62 = vadd.f32 %v2080_v42, %v1992_v61  ;;  %2351 = vst.msk [vmem:[#allocation4] sm:$0xff] %vm2350_vm2, %v13729_v14 }
 0x257   : > { %2352 = vst.msk [vmem:[#allocation4 + $0x8] sm:$0xff] %vm2350_vm2, %v13729_v14 }
 0x258   : > { %2353 = vst.msk [vmem:[#allocation4 + $0x10] sm:$0xff] %vm2350_vm2, %v13729_v14 }
 0x259   : > { %2354 = vst.msk [vmem:[#allocation4 + $0x18] sm:$0xff] %vm2350_vm2, %v13729_v14 }
 0x25a   : > { %v2169_v12 = vpop.f32.mrf.mxu2  ;;  %v2258_v18 = vpop.f32.mrf.mxu3  ;;  %2355 = vst.msk [vmem:[#allocation4 + $0x20] sm:$0xff] %vm2350_vm2, %v13729_v14 }
 0x25b   : > { %v2170_v15 = vadd.f32 %v2169_v12, %v2081_v62  ;;  %v1994_v32 = vpop.f32.mrf.mxu0  ;;  %v2083_v40 = vpop.f32.mrf.mxu1  ;;  %2356 = vst.msk [vmem:[#allocation4 + $0x28] sm:$0xff] %vm2350_vm2, %v13729_v14 }
 0x25c   : > { %v1995_v36 = vadd.f32 %v14322_v44, %v1994_v32  ;;  %2357 = vst.msk [vmem:[#allocation4 + $0x30] sm:$0xff] %vm2350_vm2, %v13729_v14 }
 0x25d   : > { %v2259_v23 = vadd.f32 %v2258_v18, %v2170_v15  ;;  %2358 = vst.msk [vmem:[#allocation4 + $0x38] sm:$0xff] %vm2350_vm2, %v13729_v14 }
 0x25e   : > { %v2084_v31 = vadd.f32 %v2083_v40, %v1995_v36  ;;  %2359 = vst.msk [vmem:[#allocation4 + $0x40] sm:$0xff] %vm2350_vm2, %v13729_v14 }
 0x25f   : > { %v13292_v25 = vpack.c.bf16 %v2259_v23, %v2257_v17  ;;  %2360 = vst.msk [vmem:[#allocation4 + $0x48] sm:$0xff] %vm2350_vm2, %v13729_v14 }
 0x260   : > { %2361 = vst.msk [vmem:[#allocation4 + $0x50] sm:$0xff] %vm2350_vm2, %v13729_v14 }
 0x261   : > { %13328 = vst [vmem:[#allocation3 + $0x10] sm:$0xff] %v13292_v25  }
 0x262   : > { %v2172_v21 = vpop.f32.mrf.mxu2  ;;  %v2261_v24 = vpop.f32.mrf.mxu3  ;;  %2362 = vst.msk [vmem:[#allocation4 + $0x58] sm:$0xff] %vm2350_vm2, %v13729_v14 }
 0x263   : > { %v1996_v3 = vpop.f32.mrf.mxu0  ;;  %v2085_v28 = vpop.f32.mrf.mxu1  ;;  %v2173_v4 = vadd.f32 %v2172_v21, %v2084_v31  ;;  %2363 = vst.msk [vmem:[#allocation4 + $0x60] sm:$0xff] %vm2350_vm2, %v13729_v14 }
 0x264   : > { %v1997_v26 = vadd.f32 %v14322_v44, %v1996_v3  ;;  %2364 = vst.msk [vmem:[#allocation4 + $0x68] sm:$0xff] %vm2350_vm2, %v13729_v14 }
 0x265   : > { %v2262_v35 = vadd.f32 %v2261_v24, %v2173_v4  ;;  %2365 = vst.msk [vmem:[#allocation4 + $0x70] sm:$0xff] %vm2350_vm2, %v13729_v14 }
 0x266   : > { %v2086_v30 = vadd.f32 %v2085_v28, %v1997_v26  ;;  %2366 = vst.msk [vmem:[#allocation4 + $0x78] sm:$0xff] %vm2350_vm2, %v13729_v14 }
 0x267   : > { %2367 = vst.msk [vmem:[#allocation4 + $0x80] sm:$0xff] %vm2350_vm2, %v13729_v14 }
 0x268   : > { %2368 = vst.msk [vmem:[#allocation4 + $0x88] sm:$0xff] %vm2350_vm2, %v13729_v14 }
 0x269   : > { %2369 = vst.msk [vmem:[#allocation4 + $0x90] sm:$0xff] %vm2350_vm2, %v13729_v14 }
 0x26a   : > { %v2174_v51 = vpop.f32.mrf.mxu2  ;;  %v2263_v6 = vpop.f32.mrf.mxu3  ;;  %2370 = vst.msk [vmem:[#allocation4 + $0x98] sm:$0xff] %vm2350_vm2, %v13729_v14 }
 0x26b   : > { %v2175_v52 = vadd.f32 %v2174_v51, %v2086_v30  ;;  %v1999_v20 = vpop.f32.mrf.mxu0  ;;  %v2088_v29 = vpop.f32.mrf.mxu1  ;;  %2371 = vst.msk [vmem:[#allocation4 + $0xa0] sm:$0xff] %vm2350_vm2, %v13729_v14 }
 0x26c   : > { %v2000_v63 = vadd.f32 %v14322_v44, %v1999_v20  ;;  %2372 = vst.msk [vmem:[#allocation4 + $0xa8] sm:$0xff] %vm2350_vm2, %v13729_v14 }
 0x26d   : > { %v2264_v19 = vadd.f32 %v2263_v6, %v2175_v52  ;;  %2373 = vst.msk [vmem:[#allocation4 + $0xb0] sm:$0xff] %vm2350_vm2, %v13729_v14 }
 0x26e   : > { %v2089_v5 = vadd.f32 %v2088_v29, %v2000_v63  ;;  %2374 = vst.msk [vmem:[#allocation4 + $0xb8] sm:$0xff] %vm2350_vm2, %v13729_v14 }
 0x26f   : > { %v13297_v11 = vpack.c.bf16 %v2264_v19, %v2262_v35  ;;  %2375 = vst.msk [vmem:[#allocation4 + $0xc0] sm:$0xff] %vm2350_vm2, %v13729_v14 }
 0x270   : > { %2376 = vst.msk [vmem:[#allocation4 + $0xc8] sm:$0xff] %vm2350_vm2, %v13729_v14 }
 0x271   : > { %13329 = vst [vmem:[#allocation3 + $0x38] sm:$0xff] %v13297_v11  }
 0x272   : > { %v2177_v34 = vpop.f32.mrf.mxu2  ;;  %v2266_v7 = vpop.f32.mrf.mxu3  ;;  %2377 = vst.msk [vmem:[#allocation4 + $0xd0] sm:$0xff] %vm2350_vm2, %v13729_v14 }
 0x273   : > { %v2001_v22 = vpop.f32.mrf.mxu0  ;;  %v2090_v58 = vpop.f32.mrf.mxu1  ;;  %v2178_v41 = vadd.f32 %v2177_v34, %v2089_v5  ;;  %2378 = vst.msk [vmem:[#allocation4 + $0xd8] sm:$0xff] %vm2350_vm2, %v13729_v14 }
 0x274   : > { %v2002_v0 = vadd.f32 %v14322_v44, %v2001_v22  ;;  %2379 = vst.msk [vmem:[#allocation4 + $0xe0] sm:$0xff] %vm2350_vm2, %v13729_v14  ;;  %v13730_v22 = vmov 0.0  }
 0x275   : > { %v2267_v59 = vadd.f32 %v2266_v7, %v2178_v41  ;;  %2380 = vst.msk [vmem:[#allocation4 + $0xe8] sm:$0xff] %vm2350_vm2, %v13729_v14 }
 0x276   : > { %v2091_v43 = vadd.f32 %v2090_v58, %v2002_v0  ;;  %2381 = vst.msk [vmem:[#allocation4 + $0xf0] sm:$0xff] %vm2350_vm2, %v13729_v14 }
 0x277   : > { %2382 = vst.msk [vmem:[#allocation4 + $0xf8] sm:$0xff] %vm2350_vm2, %v13729_v14 }
 0x278   : > { %2383 = vst.msk [vmem:[#allocation5] sm:$0xff] %vm2350_vm2, %v13730_v22 }
 0x279   : > { %2384 = vst.msk [vmem:[#allocation5 + $0x8] sm:$0xff] %vm2350_vm2, %v13730_v22 }
 0x27a   : > { %v2179_v37 = vpop.f32.mrf.mxu2  ;;  %v2268_v46 = vpop.f32.mrf.mxu3  ;;  %2385 = vst.msk [vmem:[#allocation5 + $0x10] sm:$0xff] %vm2350_vm2, %v13730_v22 }
 0x27b   : > { %v2180_v38 = vadd.f32 %v2179_v37, %v2091_v43  ;;  %v2004_v47 = vpop.f32.mrf.mxu0  ;;  %v2093_v48 = vpop.f32.mrf.mxu1  ;;  %2386 = vst.msk [vmem:[#allocation5 + $0x18] sm:$0xff] %vm2350_vm2, %v13730_v22 }
 0x27c   : > { %v2005_v60 = vadd.f32 %v14322_v44, %v2004_v47  ;;  %2387 = vst.msk [vmem:[#allocation5 + $0x20] sm:$0xff] %vm2350_vm2, %v13730_v22 }
 0x27d   : > { %v2269_v53 = vadd.f32 %v2268_v46, %v2180_v38  ;;  %2388 = vst.msk [vmem:[#allocation5 + $0x28] sm:$0xff] %vm2350_vm2, %v13730_v22 }
 0x27e   : > { %v2094_v39 = vadd.f32 %v2093_v48, %v2005_v60  ;;  %2389 = vst.msk [vmem:[#allocation5 + $0x30] sm:$0xff] %vm2350_vm2, %v13730_v22 }
 0x27f   : > { %v13302_v56 = vpack.c.bf16 %v2269_v53, %v2267_v59  ;;  %2390 = vst.msk [vmem:[#allocation5 + $0x38] sm:$0xff] %vm2350_vm2, %v13730_v22 }
 0x280   : > { %2391 = vst.msk [vmem:[#allocation5 + $0x40] sm:$0xff] %vm2350_vm2, %v13730_v22 }
 0x281   : > { %13330 = vst [vmem:[#allocation3 + $0x60] sm:$0xff] %v13302_v56  }
 0x282   : > { %v2182_v57 = vpop.f32.mrf.mxu2  ;;  %v2271_v55 = vpop.f32.mrf.mxu3  ;;  %2392 = vst.msk [vmem:[#allocation5 + $0x48] sm:$0xff] %vm2350_vm2, %v13730_v22 }
 0x283   : > { %v2006_v27 = vpop.f32.mrf.mxu0  ;;  %v2095_v33 = vpop.f32.mrf.mxu1  ;;  %v2183_v1 = vadd.f32 %v2182_v57, %v2094_v39  ;;  %2393 = vst.msk [vmem:[#allocation5 + $0x50] sm:$0xff] %vm2350_vm2, %v13730_v22 }
 0x284   : > { %v2007_v54 = vadd.f32 %v14322_v44, %v2006_v27  ;;  %2394 = vst.msk [vmem:[#allocation5 + $0x58] sm:$0xff] %vm2350_vm2, %v13730_v22 }
 0x285   : > { %v2272_v16 = vadd.f32 %v2271_v55, %v2183_v1  ;;  %2395 = vst.msk [vmem:[#allocation5 + $0x60] sm:$0xff] %vm2350_vm2, %v13730_v22 }
 0x286   : > { %v2096_v49 = vadd.f32 %v2095_v33, %v2007_v54  ;;  %2396 = vst.msk [vmem:[#allocation5 + $0x68] sm:$0xff] %vm2350_vm2, %v13730_v22 }
 0x287   : > { %2397 = vst.msk [vmem:[#allocation5 + $0x70] sm:$0xff] %vm2350_vm2, %v13730_v22 }
 0x288   : > { %2398 = vst.msk [vmem:[#allocation5 + $0x78] sm:$0xff] %vm2350_vm2, %v13730_v22 }
 0x289   : > { %2399 = vst.msk [vmem:[#allocation5 + $0x80] sm:$0xff] %vm2350_vm2, %v13730_v22 }
 0x28a   : > { %v2184_v9 = vpop.f32.mrf.mxu2  ;;  %v2273_v50 = vpop.f32.mrf.mxu3  ;;  %2400 = vst.msk [vmem:[#allocation5 + $0x88] sm:$0xff] %vm2350_vm2, %v13730_v22 }
 0x28b   : > { %v2185_v2 = vadd.f32 %v2184_v9, %v2096_v49  ;;  %v2009_v10 = vpop.f32.mrf.mxu0  ;;  %v2098_v8 = vpop.f32.mrf.mxu1  ;;  %2401 = vst.msk [vmem:[#allocation5 + $0x90] sm:$0xff] %vm2350_vm2, %v13730_v22 }
 0x28c   : > { %v2010_v62 = vadd.f32 %v14322_v44, %v2009_v10  ;;  %2402 = vst.msk [vmem:[#allocation5 + $0x98] sm:$0xff] %vm2350_vm2, %v13730_v22 }
 0x28d   : > { %v2274_v13 = vadd.f32 %v2273_v50, %v2185_v2  ;;  %2403 = vst.msk [vmem:[#allocation5 + $0xa0] sm:$0xff] %vm2350_vm2, %v13730_v22 }
 0x28e   : > { %v2099_v32 = vadd.f32 %v2098_v8, %v2010_v62  ;;  %2404 = vst.msk [vmem:[#allocation5 + $0xa8] sm:$0xff] %vm2350_vm2, %v13730_v22 }
 0x28f   : > { %v13307_v42 = vpack.c.bf16 %v2274_v13, %v2272_v16  ;;  %2405 = vst.msk [vmem:[#allocation5 + $0xb0] sm:$0xff] %vm2350_vm2, %v13730_v22 }
 0x290   : > { %2406 = vst.msk [vmem:[#allocation5 + $0xb8] sm:$0xff] %vm2350_vm2, %v13730_v22 }
 0x291   : > { %13331 = vst [vmem:[#allocation3 + $0x70] sm:$0xff] %v13307_v42  }
 0x292   : > { %v2187_v61 = vpop.f32.mrf.mxu2  ;;  %v2276_v45 = vpop.f32.mrf.mxu3  ;;  %2407 = vst.msk [vmem:[#allocation5 + $0xc0] sm:$0xff] %vm2350_vm2, %v13730_v22 }
 0x293   : > { %v2011_v12 = vpop.f32.mrf.mxu0  ;;  %v2100_v18 = vpop.f32.mrf.mxu1  ;;  %v2188_v40 = vadd.f32 %v2187_v61, %v2099_v32  ;;  %2408 = vst.msk [vmem:[#allocation5 + $0xc8] sm:$0xff] %vm2350_vm2, %v13730_v22 }
 0x294   : > { %v2012_v15 = vadd.f32 %v14322_v44, %v2011_v12  ;;  %2409 = vst.msk [vmem:[#allocation5 + $0xd0] sm:$0xff] %vm2350_vm2, %v13730_v22 }
 0x295   : > { %v2277_v36 = vadd.f32 %v2276_v45, %v2188_v40  ;;  %2410 = vst.msk [vmem:[#allocation5 + $0xd8] sm:$0xff] %vm2350_vm2, %v13730_v22 }
 0x296   : > { %v2101_v17 = vadd.f32 %v2100_v18, %v2012_v15  ;;  %2411 = vst.msk [vmem:[#allocation5 + $0xe0] sm:$0xff] %vm2350_vm2, %v13730_v22 }
 0x297   : > { %2412 = vst.msk [vmem:[#allocation5 + $0xe8] sm:$0xff] %vm2350_vm2, %v13730_v22 }
 0x298   : > { %2413 = vst.msk [vmem:[#allocation5 + $0xf0] sm:$0xff] %vm2350_vm2, %v13730_v22 }
 0x299   : > { %2414 = vst.msk [vmem:[#allocation5 + $0xf8] sm:$0xff] %vm2350_vm2, %v13730_v22 }
 0x29a   : > { %v2189_v23 = vpop.f32.mrf.mxu2  ;;  %v2278_v25 = vpop.f32.mrf.mxu3  ;;  %2415 = vst [vmem:[#allocation6 + $0x2a8] sm:$0xff] %v13730_v22 }
 0x29b   : > { %v2190_v21 = vadd.f32 %v2189_v23, %v2101_v17  ;;  %v2014_v24 = vpop.f32.mrf.mxu0  ;;  %v2103_v28 = vpop.f32.mrf.mxu1  ;;  %2416 = vst [vmem:[#allocation6 + $0x268] sm:$0xff] %v13730_v22 }
 0x29c   : > { %v2015_v30 = vadd.f32 %v14322_v44, %v2014_v24  ;;  %2417 = vst [vmem:[#allocation6 + $0x310] sm:$0xff] %v13730_v22 }
 0x29d   : > { %v2279_v3 = vadd.f32 %v2278_v25, %v2190_v21  ;;  %2418 = vst [vmem:[#allocation6 + $0x2c0] sm:$0xff] %v13730_v22 }
 0x29e   : > { %v2104_v52 = vadd.f32 %v2103_v28, %v2015_v30  ;;  %2419 = vst [vmem:[#allocation6 + $0x2c8] sm:$0xff] %v13730_v22 }
 0x29f   : > { %v13312_v26 = vpack.c.bf16 %v2279_v3, %v2277_v36  ;;  %2420 = vst [vmem:[#allocation6 + $0x3b0] sm:$0xff] %v13730_v22 }
 0x2a0   : > { %2421 = vst [vmem:[#allocation6 + $0x270] sm:$0xff] %v13730_v22 }
 0x2a1   : > { %13332 = vst [vmem:[#allocation3 + $0x78] sm:$0xff] %v13312_v26  }
 0x2a2   : > { %v2192_v31 = vpop.f32.mrf.mxu2  ;;  %v2281_v4 = vpop.f32.mrf.mxu3  ;;  %2422 = vst [vmem:[#allocation6 + $0x138] sm:$0xff] %v13730_v22 }
 0x2a3   : > { %v2016_v51 = vpop.f32.mrf.mxu0  ;;  %v2105_v20 = vpop.f32.mrf.mxu1  ;;  %v2193_v29 = vadd.f32 %v2192_v31, %v2104_v52  ;;  %2423 = vst [vmem:[#allocation6 + $0x148] sm:$0xff] %v13730_v22 }
 0x2a4   : > { %v2017_v6 = vadd.f32 %v14322_v44, %v2016_v51  ;;  %2424 = vst [vmem:[#allocation6 + $0xf8] sm:$0xff] %v13730_v22 }
 0x2a5   : > { %v2282_v34 = vadd.f32 %v2281_v4, %v2193_v29  ;;  %2425 = vst [vmem:[#allocation6 + $0x378] sm:$0xff] %v13730_v22 }
 0x2a6   : > { %v2106_v35 = vadd.f32 %v2105_v20, %v2017_v6  ;;  %2426 = vst [vmem:[#allocation6 + $0x288] sm:$0xff] %v13730_v22 }
 0x2a7   : > { %2427 = vst [vmem:[#allocation6 + $0x220] sm:$0xff] %v13730_v22 }
 0x2a8   : > { %2428 = vst [vmem:[#allocation6 + $0x2f8] sm:$0xff] %v13730_v22 }
 0x2a9   : > { %2429 = vst [vmem:[#allocation6 + $0xc8] sm:$0xff] %v13730_v22 }
 0x2aa   : > { %v2194_v44 = vpop.f32.mrf.mxu2  ;;  %v2283_v11 = vpop.f32.mrf.mxu3  ;;  %2430 = vst [vmem:[#allocation6 + $0x50] sm:$0xff] %v13730_v22 }
 0x2ab   : > { %v2195_v19 = vadd.f32 %v2194_v44, %v2106_v35  ;;  %2431 = vst [vmem:[#allocation6 + $0x150] sm:$0xff] %v13730_v22 }
 0x2ac   : > { %2432 = vst [vmem:[#allocation6 + $0x210] sm:$0xff] %v13730_v22 }
 0x2ad   : > { %v2284_v7 = vadd.f32 %v2283_v11, %v2195_v19  ;;  %2433 = vst [vmem:[#allocation6 + $0x90] sm:$0xff] %v13730_v22 }
 0x2ae   : > { %2434 = vst [vmem:[#allocation6 + $0x350] sm:$0xff] %v13730_v22 }
 0x2af   : > { %v13317_v63 = vpack.c.bf16 %v2284_v7, %v2282_v34  ;;  %2435 = vst [vmem:[#allocation6 + $0xe8] sm:$0xff] %v13730_v22 }
 0x2b0   : > { %2436 = vst [vmem:[#allocation6 + $0x370] sm:$0xff] %v13730_v22 }
 0x2b1   : > { %13333 = vst [vmem:[#allocation3 + $0x28] sm:$0xff] %v13317_v63  }
 0x2b2   : > { %2437 = vst [vmem:[#allocation6 + $0x3e8] sm:$0xff] %v13730_v22 }
 0x2b3   : > { %2438 = vst [vmem:[#allocation6 + $0x1b0] sm:$0xff] %v13730_v22 }
 0x2b4   : > { %2439 = vst [vmem:[#allocation6 + $0x390] sm:$0xff] %v13730_v22 }
 0x2b5   : > { %2440 = vst [vmem:[#allocation6 + $0x348] sm:$0xff] %v13730_v22 }
 0x2b6   : > { %2441 = vst [vmem:[#allocation6 + $0xc0] sm:$0xff] %v13730_v22 }
 0x2b7   : > { %2442 = vst [vmem:[#allocation6 + $0x238] sm:$0xff] %v13730_v22 }
 0x2b8   : > { %2443 = vst [vmem:[#allocation6 + $0x388] sm:$0xff] %v13730_v22 }
 0x2b9   : > { %2444 = vst [vmem:[#allocation6 + $0x278] sm:$0xff] %v13730_v22 }
 0x2ba   : > { %2445 = vst [vmem:[#allocation6 + $0x258] sm:$0xff] %v13730_v22 }
 0x2bb   : > { %2446 = vst [vmem:[#allocation6 + $0x80] sm:$0xff] %v13730_v22 }
 0x2bc   : > { %2447 = vst [vmem:[#allocation6 + $0x178] sm:$0xff] %v13730_v22 }
 0x2bd   : > { %2448 = vst [vmem:[#allocation6 + $0x188] sm:$0xff] %v13730_v22 }
 0x2be   : > { %2449 = vst [vmem:[#allocation6 + $0x300] sm:$0xff] %v13730_v22 }
 0x2bf   : > { %2450 = vst [vmem:[#allocation6 + $0x1c8] sm:$0xff] %v13730_v22 }
 0x2c0   : > { %2451 = vst [vmem:[#allocation6 + $0x1d8] sm:$0xff] %v13730_v22 }
 0x2c1   : > { %2452 = vst [vmem:[#allocation6 + $0x2d0] sm:$0xff] %v13730_v22 }
 0x2c2   : > { %2453 = vst [vmem:[#allocation6 + $0x3a8] sm:$0xff] %v13730_v22 }
 0x2c3   : > { %2454 = vst [vmem:[#allocation6 + $0x340] sm:$0xff] %v13730_v22 }
 0x2c4   : > { %2455 = vst [vmem:[#allocation6 + $0x1a8] sm:$0xff] %v13730_v22 }
 0x2c5   : > { %2456 = vst [vmem:[#allocation6 + $0x230] sm:$0xff] %v13730_v22 }
 0x2c6   : > { %2457 = vst [vmem:[#allocation6 + $0x328] sm:$0xff] %v13730_v22 }
 0x2c7   : > { %2458 = vst [vmem:[#allocation6 + $0x3e0] sm:$0xff] %v13730_v22 }
 0x2c8   : > { %2459 = vst [vmem:[#allocation6 + $0x298] sm:$0xff] %v13730_v22 }
 0x2c9   : > { %2460 = vst [vmem:[#allocation6 + $0x3d0] sm:$0xff] %v13730_v22 }
 0x2ca   : > { %2461 = vst [vmem:[#allocation6 + $0x3c8] sm:$0xff] %v13730_v22 }
 0x2cb   : > { %2462 = vst [vmem:[#allocation6 + $0x10] sm:$0xff] %v13730_v22 }
 0x2cc   : > { %2463 = vst [vmem:[#allocation6 + $0x60] sm:$0xff] %v13730_v22 }
 0x2cd   : > { %2464 = vst [vmem:[#allocation6 + $0x308] sm:$0xff] %v13730_v22 }
 0x2ce   : > { %2465 = vst [vmem:[#allocation6 + $0x1f8] sm:$0xff] %v13730_v22 }
 0x2cf   : > { %2466 = vst [vmem:[#allocation6 + $0x190] sm:$0xff] %v13730_v22 }
 0x2d0   : > { %2467 = vst [vmem:[#allocation6 + $0x2e8] sm:$0xff] %v13730_v22 }
 0x2d1   : > { %2468 = vst [vmem:[#allocation6 + $0xf0] sm:$0xff] %v13730_v22 }
 0x2d2   : > { %2469 = vst [vmem:[#allocation6 + $0x260] sm:$0xff] %v13730_v22 }
 0x2d3   : > { %2470 = vst [vmem:[#allocation6 + $0x18] sm:$0xff] %v13730_v22 }
 0x2d4   : > { %2471 = vst [vmem:[#allocation6 + $0x170] sm:$0xff] %v13730_v22 }
 0x2d5   : > { %2472 = vst [vmem:[#allocation6 + $0x2a0] sm:$0xff] %v13730_v22 }
 0x2d6   : > { %2473 = vst [vmem:[#allocation6 + $0x398] sm:$0xff] %v13730_v22 }
 0x2d7   : > { %2474 = vst [vmem:[#allocation6 + $0x3f0] sm:$0xff] %v13730_v22 }
 0x2d8   : > { %2475 = vst [vmem:[#allocation6 + $0x70] sm:$0xff] %v13730_v22 }
 0x2d9   : > { %2476 = vst [vmem:[#allocation6 + $0x248] sm:$0xff] %v13730_v22 }
 0x2da   : > { %2477 = vst [vmem:[#allocation6 + $0x120] sm:$0xff] %v13730_v22 }
 0x2db   : > { %2478 = vst [vmem:[#allocation6 + $0x100] sm:$0xff] %v13730_v22 }
 0x2dc   : > { %2479 = vst [vmem:[#allocation6 + $0x1d0] sm:$0xff] %v13730_v22 }
 0x2dd   : > { %2480 = vst [vmem:[#allocation6 + $0x78] sm:$0xff] %v13730_v22 }
 0x2de   : > { %2481 = vst [vmem:[#allocation6 + $0x380] sm:$0xff] %v13730_v22 }
 0x2df   : > { %2482 = vst [vmem:[#allocation6 + $0x180] sm:$0xff] %v13730_v22 }
 0x2e0   : > { %2483 = vst [vmem:[#allocation6 + $0x38] sm:$0xff] %v13730_v22 }
 0x2e1   : > { %2484 = vst [vmem:[#allocation6 + $0x360] sm:$0xff] %v13730_v22 }
 0x2e2   : > { %2485 = vst [vmem:[#allocation6 + $0x200] sm:$0xff] %v13730_v22 }
 0x2e3   : > { %2486 = vst [vmem:[#allocation6 + $0x290] sm:$0xff] %v13730_v22 }
 0x2e4   : > { %2487 = vst [vmem:[#allocation6 + $0x8] sm:$0xff] %v13730_v22 }
 0x2e5   : > { %2488 = vst [vmem:[#allocation6 + $0x2b8] sm:$0xff] %v13730_v22 }
 0x2e6   : > { %2489 = vst [vmem:[#allocation6 + $0x208] sm:$0xff] %v13730_v22 }
 0x2e7   : > { %2490 = vst [vmem:[#allocation6 + $0x130] sm:$0xff] %v13730_v22 }
 0x2e8   : > { %2491 = vst [vmem:[#allocation6 + $0x1c0] sm:$0xff] %v13730_v22 }
 0x2e9   : > { %2492 = vst [vmem:[#allocation6 + $0x2e0] sm:$0xff] %v13730_v22 }
 0x2ea   : > { %2493 = vst [vmem:[#allocation6 + $0x338] sm:$0xff] %v13730_v22 }
 0x2eb   : > { %2494 = vst [vmem:[#allocation6 + $0x330] sm:$0xff] %v13730_v22 }
 0x2ec   : > { %2495 = vst [vmem:[#allocation6 + $0x280] sm:$0xff] %v13730_v22 }
 0x2ed   : > { %2496 = vst [vmem:[#allocation6 + $0x3d8] sm:$0xff] %v13730_v22 }
 0x2ee   : > { %2497 = vst [vmem:[#allocation6 + $0x108] sm:$0xff] %v13730_v22 }
 0x2ef   : > { %2498 = vst [vmem:[#allocation6 + $0x68] sm:$0xff] %v13730_v22 }
 0x2f0   : > { %2499 = vst [vmem:[#allocation6 + $0x250] sm:$0xff] %v13730_v22 }
 0x2f1   : > { %2500 = vst [vmem:[#allocation6 + $0xb0] sm:$0xff] %v13730_v22 }
 0x2f2   : > { %2501 = vst [vmem:[#allocation6 + $0x228] sm:$0xff] %v13730_v22 }
 0x2f3   : > { %2502 = vst [vmem:[#allocation6 + $0x88] sm:$0xff] %v13730_v22 }
 0x2f4   : > { %2503 = vst [vmem:[#allocation6 + $0x58] sm:$0xff] %v13730_v22 }
 0x2f5   : > { %2504 = vst [vmem:[#allocation6 + $0x98] sm:$0xff] %v13730_v22 }
 0x2f6   : > { %2505 = vst [vmem:[#allocation6 + $0x1e0] sm:$0xff] %v13730_v22 }
 0x2f7   : > { %2506 = vst [vmem:[#allocation6 + $0x3c0] sm:$0xff] %v13730_v22 }
 0x2f8   : > { %2507 = vst [vmem:[#allocation6 + $0x240] sm:$0xff] %v13730_v22 }
 0x2f9   : > { %2508 = vst [vmem:[#allocation6 + $0x110] sm:$0xff] %v13730_v22 }
 0x2fa   : > { %2509 = vst [vmem:[#allocation6 + $0xd8] sm:$0xff] %v13730_v22 }
 0x2fb   : > { %2510 = vst [vmem:[#allocation6 + $0x20] sm:$0xff] %v13730_v22 }
 0x2fc   : > { %2511 = vst [vmem:[#allocation6 + $0x198] sm:$0xff] %v13730_v22 }
 0x2fd   : > { %2512 = vst [vmem:[#allocation6 + $0x2b0] sm:$0xff] %v13730_v22 }
 0x2fe   : > { %2513 = vst [vmem:[#allocation6 + $0x3a0] sm:$0xff] %v13730_v22 }
 0x2ff   : > { %2514 = vst [vmem:[#allocation6 + $0x1b8] sm:$0xff] %v13730_v22 }
 0x300   : > { %2515 = vst [vmem:[#allocation6 + $0x158] sm:$0xff] %v13730_v22 }
 0x301   : > { %2516 = vst [vmem:[#allocation6 + $0x30] sm:$0xff] %v13730_v22 }
 0x302   : > { %2517 = vst [vmem:[#allocation6 + $0x320] sm:$0xff] %v13730_v22 }
 0x303   : > { %2518 = vst [vmem:[#allocation6 + $0x48] sm:$0xff] %v13730_v22 }
 0x304   : > { %2519 = vst [vmem:[#allocation6 + $0x118] sm:$0xff] %v13730_v22 }
 0x305   : > { %2520 = vst [vmem:[#allocation6 + $0x1f0] sm:$0xff] %v13730_v22 }
 0x306   : > { %2521 = vst [vmem:[#allocation6 + $0x40] sm:$0xff] %v13730_v22 }
 0x307   : > { %2522 = vst [vmem:[#allocation6 + $0x368] sm:$0xff] %v13730_v22 }
 0x308   : > { %2523 = vst [vmem:[#allocation6 + $0x318] sm:$0xff] %v13730_v22 }
 0x309   : > { %2524 = vst [vmem:[#allocation6 + $0x3b8] sm:$0xff] %v13730_v22 }
 0x30a   : > { %2525 = vst [vmem:[#allocation6 + $0x1a0] sm:$0xff] %v13730_v22 }
 0x30b   : > { %2526 = vst [vmem:[#allocation6 + $0x28] sm:$0xff] %v13730_v22 }
 0x30c   : > { %2527 = vst [vmem:[#allocation6 + $0x2d8] sm:$0xff] %v13730_v22 }
 0x30d   : > { %2528 = vst [vmem:[#allocation6 + $0x358] sm:$0xff] %v13730_v22 }
 0x30e   : > { %2529 = vst [vmem:[#allocation6 + $0x168] sm:$0xff] %v13730_v22 }
 0x30f   : > { %2530 = vst [vmem:[#allocation6 + $0xa8] sm:$0xff] %v13730_v22 }
 0x310   : > { %2531 = vst [vmem:[#allocation6 + $0x1e8] sm:$0xff] %v13730_v22 }
 0x311   : > { %2532 = vst [vmem:[#allocation6 + $0xe0] sm:$0xff] %v13730_v22 }
 0x312   : > { %2533 = vst [vmem:[#allocation6 + $0x2f0] sm:$0xff] %v13730_v22 }
 0x313   : > { %2534 = vst [vmem:[#allocation6 + $0xd0] sm:$0xff] %v13730_v22 }
 0x314   : > { %2535 = vst [vmem:[#allocation6 + $0xa0] sm:$0xff] %v13730_v22 }
 0x315   : > { %2536 = vst [vmem:[#allocation6 + $0x218] sm:$0xff] %v13730_v22 }
 0x316   : > { %2537 = vst [vmem:[#allocation6 + $0x160] sm:$0xff] %v13730_v22 }
 0x317   : > { %2538 = vst [vmem:[#allocation6 + $0x3f8] sm:$0xff] %v13730_v22 }
 0x318   : > { %2539 = vst [vmem:[#allocation6] sm:$0xff] %v13730_v22 }
 0x319   : > { %2540 = vst [vmem:[#allocation6 + $0x128] sm:$0xff] %v13730_v22 }
 0x31a   : > { %2541 = vst [vmem:[#allocation6 + $0xb8] sm:$0xff] %v13730_v22 }
 0x31b   : > { %2542 = vst [vmem:[#allocation6 + $0x140] sm:$0xff] %v13730_v22 }
 0x31c PF: > { %v12782_v58 = vld [vmem:[%s20096_s4 + $0x38] sm:$0xff]  ;;  %v11091_v5 = vld [vmem:[%s20098_s6 + $0xe0] sm:$0xf]  ;;  %v12837_v41 = vld [vmem:[%s20098_s6 + $0xec] sm:$0xf0]  ;;  %s10718_s15 = sshll.u32 %s13711_s18, 7 }
 0x31d   : > { %v12798_v0 = vld [vmem:[%s20096_s4 + $0xb8] sm:$0xff]  ;;  %3001 = vmatpush.bf16.msra.mxu1 %v12782_v58  ;;  %13334 = vmatpush.bf16.msra.mxu3 %v12782_v58  ;;  %v14658_v43 = vor.u32 %v12837_v41, %v11091_v5  ;;  %v12781_v37 = vld [vmem:[%s20096_s4 + $0x30] sm:$0xff]  ;;  %v11075_v46 = vld [vmem:[%s20098_s6 + $0xc0] sm:$0xf]  ;;  %s2544_s24 = sshra.s32 %s10718_s15, 3  ;;  %vm5624_vm3 = vcmask 7168  }
 0x31e   : > { %v12833_v38 = vld [vmem:[%s20098_s6 + $0xcc] sm:$0xf0]  ;;  %3099 = vmatpush.bf16.msra.mxu2 %v12798_v0  ;;  %v11059_v59 = vld [vmem:[%s20098_s6 + $0xa0] sm:$0xf]  ;;  %v12780_v56 = vld [vmem:[%s20096_s4 + $0x28] sm:$0xff]  ;;  %s12742_s15 = sshll.u32 %s2544_s24, 4 }
 0x31f   : > { %v12797_v47 = vld [vmem:[%s20096_s4 + $0xb0] sm:$0xff]  ;;  %3975 = vmatpush.bf16.msra.mxu0 %v14658_v43  ;;  %v14673_v48 = vor.u32 %v12833_v38, %v11075_v46  ;;  %v12796_v57 = vld [vmem:[%s20096_s4 + $0xa8] sm:$0xff]  ;;  %v11043_v60 = vld [vmem:[%s20098_s6 + $0x80] sm:$0xf]  ;;  %s14763_s24 = scalar_lea.vmem [#allocation2], %s12742_s15  ;;  %p11553_p0 = scmp.ne.s32.totalorder %s13711_s18, 1 }
 0x320   : > { %v12829_v53 = vld [vmem:[%s20098_s6 + $0xac] sm:$0xf0]  ;;  %v12779_v33 = vld [vmem:[%s20096_s4 + $0x20] sm:$0xff]  ;;  %v12778_v9 = vld [vmem:[%s20096_s4 + $0x18] sm:$0xff] }
 0x321   : > { %3002 = vmatpush.bf16.msra.mxu1 %v12781_v37  ;;  %13335 = vmatpush.bf16.msra.mxu3 %v12781_v37  ;;  %v14688_v55 = vor.u32 %v12829_v53, %v11059_v59  ;;  %v12825_v27 = vld [vmem:[%s20098_s6 + $0x8c] sm:$0xf0]  ;;  %v12795_v54 = vld [vmem:[%s20096_s4 + $0xa0] sm:$0xff]  ;;  %v12794_v50 = vld [vmem:[%s20096_s4 + $0x98] sm:$0xff] }
 0x322   : > { %3100 = vmatpush.bf16.msra.mxu2 %v12797_v47  ;;  %v14703_v39 = vor.u32 %v12825_v27, %v11043_v60  ;;  %v11027_v1 = vld [vmem:[%s20098_s6 + $0x60] sm:$0xf]  ;;  %v12821_v49 = vld [vmem:[%s20098_s6 + $0x6c] sm:$0xf0]  ;;  %v12776_v14 = vld [vmem:[%s20096_s4 + $0x8] sm:$0xff] }
 0x323   : > { %3976 = vmatpush.bf16.msra.mxu0 %v14673_v48  ;;  %v14719_v2 = vor.u32 %v12821_v49, %v11027_v1  ;;  %v11011_v10 = vld [vmem:[%s20098_s6 + $0x40] sm:$0xf]  ;;  %v12817_v8 = vld [vmem:[%s20098_s6 + $0x4c] sm:$0xf0]  ;;  %v12792_v62 = vld [vmem:[%s20096_s4 + $0x88] sm:$0xff] }
 0x324   : > { %v12777_v16 = vld [vmem:[%s20096_s4 + $0x10] sm:$0xff]  ;;  %v14734_v42 = vor.u32 %v12817_v8, %v11011_v10  ;;  %v10995_v61 = vld [vmem:[%s20098_s6 + $0x20] sm:$0xf]  ;;  %v10731_v24 = vld [vmem:[%s14763_s24 + $0x8] sm:$0xf] }
 0x325   : > { %3003 = vmatpush.bf16.msra.mxu1 %v12780_v56  ;;  %13336 = vmatpush.bf16.msra.mxu3 %v12780_v56  ;;  %v12793_v13 = vld [vmem:[%s20096_s4 + $0x90] sm:$0xff]  ;;  %v12775_v18 = vld [vmem:[%s20096_s4] sm:$0xff]  ;;  %v12746_v36 = vld [vmem:[%s14763_s24 + $0x14] sm:$0xf0] }
 0x326   : > { %3101 = vmatpush.bf16.msra.mxu2 %v12796_v57  ;;  %v12813_v45 = vld [vmem:[%s20098_s6 + $0x2c] sm:$0xf0]  ;;  %v10979_v15 = vld [vmem:[%s20098_s6] sm:$0xf]  ;;  %v12835_v3 = vld [vmem:[%s20098_s6 + $0xe4] sm:$0xf]  ;;  %v14784_v30 = vor.u32 %v12746_v36, %v10731_v24 }
 0x327   : > { %3977 = vmatpush.bf16.msra.mxu0 %v14688_v55  ;;  %v14749_v12 = vor.u32 %v12813_v45, %v10995_v61  ;;  %v12791_v32 = vld [vmem:[%s20096_s4 + $0x80] sm:$0xff]  ;;  %v12809_v40 = vld [vmem:[%s20098_s6 + $0xc] sm:$0xf0]  ;;  %v11093_v28 = vld [vmem:[%s20098_s6 + $0xf0] sm:$0xf0] }
 0x328   : > { %v10723_v17 = vld [vmem:[%s14763_s24] sm:$0xf]  ;;  %v12745_v23 = vld [vmem:[%s14763_s24 + $0xc] sm:$0xf0]  ;;  %v14778_v26 = vor.u32 %v12809_v40, %v10979_v15  ;;  %20213 = vst [vmem:[#allocation21_spill] sm:$0xff] %v14784_v30  ;;  %v11096_v51 = vor.u32 %v12835_v3, %v11093_v28  ;;  %v12790_v20 = vld [vmem:[%s20096_s4 + $0x78] sm:$0xff] }
 0x329   : > { %3004 = vmatpush.bf16.msra.mxu1 %v12779_v33  ;;  %13337 = vmatpush.bf16.msra.mxu3 %v12779_v33  ;;  %v10787_v25 = vld [vmem:[%s14763_s24 + $0x80] sm:$0xf]  ;;  %v12761_v21 = vld [vmem:[%s14763_s24 + $0x8c] sm:$0xf0]  ;;  %v14780_v31 = vor.u32 %v12745_v23, %v10723_v17  ;;  %v12831_v6 = vld [vmem:[%s20098_s6 + $0xc4] sm:$0xf] }
 0x32a   : > { %3102 = vmatpush.bf16.msra.mxu2 %v12795_v54  ;;  %v14782_v4 = vor.u32 %v12761_v21, %v10787_v25  ;;  %v11077_v52 = vld [vmem:[%s20098_s6 + $0xd0] sm:$0xf0]  ;;  %v12806_v29 = vld [vmem:[%s20096_s4 + $0xf8] sm:$0xff]  ;;  %v12827_v44 = vld [vmem:[%s20098_s6 + $0xa4] sm:$0xf] }
 0x32b   : > { %3978 = vmatpush.bf16.msra.mxu0 %v14703_v39  ;;  %20212 = vst [vmem:[#allocation20_spill] sm:$0xff] %v14780_v31  ;;  %v11080_v35 = vor.u32 %v12831_v6, %v11077_v52  ;;  %v11061_v19 = vld [vmem:[%s20098_s6 + $0xb0] sm:$0xf0]  ;;  %v12823_v63 = vld [vmem:[%s20098_s6 + $0x84] sm:$0xf]  ;;  %v12788_v58 = vld [vmem:[%s20096_s4 + $0x68] sm:$0xff] }
 0x32c   : > { %v12789_v11 = vld [vmem:[%s20096_s4 + $0x70] sm:$0xff]  ;;  %v11064_v7 = vor.u32 %v12827_v44, %v11061_v19  ;;  %v12804_v0 = vld [vmem:[%s20096_s4 + $0xe8] sm:$0xff]  ;;  %v10739_v5 = vld [vmem:[%s14763_s24 + $0x20] sm:$0xf] }
 0x32d   : > { %3005 = vmatpush.bf16.msra.mxu1 %v12778_v9  ;;  %13338 = vmatpush.bf16.msra.mxu3 %v12778_v9  ;;  %v12805_v34 = vld [vmem:[%s20096_s4 + $0xf0] sm:$0xff]  ;;  %v10747_v46 = vld [vmem:[%s14763_s24 + $0x28] sm:$0xf]  ;;  %v12750_v38 = vld [vmem:[%s14763_s24 + $0x34] sm:$0xf0] }
 0x32e   : > { %3103 = vmatpush.bf16.msra.mxu2 %v12794_v50  ;;  %v11045_v22 = vld [vmem:[%s20098_s6 + $0x90] sm:$0xf0]  ;;  %v12749_v41 = vld [vmem:[%s14763_s24 + $0x2c] sm:$0xf0]  ;;  %v12787_v53 = vld [vmem:[%s20096_s4 + $0x60] sm:$0xff]  ;;  %v14853_v60 = vor.u32 %v12750_v38, %v10747_v46 }
 0x32f   : > { %3979 = vmatpush.bf16.msra.mxu0 %v14719_v2  ;;  %v12765_v37 = vld [vmem:[%s14763_s24 + $0xac] sm:$0xf0]  ;;  %v11048_v47 = vor.u32 %v12823_v63, %v11045_v22  ;;  %v11029_v59 = vld [vmem:[%s20098_s6 + $0x70] sm:$0xf0]  ;;  %v12803_v56 = vld [vmem:[%s20096_s4 + $0xe0] sm:$0xff]  ;;  %v14849_v57 = vor.u32 %v12749_v41, %v10739_v5 }
 0x330   : > { %v12815_v33 = vld [vmem:[%s20098_s6 + $0x44] sm:$0xf]  ;;  %v11013_v54 = vld [vmem:[%s20098_s6 + $0x50] sm:$0xf0]  ;;  %v12802_v1 = vld [vmem:[%s20096_s4 + $0xd8] sm:$0xff] }
 0x331   : > { %3006 = vmatpush.bf16.msra.mxu1 %v12777_v16  ;;  %13339 = vmatpush.bf16.msra.mxu3 %v12777_v16  ;;  %v11016_v49 = vor.u32 %v12815_v33, %v11013_v54  ;;  %v12811_v9 = vld [vmem:[%s20098_s6 + $0x24] sm:$0xf]  ;;  %v10997_v50 = vld [vmem:[%s20098_s6 + $0x30] sm:$0xf0]  ;;  %v12784_v61 = vld [vmem:[%s20096_s4 + $0x48] sm:$0xff] }
 0x332   : > { %3104 = vmatpush.bf16.msra.mxu2 %v12793_v13  ;;  %v12801_v10 = vld [vmem:[%s20096_s4 + $0xd0] sm:$0xff]  ;;  %v11000_v8 = vor.u32 %v12811_v9, %v10997_v50  ;;  %v12807_v16 = vld [vmem:[%s20098_s6 + $0x4] sm:$0xf]  ;;  %v10755_v45 = vld [vmem:[%s14763_s24 + $0x40] sm:$0xf] }
 0x333   : > { %3980 = vmatpush.bf16.msra.mxu0 %v14734_v42  ;;  %v10981_v13 = vld [vmem:[%s20098_s6 + $0x10] sm:$0xf0]  ;;  %v12754_v40 = vld [vmem:[%s14763_s24 + $0x54] sm:$0xf0]  ;;  %v12783_v17 = vld [vmem:[%s20096_s4 + $0x40] sm:$0xff] }
 0x334   : > { %v10984_v15 = vor.u32 %v12807_v16, %v10981_v13  ;;  %v12799_v23 = vld [vmem:[%s20096_s4 + $0xc0] sm:$0xff]  ;;  %v11099_v24 = vld [vmem:[%s20098_s6 + $0xe8] sm:$0xf]  ;;  %v12838_v36 = vld [vmem:[%s20098_s6 + $0xf4] sm:$0xf0] }
 0x335   : > { %3007 = vmatpush.bf16.msra.mxu1 %v12776_v14  ;;  %13340 = vmatpush.bf16.msra.mxu3 %v12776_v14  ;;  %v12753_v14 = vld [vmem:[%s14763_s24 + $0x4c] sm:$0xf0]  ;;  %v11100_v3 = vor.u32 %v12838_v36, %v11099_v24  ;;  %v10771_v28 = vld [vmem:[%s14763_s24 + $0x60] sm:$0xf]  ;;  %v10779_v52 = vld [vmem:[%s14763_s24 + $0x68] sm:$0xf] }
 0x336   : > { %3105 = vmatpush.bf16.msra.mxu2 %v12792_v62  ;;  %v10819_v62 = vld [vmem:[%s14763_s24 + $0xc0] sm:$0xf]  ;;  %v12773_v6 = vld [vmem:[%s14763_s24 + $0xec] sm:$0xf0]  ;;  %v11083_v19 = vld [vmem:[%s20098_s6 + $0xc8] sm:$0xf] }
 0x337   : > { %3981 = vmatpush.bf16.msra.mxu0 %v14749_v12  ;;  %v10725_v63 = vld [vmem:[%s14763_s24 + $0x10] sm:$0xf0]  ;;  %v12744_v22 = vld [vmem:[%s14763_s24 + $0xc] sm:$0xf]  ;;  %v12762_v5 = vld [vmem:[%s14763_s24 + $0x94] sm:$0xf0] }
 0x338   : > { %v11067_v46 = vld [vmem:[%s20098_s6 + $0xa8] sm:$0xf]  ;;  %v12830_v38 = vld [vmem:[%s20098_s6 + $0xb4] sm:$0xf0]  ;;  %v10765_v16 = vld [vmem:[%s14763_s24 + $0x58] sm:$0xf0] }
 0x339   : > { %3008 = vmatpush.bf16.msra.mxu1 %v12775_v18  ;;  %13341 = vmatpush.bf16.msra.mxu3 %v12775_v18  ;;  %v12769_v18 = vld [vmem:[%s14763_s24 + $0xcc] sm:$0xf0]  ;;  %v12766_v33 = vld [vmem:[%s14763_s24 + $0xb4] sm:$0xf0]  ;;  %v10827_v13 = vld [vmem:[%s14763_s24 + $0xc8] sm:$0xf] }
 0x33a   : > { %3106 = vmatpush.bf16.msra.mxu2 %v12791_v32  ;;  %v10763_v32 = vld [vmem:[%s14763_s24 + $0x48] sm:$0xf]  ;;  %v14913_v25 = vor.u32 %v12769_v18, %v10819_v62  ;;  %v12826_v9 = vld [vmem:[%s20098_s6 + $0x94] sm:$0xf0] }
 0x33b   : > { %3982 = vmatpush.bf16.msra.mxu0 %v14778_v26  ;;  %v14915_v21 = vor.u32 %v12754_v40, %v10763_v32  ;;  %v11035_v62 = vld [vmem:[%s20098_s6 + $0x68] sm:$0xf]  ;;  %v12822_v18 = vld [vmem:[%s20098_s6 + $0x74] sm:$0xf0]  ;;  %v12755_v32 = vld [vmem:[%s14763_s24 + $0x64] sm:$0xf] }
 0x33c   : > { %3009 = vmatmul.bf16.vlgmr.msra.gmra.mxu1 %v14780_v31  ;;  %3029 = vmatmul.bf16.vlgmr.msra.gmra.mxu3 %v14782_v4  ;;  %v10773_v40 = vld [vmem:[%s14763_s24 + $0x70] sm:$0xf0]  ;;  %v10843_v24 = vld [vmem:[%s14763_s24 + $0xe8] sm:$0xf]  ;;  %v12774_v36 = vld [vmem:[%s14763_s24 + $0xf4] sm:$0xf0] }
 0x33d   : > { %3107 = vmatmul.bf16.vlgmr.msra.gmra.mxu2 %v14784_v30  ;;  %3050 = vmatpush.bf16.msrb.mxu1 %v12790_v20  ;;  %v12758_v20 = vld [vmem:[%s14763_s24 + $0x74] sm:$0xf0] }
 0x33e   : > { %13342 = vmatpush.bf16.msrb.mxu2 %v14658_v43  ;;  %3983 = vmatmul.bf16.vlgmr.msra.gmra.mxu0 %v14780_v31  ;;  %v10803_v43 = vld [vmem:[%s14763_s24 + $0xa0] sm:$0xf]  ;;  %v14937_v44 = vor.u32 %v12758_v20, %v10779_v52  ;;  %v12759_v20 = vld [vmem:[%s14763_s24 + $0x84] sm:$0xf] }
 0x33f   : > { %4171 = vmatpush.bf16.msrb.mxu0 %v11096_v51  ;;  %3148 = vmatpush.bf16.msrb.mxu3 %v12806_v29  ;;  %v10835_v51 = vld [vmem:[%s14763_s24 + $0xe0] sm:$0xf] }
 0x341   : > { %3051 = vmatpush.bf16.msrb.mxu1 %v12789_v11  ;;  %v12834_v11 = vld [vmem:[%s20098_s6 + $0xd4] sm:$0xf0] }
 0x342   : > { %13343 = vmatpush.bf16.msrb.mxu2 %v14673_v48  ;;  %v12819_v48 = vld [vmem:[%s20098_s6 + $0x64] sm:$0xf] }
 0x343   : > { %4172 = vmatpush.bf16.msrb.mxu0 %v11080_v35  ;;  %3149 = vmatpush.bf16.msrb.mxu3 %v12805_v34  ;;  %v11032_v27 = vor.u32 %v12819_v48, %v11029_v59  ;;  %v14935_v35 = vor.u32 %v12773_v6, %v10835_v51  ;;  %v11084_v34 = vor.u32 %v12834_v11, %v11083_v19  ;;  %v12747_v48 = vld [vmem:[%s14763_s24 + $0x24] sm:$0xf]  ;;  %v10741_v59 = vld [vmem:[%s14763_s24 + $0x30] sm:$0xf0]  ;;  %v11019_v51 = vld [vmem:[%s20098_s6 + $0x48] sm:$0xf] }
 0x344   : > { %v14977_v54 = vor.u32 %v12747_v48, %v10741_v59  ;;  %v12818_v6 = vld [vmem:[%s20098_s6 + $0x54] sm:$0xf0]  ;;  %v10789_v19 = vld [vmem:[%s14763_s24 + $0x90] sm:$0xf0]  ;;  %v12760_v11 = vld [vmem:[%s14763_s24 + $0x8c] sm:$0xf] }
 0x345   : > { %3052 = vmatpush.bf16.msrb.mxu1 %v12788_v58  ;;  %20215 = vst [vmem:[#allocation23_spill] sm:$0xff] %v14935_v35  ;;  %v10733_v58 = vld [vmem:[%s14763_s24 + $0x18] sm:$0xf0]  ;;  %v11020_v52 = vor.u32 %v12818_v6, %v11019_v51  ;;  %v11475_v59 = vld [vmem:[%s20098_s6 + $0x3e0] sm:$0xf] }
 0x346   : > { %13344 = vmatpush.bf16.msrb.mxu2 %v14688_v55  ;;  %v14851_v55 = vor.u32 %v12765_v37, %v10803_v43  ;;  %v14957_v43 = vor.u32 %v12744_v22, %v10733_v58  ;;  %v10805_v51 = vld [vmem:[%s14763_s24 + $0xb0] sm:$0xf0]  ;;  %v12764_v6 = vld [vmem:[%s14763_s24 + $0xac] sm:$0xf] }
 0x347   : > { %4173 = vmatpush.bf16.msrb.mxu0 %v11064_v7  ;;  %3150 = vmatpush.bf16.msrb.mxu3 %v12804_v0  ;;  %v12743_v7 = vld [vmem:[%s14763_s24 + $0x4] sm:$0xf]  ;;  %v10795_v0 = vld [vmem:[%s14763_s24 + $0x88] sm:$0xf] }
 0x348   : > { %20214 = vst [vmem:[#allocation22_spill] sm:$0xff] %v14851_v55  ;;  %v14955_v41 = vor.u32 %v12743_v7, %v10725_v63  ;;  %v14959_v37 = vor.u32 %v12762_v5, %v10795_v0  ;;  %v15041_v7 = vor.u32 %v12759_v20, %v10789_v19  ;;  %v11219_v0 = vld [vmem:[%s20098_s6 + $0x1e0] sm:$0xf]  ;;  %v12869_v5 = vld [vmem:[%s20098_s6 + $0x1ec] sm:$0xf0] }
 0x349   : > { %3053 = vmatpush.bf16.msrb.mxu1 %v12787_v53  ;;  %20217 = vst [vmem:[#allocation25_spill] sm:$0xff] %v14957_v43  ;;  %v12748_v53 = vld [vmem:[%s14763_s24 + $0x2c] sm:$0xf]  ;;  %v12893_v20 = vld [vmem:[%s20098_s6 + $0x2ac] sm:$0xf0] }
 0x34a   : > { %13345 = vmatpush.bf16.msrb.mxu2 %v14703_v39  ;;  %v12786_v39 = vld [vmem:[%s20096_s4 + $0x58] sm:$0xff]  ;;  %20216 = vst [vmem:[#allocation24_spill] sm:$0xff] %v14955_v41 }
 0x34b   : > { %4174 = vmatpush.bf16.msrb.mxu0 %v11048_v47  ;;  %3151 = vmatpush.bf16.msrb.mxu3 %v12803_v56  ;;  %v11068_v47 = vor.u32 %v12830_v38, %v11067_v46  ;;  %v10749_v56 = vld [vmem:[%s14763_s24 + $0x38] sm:$0xf0]  ;;  %v11220_v46 = vor.u32 %v12869_v5, %v11219_v0  ;;  %v11347_v38 = vld [vmem:[%s20098_s6 + $0x2e0] sm:$0xf]  ;;  %v12925_v0 = vld [vmem:[%s20098_s6 + $0x3ac] sm:$0xf0] }
 0x34c   : > { %3014 = vmatmul.bf16.gmra.mxu1 %v14849_v57  ;;  %3034 = vmatmul.bf16.gmra.mxu3 %v14851_v55  ;;  %v10813_v19 = vld [vmem:[%s14763_s24 + $0xb8] sm:$0xf0] }
 0x34d   : > { %3112 = vmatmul.bf16.gmra.mxu2 %v14853_v60  ;;  %3054 = vmatpush.bf16.msrb.mxu1 %v12786_v39  ;;  %v14979_v39 = vor.u32 %v12748_v53, %v10749_v56  ;;  %v12933_v53 = vld [vmem:[%s20098_s6 + $0x3ec] sm:$0xf0]  ;;  %v11003_v56 = vld [vmem:[%s20098_s6 + $0x28] sm:$0xf] }
 0x34e   : > { %13346 = vmatpush.bf16.msrb.mxu2 %v14719_v2  ;;  %3988 = vmatmul.bf16.gmra.mxu0 %v14849_v57  ;;  %v12785_v2 = vld [vmem:[%s20096_s4 + $0x50] sm:$0xff] }
 0x34f   : > { %4175 = vmatpush.bf16.msrb.mxu0 %v11032_v27  ;;  %3152 = vmatpush.bf16.msrb.mxu3 %v12802_v1  ;;  %v10811_v27 = vld [vmem:[%s14763_s24 + $0xa8] sm:$0xf] }
 0x350   : > { %v14981_v1 = vor.u32 %v12766_v33, %v10811_v27  ;;  %v12814_v27 = vld [vmem:[%s20098_s6 + $0x34] sm:$0xf0]  ;;  %v11476_v33 = vor.u32 %v12933_v53, %v11475_v59 }
 0x351   : > { %3055 = vmatpush.bf16.msrb.mxu1 %v12785_v2  ;;  %v12751_v2 = vld [vmem:[%s14763_s24 + $0x44] sm:$0xf] }
 0x352   : > { %13347 = vmatpush.bf16.msrb.mxu2 %v14734_v42  ;;  %v12800_v42 = vld [vmem:[%s20096_s4 + $0xc8] sm:$0xff] }
 0x353   : > { %4176 = vmatpush.bf16.msrb.mxu0 %v11016_v49  ;;  %3153 = vmatpush.bf16.msrb.mxu3 %v12801_v10  ;;  %v11051_v49 = vld [vmem:[%s20098_s6 + $0x88] sm:$0xf]  ;;  %v10757_v10 = vld [vmem:[%s14763_s24 + $0x50] sm:$0xf0] }
 0x354   : > { %v11052_v50 = vor.u32 %v12826_v9, %v11051_v49  ;;  %v11004_v9 = vor.u32 %v12814_v27, %v11003_v56  ;;  %v15140_v56 = vor.u32 %v12764_v6, %v10813_v19  ;;  %v12810_v6 = vld [vmem:[%s20098_s6 + $0x14] sm:$0xf0] }
 0x355   : > { %3056 = vmatpush.bf16.msrb.mxu1 %v12784_v61  ;;  %v12770_v61 = vld [vmem:[%s14763_s24 + $0xd4] sm:$0xf0] }
 0x356   : > { %13348 = vmatpush.bf16.msrb.mxu2 %v14749_v12  ;;  %v14911_v12 = vor.u32 %v12753_v14, %v10755_v45  ;;  %v15003_v14 = vor.u32 %v12770_v61, %v10827_v13  ;;  %v12897_v13 = vld [vmem:[%s20098_s6 + $0x2cc] sm:$0xf0] }
 0x357   : > { %4177 = vmatpush.bf16.msrb.mxu0 %v11000_v8  ;;  %3154 = vmatpush.bf16.msrb.mxu3 %v12800_v42  ;;  %v12752_v8 = vld [vmem:[%s14763_s24 + $0x4c] sm:$0xf]  ;;  %v14999_v42 = vor.u32 %v12751_v2, %v10757_v10  ;;  %v12865_v2 = vld [vmem:[%s20098_s6 + $0x1cc] sm:$0xf0]  ;;  %v11331_v10 = vld [vmem:[%s20098_s6 + $0x2c0] sm:$0xf] }
 0x358   : > { %v15001_v45 = vor.u32 %v12752_v8, %v10765_v16  ;;  %20218 = vst [vmem:[#allocation26_spill] sm:$0xff] %v15003_v14 }
 0x359   : > { %3057 = vmatpush.bf16.msrb.mxu1 %v12783_v17  ;;  %v12756_v17 = vld [vmem:[%s14763_s24 + $0x6c] sm:$0xf] }
 0x35a   : > { %13349 = vmatpush.bf16.msrb.mxu2 %v14778_v26  ;;  %v12757_v26 = vld [vmem:[%s14763_s24 + $0x6c] sm:$0xf0] }
 0x35b   : > { %4178 = vmatpush.bf16.msrb.mxu0 %v10984_v15  ;;  %3155 = vmatpush.bf16.msrb.mxu3 %v12799_v23  ;;  %v14933_v29 = vor.u32 %v12757_v26, %v10771_v28  ;;  %v11036_v15 = vor.u32 %v12822_v18, %v11035_v62  ;;  %v10781_v23 = vld [vmem:[%s14763_s24 + $0x78] sm:$0xf0]  ;;  %v15025_v26 = vor.u32 %v12774_v36, %v10843_v24  ;;  %v11459_v18 = vld [vmem:[%s20098_s6 + $0x3c0] sm:$0xf]  ;;  %v12861_v24 = vld [vmem:[%s20098_s6 + $0x1ac] sm:$0xf0] }
 0x35c   : > { %3019 = vmatmul.bf16.gmra.mxu1 %v14911_v12  ;;  %3039 = vmatmul.bf16.gmra.mxu3 %v14913_v25  ;;  %v15023_v28 = vor.u32 %v12756_v17, %v10781_v23  ;;  %v11332_v62 = vor.u32 %v12897_v13, %v11331_v10  ;;  %v12763_v17 = vld [vmem:[%s14763_s24 + $0xa4] sm:$0xf]  ;;  %v11187_v23 = vld [vmem:[%s20098_s6 + $0x1a0] sm:$0xf]  ;;  %v12921_v10 = vld [vmem:[%s20098_s6 + $0x38c] sm:$0xf0] }
 0x35d   : > { %3117 = vmatmul.bf16.gmra.mxu2 %v14915_v21  ;;  %20219 = vst [vmem:[#allocation27_spill] sm:$0xff] %v15025_v26  ;;  %4024 = vmatpush.bf16.msra.mxu1 %v11220_v46  ;;  %v11315_v36 = vld [vmem:[%s20098_s6 + $0x2a0] sm:$0xf]  ;;  %v15138_v53 = vor.u32 %v12763_v17, %v10805_v51  ;;  %v12885_v17 = vld [vmem:[%s20098_s6 + $0x26c] sm:$0xf0] }
 0x35e   : > { %3993 = vmatmul.bf16.gmra.mxu0 %v14911_v12  ;;  %v10987_v51 = vld [vmem:[%s20098_s6 + $0x8] sm:$0xf] }
 0x35f   : > { %4367 = vmatpush.bf16.msra.mxu0 %v11100_v3  ;;  %v15021_v3 = vor.u32 %v12755_v32, %v10773_v40  ;;  %4122 = vmatpush.bf16.msra.mxu3 %v11476_v33  ;;  %v12889_v33 = vld [vmem:[%s20098_s6 + $0x28c] sm:$0xf0]  ;;  %v10988_v19 = vor.u32 %v12810_v6, %v10987_v51  ;;  %v11379_v6 = vld [vmem:[%s20098_s6 + $0x320] sm:$0xf] }
 0x363   : > { %4368 = vmatpush.bf16.msra.mxu0 %v11084_v34  ;;  %v10797_v34 = vld [vmem:[%s14763_s24 + $0x98] sm:$0xf0] }
 0x364   : > { %v15043_v63 = vor.u32 %v12760_v11, %v10797_v34  ;;  %v11316_v11 = vor.u32 %v12893_v20, %v11315_v36  ;;  %v11443_v34 = vld [vmem:[%s20098_s6 + $0x3a0] sm:$0xf]  ;;  %v12917_v36 = vld [vmem:[%s20098_s6 + $0x36c] sm:$0xf0] }
 0x365   : > { %v11444_v5 = vor.u32 %v12925_v0, %v11443_v34  ;;  %v12849_v34 = vld [vmem:[%s20098_s6 + $0x14c] sm:$0xf0]  ;;  %v11267_v0 = vld [vmem:[%s20098_s6 + $0x240] sm:$0xf] }
 0x367   : > { %4369 = vmatpush.bf16.msra.mxu0 %v11068_v47  ;;  %v12901_v47 = vld [vmem:[%s20098_s6 + $0x2ec] sm:$0xf0] }
 0x368   : > { %v11348_v48 = vor.u32 %v12901_v47, %v11347_v38  ;;  %v11171_v38 = vld [vmem:[%s20098_s6 + $0x180] sm:$0xf]  ;;  %v12857_v47 = vld [vmem:[%s20098_s6 + $0x18c] sm:$0xf0] }
 0x369   : > { %v11172_v27 = vor.u32 %v12857_v47, %v11171_v38  ;;  %v12881_v47 = vld [vmem:[%s20098_s6 + $0x24c] sm:$0xf0] }
 0x36a   : > { %4073 = vmatpush.bf16.msra.mxu2 %v11348_v48  ;;  %v11299_v48 = vld [vmem:[%s20098_s6 + $0x280] sm:$0xf] }
 0x36b   : > { %4370 = vmatpush.bf16.msra.mxu0 %v11052_v50  ;;  %v11203_v50 = vld [vmem:[%s20098_s6 + $0x1c0] sm:$0xf] }
 0x36c   : > { %3024 = vmatmul.bf16.gmra.mxu1 %v14933_v29  ;;  %3044 = vmatmul.bf16.gmra.mxu3 %v14935_v35  ;;  %v11204_v16 = vor.u32 %v12865_v2, %v11203_v50  ;;  %v11300_v50 = vor.u32 %v12889_v33, %v11299_v48  ;;  %v11427_v2 = vld [vmem:[%s20098_s6 + $0x380] sm:$0xf] }
 0x36d   : > { %3122 = vmatmul.bf16.gmra.mxu2 %v14937_v44  ;;  %v11395_v33 = vld [vmem:[%s20098_s6 + $0x340] sm:$0xf] }
 0x36e   : > { %3998 = vmatmul.bf16.gmra.mxu0 %v14933_v29  ;;  %4025 = vmatpush.bf16.msra.mxu1 %v11204_v16  ;;  %v11428_v16 = vor.u32 %v12921_v10, %v11427_v2 }
 0x36f   : > { %4371 = vmatpush.bf16.msra.mxu0 %v11036_v15  ;;  %v12929_v15 = vld [vmem:[%s20098_s6 + $0x3cc] sm:$0xf0]  ;;  %4074 = vmatpush.bf16.msra.mxu2 %v11332_v62  ;;  %v11155_v62 = vld [vmem:[%s20098_s6 + $0x160] sm:$0xf] }
 0x370   : > { %v11460_v32 = vor.u32 %v12929_v15, %v11459_v18  ;;  %v12853_v18 = vld [vmem:[%s20098_s6 + $0x16c] sm:$0xf0] }
 0x371   : > { %v11156_v15 = vor.u32 %v12853_v18, %v11155_v62  ;;  %v11123_v62 = vld [vmem:[%s20098_s6 + $0x120] sm:$0xf]  ;;  %v12845_v18 = vld [vmem:[%s20098_s6 + $0x12c] sm:$0xf0] }
 0x372   : > { %4123 = vmatpush.bf16.msra.mxu3 %v11460_v32  ;;  %v11283_v32 = vld [vmem:[%s20098_s6 + $0x260] sm:$0xf] }
 0x373   : > { %4372 = vmatpush.bf16.msra.mxu0 %v11020_v52  ;;  %v11188_v52 = vor.u32 %v12861_v24, %v11187_v23  ;;  %4075 = vmatpush.bf16.msra.mxu2 %v11316_v11  ;;  %v11284_v23 = vor.u32 %v12885_v17, %v11283_v32  ;;  %v11411_v24 = vld [vmem:[%s20098_s6 + $0x360] sm:$0xf]  ;;  %v10821_v32 = vld [vmem:[%s14763_s24 + $0xd0] sm:$0xf0]  ;;  %v12768_v17 = vld [vmem:[%s14763_s24 + $0xcc] sm:$0xf] }
 0x374   : > { %v11139_v11 = vld [vmem:[%s20098_s6 + $0x140] sm:$0xf] }
 0x375   : > { %4026 = vmatpush.bf16.msra.mxu1 %v11188_v52  ;;  %v11412_v52 = vor.u32 %v12917_v36, %v11411_v24  ;;  %v11140_v38 = vor.u32 %v12849_v34, %v11139_v11  ;;  %v12877_v24 = vld [vmem:[%s20098_s6 + $0x22c] sm:$0xf0]  ;;  %v10829_v36 = vld [vmem:[%s14763_s24 + $0xd8] sm:$0xf0]  ;;  %v11107_v34 = vld [vmem:[%s20098_s6 + $0x100] sm:$0xf] }
 0x376   : > { %4124 = vmatpush.bf16.msra.mxu3 %v11444_v5 }
 0x377   : > { %4373 = vmatpush.bf16.msra.mxu0 %v11004_v9  ;;  %4076 = vmatpush.bf16.msra.mxu2 %v11300_v50  ;;  %v12913_v50 = vld [vmem:[%s20098_s6 + $0x34c] sm:$0xf0] }
 0x378   : > { %v11396_v2 = vor.u32 %v12913_v50, %v11395_v33  ;;  %v15246_v33 = vor.u32 %v12768_v17, %v10829_v36 }
 0x379   : > { %4027 = vmatpush.bf16.msra.mxu1 %v11172_v27  ;;  %v11268_v27 = vor.u32 %v12881_v47, %v11267_v0  ;;  %v12841_v0 = vld [vmem:[%s20098_s6 + $0x10c] sm:$0xf0] }
 0x37a   : > { %4125 = vmatpush.bf16.msra.mxu3 %v11428_v16  ;;  %v12767_v16 = vld [vmem:[%s14763_s24 + $0xc4] sm:$0xf]  ;;  %20224 = vst [vmem:[#allocation32_spill] sm:$0xff] %v15246_v33  ;;  %v11108_v50 = vor.u32 %v12841_v0, %v11107_v34  ;;  %v10837_v0 = vld [vmem:[%s14763_s24 + $0xf0] sm:$0xf0] }
 0x37b   : > { %4077 = vmatpush.bf16.msra.mxu2 %v11284_v23  ;;  %4374 = vmatpush.bf16.msra.mxu0 %v10988_v19  ;;  %v11124_v23 = vor.u32 %v12845_v18, %v11123_v62  ;;  %v12771_v34 = vld [vmem:[%s14763_s24 + $0xe4] sm:$0xf] }
 0x37c   : > { %3058 = vmatmul.bf16.vlgmr.msrb.gmra.mxu1 %v14955_v41  ;;  %3156 = vmatmul.bf16.vlgmr.msrb.gmra.mxu3 %v14957_v43 }
 0x37d   : > { %3127 = vmatmul.bf16.gmra.mxu2 %v14959_v37  ;;  %4028 = vmatpush.bf16.msra.mxu1 %v11156_v15  ;;  %v11251_v15 = vld [vmem:[%s20098_s6 + $0x220] sm:$0xf] }
 0x37e   : > { %4179 = vmatmul.bf16.vlgmr.msrb.gmra.mxu0 %v14780_v31  ;;  %4126 = vmatpush.bf16.msra.mxu3 %v11412_v52  ;;  %v11252_v51 = vor.u32 %v12877_v24, %v11251_v15  ;;  %v12909_v52 = vld [vmem:[%s20098_s6 + $0x32c] sm:$0xf0]  ;;  %v11363_v15 = vld [vmem:[%s20098_s6 + $0x300] sm:$0xf]  ;;  %v11101_v24 = vld [vmem:[%s20098_s6 + $0xf8] sm:$0xf0] }
 0x37f   : > { %4078 = vmatpush.bf16.msra.mxu2 %v11268_v27  ;;  %v11380_v19 = vor.u32 %v12909_v52, %v11379_v6  ;;  %v15244_v27 = vor.u32 %v12767_v16, %v10821_v32  ;;  %v12905_v16 = vld [vmem:[%s20098_s6 + $0x30c] sm:$0xf0] }
 0x380   : > { %v11364_v32 = vor.u32 %v12905_v16, %v11363_v15  ;;  %v15287_v15 = vor.u32 %v12771_v34, %v10837_v0 }
 0x381   : > { %4029 = vmatpush.bf16.msra.mxu1 %v11140_v38  ;;  %v11235_v38 = vld [vmem:[%s20098_s6 + $0x200] sm:$0xf] }
 0x382   : > { %4127 = vmatpush.bf16.msra.mxu3 %v11396_v2  ;;  %v12873_v2 = vld [vmem:[%s20098_s6 + $0x20c] sm:$0xf0]  ;;  %20227 = vst [vmem:[#allocation35_spill] sm:$0xff] %v15287_v15 }
 0x383   : > { %4079 = vmatpush.bf16.msra.mxu2 %v11252_v51  ;;  %v11236_v18 = vor.u32 %v12873_v2, %v11235_v38  ;;  %v12772_v38 = vld [vmem:[%s14763_s24 + $0xec] sm:$0xf] }
 0x385   : > { %4030 = vmatpush.bf16.msra.mxu1 %v11124_v23  ;;  %v12836_v23 = vld [vmem:[%s20098_s6 + $0xec] sm:$0xf] }
 0x386   : > { %4128 = vmatpush.bf16.msra.mxu3 %v11380_v19  ;;  %v11104_v51 = vor.u32 %v12836_v23, %v11101_v24  ;;  %v12832_v24 = vld [vmem:[%s20098_s6 + $0xcc] sm:$0xf] }
 0x387   : > { %4080 = vmatpush.bf16.msra.mxu2 %v11236_v18 }
 0x388   : > { %4563 = vmatpush.bf16.msrb.mxu0 %v11104_v51  ;;  %v11085_v51 = vld [vmem:[%s20098_s6 + $0xd8] sm:$0xf0] }
 0x389   : > { %4031 = vmatpush.bf16.msra.mxu1 %v11108_v50  ;;  %v10845_v50 = vld [vmem:[%s14763_s24 + $0xf8] sm:$0xf0]  ;;  %v11088_v0 = vor.u32 %v12832_v24, %v11085_v51 }
 0x38a   : > { %4129 = vmatpush.bf16.msra.mxu3 %v11364_v32  ;;  %v15289_v16 = vor.u32 %v12772_v38, %v10845_v50 }
 0x38c   : > { %3063 = vmatmul.bf16.gmra.mxu1 %v14977_v54  ;;  %3161 = vmatmul.bf16.gmra.mxu3 %v14979_v39  ;;  %20228 = vst [vmem:[#allocation36_spill] sm:$0xff] %v15289_v16 }
 0x38d   : > { %3132 = vmatmul.bf16.gmra.mxu2 %v14981_v1  ;;  %4564 = vmatpush.bf16.msrb.mxu0 %v11088_v0 }
 0x38e   : > { %4184 = vmatmul.bf16.gmra.mxu0 %v14849_v57 }
 0x39c   : > { %3068 = vmatmul.bf16.gmra.mxu1 %v14999_v42  ;;  %3166 = vmatmul.bf16.gmra.mxu3 %v15001_v45 }
 0x39d   : > { %3137 = vmatmul.bf16.gmra.mxu2 %v15003_v14 }
 0x39e   : > { %4189 = vmatmul.bf16.gmra.mxu0 %v14911_v12 }
 0x3ac   : > { %3073 = vmatmul.bf16.gmra.mxu1 %v15021_v3  ;;  %3171 = vmatmul.bf16.gmra.mxu3 %v15023_v28 }
 0x3ad   : > { %3142 = vmatmul.bf16.gmra.mxu2 %v15025_v26 }
 0x3ae   : > { %4194 = vmatmul.bf16.gmra.mxu0 %v14933_v29 }
 0x3b9   : > { %v15045_v22 = vpop.f32.mrf.mxu1 }
 0x3bb   : > { %v15047_v58 = vpop.f32.mrf.mxu0 }
 0x3bc   : > { %20220 = vst [vmem:[#allocation28_spill] sm:$0xff] %v15047_v58  ;;  %3078 = vmatmul.bf16.gmra.mxu1 %v15041_v7  ;;  %3176 = vmatmul.bf16.gmra.mxu3 %v15043_v63 }
 0x3bd   : > { %4003 = vmatmul.bf16.vlgmr.msrb.gmra.mxu2 %v14782_v4 }
 0x3be   : > { %4199 = vmatmul.bf16.gmra.mxu0 %v14782_v4 }
 0x3bf   : > { %v15077_v49 = vpop.f32.mrf.mxu3 }
 0x3c0   : > { %v15088_v8 = vpop.f32.mrf.mxu2 }
 0x3c1   : > { %v15093_v61 = vpop.f32.mrf.mxu1 }
 0x3c3   : > { %v15101_v40 = vpop.f32.mrf.mxu0 }
 0x3c4   : > { %20221 = vst [vmem:[#allocation29_spill] sm:$0xff] %v15101_v40 }
 0x3c7   : > { %v15125_v46 = vpop.f32.mrf.mxu3 }
 0x3c8   : > { %v15136_v59 = vpop.f32.mrf.mxu2 }
 0x3c9   : > { %v15145_v9 = vpop.f32.mrf.mxu1 }
 0x3cb   : > { %v15153_v13 = vpop.f32.mrf.mxu0 }
 0x3cc   : > { %20222 = vst [vmem:[#allocation30_spill] sm:$0xff] %v15153_v13  ;;  %3083 = vmatmul.bf16.gmra.mxu1 %v15138_v53  ;;  %3181 = vmatmul.bf16.gmra.mxu3 %v15140_v56 }
 0x3cd   : > { %4008 = vmatmul.bf16.gmra.mxu2 %v14851_v55 }
 0x3ce   : > { %4204 = vmatmul.bf16.gmra.mxu0 %v14851_v55 }
 0x3cf   : > { %v15183_v20 = vpop.f32.mrf.mxu3 }
 0x3d0   : > { %v15194_v5 = vpop.f32.mrf.mxu2 }
 0x3d1   : > { %v15199_v48 = vpop.f32.mrf.mxu1 }
 0x3d3   : > { %v15207_v10 = vpop.f32.mrf.mxu0 }
 0x3d4   : > { %20223 = vst [vmem:[#allocation31_spill] sm:$0xff] %v15207_v10 }
 0x3d7   : > { %v15231_v11 = vpop.f32.mrf.mxu3 }
 0x3d8   : > { %v15242_v47 = vpop.f32.mrf.mxu2 }
 0x3d9   : > { %v15251_v62 = vpop.f32.mrf.mxu1 }
 0x3db   : > { %v15259_v17 = vpop.f32.mrf.mxu0 }
 0x3dc   : > { %20225 = vst [vmem:[#allocation33_spill] sm:$0xff] %v15259_v17  ;;  %3088 = vmatmul.bf16.gmra.mxu1 %v15244_v27  ;;  %3186 = vmatmul.bf16.gmra.mxu3 %v15246_v33 }
 0x3dd   : > { %4013 = vmatmul.bf16.gmra.mxu2 %v14913_v25 }
 0x3de   : > { %4209 = vmatmul.bf16.gmra.mxu0 %v14913_v25 }
 0x3df   : > { %v15271_v36 = vpop.f32.mrf.mxu3 }
 0x3e0   : > { %v15273_v6 = vpop.f32.mrf.mxu2 }
 0x3e1   : > { %v15275_v52 = vpop.f32.mrf.mxu1 }
 0x3e3   : > { %v15277_v19 = vpop.f32.mrf.mxu0 }
 0x3e4   : > { %20226 = vst [vmem:[#allocation34_spill] sm:$0xff] %v15277_v19 }
 0x3e7   : > { %v15283_v2 = vpop.f32.mrf.mxu3 }
 0x3e8   : > { %v15285_v18 = vpop.f32.mrf.mxu2 }
 0x3e9   : > { %v15291_v32 = vpop.f32.mrf.mxu1 }
 0x3eb   : > { %v15293_v23 = vpop.f32.mrf.mxu0 }
 0x3ec   : > { %20229 = vst [vmem:[#allocation37_spill] sm:$0xff] %v15293_v23  ;;  %3093 = vmatmul.bf16.gmra.mxu1 %v15287_v15  ;;  %3191 = vmatmul.bf16.gmra.mxu3 %v15289_v16  ;;  %v15314_v23 = vld [vmem:[%s20097_s5] ss:$0 sm:$0xff] }
 0x3ed   : > { %4018 = vmatmul.bf16.gmra.mxu2 %v14935_v35  ;;  %v3011_v17 = vadd.f32 %v15314_v23, %v15045_v22  ;;  %v12828_v22 = vld [vmem:[%s20098_s6 + $0xac] sm:$0xf]  ;;  %v3016_v58 = vadd.f32 %v15314_v23, %v15145_v9  ;;  %v3018_v9 = vadd.f32 %v15314_v23, %v15199_v48 }
 0x3ee   : > { %4214 = vmatmul.bf16.gmra.mxu0 %v14935_v35 }
 0x3ef   : > { %v15305_v34 = vpop.f32.mrf.mxu3 }
 0x3f0   : > { %v15307_v38 = vpop.f32.mrf.mxu2 }
 0x3f1   : > { %v15309_v50 = vpop.f32.mrf.mxu1 }
 0x3f3   : > { %v15316_v19 = vpop.f32.mrf.mxu0 }
 0x3f4   : > { %20230 = vst [vmem:[#allocation38_spill] sm:$0xff] %v15316_v19  ;;  %v3013_v19 = vadd.f32 %v15314_v23, %v15093_v61 }
 0x3f7   : > { %v15320_v10 = vpop.f32.mrf.mxu3 }
 0x3f8   : > { %20231 = vst [vmem:[#allocation39_spill] sm:$0xff] %v15320_v10  ;;  %v15322_v13 = vpop.f32.mrf.mxu2 }
 0x3f9   : > { %v3059_v24 = vpop.f32.mrf.mxu1 }
 0x3fa   : > { %v3060_v51 = vadd.f32 %v3059_v24, %v3011_v17  ;;  %v11069_v17 = vld [vmem:[%s20098_s6 + $0xb8] sm:$0xf0] }
 0x3fb   : > { %v15324_v40 = vpop.f32.mrf.mxu0 }
 0x3fc   : > { %20232 = vst [vmem:[#allocation40_spill] sm:$0xff] %v15324_v40  ;;  %4032 = vmatmul.bf16.vlgmr.msra.gmra.mxu1 %v14955_v41  ;;  %4130 = vmatmul.bf16.vlgmr.msra.gmra.mxu3 %v14957_v43  ;;  %v3109_v0 = vadd.f32 %v15088_v8, %v3060_v51  ;;  %v11072_v40 = vor.u32 %v12828_v22, %v11069_v17 }
 0x3fd   : > { %4081 = vmatmul.bf16.vlgmr.msra.gmra.mxu2 %v14784_v30 }
 0x3fe   : > { %4375 = vmatmul.bf16.vlgmr.msra.gmra.mxu0 %v14780_v31 }
 0x3ff   : > { %v3157_v24 = vpop.f32.mrf.mxu3  ;;  %4565 = vmatpush.bf16.msrb.mxu0 %v11072_v40 }
 0x400   : > { %v15339_v43 = vpop.f32.mrf.mxu2  ;;  %v15341_v8 = vadd.f32 %v3157_v24, %v3109_v0  ;;  %v3021_v0 = vadd.f32 %v15314_v23, %v15251_v62  ;;  %v12820_v62 = vld [vmem:[%s20098_s6 + $0x6c] sm:$0xf] }
 0x401   : > { %v3061_v51 = vpop.f32.mrf.mxu1 }
 0x402   : > { %v3062_v31 = vadd.f32 %v3061_v51, %v3013_v19 }
 0x403   : > { %v15343_v30 = vpop.f32.mrf.mxu0 }
 0x404   : > { %20233 = vst [vmem:[#allocation41_spill] sm:$0xff] %v15343_v30  ;;  %v3111_v41 = vadd.f32 %v15136_v59, %v3062_v31 }
 0x407   : > { %v3159_v10 = vpop.f32.mrf.mxu3 }
 0x408   : > { %v15348_v35 = vpop.f32.mrf.mxu2  ;;  %v15350_v22 = vadd.f32 %v3159_v10, %v3111_v41  ;;  %v12824_v41 = vld [vmem:[%s20098_s6 + $0x8c] sm:$0xf] }
 0x409   : > { %v3064_v61 = vpop.f32.mrf.mxu1 }
 0x40a   : > { %v3065_v17 = vadd.f32 %v3064_v61, %v3016_v58  ;;  %v11053_v58 = vld [vmem:[%s20098_s6 + $0x98] sm:$0xf0] }
 0x40b   : > { %v15354_v24 = vpop.f32.mrf.mxu0  ;;  %v11056_v59 = vor.u32 %v12824_v41, %v11053_v58 }
 0x40c   : > { %20234 = vst [vmem:[#allocation42_spill] sm:$0xff] %v15354_v24  ;;  %4037 = vmatmul.bf16.gmra.mxu1 %v14977_v54  ;;  %4135 = vmatmul.bf16.gmra.mxu3 %v14979_v39  ;;  %v3114_v31 = vadd.f32 %v15194_v5, %v3065_v17 }
 0x40d   : > { %4086 = vmatmul.bf16.gmra.mxu2 %v14853_v60  ;;  %4566 = vmatpush.bf16.msrb.mxu0 %v11056_v59 }
 0x40e   : > { %4380 = vmatmul.bf16.gmra.mxu0 %v14849_v57 }
 0x40f   : > { %v3162_v40 = vpop.f32.mrf.mxu3 }
 0x410   : > { %v15369_v10 = vpop.f32.mrf.mxu2  ;;  %v15371_v5 = vadd.f32 %v3162_v40, %v3114_v31  ;;  %v3026_v31 = vadd.f32 %v15314_v23, %v15291_v32  ;;  %v12816_v32 = vld [vmem:[%s20098_s6 + $0x4c] sm:$0xf] }
 0x411   : > { %v3066_v19 = vpop.f32.mrf.mxu1 }
 0x412   : > { %v3067_v51 = vadd.f32 %v3066_v19, %v3018_v9  ;;  %v3023_v9 = vadd.f32 %v15314_v23, %v15275_v52 }
 0x413   : > { %v15373_v61 = vpop.f32.mrf.mxu0 }
 0x414   : > { %20235 = vst [vmem:[#allocation43_spill] sm:$0xff] %v15373_v61  ;;  %v3116_v17 = vadd.f32 %v15242_v47, %v3067_v51 }
 0x417   : > { %v3164_v24 = vpop.f32.mrf.mxu3 }
 0x418   : > { %v15378_v30 = vpop.f32.mrf.mxu2  ;;  %v15380_v41 = vadd.f32 %v3164_v24, %v3116_v17 }
 0x419   : > { %v3069_v48 = vpop.f32.mrf.mxu1 }
 0x41a   : > { %v3070_v58 = vadd.f32 %v3069_v48, %v3021_v0  ;;  %v11037_v0 = vld [vmem:[%s20098_s6 + $0x78] sm:$0xf0] }
 0x41b   : > { %v15384_v40 = vpop.f32.mrf.mxu0  ;;  %v11040_v59 = vor.u32 %v12820_v62, %v11037_v0 }
 0x41c   : > { %20236 = vst [vmem:[#allocation44_spill] sm:$0xff] %v15384_v40  ;;  %4042 = vmatmul.bf16.gmra.mxu1 %v14999_v42  ;;  %4140 = vmatmul.bf16.gmra.mxu3 %v15001_v45  ;;  %v3119_v47 = vadd.f32 %v15273_v6, %v3070_v58 }
 0x41d   : > { %4091 = vmatmul.bf16.gmra.mxu2 %v14915_v21  ;;  %4567 = vmatpush.bf16.msrb.mxu0 %v11040_v59 }
 0x41e   : > { %4385 = vmatmul.bf16.gmra.mxu0 %v14911_v12 }
 0x41f   : > { %v3167_v24 = vpop.f32.mrf.mxu3 }
 0x420   : > { %v15399_v19 = vpop.f32.mrf.mxu2  ;;  %v15401_v6 = vadd.f32 %v3167_v24, %v3119_v47 }
 0x421   : > { %v3071_v51 = vpop.f32.mrf.mxu1 }
 0x422   : > { %v3072_v17 = vadd.f32 %v3071_v51, %v3023_v9  ;;  %v3028_v9 = vadd.f32 %v15314_v23, %v15309_v50 }
 0x423   : > { %v15403_v48 = vpop.f32.mrf.mxu0 }
 0x424   : > { %20237 = vst [vmem:[#allocation45_spill] sm:$0xff] %v15403_v48  ;;  %v3121_v58 = vadd.f32 %v15285_v18, %v3072_v17 }
 0x427   : > { %v3169_v40 = vpop.f32.mrf.mxu3 }
 0x428   : > { %v15408_v61 = vpop.f32.mrf.mxu2  ;;  %v15410_v62 = vadd.f32 %v3169_v40, %v3121_v58 }
 0x429   : > { %v3074_v52 = vpop.f32.mrf.mxu1 }
 0x42a   : > { %v3075_v0 = vadd.f32 %v3074_v52, %v3026_v31  ;;  %v11021_v31 = vld [vmem:[%s20098_s6 + $0x58] sm:$0xf0] }
 0x42b   : > { %v15414_v24 = vpop.f32.mrf.mxu0  ;;  %v11024_v59 = vor.u32 %v12816_v32, %v11021_v31 }
 0x42c   : > { %20238 = vst [vmem:[#allocation46_spill] sm:$0xff] %v15414_v24  ;;  %4047 = vmatmul.bf16.gmra.mxu1 %v15021_v3  ;;  %4145 = vmatmul.bf16.gmra.mxu3 %v15023_v28  ;;  %v3124_v18 = vadd.f32 %v15307_v38, %v3075_v0  ;;  %v3031_v24 = vadd.f32 %v15314_v23, %v15077_v49  ;;  %v12899_v49 = vld [vmem:[%s20098_s6 + $0x2e4] sm:$0xf] }
 0x42d   : > { %4096 = vmatmul.bf16.gmra.mxu2 %v14937_v44  ;;  %4568 = vmatpush.bf16.msrb.mxu0 %v11024_v59  ;;  %v12867_v59 = vld [vmem:[%s20098_s6 + $0x1e4] sm:$0xf] }
 0x42e   : > { %4390 = vmatmul.bf16.gmra.mxu0 %v14933_v29 }
 0x42f   : > { %v3172_v40 = vpop.f32.mrf.mxu3 }
 0x430   : > { %v15429_v51 = vpop.f32.mrf.mxu2  ;;  %v15431_v38 = vadd.f32 %v3172_v40, %v3124_v18  ;;  %v12895_v18 = vld [vmem:[%s20098_s6 + $0x2c4] sm:$0xf] }
 0x431   : > { %v3076_v17 = vpop.f32.mrf.mxu1 }
 0x432   : > { %v3077_v58 = vadd.f32 %v3076_v17, %v3028_v9  ;;  %v11349_v9 = vld [vmem:[%s20098_s6 + $0x2f0] sm:$0xf0] }
 0x433   : > { %v15433_v52 = vpop.f32.mrf.mxu0  ;;  %v11352_v17 = vor.u32 %v12899_v49, %v11349_v9  ;;  %v12863_v49 = vld [vmem:[%s20098_s6 + $0x1c4] sm:$0xf]  ;;  %v11205_v9 = vld [vmem:[%s20098_s6 + $0x1d0] sm:$0xf0] }
 0x434   : > { %20239 = vst [vmem:[#allocation47_spill] sm:$0xff] %v15433_v52  ;;  %v3126_v0 = vadd.f32 %v15322_v13, %v3077_v58  ;;  %v11221_v13 = vld [vmem:[%s20098_s6 + $0x1f0] sm:$0xf0]  ;;  %v12931_v58 = vld [vmem:[%s20098_s6 + $0x3e4] sm:$0xf] }
 0x435   : > { %4269 = vmatpush.bf16.msrb.mxu2 %v11352_v17  ;;  %v11208_v17 = vor.u32 %v12863_v49, %v11205_v9  ;;  %v12927_v52 = vld [vmem:[%s20098_s6 + $0x3c4] sm:$0xf] }
 0x436   : > { %v12859_v49 = vld [vmem:[%s20098_s6 + $0x1a4] sm:$0xf] }
 0x437   : > { %v3174_v47 = vpop.f32.mrf.mxu3 }
 0x438   : > { %v15438_v48 = vpop.f32.mrf.mxu2  ;;  %v15440_v32 = vadd.f32 %v3174_v47, %v3126_v0  ;;  %v11477_v0 = vld [vmem:[%s20098_s6 + $0x3f0] sm:$0xf0] }
 0x439   : > { %v3079_v50 = vpop.f32.mrf.mxu1 }
 0x43a   : > { %v3080_v31 = vadd.f32 %v3079_v50, %v3031_v24  ;;  %v11224_v24 = vor.u32 %v12867_v59, %v11221_v13  ;;  %v11005_v50 = vld [vmem:[%s20098_s6 + $0x38] sm:$0xf0] }
 0x43b   : > { %v15444_v40 = vpop.f32.mrf.mxu0 }
 0x43c   : > { %20240 = vst [vmem:[#allocation48_spill] sm:$0xff] %v15444_v40  ;;  %4052 = vmatmul.bf16.gmra.mxu1 %v15041_v7  ;;  %4150 = vmatmul.bf16.gmra.mxu3 %v15043_v63  ;;  %v3129_v47 = vadd.f32 %v15339_v43, %v3080_v31  ;;  %v12812_v43 = vld [vmem:[%s20098_s6 + $0x2c] sm:$0xf]  ;;  %v11480_v31 = vor.u32 %v12931_v58, %v11477_v0  ;;  %v11333_v0 = vld [vmem:[%s20098_s6 + $0x2d0] sm:$0xf0] }
 0x43d   : > { %4101 = vmatmul.bf16.gmra.mxu2 %v14959_v37  ;;  %4220 = vmatpush.bf16.msrb.mxu1 %v11224_v24  ;;  %v11008_v13 = vor.u32 %v12812_v43, %v11005_v50  ;;  %v3033_v40 = vadd.f32 %v15314_v23, %v15125_v46  ;;  %v11336_v50 = vor.u32 %v12895_v18, %v11333_v0  ;;  %v11461_v46 = vld [vmem:[%s20098_s6 + $0x3d0] sm:$0xf0]  ;;  %v12923_v0 = vld [vmem:[%s20098_s6 + $0x3a4] sm:$0xf] }
 0x43e   : > { %4395 = vmatmul.bf16.gmra.mxu0 %v14782_v4  ;;  %4318 = vmatpush.bf16.msrb.mxu3 %v11480_v31  ;;  %v11189_v18 = vld [vmem:[%s20098_s6 + $0x1b0] sm:$0xf0] }
 0x43f   : > { %v3177_v59 = vpop.f32.mrf.mxu3  ;;  %4569 = vmatpush.bf16.msrb.mxu0 %v11008_v13  ;;  %4270 = vmatpush.bf16.msrb.mxu2 %v11336_v50  ;;  %v12891_v13 = vld [vmem:[%s20098_s6 + $0x2a4] sm:$0xf] }
 0x440   : > { %v15486_v24 = vadd.f32 %v3177_v59, %v3129_v47  ;;  %v15488_v58 = vpop.f32.mrf.mxu2  ;;  %v11464_v59 = vor.u32 %v12927_v52, %v11461_v46  ;;  %v11317_v52 = vld [vmem:[%s20098_s6 + $0x2b0] sm:$0xf0] }
 0x441   : > { %v3081_v43 = vpop.f32.mrf.mxu1  ;;  %4221 = vmatpush.bf16.msrb.mxu1 %v11208_v17  ;;  %v11320_v17 = vor.u32 %v12891_v13, %v11317_v52  ;;  %v11301_v52 = vld [vmem:[%s20098_s6 + $0x290] sm:$0xf0] }
 0x442   : > { %v3082_v47 = vadd.f32 %v3081_v43, %v3033_v40  ;;  %4319 = vmatpush.bf16.msrb.mxu3 %v11464_v59  ;;  %v11192_v40 = vor.u32 %v12859_v49, %v11189_v18  ;;  %v11445_v43 = vld [vmem:[%s20098_s6 + $0x3b0] sm:$0xf0]  ;;  %v12887_v59 = vld [vmem:[%s20098_s6 + $0x284] sm:$0xf]  ;;  %v3036_v49 = vadd.f32 %v15314_v23, %v15183_v20 }
 0x443   : > { %v15499_v31 = vpop.f32.mrf.mxu0  ;;  %v11448_v50 = vor.u32 %v12923_v0, %v11445_v43  ;;  %4271 = vmatpush.bf16.msrb.mxu2 %v11320_v17  ;;  %v11304_v0 = vor.u32 %v12887_v59, %v11301_v52  ;;  %v12919_v43 = vld [vmem:[%s20098_s6 + $0x384] sm:$0xf]  ;;  %v11429_v20 = vld [vmem:[%s20098_s6 + $0x390] sm:$0xf0] }
 0x444   : > { %20241 = vst [vmem:[#allocation49_spill] sm:$0xff] %v15499_v31  ;;  %v3131_v9 = vadd.f32 %v15348_v35, %v3082_v47  ;;  %v12855_v35 = vld [vmem:[%s20098_s6 + $0x184] sm:$0xf]  ;;  %v11173_v47 = vld [vmem:[%s20098_s6 + $0x190] sm:$0xf0] }
 0x445   : > { %4222 = vmatpush.bf16.msrb.mxu1 %v11192_v40  ;;  %v11176_v40 = vor.u32 %v12855_v35, %v11173_v47  ;;  %v12851_v47 = vld [vmem:[%s20098_s6 + $0x164] sm:$0xf]  ;;  %v11157_v59 = vld [vmem:[%s20098_s6 + $0x170] sm:$0xf0] }
 0x446   : > { %4320 = vmatpush.bf16.msrb.mxu3 %v11448_v50  ;;  %v11432_v50 = vor.u32 %v12919_v43, %v11429_v20  ;;  %v12883_v52 = vld [vmem:[%s20098_s6 + $0x264] sm:$0xf]  ;;  %v11413_v20 = vld [vmem:[%s20098_s6 + $0x370] sm:$0xf0] }
 0x447   : > { %v3179_v46 = vpop.f32.mrf.mxu3  ;;  %4272 = vmatpush.bf16.msrb.mxu2 %v11304_v0  ;;  %v12915_v43 = vld [vmem:[%s20098_s6 + $0x364] sm:$0xf]  ;;  %v11397_v31 = vld [vmem:[%s20098_s6 + $0x350] sm:$0xf0] }
 0x448   : > { %v15531_v18 = vadd.f32 %v3179_v46, %v3131_v9  ;;  %v15533_v13 = vpop.f32.mrf.mxu2  ;;  %v12879_v9 = vld [vmem:[%s20098_s6 + $0x244] sm:$0xf] }
 0x449   : > { %v3084_v17 = vpop.f32.mrf.mxu1  ;;  %4223 = vmatpush.bf16.msrb.mxu1 %v11176_v40  ;;  %v11160_v40 = vor.u32 %v12851_v47, %v11157_v59 }
 0x44a   : > { %v3085_v46 = vadd.f32 %v3084_v17, %v3036_v49  ;;  %v11285_v17 = vld [vmem:[%s20098_s6 + $0x270] sm:$0xf0]  ;;  %4321 = vmatpush.bf16.msrb.mxu3 %v11432_v50  ;;  %v11416_v50 = vor.u32 %v12915_v43, %v11413_v20 }
 0x44b   : > { %v15546_v35 = vpop.f32.mrf.mxu0  ;;  %v11288_v0 = vor.u32 %v12883_v52, %v11285_v17  ;;  %v12847_v52 = vld [vmem:[%s20098_s6 + $0x144] sm:$0xf]  ;;  %v11141_v17 = vld [vmem:[%s20098_s6 + $0x150] sm:$0xf0] }
 0x44c   : > { %20242 = vst [vmem:[#allocation50_spill] sm:$0xff] %v15546_v35  ;;  %4057 = vmatmul.bf16.gmra.mxu1 %v15138_v53  ;;  %4155 = vmatmul.bf16.gmra.mxu3 %v15140_v56  ;;  %v3134_v49 = vadd.f32 %v15369_v10, %v3085_v46  ;;  %v12808_v10 = vld [vmem:[%s20098_s6 + $0xc] sm:$0xf]  ;;  %v10989_v46 = vld [vmem:[%s20098_s6 + $0x18] sm:$0xf0]  ;;  %v3038_v35 = vadd.f32 %v15314_v23, %v15231_v11 }
 0x44d   : > { %4106 = vmatmul.bf16.gmra.mxu2 %v14981_v1  ;;  %4224 = vmatpush.bf16.msrb.mxu1 %v11160_v40  ;;  %v10992_v59 = vor.u32 %v12808_v10, %v10989_v46  ;;  %v11144_v43 = vor.u32 %v12847_v52, %v11141_v17  ;;  %v12911_v46 = vld [vmem:[%s20098_s6 + $0x344] sm:$0xf] }
 0x44e   : > { %4400 = vmatmul.bf16.gmra.mxu0 %v14851_v55  ;;  %4273 = vmatpush.bf16.msrb.mxu2 %v11288_v0  ;;  %v11269_v0 = vld [vmem:[%s20098_s6 + $0x250] sm:$0xf0]  ;;  %v11400_v55 = vor.u32 %v12911_v46, %v11397_v31 }
 0x44f   : > { %v3182_v47 = vpop.f32.mrf.mxu3  ;;  %4570 = vmatpush.bf16.msrb.mxu0 %v10992_v59  ;;  %4322 = vmatpush.bf16.msrb.mxu3 %v11416_v50  ;;  %v11272_v10 = vor.u32 %v12879_v9, %v11269_v0  ;;  %v12843_v59 = vld [vmem:[%s20098_s6 + $0x124] sm:$0xf]  ;;  %v11125_v9 = vld [vmem:[%s20098_s6 + $0x130] sm:$0xf0] }
 0x450   : > { %v15588_v40 = vpop.f32.mrf.mxu2  ;;  %v12875_v50 = vld [vmem:[%s20098_s6 + $0x224] sm:$0xf]  ;;  %v11253_v31 = vld [vmem:[%s20098_s6 + $0x230] sm:$0xf0] }
 0x451   : > { %v3086_v20 = vpop.f32.mrf.mxu1  ;;  %4225 = vmatpush.bf16.msrb.mxu1 %v11144_v43  ;;  %v11256_v43 = vor.u32 %v12875_v50, %v11253_v31  ;;  %v12907_v0 = vld [vmem:[%s20098_s6 + $0x324] sm:$0xf] }
 0x452   : > { %v3087_v11 = vadd.f32 %v3086_v20, %v3038_v35  ;;  %4274 = vmatpush.bf16.msrb.mxu2 %v11272_v10  ;;  %v11128_v35 = vor.u32 %v12843_v59, %v11125_v9  ;;  %v11381_v20 = vld [vmem:[%s20098_s6 + $0x330] sm:$0xf0]  ;;  %v3041_v59 = vadd.f32 %v15314_v23, %v15271_v36  ;;  %v15631_v9 = vadd.f32 %v3182_v47, %v3134_v49 }
 0x453   : > { %v15599_v52 = vpop.f32.mrf.mxu0  ;;  %4323 = vmatpush.bf16.msrb.mxu3 %v11400_v55  ;;  %v11384_v10 = vor.u32 %v12907_v0, %v11381_v20  ;;  %v11109_v55 = vld [vmem:[%s20098_s6 + $0x110] sm:$0xf0] }
 0x454   : > { %20243 = vst [vmem:[#allocation51_spill] sm:$0xff] %v15599_v52  ;;  %v3136_v17 = vadd.f32 %v15378_v30, %v3087_v11  ;;  %v12839_v30 = vld [vmem:[%s20098_s6 + $0x104] sm:$0xf]  ;;  %v11365_v36 = vld [vmem:[%s20098_s6 + $0x310] sm:$0xf0] }
 0x455   : > { %4226 = vmatpush.bf16.msrb.mxu1 %v11128_v35  ;;  %v12871_v11 = vld [vmem:[%s20098_s6 + $0x204] sm:$0xf]  ;;  %v11112_v31 = vor.u32 %v12839_v30, %v11109_v55  ;;  %v3043_v55 = vadd.f32 %v15314_v23, %v15283_v2 }
 0x456   : > { %4275 = vmatpush.bf16.msrb.mxu2 %v11256_v43  ;;  %v11237_v43 = vld [vmem:[%s20098_s6 + $0x210] sm:$0xf0]  ;;  %v12903_v52 = vld [vmem:[%s20098_s6 + $0x304] sm:$0xf] }
 0x457   : > { %v3184_v46 = vpop.f32.mrf.mxu3  ;;  %4324 = vmatpush.bf16.msrb.mxu3 %v11384_v10  ;;  %v11240_v20 = vor.u32 %v12871_v11, %v11237_v43 }
 0x458   : > { %v15633_v50 = vadd.f32 %v3184_v46, %v3136_v17  ;;  %v15635_v35 = vpop.f32.mrf.mxu2  ;;  %v11368_v17 = vor.u32 %v12903_v52, %v11365_v36 }
 0x459   : > { %v3089_v0 = vpop.f32.mrf.mxu1  ;;  %4227 = vmatpush.bf16.msrb.mxu1 %v11112_v31 }
 0x45a   : > { %v3090_v47 = vadd.f32 %v3089_v0, %v3041_v59  ;;  %4276 = vmatpush.bf16.msrb.mxu2 %v11240_v20 }
 0x45b   : > { %v15648_v46 = vpop.f32.mrf.mxu0  ;;  %4325 = vmatpush.bf16.msrb.mxu3 %v11368_v17 }
 0x45c   : > { %20244 = vst [vmem:[#allocation52_spill] sm:$0xff] %v15648_v46  ;;  %4062 = vmatmul.bf16.gmra.mxu1 %v15244_v27  ;;  %4160 = vmatmul.bf16.gmra.mxu3 %v15246_v33  ;;  %v3139_v10 = vadd.f32 %v15399_v19, %v3090_v47  ;;  %v3046_v19 = vadd.f32 %v15314_v23, %v15305_v34 }
 0x45d   : > { %4111 = vmatmul.bf16.gmra.mxu2 %v15003_v14 }
 0x45e   : > { %4405 = vmatmul.bf16.gmra.mxu0 %v14913_v25 }
 0x45f   : > { %v3187_v30 = vpop.f32.mrf.mxu3 }
 0x460   : > { %v15657_v11 = vpop.f32.mrf.mxu2  ;;  %v3188_v20 = vadd.f32 %v3187_v30, %v3139_v10  ;;  %v20248_v10 = vld [vmem:[#allocation39_spill] sm:$0xff] }
 0x461   : > { %v3091_v52 = vpop.f32.mrf.mxu1  ;;  %v3048_v30 = vadd.f32 %v15314_v23, %v20248_v10 }
 0x462   : > { %v3092_v59 = vadd.f32 %v3091_v52, %v3043_v55 }
 0x463   : > { %v15659_v31 = vpop.f32.mrf.mxu0 }
 0x464   : > { %20245 = vst [vmem:[#allocation53_spill] sm:$0xff] %v15659_v31  ;;  %v3141_v43 = vadd.f32 %v15408_v61, %v3092_v59  ;;  %v20247_v61 = vld [vmem:[#allocation23_spill] sm:$0xff] }
 0x465   : > { %v15680_v59 = vld [vmem:[%s20099_s7] sm:$0xf] }
 0x466   : > { %20249 = vst [vmem:[#allocation39_spill] sm:$0xff] %v15680_v59 }
 0x467   : > { %v3189_v0 = vpop.f32.mrf.mxu3 }
 0x468   : > { %v3190_v36 = vadd.f32 %v3189_v0, %v3141_v43  ;;  %v15664_v47 = vpop.f32.mrf.mxu2 }
 0x469   : > { %v3094_v17 = vpop.f32.mrf.mxu1 }
 0x46a   : > { %v4797_v49 = vpack.c.bf16 %v3190_v36, %v3188_v20  ;;  %v3095_v46 = vadd.f32 %v3094_v17, %v3046_v19  ;;  %v20251_v36 = vld [vmem:[#allocation28_spill] sm:$0xff] }
 0x46b   : > { %v15666_v2 = vpop.f32.mrf.mxu0 }
 0x46c   : > { %20246 = vst [vmem:[#allocation54_spill] sm:$0xff] %v15666_v2  ;;  %4067 = vmatmul.bf16.gmra.mxu1 %v15287_v15  ;;  %4165 = vmatmul.bf16.gmra.mxu3 %v15289_v16  ;;  %v3144_v55 = vadd.f32 %v15429_v51, %v3095_v46  ;;  %v15685_v51 = vperm.slane %v15680_v59, 0 }
 0x46d   : > { %4116 = vmatmul.bf16.gmra.mxu2 %v15025_v26 }
 0x46e   : > { %4410 = vmatmul.bf16.gmra.mxu0 %v20247_v61  ;;  %v3985_v23 = vadd.f32 %v20251_v36, %v15685_v51 }
 0x46f   : > { %v3192_v34 = vpop.f32.mrf.mxu3 }
 0x470   : > { %v15675_v52 = vpop.f32.mrf.mxu2  ;;  %v3193_v17 = vadd.f32 %v3192_v34, %v3144_v55  ;;  %v20257_v55 = vld [vmem:[#allocation29_spill] sm:$0xff] }
 0x471   : > { %v3096_v43 = vpop.f32.mrf.mxu1  ;;  %v3987_v34 = vadd.f32 %v20257_v55, %v15685_v51 }
 0x472   : > { %v3097_v0 = vadd.f32 %v3096_v43, %v3048_v30  ;;  %v20253_v30 = vld [vmem:[#allocation24_spill] sm:$0xff]  ;;  %v20254_v43 = vld [vmem:[#allocation21_spill] sm:$0xff] }
 0x473   : > { %v15682_v19 = vpop.f32.mrf.mxu0 }
 0x474   : > { %20250 = vst [vmem:[#allocation55_spill] sm:$0xff] %v15682_v19  ;;  %v3146_v46 = vadd.f32 %v15438_v48, %v3097_v0  ;;  %v20255_v19 = vld [vmem:[#allocation25_spill] sm:$0xff]  ;;  %v20256_v48 = vld [vmem:[#allocation20_spill] sm:$0xff] }
 0x477   : > { %v3194_v20 = vpop.f32.mrf.mxu3 }
 0x478   : > { %v3195_v10 = vadd.f32 %v3194_v20, %v3146_v46  ;;  %v15690_v2 = vpop.f32.mrf.mxu2 }
 0x479   : > { %v4033_v31 = vpop.f32.mrf.mxu1 }
 0x47a   : > { %v4798_v61 = vpack.c.bf16 %v3195_v10, %v3193_v17  ;;  %v4034_v16 = vadd.f32 %v4033_v31, %v3985_v23  ;;  %v20258_v10 = vld [vmem:[#allocation30_spill] sm:$0xff] }
 0x47b   : > { %v15692_v26 = vpop.f32.mrf.mxu0 }
 0x47c   : > { %20252 = vst [vmem:[#allocation28_spill] sm:$0xff] %v15692_v26  ;;  %4228 = vmatmul.bf16.vlgmr.msrb.gmra.mxu1 %v20253_v30  ;;  %4895 = vmatpush.bf16.xpose.msra.mxu0 %v4798_v61  ;;  %v3990_v26 = vadd.f32 %v20258_v10, %v15685_v51 }
 0x47d   : > { %4277 = vmatmul.bf16.vlgmr.msrb.gmra.mxu2 %v20254_v43  ;;  %4326 = vmatmul.bf16.vlgmr.msrb.gmra.mxu3 %v20255_v19 }
 0x47e   : > { %4571 = vmatmul.bf16.vlgmr.msrb.gmra.mxu0 %v20256_v48 }
 0x47f   : > { %v4131_v0 = vpop.f32.mrf.mxu3 }
 0x480   : > { %v4082_v46 = vpop.f32.mrf.mxu2 }
 0x481   : > { %v4083_v20 = vadd.f32 %v4082_v46, %v4034_v16  ;;  %v4035_v36 = vpop.f32.mrf.mxu1  ;;  %v20259_v16 = vpack.c.bf16 %v15633_v50, %v15631_v9  ;;  %v20261_v50 = vpack.c.bf16 %v15531_v18, %v15486_v24  ;;  %v11403_v24 = vld [vmem:[%s20098_s6 + $0x348] sm:$0xf] }
 0x482   : > { %v4036_v17 = vadd.f32 %v4035_v36, %v3987_v34 }
 0x483   : > { %v15700_v31 = vadd.f32 %v4131_v0, %v4083_v20  ;;  %v15702_v23 = vpop.f32.mrf.mxu0 }
 0x484   : > { %4896 = vmatpush.bf16.xpose.msra.mxu0 %v4797_v49 }
 0x487   : > { %v4133_v61 = vpop.f32.mrf.mxu3 }
 0x488   : > { %v4084_v19 = vpop.f32.mrf.mxu2 }
 0x489   : > { %v4085_v43 = vadd.f32 %v4084_v19, %v4036_v17  ;;  %v4038_v48 = vpop.f32.mrf.mxu1  ;;  %v20260_v19 = vld [vmem:[#allocation31_spill] sm:$0xff] }
 0x48a   : > { %v4039_v30 = vadd.f32 %v4038_v48, %v3990_v26 }
 0x48b   : > { %v15706_v59 = vadd.f32 %v4133_v61, %v4085_v43  ;;  %v15708_v55 = vpop.f32.mrf.mxu0  ;;  %v3992_v43 = vadd.f32 %v20260_v19, %v15685_v51  ;;  %v20262_v61 = vld [vmem:[#allocation33_spill] sm:$0xff] }
 0x48c   : > { %4233 = vmatmul.bf16.gmra.mxu1 %v14977_v54  ;;  %4897 = vmatpush.bf16.xpose.msra.mxu0 %v20259_v16 }
 0x48d   : > { %4282 = vmatmul.bf16.gmra.mxu2 %v14853_v60  ;;  %4331 = vmatmul.bf16.gmra.mxu3 %v14979_v39 }
 0x48e   : > { %4576 = vmatmul.bf16.gmra.mxu0 %v14849_v57  ;;  %v3995_v57 = vadd.f32 %v20262_v61, %v15685_v51 }
 0x48f   : > { %v4136_v26 = vpop.f32.mrf.mxu3 }
 0x490   : > { %v4087_v0 = vpop.f32.mrf.mxu2 }
 0x491   : > { %v4088_v34 = vadd.f32 %v4087_v0, %v4039_v30  ;;  %v4040_v46 = vpop.f32.mrf.mxu1 }
 0x492   : > { %v4041_v20 = vadd.f32 %v4040_v46, %v3992_v43  ;;  %v20264_v43 = vld [vmem:[#allocation34_spill] sm:$0xff] }
 0x493   : > { %v15721_v36 = vadd.f32 %v4136_v26, %v4088_v34  ;;  %v15723_v9 = vpop.f32.mrf.mxu0  ;;  %v20263_v26 = vpack.c.bf16 %v15440_v32, %v15431_v38  ;;  %v3997_v0 = vadd.f32 %v20264_v43, %v15685_v51  ;;  %v11227_v38 = vld [vmem:[%s20098_s6 + $0x1e8] sm:$0xf]  ;;  %v12870_v32 = vld [vmem:[%s20098_s6 + $0x1f4] sm:$0xf0] }
 0x494   : > { %4898 = vmatpush.bf16.xpose.msra.mxu0 %v20261_v50 }
 0x497   : > { %v4138_v17 = vpop.f32.mrf.mxu3 }
 0x498   : > { %v4089_v10 = vpop.f32.mrf.mxu2 }
 0x499   : > { %v4090_v48 = vadd.f32 %v4089_v10, %v4041_v20  ;;  %v4043_v16 = vpop.f32.mrf.mxu1  ;;  %v11211_v10 = vld [vmem:[%s20098_s6 + $0x1c8] sm:$0xf] }
 0x49a   : > { %v4044_v19 = vadd.f32 %v4043_v16, %v3995_v57  ;;  %v20265_v57 = vpack.c.bf16 %v15410_v62, %v15401_v6  ;;  %v11195_v62 = vld [vmem:[%s20098_s6 + $0x1a8] sm:$0xf] }
 0x49b   : > { %v15730_v49 = vadd.f32 %v4138_v17, %v4090_v48  ;;  %v15732_v30 = vpop.f32.mrf.mxu0  ;;  %v12866_v48 = vld [vmem:[%s20098_s6 + $0x1d4] sm:$0xf0] }
 0x49c   : > { %4238 = vmatmul.bf16.gmra.mxu1 %v14999_v42  ;;  %4899 = vmatpush.bf16.xpose.msra.mxu0 %v20263_v26  ;;  %v20266_v26 = vld [vmem:[#allocation37_spill] sm:$0xff] }
 0x49d   : > { %4287 = vmatmul.bf16.gmra.mxu2 %v14915_v21  ;;  %4336 = vmatmul.bf16.gmra.mxu3 %v15001_v45 }
 0x49e   : > { %4581 = vmatmul.bf16.gmra.mxu0 %v14911_v12  ;;  %v11228_v12 = vor.u32 %v12870_v32, %v11227_v38 }
 0x49f   : > { %v4141_v18 = vpop.f32.mrf.mxu3 }
 0x4a0   : > { %v4092_v34 = vpop.f32.mrf.mxu2  ;;  %4416 = vmatpush.bf16.msra.mxu1 %v11228_v12  ;;  %v12914_v12 = vld [vmem:[%s20098_s6 + $0x354] sm:$0xf0] }
 0x4a1   : > { %v4093_v46 = vadd.f32 %v4092_v34, %v4044_v19  ;;  %v4045_v20 = vpop.f32.mrf.mxu1  ;;  %v11212_v19 = vor.u32 %v12866_v48, %v11211_v10  ;;  %v12858_v10 = vld [vmem:[%s20098_s6 + $0x194] sm:$0xf0] }
 0x4a2   : > { %v4046_v50 = vadd.f32 %v4045_v20, %v3997_v0  ;;  %v20268_v48 = vld [vmem:[#allocation38_spill] sm:$0xff] }
 0x4a3   : > { %v15751_v17 = vadd.f32 %v4141_v18, %v4093_v46  ;;  %v15753_v61 = vpop.f32.mrf.mxu0  ;;  %v4000_v18 = vadd.f32 %v20266_v26, %v15685_v51  ;;  %v12862_v46 = vld [vmem:[%s20098_s6 + $0x1b4] sm:$0xf0] }
 0x4a4   : > { %4900 = vmatpush.bf16.xpose.msra.mxu0 %v20265_v57  ;;  %4417 = vmatpush.bf16.msra.mxu1 %v11212_v19  ;;  %v11196_v32 = vor.u32 %v12862_v46, %v11195_v62  ;;  %v11179_v57 = vld [vmem:[%s20098_s6 + $0x188] sm:$0xf] }
 0x4a7   : > { %v4143_v16 = vpop.f32.mrf.mxu3 }
 0x4a8   : > { %v4094_v43 = vpop.f32.mrf.mxu2  ;;  %4418 = vmatpush.bf16.msra.mxu1 %v11196_v32  ;;  %v20269_v32 = vpack.c.bf16 %v15350_v22, %v15341_v8  ;;  %v11131_v8 = vld [vmem:[%s20098_s6 + $0x128] sm:$0xf]  ;;  %v12846_v22 = vld [vmem:[%s20098_s6 + $0x134] sm:$0xf0] }
 0x4a9   : > { %v4095_v0 = vadd.f32 %v4094_v43, %v4046_v50  ;;  %v4048_v34 = vpop.f32.mrf.mxu1  ;;  %v20267_v50 = vpack.c.bf16 %v15380_v41, %v15371_v5  ;;  %v11180_v41 = vor.u32 %v12858_v10, %v11179_v57  ;;  %v12850_v57 = vld [vmem:[%s20098_s6 + $0x154] sm:$0xf0] }
 0x4aa   : > { %v4049_v6 = vadd.f32 %v4048_v34, %v4000_v18 }
 0x4ab   : > { %v15772_v20 = vadd.f32 %v4143_v16, %v4095_v0  ;;  %v15774_v38 = vpop.f32.mrf.mxu0  ;;  %v4002_v16 = vadd.f32 %v20268_v48, %v15685_v51  ;;  %v12854_v0 = vld [vmem:[%s20098_s6 + $0x174] sm:$0xf0] }
 0x4ac   : > { %4243 = vmatmul.bf16.gmra.mxu1 %v15021_v3  ;;  %4901 = vmatpush.bf16.xpose.msra.mxu0 %v20267_v50  ;;  %v11147_v50 = vld [vmem:[%s20098_s6 + $0x148] sm:$0xf] }
 0x4ad   : > { %4292 = vmatmul.bf16.gmra.mxu2 %v14937_v44  ;;  %4341 = vmatmul.bf16.gmra.mxu3 %v15023_v28 }
 0x4ae   : > { %4586 = vmatmul.bf16.gmra.mxu0 %v14933_v29  ;;  %4419 = vmatpush.bf16.msra.mxu1 %v11180_v41  ;;  %v11163_v29 = vld [vmem:[%s20098_s6 + $0x168] sm:$0xf] }
 0x4af   : > { %v4146_v5 = vpop.f32.mrf.mxu3  ;;  %v11164_v46 = vor.u32 %v12854_v0, %v11163_v29  ;;  %v12902_v29 = vld [vmem:[%s20098_s6 + $0x2f4] sm:$0xf0] }
 0x4b0   : > { %v4097_v19 = vpop.f32.mrf.mxu2 }
 0x4b1   : > { %v4098_v26 = vadd.f32 %v4097_v19, %v4049_v6  ;;  %v4050_v18 = vpop.f32.mrf.mxu1  ;;  %v4005_v6 = vadd.f32 %v15488_v58, %v15685_v51 }
 0x4b2   : > { %v4051_v43 = vadd.f32 %v4050_v18, %v4002_v16  ;;  %4420 = vmatpush.bf16.msra.mxu1 %v11164_v46  ;;  %v11132_v18 = vor.u32 %v12846_v22, %v11131_v8 }
 0x4b3   : > { %v15799_v34 = vadd.f32 %v4146_v5, %v4098_v26  ;;  %v15801_v62 = vpop.f32.mrf.mxu0  ;;  %v11148_v5 = vor.u32 %v12850_v57, %v11147_v50  ;;  %v11115_v57 = vld [vmem:[%s20098_s6 + $0x108] sm:$0xf] }
 0x4b4   : > { %4902 = vmatpush.bf16.xpose.msra.mxu0 %v20269_v32  ;;  %v11483_v32 = vld [vmem:[%s20098_s6 + $0x3e8] sm:$0xf] }
 0x4b6   : > { %4421 = vmatpush.bf16.msra.mxu1 %v11148_v5 }
 0x4b7   : > { %v4148_v10 = vpop.f32.mrf.mxu3 }
 0x4b8   : > { %v4099_v41 = vpop.f32.mrf.mxu2 }
 0x4b9   : > { %v4100_v48 = vadd.f32 %v4099_v41, %v4051_v43  ;;  %v4053_v16 = vpop.f32.mrf.mxu1  ;;  %v11355_v43 = vld [vmem:[%s20098_s6 + $0x2e8] sm:$0xf] }
 0x4ba   : > { %v4054_v19 = vadd.f32 %v4053_v16, %v4005_v6  ;;  %v11356_v0 = vor.u32 %v12902_v29, %v11355_v43  ;;  %v12934_v6 = vld [vmem:[%s20098_s6 + $0x3f4] sm:$0xf0]  ;;  %4422 = vmatpush.bf16.msra.mxu1 %v11132_v18  ;;  %v12868_v16 = vld [vmem:[%s20098_s6 + $0x1ec] sm:$0xf]  ;;  %v11229_v18 = vld [vmem:[%s20098_s6 + $0x1f8] sm:$0xf0]  ;;  %v4007_v43 = vadd.f32 %v15533_v13, %v15685_v51 }
 0x4bb   : > { %v15820_v58 = vadd.f32 %v4148_v10, %v4100_v48  ;;  %v15822_v26 = vpop.f32.mrf.mxu0  ;;  %v11484_v50 = vor.u32 %v12934_v6, %v11483_v32  ;;  %v12842_v10 = vld [vmem:[%s20098_s6 + $0x114] sm:$0xf0]  ;;  %v11339_v48 = vld [vmem:[%s20098_s6 + $0x2c8] sm:$0xf]  ;;  %v11232_v32 = vor.u32 %v12868_v16, %v11229_v18 }
 0x4bc   : > { %4248 = vmatmul.bf16.gmra.mxu1 %v15041_v7  ;;  %4465 = vmatpush.bf16.msra.mxu2 %v11356_v0  ;;  %v11116_v41 = vor.u32 %v12842_v10, %v11115_v57  ;;  %v11467_v6 = vld [vmem:[%s20098_s6 + $0x3c8] sm:$0xf]  ;;  %v12930_v57 = vld [vmem:[%s20098_s6 + $0x3d4] sm:$0xf0] }
 0x4bd   : > { %4297 = vmatmul.bf16.gmra.mxu2 %v14959_v37  ;;  %4346 = vmatmul.bf16.gmra.mxu3 %v15043_v63  ;;  %v11323_v13 = vld [vmem:[%s20098_s6 + $0x2a8] sm:$0xf]  ;;  %v12926_v18 = vld [vmem:[%s20098_s6 + $0x3b4] sm:$0xf0] }
 0x4be   : > { %4591 = vmatmul.bf16.gmra.mxu0 %v14782_v4  ;;  %v12898_v4 = vld [vmem:[%s20098_s6 + $0x2d4] sm:$0xf0]  ;;  %4514 = vmatpush.bf16.msra.mxu3 %v11484_v50  ;;  %v11468_v50 = vor.u32 %v12930_v57, %v11467_v6  ;;  %v11307_v6 = vld [vmem:[%s20098_s6 + $0x288] sm:$0xf] }
 0x4bf   : > { %v4151_v5 = vpop.f32.mrf.mxu3  ;;  %v11340_v22 = vor.u32 %v12898_v4, %v11339_v48  ;;  %4423 = vmatpush.bf16.msra.mxu1 %v11116_v41  ;;  %v12864_v4 = vld [vmem:[%s20098_s6 + $0x1cc] sm:$0xf] }
 0x4c0   : > { %v4102_v8 = vpop.f32.mrf.mxu2 }
 0x4c1   : > { %v4103_v29 = vadd.f32 %v4102_v8, %v4054_v19  ;;  %v4055_v0 = vpop.f32.mrf.mxu1  ;;  %4466 = vmatpush.bf16.msra.mxu2 %v11340_v22  ;;  %v12894_v19 = vld [vmem:[%s20098_s6 + $0x2b4] sm:$0xf0]  ;;  %v11451_v22 = vld [vmem:[%s20098_s6 + $0x3a8] sm:$0xf] }
 0x4c2   : > { %4515 = vmatpush.bf16.msra.mxu3 %v11468_v50  ;;  %v11324_v41 = vor.u32 %v12894_v19, %v11323_v13  ;;  %v4056_v16 = vadd.f32 %v4055_v0, %v4007_v43  ;;  %v12890_v43 = vld [vmem:[%s20098_s6 + $0x294] sm:$0xf0]  ;;  %v12860_v0 = vld [vmem:[%s20098_s6 + $0x1ac] sm:$0xf]  ;;  %v11197_v13 = vld [vmem:[%s20098_s6 + $0x1b8] sm:$0xf0] }
 0x4c3   : > { %v15868_v10 = vadd.f32 %v4151_v5, %v4103_v29  ;;  %v15870_v48 = vpop.f32.mrf.mxu0  ;;  %4612 = vmatpush.bf16.msrb.mxu1 %v11232_v32  ;;  %v11213_v5 = vld [vmem:[%s20098_s6 + $0x1d8] sm:$0xf0]  ;;  %v11452_v29 = vor.u32 %v12926_v18, %v11451_v22  ;;  %v11308_v50 = vor.u32 %v12890_v43, %v11307_v6  ;;  %v12886_v6 = vld [vmem:[%s20098_s6 + $0x274] sm:$0xf0]  ;;  %v12856_v43 = vld [vmem:[%s20098_s6 + $0x18c] sm:$0xf] }
 0x4c4   : > { %20270 = vst [vmem:[#allocation20_spill] sm:$0xff] %v15870_v48  ;;  %v11216_v8 = vor.u32 %v12864_v4, %v11213_v5  ;;  %v11435_v5 = vld [vmem:[%s20098_s6 + $0x388] sm:$0xf]  ;;  %v12935_v48 = vld [vmem:[#allocation3 + $0x30] sm:$0xff] }
 0x4c5   : > { %4467 = vmatpush.bf16.msra.mxu2 %v11324_v41  ;;  %v11200_v41 = vor.u32 %v12860_v0, %v11197_v13  ;;  %v11181_v0 = vld [vmem:[%s20098_s6 + $0x198] sm:$0xf0] }
 0x4c6   : > { %4516 = vmatpush.bf16.msra.mxu3 %v11452_v29  ;;  %v11184_v13 = vor.u32 %v12856_v43, %v11181_v0 }
 0x4c7   : > { %v4153_v32 = vpop.f32.mrf.mxu3  ;;  %4613 = vmatpush.bf16.msrb.mxu1 %v11216_v8  ;;  %v12922_v8 = vld [vmem:[%s20098_s6 + $0x394] sm:$0xf0] }
 0x4c8   : > { %v4104_v57 = vpop.f32.mrf.mxu2  ;;  %v11436_v22 = vor.u32 %v12922_v8, %v11435_v5  ;;  %v20272_v5 = vld [vmem:[#allocation22_spill] sm:$0xff] }
 0x4c9   : > { %v4105_v19 = vadd.f32 %v4104_v57, %v4056_v16  ;;  %v4058_v4 = vpop.f32.mrf.mxu1  ;;  %4468 = vmatpush.bf16.msra.mxu2 %v11308_v50  ;;  %v11291_v16 = vld [vmem:[%s20098_s6 + $0x268] sm:$0xf]  ;;  %v4010_v57 = vadd.f32 %v15588_v40, %v15685_v51 }
 0x4ca   : > { %4517 = vmatpush.bf16.msra.mxu3 %v11436_v22  ;;  %v11275_v22 = vld [vmem:[%s20098_s6 + $0x248] sm:$0xf] }
 0x4cb   : > { %v15908_v18 = vadd.f32 %v4153_v32, %v4105_v19  ;;  %v15910_v29 = vpop.f32.mrf.mxu0  ;;  %4614 = vmatpush.bf16.msrb.mxu1 %v11200_v41  ;;  %v11292_v32 = vor.u32 %v12886_v6, %v11291_v16  ;;  %v11419_v19 = vld [vmem:[%s20098_s6 + $0x368] sm:$0xf]  ;;  %v12918_v41 = vld [vmem:[%s20098_s6 + $0x374] sm:$0xf0]  ;;  %v12852_v6 = vld [vmem:[%s20098_s6 + $0x16c] sm:$0xf] }
 0x4cc   : > { %20271 = vst [vmem:[#allocation29_spill] sm:$0xff] %v15910_v29  ;;  %4253 = vmatmul.bf16.gmra.mxu1 %v15138_v53  ;;  %v11420_v8 = vor.u32 %v12918_v41, %v11419_v19  ;;  %v12882_v16 = vld [vmem:[%s20098_s6 + $0x254] sm:$0xf0]  ;;  %v4059_v19 = vadd.f32 %v4058_v4, %v4010_v57  ;;  %v12848_v57 = vld [vmem:[%s20098_s6 + $0x14c] sm:$0xf] }
 0x4cd   : > { %4302 = vmatmul.bf16.gmra.mxu2 %v14981_v1  ;;  %4351 = vmatmul.bf16.gmra.mxu3 %v15140_v56  ;;  %v11276_v0 = vor.u32 %v12882_v16, %v11275_v22  ;;  %v12878_v4 = vld [vmem:[%s20098_s6 + $0x234] sm:$0xf0] }
 0x4ce   : > { %4596 = vmatmul.bf16.gmra.mxu0 %v20272_v5  ;;  %4469 = vmatpush.bf16.msra.mxu2 %v11292_v32  ;;  %v11165_v32 = vld [vmem:[%s20098_s6 + $0x178] sm:$0xf0] }
 0x4cf   : > { %v4156_v40 = vpop.f32.mrf.mxu3  ;;  %4615 = vmatpush.bf16.msrb.mxu1 %v11184_v13  ;;  %4518 = vmatpush.bf16.msra.mxu3 %v11420_v8  ;;  %v4012_v13 = vadd.f32 %v15635_v35, %v15685_v51  ;;  %v11168_v5 = vor.u32 %v12852_v6, %v11165_v32  ;;  %v11404_v8 = vor.u32 %v12914_v12, %v11403_v24  ;;  %v11259_v35 = vld [vmem:[%s20098_s6 + $0x228] sm:$0xf]  ;;  %v11149_v24 = vld [vmem:[%s20098_s6 + $0x158] sm:$0xf0] }
 0x4d0   : > { %v4107_v43 = vpop.f32.mrf.mxu2  ;;  %v11260_v16 = vor.u32 %v12878_v4, %v11259_v35  ;;  %v11387_v32 = vld [vmem:[%s20098_s6 + $0x328] sm:$0xf]  ;;  %v11133_v35 = vld [vmem:[%s20098_s6 + $0x138] sm:$0xf0] }
 0x4d1   : > { %v4060_v41 = vpop.f32.mrf.mxu1  ;;  %v4108_v12 = vadd.f32 %v4107_v43, %v4059_v19  ;;  %v12874_v43 = vld [vmem:[%s20098_s6 + $0x214] sm:$0xf0] }
 0x4d2   : > { %4470 = vmatpush.bf16.msra.mxu2 %v11276_v0  ;;  %v4061_v6 = vadd.f32 %v4060_v41, %v4012_v13  ;;  %v11152_v0 = vor.u32 %v12848_v57, %v11149_v24  ;;  %v12844_v13 = vld [vmem:[%s20098_s6 + $0x12c] sm:$0xf] }
 0x4d3   : > { %v15958_v22 = vpop.f32.mrf.mxu0  ;;  %4616 = vmatpush.bf16.msrb.mxu1 %v11168_v5  ;;  %4519 = vmatpush.bf16.msra.mxu3 %v11404_v8  ;;  %v12910_v5 = vld [vmem:[%s20098_s6 + $0x334] sm:$0xf0]  ;;  %v11243_v8 = vld [vmem:[%s20098_s6 + $0x208] sm:$0xf]  ;;  %v15990_v4 = vadd.f32 %v4156_v40, %v4108_v12  ;;  %v11136_v24 = vor.u32 %v12844_v13, %v11133_v35  ;;  %v12840_v40 = vld [vmem:[%s20098_s6 + $0x10c] sm:$0xf] }
 0x4d4   : > { %20273 = vst [vmem:[#allocation30_spill] sm:$0xff] %v15958_v22  ;;  %v11388_v46 = vor.u32 %v12910_v5, %v11387_v32  ;;  %v11244_v41 = vor.u32 %v12874_v43, %v11243_v8  ;;  %v12906_v32 = vld [vmem:[%s20098_s6 + $0x314] sm:$0xf0]  ;;  %v11117_v12 = vld [vmem:[%s20098_s6 + $0x118] sm:$0xf0] }
 0x4d6   : > { %4471 = vmatpush.bf16.msra.mxu2 %v11260_v16 }
 0x4d7   : > { %v4158_v50 = vpop.f32.mrf.mxu3  ;;  %4617 = vmatpush.bf16.msrb.mxu1 %v11152_v0  ;;  %4520 = vmatpush.bf16.msra.mxu3 %v11388_v46  ;;  %v11371_v0 = vld [vmem:[%s20098_s6 + $0x308] sm:$0xf] }
 0x4d8   : > { %v4109_v19 = vpop.f32.mrf.mxu2  ;;  %v11372_v5 = vor.u32 %v12906_v32, %v11371_v0 }
 0x4d9   : > { %v4110_v57 = vadd.f32 %v4109_v19, %v4061_v6  ;;  %v4063_v16 = vpop.f32.mrf.mxu1  ;;  %v11120_v6 = vor.u32 %v12840_v40, %v11117_v12 }
 0x4da   : > { %4472 = vmatpush.bf16.msra.mxu2 %v11244_v41  ;;  %v4017_v41 = vadd.f32 %v15664_v47, %v15685_v51 }
 0x4db   : > { %v15998_v46 = vadd.f32 %v4158_v50, %v4110_v57  ;;  %v16000_v8 = vpop.f32.mrf.mxu0  ;;  %4618 = vmatpush.bf16.msrb.mxu1 %v11136_v24  ;;  %4521 = vmatpush.bf16.msra.mxu3 %v11372_v5  ;;  %v4015_v50 = vadd.f32 %v15657_v11, %v15685_v51 }
 0x4dc   : > { %20274 = vst [vmem:[#allocation31_spill] sm:$0xff] %v16000_v8  ;;  %4258 = vmatmul.bf16.gmra.mxu1 %v15244_v27 }
 0x4dd   : > { %v6109_v43 = vpack.c.bf16 %v15998_v46, %v15990_v4  ;;  %4307 = vmatmul.bf16.gmra.mxu2 %v15003_v14  ;;  %4356 = vmatmul.bf16.gmra.mxu3 %v15246_v33  ;;  %v4064_v35 = vadd.f32 %v4063_v16, %v4015_v50  ;;  %v20277_v16 = vld [vmem:[#allocation27_spill] sm:$0xff] }
 0x4de   : > { %4601 = vmatmul.bf16.gmra.mxu0 %v14913_v25  ;;  %v4020_v25 = vadd.f32 %v15675_v52, %v15685_v51  ;;  %v20279_v50 = vld [vmem:[#allocation23_spill] sm:$0xff] }
 0x4df   : > { %v4161_v13 = vpop.f32.mrf.mxu3  ;;  %4619 = vmatpush.bf16.msrb.mxu1 %v11120_v6  ;;  %v20278_v6 = vld [vmem:[#allocation36_spill] sm:$0xff] }
 0x4e0   : > { %v4112_v19 = vpop.f32.mrf.mxu2 }
 0x4e1   : > { %v4065_v57 = vpop.f32.mrf.mxu1  ;;  %v4113_v11 = vadd.f32 %v4112_v19, %v4064_v35 }
 0x4e2   : > { %v4066_v0 = vadd.f32 %v4065_v57, %v4017_v41 }
 0x4e3   : > { %v16018_v24 = vpop.f32.mrf.mxu0  ;;  %v4162_v5 = vadd.f32 %v4161_v13, %v4113_v11  ;;  %v4022_v13 = vadd.f32 %v15690_v2, %v15685_v51 }
 0x4e4   : > { %20275 = vst [vmem:[#allocation33_spill] sm:$0xff] %v16018_v24 }
 0x4e7   : > { %v4163_v32 = vpop.f32.mrf.mxu3 }
 0x4e8   : > { %v4114_v4 = vpop.f32.mrf.mxu2 }
 0x4e9   : > { %v4115_v46 = vadd.f32 %v4114_v4, %v4066_v0  ;;  %v4068_v40 = vpop.f32.mrf.mxu1  ;;  %v20281_v0 = vld [vmem:[#allocation39_spill] sm:$0xff] }
 0x4ea   : > { %v4069_v35 = vadd.f32 %v4068_v40, %v4020_v25  ;;  %v20284_v40 = vld [vmem:[#allocation24_spill] sm:$0xff] }
 0x4eb   : > { %v4164_v12 = vadd.f32 %v4163_v32, %v4115_v46  ;;  %v16020_v8 = vpop.f32.mrf.mxu0  ;;  %v16033_v32 = vperm.slane %v20281_v0, 1  ;;  %v20282_v46 = vld [vmem:[#allocation40_spill] sm:$0xff]  ;;  %v20285_v0 = vld [vmem:[#allocation21_spill] sm:$0xff] }
 0x4ec   : > { %20276 = vst [vmem:[#allocation34_spill] sm:$0xff] %v16020_v8  ;;  %4263 = vmatmul.bf16.gmra.mxu1 %v15287_v15 }
 0x4ed   : > { %v6113_v47 = vpack.c.bf16 %v4164_v12, %v4162_v5  ;;  %4312 = vmatmul.bf16.gmra.mxu2 %v20277_v16  ;;  %4361 = vmatmul.bf16.gmra.mxu3 %v20278_v6  ;;  %v4181_v12 = vadd.f32 %v20282_v46, %v16033_v32 }
 0x4ee   : > { %4606 = vmatmul.bf16.gmra.mxu0 %v20279_v50 }
 0x4ef   : > { %v4166_v19 = vpop.f32.mrf.mxu3 }
 0x4f0   : > { %v4117_v41 = vpop.f32.mrf.mxu2 }
 0x4f1   : > { %v4070_v57 = vpop.f32.mrf.mxu1  ;;  %v4118_v52 = vadd.f32 %v4117_v41, %v4069_v35  ;;  %v20286_v41 = vld [vmem:[#allocation25_spill] sm:$0xff] }
 0x4f2   : > { %v4071_v4 = vadd.f32 %v4070_v57, %v4022_v13  ;;  %v20287_v13 = vld [vmem:[#allocation41_spill] sm:$0xff] }
 0x4f3   : > { %v16030_v11 = vpop.f32.mrf.mxu0  ;;  %v4167_v50 = vadd.f32 %v4166_v19, %v4118_v52  ;;  %v4183_v35 = vadd.f32 %v20287_v13, %v16033_v32  ;;  %v12936_v13 = vld [vmem:[#allocation3] sm:$0xff] }
 0x4f4   : > { %20280 = vst [vmem:[#allocation37_spill] sm:$0xff] %v16030_v11 }
 0x4f7   : > { %v4168_v5 = vpop.f32.mrf.mxu3 }
 0x4f8   : > { %v4119_v8 = vpop.f32.mrf.mxu2 }
 0x4f9   : > { %v4120_v24 = vadd.f32 %v4119_v8, %v4071_v4  ;;  %v4229_v22 = vpop.f32.mrf.mxu1 }
 0x4fa   : > { %v4230_v29 = vadd.f32 %v4229_v22, %v4181_v12 }
 0x4fb   : > { %v4169_v2 = vadd.f32 %v4168_v5, %v4120_v24  ;;  %v16037_v51 = vpop.f32.mrf.mxu0  ;;  %v20289_v5 = vld [vmem:[#allocation42_spill] sm:$0xff] }
 0x4fc   : > { %20283 = vst [vmem:[#allocation38_spill] sm:$0xff] %v16037_v51  ;;  %4424 = vmatmul.bf16.vlgmr.msra.gmra.mxu1 %v20284_v40  ;;  %v4186_v46 = vadd.f32 %v20289_v5, %v16033_v32 }
 0x4fd   : > { %v6117_v25 = vpack.c.bf16 %v4169_v2, %v4167_v50  ;;  %4473 = vmatmul.bf16.vlgmr.msra.gmra.mxu2 %v20285_v0  ;;  %4522 = vmatmul.bf16.vlgmr.msra.gmra.mxu3 %v20286_v41 }
 0x4fe   : > { %4903 = vmatmul.bf16.vlgmr.msra.gmra.mxu0 %v12935_v48 }
 0x4ff   : > { %6121 = vmatpush.bf16.msra.mxu1 %v6117_v25 }
 0x500   : > { %v4278_v19 = vpop.f32.mrf.mxu2  ;;  %v4327_v8 = vpop.f32.mrf.mxu3 }
 0x501   : > { %v4279_v57 = vadd.f32 %v4278_v19, %v4230_v29  ;;  %v4231_v22 = vpop.f32.mrf.mxu1  ;;  %v20293_v19 = vld [vmem:[#allocation43_spill] sm:$0xff] }
 0x502   : > { %v4232_v52 = vadd.f32 %v4231_v22, %v4183_v35  ;;  %v20291_v35 = vpack.c.bf16 %v15908_v18, %v15868_v10 }
 0x503   : > { %v16044_v24 = vadd.f32 %v4327_v8, %v4279_v57  ;;  %v16046_v4 = vpop.f32.mrf.mxu0  ;;  %6122 = vmatpush.bf16.msra.mxu1 %v6113_v47  ;;  %v20292_v47 = vpack.c.bf16 %v15820_v58, %v15799_v34  ;;  %v4188_v8 = vadd.f32 %v20293_v19, %v16033_v32  ;;  %v20296_v34 = vpack.c.bf16 %v15730_v49, %v15721_v36  ;;  %v20297_v58 = vld [vmem:[#allocation44_spill] sm:$0xff]  ;;  %v20300_v36 = vld [vmem:[#allocation45_spill] sm:$0xff] }
 0x504   : > { %20288 = vst [vmem:[#allocation22_spill] sm:$0xff] %v16046_v4  ;;  %v12942_v4 = vld [vmem:[#allocation3 + $0x48] sm:$0xff] }
 0x507   : > { %6123 = vmatpush.bf16.msra.mxu1 %v6109_v43 }
 0x508   : > { %v4280_v12 = vpop.f32.mrf.mxu2  ;;  %v4329_v48 = vpop.f32.mrf.mxu3 }
 0x509   : > { %v4281_v50 = vadd.f32 %v4280_v12, %v4232_v52  ;;  %v4234_v2 = vpop.f32.mrf.mxu1  ;;  %v20295_v12 = vpack.c.bf16 %v15772_v20, %v15751_v17  ;;  %v20299_v17 = vpack.c.bf16 %v15706_v59, %v15700_v31  ;;  %v4193_v20 = vadd.f32 %v20300_v36, %v16033_v32  ;;  %v20304_v36 = vld [vmem:[#allocation47_spill] sm:$0xff] }
 0x50a   : > { %v4235_v25 = vadd.f32 %v4234_v2, %v4186_v46 }
 0x50b   : > { %v16050_v51 = vadd.f32 %v4329_v48, %v4281_v50  ;;  %v16052_v29 = vpop.f32.mrf.mxu0  ;;  %6124 = vmatpush.bf16.msra.mxu1 %v20291_v35  ;;  %v4191_v48 = vadd.f32 %v20297_v58, %v16033_v32 }
 0x50c   : > { %20290 = vst [vmem:[#allocation23_spill] sm:$0xff] %v16052_v29  ;;  %4429 = vmatmul.bf16.gmra.mxu1 %v14977_v54 }
 0x50d   : > { %4478 = vmatmul.bf16.gmra.mxu2 %v14853_v60  ;;  %4527 = vmatmul.bf16.gmra.mxu3 %v14979_v39 }
 0x50e   : > { %4908 = vmatmul.bf16.gmra.mxu0 %v12936_v13 }
 0x50f   : > { %6125 = vmatpush.bf16.msra.mxu1 %v20292_v47  ;;  %v12937_v47 = vld [vmem:[#allocation3 + $0x58] sm:$0xff] }
 0x510   : > { %v4283_v57 = vpop.f32.mrf.mxu2  ;;  %v4332_v10 = vpop.f32.mrf.mxu3 }
 0x511   : > { %v4284_v18 = vadd.f32 %v4283_v57, %v4235_v25  ;;  %v4236_v22 = vpop.f32.mrf.mxu1 }
 0x512   : > { %v4237_v52 = vadd.f32 %v4236_v22, %v4188_v8 }
 0x513   : > { %v16067_v5 = vadd.f32 %v4332_v10, %v4284_v18  ;;  %v16069_v46 = vpop.f32.mrf.mxu0  ;;  %6126 = vmatpush.bf16.msra.mxu1 %v20295_v12  ;;  %v20302_v12 = vld [vmem:[#allocation46_spill] sm:$0xff] }
 0x514   : > { %20294 = vst [vmem:[#allocation39_spill] sm:$0xff] %v16069_v46 }
 0x517   : > { %6127 = vmatpush.bf16.msra.mxu1 %v20296_v34  ;;  %v4196_v34 = vadd.f32 %v20302_v12, %v16033_v32 }
 0x518   : > { %v4285_v50 = vpop.f32.mrf.mxu2  ;;  %v4334_v2 = vpop.f32.mrf.mxu3 }
 0x519   : > { %v4286_v25 = vadd.f32 %v4285_v50, %v4237_v52  ;;  %v4239_v13 = vpop.f32.mrf.mxu1 }
 0x51a   : > { %v4240_v35 = vadd.f32 %v4239_v13, %v4191_v48  ;;  %v12938_v13 = vld [vmem:[#allocation3 + $0x18] sm:$0xff] }
 0x51b   : > { %v16079_v19 = vadd.f32 %v4334_v2, %v4286_v25  ;;  %v16081_v8 = vpop.f32.mrf.mxu0  ;;  %6128 = vmatpush.bf16.msra.mxu1 %v20299_v17 }
 0x51c   : > { %20298 = vst [vmem:[#allocation40_spill] sm:$0xff] %v16081_v8  ;;  %4434 = vmatmul.bf16.gmra.mxu1 %v14999_v42 }
 0x51d   : > { %4483 = vmatmul.bf16.gmra.mxu2 %v14915_v21  ;;  %4532 = vmatmul.bf16.gmra.mxu3 %v15001_v45 }
 0x51e   : > { %4913 = vmatmul.bf16.gmra.mxu0 %v12937_v47 }
 0x520   : > { %v4288_v57 = vpop.f32.mrf.mxu2  ;;  %v4337_v10 = vpop.f32.mrf.mxu3 }
 0x521   : > { %v4289_v18 = vadd.f32 %v4288_v57, %v4240_v35  ;;  %v4241_v22 = vpop.f32.mrf.mxu1  ;;  %v12939_v35 = vld [vmem:[#allocation3 + $0x50] sm:$0xff] }
 0x522   : > { %v4242_v52 = vadd.f32 %v4241_v22, %v4193_v20  ;;  %v4198_v20 = vadd.f32 %v20304_v36, %v16033_v32 }
 0x523   : > { %v16093_v59 = vadd.f32 %v4337_v10, %v4289_v18  ;;  %v16095_v31 = vpop.f32.mrf.mxu0 }
 0x524   : > { %20301 = vst [vmem:[#allocation24_spill] sm:$0xff] %v16095_v31 }
 0x528   : > { %v4290_v58 = vpop.f32.mrf.mxu2  ;;  %v4339_v48 = vpop.f32.mrf.mxu3 }
 0x529   : > { %v4291_v50 = vadd.f32 %v4290_v58, %v4242_v52  ;;  %v4244_v2 = vpop.f32.mrf.mxu1  ;;  %v20306_v58 = vld [vmem:[#allocation48_spill] sm:$0xff] }
 0x52a   : > { %v4245_v25 = vadd.f32 %v4244_v2, %v4196_v34 }
 0x52b   : > { %v16099_v47 = vadd.f32 %v4339_v48, %v4291_v50  ;;  %v16101_v17 = vpop.f32.mrf.mxu0  ;;  %v4201_v48 = vadd.f32 %v20306_v58, %v16033_v32 }
 0x52c   : > { %20303 = vst [vmem:[#allocation21_spill] sm:$0xff] %v16101_v17  ;;  %4439 = vmatmul.bf16.gmra.mxu1 %v15021_v3 }
 0x52d   : > { %4488 = vmatmul.bf16.gmra.mxu2 %v14937_v44  ;;  %4537 = vmatmul.bf16.gmra.mxu3 %v15023_v28 }
 0x52e   : > { %4918 = vmatmul.bf16.gmra.mxu0 %v12938_v13 }
 0x530   : > { %v4293_v57 = vpop.f32.mrf.mxu2  ;;  %v4342_v10 = vpop.f32.mrf.mxu3 }
 0x531   : > { %v4294_v18 = vadd.f32 %v4293_v57, %v4245_v25  ;;  %v4246_v22 = vpop.f32.mrf.mxu1  ;;  %v12900_v25 = vld [vmem:[%s20098_s6 + $0x2ec] sm:$0xf] }
 0x532   : > { %v4247_v52 = vadd.f32 %v4246_v22, %v4198_v20  ;;  %v11357_v20 = vld [vmem:[%s20098_s6 + $0x2f8] sm:$0xf0]  ;;  %v12896_v22 = vld [vmem:[%s20098_s6 + $0x2cc] sm:$0xf] }
 0x533   : > { %v16110_v12 = vadd.f32 %v4342_v10, %v4294_v18  ;;  %v16112_v34 = vpop.f32.mrf.mxu0  ;;  %v11360_v57 = vor.u32 %v12900_v25, %v11357_v20  ;;  %v11469_v20 = vld [vmem:[%s20098_s6 + $0x3d8] sm:$0xf0] }
 0x534   : > { %20305 = vst [vmem:[#allocation25_spill] sm:$0xff] %v16112_v34  ;;  %v20313_v34 = vld [vmem:[#allocation51_spill] sm:$0xff] }
 0x535   : > { %4661 = vmatpush.bf16.msrb.mxu2 %v11360_v57  ;;  %v4208_v31 = vadd.f32 %v20313_v34, %v16033_v32  ;;  %v11245_v34 = vld [vmem:[%s20098_s6 + $0x218] sm:$0xf0] }
 0x538   : > { %v4295_v50 = vpop.f32.mrf.mxu2  ;;  %v4344_v2 = vpop.f32.mrf.mxu3 }
 0x539   : > { %v4296_v43 = vadd.f32 %v4295_v50, %v4247_v52  ;;  %v4249_v49 = vpop.f32.mrf.mxu1  ;;  %v11341_v52 = vld [vmem:[%s20098_s6 + $0x2d8] sm:$0xf0] }
 0x53a   : > { %v4250_v13 = vadd.f32 %v4249_v49, %v4201_v48  ;;  %v11485_v49 = vld [vmem:[%s20098_s6 + $0x3f8] sm:$0xf0]  ;;  %v11344_v50 = vor.u32 %v12896_v22, %v11341_v52  ;;  %v20309_v52 = vld [vmem:[#allocation49_spill] sm:$0xff] }
 0x53b   : > { %v16116_v17 = vadd.f32 %v4344_v2, %v4296_v43  ;;  %v16118_v36 = vpop.f32.mrf.mxu0  ;;  %v12932_v43 = vld [vmem:[%s20098_s6 + $0x3ec] sm:$0xf] }
 0x53c   : > { %20307 = vst [vmem:[#allocation41_spill] sm:$0xff] %v16118_v36  ;;  %4444 = vmatmul.bf16.gmra.mxu1 %v15041_v7  ;;  %v11488_v18 = vor.u32 %v12932_v43, %v11485_v49  ;;  %4662 = vmatpush.bf16.msrb.mxu2 %v11344_v50  ;;  %v11453_v50 = vld [vmem:[%s20098_s6 + $0x3b8] sm:$0xf0] }
 0x53d   : > { %4493 = vmatmul.bf16.gmra.mxu2 %v14959_v37  ;;  %4542 = vmatmul.bf16.gmra.mxu3 %v15043_v63 }
 0x53e   : > { %4923 = vmatmul.bf16.gmra.mxu0 %v12939_v35  ;;  %4710 = vmatpush.bf16.msrb.mxu3 %v11488_v18  ;;  %v12928_v35 = vld [vmem:[%s20098_s6 + $0x3cc] sm:$0xf] }
 0x53f   : > { %v11472_v57 = vor.u32 %v12928_v35, %v11469_v20  ;;  %v12892_v18 = vld [vmem:[%s20098_s6 + $0x2ac] sm:$0xf] }
 0x540   : > { %v4298_v58 = vpop.f32.mrf.mxu2  ;;  %v4347_v48 = vpop.f32.mrf.mxu3  ;;  %v12888_v20 = vld [vmem:[%s20098_s6 + $0x28c] sm:$0xf] }
 0x541   : > { %v4299_v2 = vadd.f32 %v4298_v58, %v4250_v13  ;;  %v4251_v25 = vpop.f32.mrf.mxu1  ;;  %v11325_v13 = vld [vmem:[%s20098_s6 + $0x2b8] sm:$0xf0]  ;;  %v4203_v58 = vadd.f32 %v20309_v52, %v16033_v32 }
 0x542   : > { %4711 = vmatpush.bf16.msrb.mxu3 %v11472_v57  ;;  %v11328_v22 = vor.u32 %v12892_v18, %v11325_v13  ;;  %v11309_v57 = vld [vmem:[%s20098_s6 + $0x298] sm:$0xf0] }
 0x543   : > { %v16149_v43 = vadd.f32 %v4347_v48, %v4299_v2  ;;  %v16151_v49 = vpop.f32.mrf.mxu0  ;;  %v12924_v48 = vld [vmem:[%s20098_s6 + $0x3ac] sm:$0xf]  ;;  %v4252_v35 = vadd.f32 %v4251_v25, %v4203_v58  ;;  %v11312_v52 = vor.u32 %v12888_v20, %v11309_v57  ;;  %v11437_v25 = vld [vmem:[%s20098_s6 + $0x398] sm:$0xf0]  ;;  %v12940_v58 = vld [vmem:[#allocation3 + $0x68] sm:$0xff] }
 0x544   : > { %20308 = vst [vmem:[#allocation42_spill] sm:$0xff] %v16151_v49  ;;  %4663 = vmatpush.bf16.msrb.mxu2 %v11328_v22  ;;  %v11456_v2 = vor.u32 %v12924_v48, %v11453_v50  ;;  %v12920_v22 = vld [vmem:[%s20098_s6 + $0x38c] sm:$0xf] }
 0x545   : > { %v11440_v48 = vor.u32 %v12920_v22, %v11437_v25  ;;  %v11277_v22 = vld [vmem:[%s20098_s6 + $0x258] sm:$0xf0]  ;;  %v12912_v57 = vld [vmem:[%s20098_s6 + $0x34c] sm:$0xf] }
 0x546   : > { %4712 = vmatpush.bf16.msrb.mxu3 %v11456_v2  ;;  %v12884_v2 = vld [vmem:[%s20098_s6 + $0x26c] sm:$0xf] }
 0x548   : > { %v4300_v18 = vpop.f32.mrf.mxu2  ;;  %v4349_v13 = vpop.f32.mrf.mxu3  ;;  %4664 = vmatpush.bf16.msrb.mxu2 %v11312_v52  ;;  %v12880_v52 = vld [vmem:[%s20098_s6 + $0x24c] sm:$0xf] }
 0x549   : > { %v4301_v10 = vadd.f32 %v4300_v18, %v4252_v35  ;;  %v4254_v49 = vpop.f32.mrf.mxu1  ;;  %v11293_v35 = vld [vmem:[%s20098_s6 + $0x278] sm:$0xf0] }
 0x54a   : > { %4713 = vmatpush.bf16.msrb.mxu3 %v11440_v48  ;;  %v11296_v20 = vor.u32 %v12884_v2, %v11293_v35  ;;  %v11421_v18 = vld [vmem:[%s20098_s6 + $0x378] sm:$0xf0]  ;;  %v11280_v2 = vor.u32 %v12880_v52, %v11277_v22 }
 0x54b   : > { %v16179_v50 = vadd.f32 %v4349_v13, %v4301_v10  ;;  %v16181_v36 = vpop.f32.mrf.mxu0  ;;  %v12916_v10 = vld [vmem:[%s20098_s6 + $0x36c] sm:$0xf]  ;;  %v11261_v52 = vld [vmem:[%s20098_s6 + $0x238] sm:$0xf0] }
 0x54c   : > { %20310 = vst [vmem:[#allocation43_spill] sm:$0xff] %v16181_v36  ;;  %4449 = vmatmul.bf16.gmra.mxu1 %v15138_v53  ;;  %4665 = vmatpush.bf16.msrb.mxu2 %v11296_v20  ;;  %v11424_v13 = vor.u32 %v12916_v10, %v11421_v18  ;;  %v20311_v10 = vld [vmem:[#allocation50_spill] sm:$0xff] }
 0x54d   : > { %4498 = vmatmul.bf16.gmra.mxu2 %v14981_v1  ;;  %4547 = vmatmul.bf16.gmra.mxu3 %v15140_v56  ;;  %v4206_v18 = vadd.f32 %v20311_v10, %v16033_v32 }
 0x54e   : > { %4928 = vmatmul.bf16.gmra.mxu0 %v12940_v58  ;;  %4714 = vmatpush.bf16.msrb.mxu3 %v11424_v13  ;;  %v11405_v58 = vld [vmem:[%s20098_s6 + $0x358] sm:$0xf0]  ;;  %v12876_v13 = vld [vmem:[%s20098_s6 + $0x22c] sm:$0xf] }
 0x54f   : > { %v11408_v20 = vor.u32 %v12912_v57, %v11405_v58  ;;  %v11264_v22 = vor.u32 %v12876_v13, %v11261_v52  ;;  %v12908_v57 = vld [vmem:[%s20098_s6 + $0x32c] sm:$0xf]  ;;  %v11389_v58 = vld [vmem:[%s20098_s6 + $0x338] sm:$0xf0] }
 0x550   : > { %v4303_v25 = vpop.f32.mrf.mxu2  ;;  %v4352_v48 = vpop.f32.mrf.mxu3  ;;  %4666 = vmatpush.bf16.msrb.mxu2 %v11280_v2  ;;  %v4255_v2 = vadd.f32 %v4254_v49, %v4206_v18  ;;  %v11392_v10 = vor.u32 %v12908_v57, %v11389_v58 }
 0x551   : > { %v4256_v35 = vpop.f32.mrf.mxu1 }
 0x552   : > { %4715 = vmatpush.bf16.msrb.mxu3 %v11408_v20  ;;  %v4257_v8 = vadd.f32 %v4256_v35, %v4208_v31  ;;  %v12872_v20 = vld [vmem:[%s20098_s6 + $0x20c] sm:$0xf]  ;;  %v11373_v31 = vld [vmem:[%s20098_s6 + $0x318] sm:$0xf0] }
 0x553   : > { %v16214_v36 = vpop.f32.mrf.mxu0  ;;  %v11248_v13 = vor.u32 %v12872_v20, %v11245_v34 }
 0x554   : > { %20312 = vst [vmem:[#allocation44_spill] sm:$0xff] %v16214_v36  ;;  %4667 = vmatpush.bf16.msrb.mxu2 %v11264_v22  ;;  %v4304_v36 = vadd.f32 %v4303_v25, %v4255_v2  ;;  %v12904_v22 = vld [vmem:[%s20098_s6 + $0x30c] sm:$0xf]  ;;  %v12941_v25 = vld [vmem:[#allocation3 + $0x8] sm:$0xff] }
 0x555   : > { %v11376_v35 = vor.u32 %v12904_v22, %v11373_v31 }
 0x556   : > { %4716 = vmatpush.bf16.msrb.mxu3 %v11392_v10  ;;  %v16242_v2 = vadd.f32 %v4352_v48, %v4304_v36  ;;  %v20315_v36 = vld [vmem:[#allocation52_spill] sm:$0xff] }
 0x557   : > { %v4211_v48 = vadd.f32 %v20315_v36, %v16033_v32 }
 0x558   : > { %v4305_v49 = vpop.f32.mrf.mxu2  ;;  %v4354_v18 = vpop.f32.mrf.mxu3  ;;  %4668 = vmatpush.bf16.msrb.mxu2 %v11248_v13 }
 0x559   : > { %v4306_v52 = vadd.f32 %v4305_v49, %v4257_v8  ;;  %v4259_v46 = vpop.f32.mrf.mxu1 }
 0x55a   : > { %4717 = vmatpush.bf16.msrb.mxu3 %v11376_v35 }
 0x55b   : > { %v16244_v57 = vadd.f32 %v4354_v18, %v4306_v52  ;;  %v16246_v58 = vpop.f32.mrf.mxu0  ;;  %v20317_v18 = vld [vmem:[#allocation53_spill] sm:$0xff]  ;;  %v4260_v52 = vadd.f32 %v4259_v46, %v4211_v48  ;;  %v20319_v48 = vld [vmem:[#allocation54_spill] sm:$0xff] }
 0x55c   : > { %20314 = vst [vmem:[#allocation45_spill] sm:$0xff] %v16246_v58  ;;  %4454 = vmatmul.bf16.gmra.mxu1 %v15244_v27  ;;  %v4213_v13 = vadd.f32 %v20317_v18, %v16033_v32  ;;  %v4216_v18 = vadd.f32 %v20319_v48, %v16033_v32 }
 0x55d   : > { %4503 = vmatmul.bf16.gmra.mxu2 %v15003_v14  ;;  %4552 = vmatmul.bf16.gmra.mxu3 %v15246_v33 }
 0x55e   : > { %4933 = vmatmul.bf16.gmra.mxu0 %v12941_v25 }
 0x560   : > { %v4308_v10 = vpop.f32.mrf.mxu2  ;;  %v4357_v20 = vpop.f32.mrf.mxu3 }
 0x561   : > { %v4261_v34 = vpop.f32.mrf.mxu1  ;;  %v4309_v22 = vadd.f32 %v4308_v10, %v4260_v52 }
 0x562   : > { %v4262_v31 = vadd.f32 %v4261_v34, %v4213_v13 }
 0x563   : > { %v16255_v49 = vpop.f32.mrf.mxu0  ;;  %v4358_v25 = vadd.f32 %v4357_v20, %v4309_v22 }
 0x564   : > { %20316 = vst [vmem:[#allocation46_spill] sm:$0xff] %v16255_v49 }
 0x568   : > { %v4310_v35 = vpop.f32.mrf.mxu2  ;;  %v4359_v8 = vpop.f32.mrf.mxu3 }
 0x569   : > { %v4311_v58 = vadd.f32 %v4310_v35, %v4262_v31  ;;  %v4264_v29 = vpop.f32.mrf.mxu1  ;;  %v20322_v31 = vld [vmem:[#allocation28_spill] sm:$0xff] }
 0x56b   : > { %v4360_v11 = vadd.f32 %v4359_v8, %v4311_v58  ;;  %v16259_v33 = vpop.f32.mrf.mxu0  ;;  %v16271_v58 = vld [vmem:[%s20099_s7] sm:$0xf] }
 0x56c   : > { %20318 = vst [vmem:[#allocation47_spill] sm:$0xff] %v16259_v33  ;;  %4459 = vmatmul.bf16.gmra.mxu1 %v15287_v15  ;;  %v20321_v8 = vld [vmem:[#allocation55_spill] sm:$0xff] }
 0x56d   : > { %v6114_v36 = vpack.c.bf16 %v4360_v11, %v4358_v25  ;;  %4508 = vmatmul.bf16.gmra.mxu2 %v20277_v16  ;;  %4557 = vmatmul.bf16.gmra.mxu3 %v20278_v6  ;;  %v16274_v11 = vperm.slane %v16271_v58, 2  ;;  %v4218_v20 = vadd.f32 %v20321_v8, %v16033_v32  ;;  %v12943_v6 = vld [vmem:[#allocation3 + $0x40] sm:$0xff] }
 0x56e   : > { %4938 = vmatmul.bf16.gmra.mxu0 %v12942_v4  ;;  %v4265_v4 = vadd.f32 %v4264_v29, %v4216_v18 }
 0x56f   : > { %v4377_v35 = vadd.f32 %v20322_v31, %v16274_v11  ;;  %v4379_v29 = vadd.f32 %v15702_v23, %v16274_v11 }
 0x570   : > { %v4313_v46 = vpop.f32.mrf.mxu2  ;;  %v4362_v10 = vpop.f32.mrf.mxu3 }
 0x571   : > { %v4266_v34 = vpop.f32.mrf.mxu1  ;;  %v4314_v52 = vadd.f32 %v4313_v46, %v4265_v4 }
 0x572   : > { %v4267_v22 = vadd.f32 %v4266_v34, %v4218_v20 }
 0x573   : > { %v16266_v13 = vpop.f32.mrf.mxu0  ;;  %v4363_v16 = vadd.f32 %v4362_v10, %v4314_v52 }
 0x574   : > { %20320 = vst [vmem:[#allocation48_spill] sm:$0xff] %v16266_v13 }
 0x578   : > { %v4315_v25 = vpop.f32.mrf.mxu2  ;;  %v4364_v48 = vpop.f32.mrf.mxu3 }
 0x579   : > { %v4316_v13 = vadd.f32 %v4315_v25, %v4267_v22  ;;  %v4425_v49 = vpop.f32.mrf.mxu1 }
 0x57a   : > { %v4426_v33 = vadd.f32 %v4425_v49, %v4377_v35 }
 0x57b   : > { %v4365_v15 = vadd.f32 %v4364_v48, %v4316_v13  ;;  %v16280_v14 = vpop.f32.mrf.mxu0 }
 0x57c   : > { %5016 = vmax.xlane.f32.xlu0 %v16280_v14  ;;  %4620 = vmatmul.bf16.vlgmr.msrb.gmra.mxu1 %v20284_v40 }
 0x57d   : > { %v6118_v32 = vpack.c.bf16 %v4365_v15, %v4363_v16  ;;  %4669 = vmatmul.bf16.vlgmr.msrb.gmra.mxu2 %v20285_v0  ;;  %4718 = vmatmul.bf16.vlgmr.msrb.gmra.mxu3 %v20286_v41  ;;  %v20323_v15 = vpack.c.bf16 %v16244_v57, %v16242_v2  ;;  %v4382_v16 = vadd.f32 %v15708_v55, %v16274_v11 }
 0x57e   : > { %4943 = vmatmul.bf16.gmra.mxu0 %v12943_v6  ;;  %v20325_v2 = vpack.c.bf16 %v16116_v17, %v16110_v12  ;;  %v4384_v57 = vadd.f32 %v15723_v9, %v16274_v11  ;;  %v4387_v9 = vadd.f32 %v15732_v30, %v16274_v11 }
 0x57f   : > { %6210 = vmatpush.bf16.msra.mxu2 %v6118_v32 }
 0x580   : > { %v4474_v49 = vpop.f32.mrf.mxu2  ;;  %v4523_v46 = vpop.f32.mrf.mxu3 }
 0x581   : > { %v4475_v10 = vadd.f32 %v4474_v49, %v4426_v33  ;;  %v4427_v34 = vpop.f32.mrf.mxu1 }
 0x582   : > { %v4428_v18 = vadd.f32 %v4427_v34, %v4379_v29 }
 0x583   : > { %v16288_v13 = vadd.f32 %v4523_v46, %v4475_v10  ;;  %v16290_v8 = vpop.f32.mrf.mxu0  ;;  %6211 = vmatpush.bf16.msra.mxu2 %v6114_v36  ;;  %v20324_v36 = vpack.c.bf16 %v16179_v50, %v16149_v43 }
 0x584   : > { %5018 = vmax.xlane.f32.xlu0 %v16290_v8 }
 0x587   : > { %6212 = vmatpush.bf16.msra.mxu2 %v20323_v15 }
 0x588   : > { %v4476_v23 = vpop.f32.mrf.mxu2  ;;  %v4525_v6 = vpop.f32.mrf.mxu3 }
 0x589   : > { %v4477_v40 = vadd.f32 %v4476_v23, %v4428_v18  ;;  %v4430_v33 = vpop.f32.mrf.mxu1 }
 0x58a   : > { %v4431_v0 = vadd.f32 %v4430_v33, %v4382_v16 }
 0x58b   : > { %v16298_v41 = vadd.f32 %v4525_v6, %v4477_v40  ;;  %v16300_v20 = vpop.f32.mrf.mxu0  ;;  %6213 = vmatpush.bf16.msra.mxu2 %v20324_v36 }
 0x58c   : > { %5020 = vmax.xlane.f32.xlu1 %v16300_v20  ;;  %4625 = vmatmul.bf16.gmra.mxu1 %v14977_v54  ;;  %v12944_v54 = vld [vmem:[#allocation3 + $0x20] sm:$0xff] }
 0x58d   : > { %v6091_v55 = vpack.c.bf16 %v16298_v41, %v16288_v13  ;;  %4674 = vmatmul.bf16.gmra.mxu2 %v14853_v60  ;;  %4723 = vmatmul.bf16.gmra.mxu3 %v14979_v39  ;;  %v20326_v60 = vpack.c.bf16 %v16099_v47, %v16093_v59  ;;  %v20327_v39 = vpack.c.bf16 %v16079_v19, %v16067_v5  ;;  %v20359_v41 = vld [vmem:[#allocation24_spill] sm:$0xff] }
 0x58e   : > { %4948 = vmatmul.bf16.gmra.mxu0 %v12944_v54  ;;  %v20328_v59 = vpack.c.bf16 %v16050_v51, %v16044_v24  ;;  %v4389_v5 = vadd.f32 %v15753_v61, %v16274_v11 }
 0x58f   : > { %6214 = vmatpush.bf16.msra.mxu2 %v20325_v2 }
 0x590   : > { %v4479_v43 = vpop.f32.mrf.mxu2  ;;  %v4528_v50 = vpop.f32.mrf.mxu3 }
 0x591   : > { %v4480_v4 = vadd.f32 %v4479_v43, %v4431_v0  ;;  %v4432_v52 = vpop.f32.mrf.mxu1 }
 0x592   : > { %v4433_v22 = vadd.f32 %v4432_v52, %v4384_v57 }
 0x593   : > { %v16316_v31 = vadd.f32 %v4528_v50, %v4480_v4  ;;  %v16318_v35 = vpop.f32.mrf.mxu0  ;;  %6215 = vmatpush.bf16.msra.mxu2 %v20326_v60 }
 0x594   : > { %5022 = vmax.xlane.f32.xlu1 %v16318_v35 }
 0x597   : > { %6216 = vmatpush.bf16.msra.mxu2 %v20327_v39 }
 0x598   : > { %v4481_v17 = vpop.f32.mrf.mxu2  ;;  %v4530_v12 = vpop.f32.mrf.mxu3 }
 0x599   : > { %v4482_v25 = vadd.f32 %v4481_v17, %v4433_v22  ;;  %v4435_v48 = vpop.f32.mrf.mxu1 }
 0x59a   : > { %v4436_v32 = vadd.f32 %v4435_v48, %v4387_v9 }
 0x59b   : > { %v16329_v29 = vadd.f32 %v4530_v12, %v4482_v25  ;;  %v16331_v49 = vpop.f32.mrf.mxu0  ;;  %6217 = vmatpush.bf16.msra.mxu2 %v20328_v59  ;;  %v20329_v25 = vld [vmem:[#allocation20_spill] sm:$0xff] }
 0x59c   : > { %5024 = vmax.xlane.f32.xlu2 %v16331_v49  ;;  %4630 = vmatmul.bf16.gmra.mxu1 %v14999_v42  ;;  %v4392_v42 = vadd.f32 %v15774_v38, %v16274_v11  ;;  %v4394_v38 = vadd.f32 %v15801_v62, %v16274_v11 }
 0x59d   : > { %v6095_v30 = vpack.c.bf16 %v16329_v29, %v16316_v31  ;;  %4679 = vmatmul.bf16.gmra.mxu2 %v14915_v21  ;;  %4728 = vmatmul.bf16.gmra.mxu3 %v15001_v45  ;;  %v16525_v29 = vld [vmem:[#allocation4 + $0x30] sm:$0xff] }
 0x5a0   : > { %v4484_v19 = vpop.f32.mrf.mxu2  ;;  %v4533_v47 = vpop.f32.mrf.mxu3 }
 0x5a1   : > { %v4485_v46 = vadd.f32 %v4484_v19, %v4436_v32  ;;  %v4437_v10 = vpop.f32.mrf.mxu1 }
 0x5a2   : > { %v4438_v51 = vadd.f32 %v4437_v10, %v4389_v5  ;;  %v12945_v5 = vld [vmem:[#allocation3 + $0x10] sm:$0xff] }
 0x5a3   : > { %v16344_v24 = vadd.f32 %v4533_v47, %v4485_v46  ;;  %v16346_v34 = vpop.f32.mrf.mxu0  ;;  %4953 = vmatmul.bf16.gmra.mxu0 %v12945_v5 }
 0x5a4   : > { %5026 = vmax.xlane.f32.xlu2 %v16346_v34 }
 0x5a8   : > { %v4486_v21 = vpop.f32.mrf.mxu2  ;;  %v4535_v18 = vpop.f32.mrf.mxu3 }
 0x5a9   : > { %v4487_v45 = vadd.f32 %v4486_v21, %v4438_v51  ;;  %v4440_v15 = vpop.f32.mrf.mxu1  ;;  %v20331_v21 = vld [vmem:[#allocation29_spill] sm:$0xff] }
 0x5aa   : > { %v4441_v16 = vadd.f32 %v4440_v15, %v4392_v42  ;;  %v20333_v15 = vld [vmem:[#allocation30_spill] sm:$0xff] }
 0x5ab   : > { %v16351_v61 = vadd.f32 %v4535_v18, %v4487_v45  ;;  %v16353_v23 = vpop.f32.mrf.mxu0  ;;  %v4402_v18 = vadd.f32 %v20331_v21, %v16274_v11 }
 0x5ac   : > { %5028 = vmax.xlane.f32.xlu0 %v16353_v23  ;;  %4635 = vmatmul.bf16.gmra.mxu1 %v15021_v3  ;;  %v4397_v3 = vadd.f32 %v15822_v26, %v16274_v11 }
 0x5ad   : > { %v6099_v6 = vpack.c.bf16 %v16351_v61, %v16344_v24  ;;  %4684 = vmatmul.bf16.gmra.mxu2 %v14937_v44  ;;  %4733 = vmatmul.bf16.gmra.mxu3 %v15023_v28 }
 0x5b0   : > { %v4489_v40 = vpop.f32.mrf.mxu2  ;;  %v4538_v33 = vpop.f32.mrf.mxu3 }
 0x5b1   : > { %v4490_v0 = vadd.f32 %v4489_v40, %v4441_v16  ;;  %v4442_v36 = vpop.f32.mrf.mxu1 }
 0x5b2   : > { %v4443_v2 = vadd.f32 %v4442_v36, %v4394_v38 }
 0x5b3   : > { %v16363_v57 = vadd.f32 %v4538_v33, %v4490_v0  ;;  %v16365_v43 = vpop.f32.mrf.mxu0 }
 0x5b4   : > { %5030 = vmax.xlane.f32.xlu1 %v16365_v43 }
 0x5b8   : > { %v4491_v44 = vpop.f32.mrf.mxu2  ;;  %v4540_v50 = vpop.f32.mrf.mxu3 }
 0x5b9   : > { %v4492_v28 = vadd.f32 %v4491_v44, %v4443_v2  ;;  %v4445_v4 = vpop.f32.mrf.mxu1 }
 0x5ba   : > { %v4446_v52 = vadd.f32 %v4445_v4, %v4397_v3 }
 0x5bb   : > { %v16370_v62 = vadd.f32 %v4540_v50, %v4492_v28  ;;  %v16372_v22 = vpop.f32.mrf.mxu0  ;;  %v20335_v50 = vld [vmem:[#allocation26_spill] sm:$0xff]  ;;  %v20336_v28 = vld [vmem:[#allocation32_spill] sm:$0xff] }
 0x5bc   : > { %5032 = vmax.xlane.f32.xlu2 %v16372_v22  ;;  %4640 = vmatmul.bf16.gmra.mxu1 %v15041_v7  ;;  %v4399_v7 = vadd.f32 %v20329_v25, %v16274_v11  ;;  %v13731_v25 = vmov 0   ;;  %20358 = vst [vmem:[#allocation32_spill] sm:$0xff] %v16525_v29 }
 0x5bd   : > { %v6103_v54 = vpack.c.bf16 %v16370_v62, %v16363_v57  ;;  %4689 = vmatmul.bf16.gmra.mxu2 %v14959_v37  ;;  %4738 = vmatmul.bf16.gmra.mxu3 %v15043_v63  ;;  %v20354_v57 = vld [vmem:[#allocation39_spill] sm:$0xff] }
 0x5be   : > { %13427 = vset.pattern.permute.xlu2 %v13731_v25  ;;  %13428 = vset.pattern.permute.xlu0 %v13731_v25 }
 0x5bf   : > { %13429 = vset.pattern.permute.xlu1 %v13731_v25  ;;  %v16440_v25 = vld [vmem:[#allocation4 + $0x8] sm:$0xff] }
 0x5c0   : > { %v4494_v26 = vpop.f32.mrf.mxu2  ;;  %v4543_v60 = vpop.f32.mrf.mxu3 }
 0x5c1   : > { %v4495_v39 = vadd.f32 %v4494_v26, %v4446_v52  ;;  %v4447_v9 = vpop.f32.mrf.mxu1 }
 0x5c2   : > { %v4448_v48 = vadd.f32 %v4447_v9, %v4399_v7 }
 0x5c3   : > { %v16380_v17 = vadd.f32 %v4543_v60, %v4495_v39  ;;  %v16382_v12 = vpop.f32.mrf.mxu0  ;;  %v20337_v60 = vld [vmem:[#allocation31_spill] sm:$0xff] }
 0x5c4   : > { %5034 = vmax.xlane.f32.xlu0 %v16382_v12  ;;  %v4407_v39 = vadd.f32 %v20337_v60, %v16274_v11 }
 0x5c8   : > { %v4496_v32 = vpop.f32.mrf.mxu2  ;;  %v4545_v59 = vpop.f32.mrf.mxu3 }
 0x5c9   : > { %v4497_v37 = vadd.f32 %v4496_v32, %v4448_v48  ;;  %v4450_v19 = vpop.f32.mrf.mxu1 }
 0x5ca   : > { %v4451_v16 = vadd.f32 %v4450_v19, %v4402_v18  ;;  %v20341_v18 = vld [vmem:[#allocation35_spill] sm:$0xff] }
 0x5cb   : > { %v16387_v63 = vadd.f32 %v4545_v59, %v4497_v37  ;;  %v16389_v47 = vpop.f32.mrf.mxu0 }
 0x5cc   : > { %20330 = vst [vmem:[#allocation49_spill] sm:$0xff] %v16389_v47  ;;  %5036 = vmax.xlane.f32.xlu1 %v16389_v47  ;;  %4645 = vmatmul.bf16.gmra.mxu1 %v15138_v53  ;;  %v4404_v53 = vadd.f32 %v20333_v15, %v16274_v11 }
 0x5cd   : > { %v6107_v46 = vpack.c.bf16 %v16387_v63, %v16380_v17  ;;  %4694 = vmatmul.bf16.gmra.mxu2 %v14981_v1  ;;  %4743 = vmatmul.bf16.gmra.mxu3 %v15140_v56 }
 0x5d0   : > { %v4499_v10 = vpop.f32.mrf.mxu2  ;;  %v4548_v51 = vpop.f32.mrf.mxu3 }
 0x5d1   : > { %v4452_v42 = vpop.f32.mrf.mxu1  ;;  %v4500_v38 = vadd.f32 %v4499_v10, %v4451_v16  ;;  %v4984_v16 = vld [vmem:[#allocation4] sm:$0xff] }
 0x5d2   : > { %v4453_v40 = vadd.f32 %v4452_v42, %v4404_v53  ;;  %v20342_v53 = vld [vmem:[#allocation27_spill] sm:$0xff] }
 0x5d3   : > { %v16399_v45 = vpop.f32.mrf.mxu0  ;;  %v16404_v36 = vadd.f32 %v4548_v51, %v4500_v38  ;;  %v20343_v38 = vld [vmem:[#allocation36_spill] sm:$0xff] }
 0x5d4   : > { %20332 = vst [vmem:[#allocation50_spill] sm:$0xff] %v16399_v45  ;;  %5038 = vmax.xlane.f32.xlu2 %v16399_v45 }
 0x5d8   : > { %v4501_v33 = vpop.f32.mrf.mxu2  ;;  %v4550_v1 = vpop.f32.mrf.mxu3 }
 0x5d9   : > { %v4502_v0 = vadd.f32 %v4501_v33, %v4453_v40  ;;  %v4455_v56 = vpop.f32.mrf.mxu1 }
 0x5da   : > { %v4456_v48 = vadd.f32 %v4455_v56, %v4407_v39 }
 0x5db   : > { %v16406_v2 = vadd.f32 %v4550_v1, %v4502_v0  ;;  %v16408_v3 = vpop.f32.mrf.mxu0 }
 0x5dc   : > { %20334 = vst [vmem:[#allocation51_spill] sm:$0xff] %v16408_v3  ;;  %5040 = vmax.xlane.f32.xlu0 %v16408_v3  ;;  %4650 = vmatmul.bf16.gmra.mxu1 %v15244_v27  ;;  %v20339_v27 = vld [vmem:[#allocation33_spill] sm:$0xff] }
 0x5dd   : > { %v6111_v44 = vpack.c.bf16 %v16406_v2, %v16404_v36  ;;  %4699 = vmatmul.bf16.gmra.mxu2 %v20335_v50  ;;  %4748 = vmatmul.bf16.gmra.mxu3 %v20336_v28  ;;  %v4409_v7 = vadd.f32 %v20339_v27, %v16274_v11  ;;  %v20344_v50 = vld [vmem:[#allocation34_spill] sm:$0xff]  ;;  %v16485_v2 = vld [vmem:[#allocation4 + $0x20] sm:$0xff] }
 0x5de   : > { %v4412_v28 = vadd.f32 %v20344_v50, %v16274_v11  ;;  %20351 = vst [vmem:[#allocation28_spill] sm:$0xff] %v16485_v2 }
 0x5e0   : > { %v4504_v4 = vpop.f32.mrf.mxu2  ;;  %v4553_v52 = vpop.f32.mrf.mxu3 }
 0x5e1   : > { %v4457_v26 = vpop.f32.mrf.mxu1  ;;  %v4505_v32 = vadd.f32 %v4504_v4, %v4456_v48 }
 0x5e2   : > { %v4458_v59 = vadd.f32 %v4457_v26, %v4409_v7  ;;  %v20346_v26 = vld [vmem:[#allocation37_spill] sm:$0xff] }
 0x5e3   : > { %v16418_v9 = vpop.f32.mrf.mxu0  ;;  %v4554_v51 = vadd.f32 %v4553_v52, %v4505_v32  ;;  %v16435_v52 = vperm.slane %v16271_v58, 3  ;;  %v4414_v60 = vadd.f32 %v20346_v26, %v16274_v11  ;;  %v20347_v32 = vld [vmem:[#allocation38_spill] sm:$0xff] }
 0x5e4   : > { %20338 = vst [vmem:[#allocation52_spill] sm:$0xff] %v16418_v9  ;;  %5042 = vmax.xlane.f32.xlu1 %v16418_v9 }
 0x5e5   : > { %v4580_v62 = vadd.f32 %v20354_v57, %v16435_v52 }
 0x5e8   : > { %v4506_v5 = vpop.f32.mrf.mxu2  ;;  %v4555_v37 = vpop.f32.mrf.mxu3 }
 0x5e9   : > { %v4507_v19 = vadd.f32 %v4506_v5, %v4458_v59  ;;  %v4460_v10 = vpop.f32.mrf.mxu1  ;;  %v4573_v59 = vadd.f32 %v20347_v32, %v16435_v52 }
 0x5ea   : > { %v4461_v39 = vadd.f32 %v4460_v10, %v4412_v28  ;;  %v12946_v10 = vld [vmem:[#allocation3 + $0x38] sm:$0xff] }
 0x5eb   : > { %v4556_v42 = vadd.f32 %v4555_v37, %v4507_v19  ;;  %v16423_v21 = vpop.f32.mrf.mxu0  ;;  %4958 = vmatmul.bf16.gmra.mxu0 %v12946_v10 }
 0x5ec   : > { %20340 = vst [vmem:[#allocation53_spill] sm:$0xff] %v16423_v21  ;;  %5044 = vmax.xlane.f32.xlu2 %v16423_v21  ;;  %4655 = vmatmul.bf16.gmra.mxu1 %v20341_v18 }
 0x5ed   : > { %v6115_v15 = vpack.c.bf16 %v4556_v42, %v4554_v51  ;;  %4704 = vmatmul.bf16.gmra.mxu2 %v20342_v53  ;;  %4753 = vmatmul.bf16.gmra.mxu3 %v20343_v38 }
 0x5ef   : > { %v5017_v40 = vpop.xlane.xlu0 %5016 }
 0x5f0   : > { %v5080_v33 = vmax.f32 %v4984_v16, %v5017_v40  ;;  %v4509_v1 = vpop.f32.mrf.mxu2  ;;  %v4558_v0 = vpop.f32.mrf.mxu3 }
 0x5f1   : > { %v4462_v56 = vpop.f32.mrf.mxu1  ;;  %v4510_v27 = vadd.f32 %v4509_v1, %v4461_v39  ;;  %v16454_v1 = vld [vmem:[#allocation4 + $0x10] sm:$0xff] }
 0x5f2   : > { %6733 = vst.msk [vmem:[#allocation4] sm:$0xff] %vm5624_vm3, %v5080_v33  ;;  %v4463_v7 = vadd.f32 %v4462_v56, %v4414_v60  ;;  %v5112_v32 = vsub.f32 %v4984_v16, %v5080_v33 }
 0x5f3   : > { %v16432_v4 = vpop.f32.mrf.mxu0  ;;  %v4559_v18 = vadd.f32 %v4558_v0, %v4510_v27  ;;  %v20349_v27 = vld [vmem:[#allocation22_spill] sm:$0xff] }
 0x5f4   : > { %20345 = vst [vmem:[#allocation54_spill] sm:$0xff] %v16432_v4  ;;  %5046 = vmax.xlane.f32.xlu0 %v16432_v4 }
 0x5f7   : > { %v5019_v48 = vpop.xlane.xlu0 %5018 }
 0x5f8   : > { %v16445_v5 = vmax.f32 %v16440_v25, %v5019_v48  ;;  %v4511_v37 = vpop.f32.mrf.mxu2  ;;  %v4560_v58 = vpop.f32.mrf.mxu3  ;;  %v16465_v48 = vld [vmem:[#allocation4 + $0x18] sm:$0xff] }
 0x5f9   : > { %v4512_v19 = vadd.f32 %v4511_v37, %v4463_v7  ;;  %v4621_v51 = vpop.f32.mrf.mxu1  ;;  %v4575_v7 = vadd.f32 %v20349_v27, %v16435_v52 }
 0x5fa   : > { %v5113_v42 = vsub.f32 %v16440_v25, %v16445_v5  ;;  %6734 = vst.msk [vmem:[#allocation4 + $0x8] sm:$0xff] %vm5624_vm3, %v16445_v5  ;;  %v4622_v11 = vadd.f32 %v4621_v51, %v4573_v59 }
 0x5fb   : > { %v4561_v53 = vadd.f32 %v4560_v58, %v4512_v19  ;;  %v16451_v38 = vpop.f32.mrf.mxu0  ;;  %v20350_v58 = vld [vmem:[#allocation23_spill] sm:$0xff] }
 0x5fc   : > { %20348 = vst [vmem:[#allocation55_spill] sm:$0xff] %v16451_v38  ;;  %5048 = vmax.xlane.f32.xlu1 %v16451_v38  ;;  %v4578_v19 = vadd.f32 %v20350_v58, %v16435_v52 }
 0x5fd   : > { %v6119_v40 = vpack.c.bf16 %v4561_v53, %v4559_v18  ;;  %v5144_v53 = vmul.f32 1.442695, %v5112_v32 }
 0x5ff   : > { %v5021_v56 = vpop.xlane.xlu1 %5020  ;;  %6299 = vmatpush.bf16.msra.mxu3 %v6119_v40  ;;  %13431 = vpow2.f32 %v5144_v53 }
 0x600   : > { %v16457_v50 = vmax.f32 %v16454_v1, %v5021_v56  ;;  %v4670_v28 = vpop.f32.mrf.mxu2  ;;  %v4719_v26 = vpop.f32.mrf.mxu3 }
 0x601   : > { %v4671_v60 = vadd.f32 %v4670_v28, %v4622_v11  ;;  %v4623_v39 = vpop.f32.mrf.mxu1 }
 0x602   : > { %6735 = vst.msk [vmem:[#allocation4 + $0x10] sm:$0xff] %vm5624_vm3, %v16457_v50  ;;  %v4624_v59 = vadd.f32 %v4623_v39, %v4575_v7  ;;  %v20356_v7 = vld [vmem:[#allocation40_spill] sm:$0xff] }
 0x603   : > { %v16461_v0 = vadd.f32 %v4719_v26, %v4671_v60  ;;  %6300 = vmatpush.bf16.msra.mxu3 %v6115_v15  ;;  %v4583_v32 = vadd.f32 %v20356_v7, %v16435_v52 }
 0x604   : > { %5210 = vperm.xlu2 %13427, %v5080_v33  }
 0x605   : > { %v16500_v60 = vpop.eup %13431 }
 0x606   : > { %20353 = vst [vmem:[#allocation29_spill] sm:$0xff] %v16500_v60 }
 0x607   : > { %v5023_v37 = vpop.xlane.xlu1 %5022  ;;  %6301 = vmatpush.bf16.msra.mxu3 %v6111_v44  ;;  %v12947_v44 = vld [vmem:[#allocation3 + $0x60] sm:$0xff] }
 0x608   : > { %v16473_v51 = vmax.f32 %v16465_v48, %v5023_v37  ;;  %5215 = vperm.xlu0 %13428, %v16445_v5   ;;  %v4672_v15 = vpop.f32.mrf.mxu2  ;;  %v4721_v11 = vpop.f32.mrf.mxu3  ;;  %4963 = vmatmul.bf16.gmra.mxu0 %v12947_v44 }
 0x609   : > { %v4673_v10 = vadd.f32 %v4672_v15, %v4624_v59  ;;  %v4626_v18 = vpop.f32.mrf.mxu1 }
 0x60a   : > { %6736 = vst.msk [vmem:[#allocation4 + $0x18] sm:$0xff] %vm5624_vm3, %v16473_v51  ;;  %v4627_v16 = vadd.f32 %v4626_v18, %v4578_v19 }
 0x60b   : > { %v16478_v33 = vadd.f32 %v4721_v11, %v4673_v10  ;;  %6302 = vmatpush.bf16.msra.mxu3 %v6107_v46 }
 0x60f   : > { %v5025_v40 = vpop.xlane.xlu2 %5024  ;;  %6303 = vmatpush.bf16.msra.mxu3 %v6103_v54  ;;  %v16505_v54 = vld [vmem:[#allocation4 + $0x28] sm:$0xff] }
 0x610   : > { %v16491_v56 = vmax.f32 %v16485_v2, %v5025_v40  ;;  %v4675_v28 = vpop.f32.mrf.mxu2  ;;  %v4724_v26 = vpop.f32.mrf.mxu3  ;;  %20355 = vst [vmem:[#allocation30_spill] sm:$0xff] %v16505_v54 }
 0x611   : > { %v4676_v17 = vadd.f32 %v4675_v28, %v4627_v16  ;;  %v4628_v63 = vpop.f32.mrf.mxu1  ;;  %v16536_v16 = vld [vmem:[#allocation4 + $0x38] sm:$0xff]  ;;  %v16538_v40 = vpop.f32.mrf.mxu0 }
 0x612   : > { %20352 = vst [vmem:[#allocation20_spill] sm:$0xff] %v16491_v56  ;;  %v4629_v39 = vadd.f32 %v4628_v63, %v4580_v62 }
 0x613   : > { %6737 = vst.msk [vmem:[#allocation4 + $0x20] sm:$0xff] %vm5624_vm3, %v16491_v56  ;;  %v16495_v46 = vadd.f32 %v4724_v26, %v4676_v17  ;;  %6304 = vmatpush.bf16.msra.mxu3 %v6099_v6  ;;  %v20362_v26 = vld [vmem:[#allocation21_spill] sm:$0xff] }
 0x614   : > { %20360 = vst [vmem:[#allocation31_spill] sm:$0xff] %v16536_v16  ;;  %v4588_v17 = vadd.f32 %v20362_v26, %v16435_v52 }
 0x615   : > { %5787 = vperm.xlu1 %13429, %v16500_v60   ;;  %20361 = vst [vmem:[#allocation33_spill] sm:$0xff] %v16538_v40 }
 0x617   : > { %v5027_v27 = vpop.xlane.xlu2 %5026  ;;  %6305 = vmatpush.bf16.msra.mxu3 %v6095_v30 }
 0x618   : > { %v16513_v24 = vmax.f32 %v16505_v54, %v5027_v27  ;;  %v4677_v61 = vpop.f32.mrf.mxu2  ;;  %v4726_v6 = vpop.f32.mrf.mxu3 }
 0x619   : > { %v4678_v59 = vadd.f32 %v4677_v61, %v4629_v39  ;;  %v4631_v37 = vpop.f32.mrf.mxu1 }
 0x61a   : > { %20357 = vst [vmem:[#allocation26_spill] sm:$0xff] %v16513_v24  ;;  %v4632_v58 = vadd.f32 %v4631_v37, %v4583_v32  ;;  %v16554_v37 = vpop.f32.mrf.mxu0 }
 0x61b   : > { %6738 = vst.msk [vmem:[#allocation4 + $0x28] sm:$0xff] %vm5624_vm3, %v16513_v24  ;;  %v16517_v19 = vadd.f32 %v4726_v6, %v4678_v59  ;;  %6306 = vmatpush.bf16.msra.mxu3 %v6091_v55  ;;  %v4585_v55 = vadd.f32 %v20359_v41, %v16435_v52  ;;  %v16552_v6 = vld [vmem:[#allocation4 + $0x40] sm:$0xff]  ;;  %v20366_v41 = vld [vmem:[#allocation25_spill] sm:$0xff] }
 0x61c   : > { %20364 = vst [vmem:[#allocation27_spill] sm:$0xff] %v16552_v6 }
 0x61d   : > { %5220 = vperm.xlu1 %13429, %v16457_v50   ;;  %20365 = vst [vmem:[#allocation36_spill] sm:$0xff] %v16554_v37 }
 0x61f   : > { %v5029_v30 = vpop.xlane.xlu0 %5028 }
 0x620   : > { %v16528_v15 = vmax.f32 %v16525_v29, %v5029_v30  ;;  %v4680_v11 = vpop.f32.mrf.mxu2  ;;  %v4729_v10 = vpop.f32.mrf.mxu3 }
 0x621   : > { %v4681_v18 = vadd.f32 %v4680_v11, %v4632_v58  ;;  %v4633_v53 = vpop.f32.mrf.mxu1 }
 0x622   : > { %6739 = vst.msk [vmem:[#allocation4 + $0x30] sm:$0xff] %vm5624_vm3, %v16528_v15  ;;  %v4634_v44 = vadd.f32 %v4633_v53, %v4585_v55  ;;  %v4590_v55 = vadd.f32 %v20366_v41, %v16435_v52  ;;  %v16584_v41 = vld [vmem:[#allocation4 + $0x50] sm:$0xff] }
 0x623   : > { %v16532_v13 = vadd.f32 %v4729_v10, %v4681_v18  ;;  %20369 = vst [vmem:[#allocation37_spill] sm:$0xff] %v16584_v41 }
 0x627   : > { %v5031_v28 = vpop.xlane.xlu1 %5030 }
 0x628   : > { %v16543_v63 = vmax.f32 %v16536_v16, %v5031_v28  ;;  %v4682_v57 = vpop.f32.mrf.mxu2  ;;  %v4731_v62 = vpop.f32.mrf.mxu3  ;;  %v5114_v28 = vsub.f32 %v16454_v1, %v16457_v50  ;;  %v20385_v16 = vld [vmem:[#allocation47_spill] sm:$0xff] }
 0x629   : > { %v4683_v39 = vadd.f32 %v4682_v57, %v4634_v44  ;;  %v4636_v27 = vpop.f32.mrf.mxu1  ;;  %v16566_v44 = vld [vmem:[#allocation4 + $0x48] sm:$0xff] }
 0x62a   : > { %20363 = vst [vmem:[#allocation35_spill] sm:$0xff] %v16543_v63  ;;  %v4637_v7 = vadd.f32 %v4636_v27, %v4588_v17  ;;  %v20368_v57 = vld [vmem:[#allocation41_spill] sm:$0xff]  ;;  %v5148_v50 = vmul.f32 1.442695, %v5114_v28 }
 0x62b   : > { %6740 = vst.msk [vmem:[#allocation4 + $0x38] sm:$0xff] %vm5624_vm3, %v16543_v63  ;;  %v16547_v32 = vadd.f32 %v4731_v62, %v4683_v39  ;;  %v4593_v62 = vadd.f32 %v20368_v57, %v16435_v52 }
 0x62c   : > { %20367 = vst [vmem:[#allocation34_spill] sm:$0xff] %v16566_v44 }
 0x62d   : > { %5050 = vmax.xlane.f32.xlu2 %v16538_v40 }
 0x62f   : > { %v5033_v59 = vpop.xlane.xlu2 %5032 }
 0x630   : > { %v16557_v58 = vmax.f32 %v16552_v6, %v5033_v59  ;;  %v4685_v30 = vpop.f32.mrf.mxu2  ;;  %v4734_v11 = vpop.f32.mrf.mxu3 }
 0x631   : > { %v4686_v10 = vadd.f32 %v4685_v30, %v4637_v7  ;;  %v4638_v18 = vpop.f32.mrf.mxu1 }
 0x632   : > { %6741 = vst.msk [vmem:[#allocation4 + $0x40] sm:$0xff] %vm5624_vm3, %v16557_v58  ;;  %5052 = vmax.xlane.f32.xlu0 %v16554_v37  ;;  %v4639_v26 = vadd.f32 %v4638_v18, %v4590_v55  ;;  %v20377_v18 = vld [vmem:[#allocation44_spill] sm:$0xff]  ;;  %v4608_v37 = vadd.f32 %v20385_v16, %v16435_v52 }
 0x633   : > { %v16562_v53 = vadd.f32 %v4734_v11, %v4686_v10  ;;  %v5146_v11 = vmul.f32 1.442695, %v5113_v42  ;;  %v4600_v31 = vadd.f32 %v20377_v18, %v16435_v52 }
 0x635   : > { %13433 = vpow2.f32 %v5146_v11  ;;  %v16602_v11 = vld [vmem:[#allocation4 + $0x58] sm:$0xff] }
 0x636   : > { %13435 = vpow2.f32 %v5148_v50  ;;  %20374 = vst [vmem:[#allocation39_spill] sm:$0xff] %v16602_v11 }
 0x637   : > { %v5035_v17 = vpop.xlane.xlu0 %5034 }
 0x638   : > { %v16573_v39 = vmax.f32 %v16566_v44, %v5035_v17  ;;  %v4687_v27 = vpop.f32.mrf.mxu2  ;;  %v4736_v7 = vpop.f32.mrf.mxu3 }
 0x639   : > { %v4688_v59 = vadd.f32 %v4687_v27, %v4639_v26  ;;  %v4641_v30 = vpop.f32.mrf.mxu1  ;;  %v12948_v27 = vld [vmem:[#allocation3 + $0x70] sm:$0xff] }
 0x63a   : > { %6742 = vst.msk [vmem:[#allocation4 + $0x48] sm:$0xff] %vm5624_vm3, %v16573_v39  ;;  %v4642_v1 = vadd.f32 %v4641_v30, %v4593_v62  ;;  %v16595_v62 = vpop.f32.mrf.mxu0  ;;  %4968 = vmatmul.bf16.gmra.mxu0 %v12948_v27 }
 0x63b   : > { %v16580_v10 = vadd.f32 %v4736_v7, %v4688_v59  ;;  %v16593_v57 = vpop.eup %13433  ;;  %20371 = vst [vmem:[#allocation22_spill] sm:$0xff] %v16595_v62  ;;  %v20373_v59 = vld [vmem:[#allocation42_spill] sm:$0xff] }
 0x63c   : > { %20370 = vst [vmem:[#allocation38_spill] sm:$0xff] %v16593_v57  ;;  %v16597_v7 = vpop.eup %13435  ;;  %v4595_v30 = vadd.f32 %v20373_v59, %v16435_v52 }
 0x63d   : > { %20372 = vst [vmem:[#allocation23_spill] sm:$0xff] %v16597_v7 }
 0x63f   : > { %v5037_v55 = vpop.xlane.xlu1 %5036 }
 0x640   : > { %v16587_v26 = vmax.f32 %v16584_v41, %v5037_v55  ;;  %v4690_v25 = vpop.f32.mrf.mxu2  ;;  %v4739_v5 = vpop.f32.mrf.mxu3 }
 0x641   : > { %v4691_v42 = vadd.f32 %v4690_v25, %v4642_v1  ;;  %v4643_v17 = vpop.f32.mrf.mxu1 }
 0x642   : > { %6743 = vst.msk [vmem:[#allocation4 + $0x50] sm:$0xff] %vm5624_vm3, %v16587_v26  ;;  %v4644_v1 = vadd.f32 %v4643_v17, %v4595_v30  ;;  %v16616_v17 = vld [vmem:[#allocation4 + $0x60] sm:$0xff] }
 0x643   : > { %v16591_v28 = vadd.f32 %v4739_v5, %v4691_v42  ;;  %20375 = vst [vmem:[#allocation40_spill] sm:$0xff] %v16616_v17 }
 0x645   : > { %5792 = vperm.xlu2 %13427, %v16593_v57  }
 0x646   : > { %5797 = vperm.xlu0 %13428, %v16597_v7  }
 0x647   : > { %v5039_v50 = vpop.xlane.xlu2 %5038  ;;  %5054 = vmax.xlane.f32.xlu1 %v16595_v62 }
 0x648   : > { %v16607_v55 = vmax.f32 %v16602_v11, %v5039_v50  ;;  %v4692_v25 = vpop.f32.mrf.mxu2  ;;  %v4741_v5 = vpop.f32.mrf.mxu3 }
 0x649   : > { %v4693_v42 = vadd.f32 %v4692_v25, %v4644_v1  ;;  %v4646_v36 = vpop.f32.mrf.mxu1  ;;  %v5115_v1 = vsub.f32 %v16465_v48, %v16473_v51 }
 0x64a   : > { %6744 = vst.msk [vmem:[#allocation4 + $0x58] sm:$0xff] %vm5624_vm3, %v16607_v55 }
 0x64b   : > { %v16611_v59 = vadd.f32 %v4741_v5, %v4693_v42  ;;  %v20376_v5 = vld [vmem:[#allocation43_spill] sm:$0xff]  ;;  %v5150_v11 = vmul.f32 1.442695, %v5115_v1 }
 0x64c   : > { %v4598_v42 = vadd.f32 %v20376_v5, %v16435_v52  ;;  %v12949_v1 = vld [vmem:[#allocation3 + $0x78] sm:$0xff] }
 0x64d   : > { %5225 = vperm.xlu2 %13427, %v16473_v51   ;;  %13437 = vpow2.f32 %v5150_v11  ;;  %4973 = vmatmul.bf16.gmra.mxu0 %v12949_v1 }
 0x64e   : > { %v4647_v44 = vadd.f32 %v4646_v36, %v4598_v42 }
 0x64f   : > { %v5041_v27 = vpop.xlane.xlu0 %5040 }
 0x650   : > { %v16619_v30 = vmax.f32 %v16616_v17, %v5041_v27  ;;  %v4695_v50 = vpop.f32.mrf.mxu2  ;;  %v4744_v61 = vpop.f32.mrf.mxu3  ;;  %v16630_v27 = vld [vmem:[#allocation4 + $0x68] sm:$0xff] }
 0x651   : > { %v4648_v25 = vpop.f32.mrf.mxu1  ;;  %20378 = vst [vmem:[#allocation24_spill] sm:$0xff] %v16630_v27  ;;  %v4696_v17 = vadd.f32 %v4695_v50, %v4647_v44  ;;  %v16643_v44 = vld [vmem:[#allocation4 + $0x70] sm:$0xff] }
 0x652   : > { %6745 = vst.msk [vmem:[#allocation4 + $0x60] sm:$0xff] %vm5624_vm3, %v16619_v30  ;;  %v4649_v6 = vadd.f32 %v4648_v25, %v4600_v31  ;;  %v12950_v31 = vld [vmem:[#allocation3 + $0x28] sm:$0xff] }
 0x653   : > { %v16637_v18 = vadd.f32 %v4744_v61, %v4696_v17  ;;  %20379 = vst [vmem:[#allocation21_spill] sm:$0xff] %v16643_v44 }
 0x655   : > { %5230 = vperm.xlu2 %13427, %v16491_v56  }
 0x657   : > { %v5043_v41 = vpop.xlane.xlu1 %5042 }
 0x658   : > { %v16633_v48 = vmax.f32 %v16630_v27, %v5043_v41  ;;  %v4697_v51 = vpop.f32.mrf.mxu2  ;;  %v4746_v29 = vpop.f32.mrf.mxu3  ;;  %v16665_v27 = vld [vmem:[#allocation4 + $0x80] sm:$0xff] }
 0x659   : > { %v4698_v54 = vadd.f32 %v4697_v51, %v4649_v6  ;;  %v4651_v5 = vpop.f32.mrf.mxu1  ;;  %v16645_v41 = vpop.eup %13437  ;;  %20384 = vst [vmem:[#allocation44_spill] sm:$0xff] %v16665_v27 }
 0x65a   : > { %6746 = vst.msk [vmem:[#allocation4 + $0x68] sm:$0xff] %vm5624_vm3, %v16633_v48 }
 0x65b   : > { %v16639_v36 = vadd.f32 %v4746_v29, %v4698_v54  ;;  %20380 = vst [vmem:[#allocation25_spill] sm:$0xff] %v16645_v41  ;;  %v16653_v54 = vpop.f32.mrf.mxu0  ;;  %v16655_v29 = vld [vmem:[#allocation4 + $0x78] sm:$0xff] }
 0x65c   : > { %20381 = vst [vmem:[#allocation41_spill] sm:$0xff] %v16655_v29 }
 0x65d   : > { %4978 = vmatmul.bf16.gmra.mxu0 %v12950_v31  ;;  %v20386_v31 = vld [vmem:[#allocation46_spill] sm:$0xff] }
 0x65e   : > { %v4605_v7 = vadd.f32 %v20386_v31, %v16435_v52 }
 0x65f   : > { %v5045_v50 = vpop.xlane.xlu2 %5044 }
 0x660   : > { %v16648_v6 = vmax.f32 %v16643_v44, %v5045_v50  ;;  %5802 = vperm.xlu1 %13429, %v16645_v41   ;;  %v4700_v11 = vpop.f32.mrf.mxu2  ;;  %v4749_v61 = vpop.f32.mrf.mxu3 }
 0x661   : > { %v4653_v17 = vpop.f32.mrf.mxu1 }
 0x662   : > { %6747 = vst.msk [vmem:[#allocation4 + $0x70] sm:$0xff] %vm5624_vm3, %v16648_v6  ;;  %v4654_v38 = vadd.f32 %v4653_v17, %v4605_v7 }
 0x663   : > { %v16663_v44 = vpop.f32.mrf.mxu0 }
 0x664   : > { %20383 = vst [vmem:[#allocation43_spill] sm:$0xff] %v16663_v44 }
 0x667   : > { %v5047_v25 = vpop.xlane.xlu0 %5046  ;;  %v5211_v62 = vpop.permute.xlu2 %5210 }
 0x668   : > { %v16658_v42 = vmax.f32 %v16655_v29, %v5047_v25  ;;  %5235 = vperm.xlu1 %13429, %v16513_v24   ;;  %v4702_v51 = vpop.f32.mrf.mxu2  ;;  %v4751_v1 = vpop.f32.mrf.mxu3  ;;  %v5368_v56 = vsub.f32 %v16280_v14, %v5211_v62 }
 0x669   : > { %v4656_v50 = vpop.f32.mrf.mxu1  ;;  %v4703_v3 = vadd.f32 %v4702_v51, %v4654_v38 }
 0x66a   : > { %20382 = vst [vmem:[#allocation42_spill] sm:$0xff] %v16658_v42 }
 0x66b   : > { %6748 = vst.msk [vmem:[#allocation4 + $0x78] sm:$0xff] %vm5624_vm3, %v16658_v42  ;;  %v5400_v42 = vmul.f32 1.442695, %v5368_v56  ;;  %v16708_v56 = vpop.f32.mrf.mxu0 }
 0x66d   : > { %13439 = vpow2.f32 %v5400_v42 }
 0x66f   : > { %v5049_v41 = vpop.xlane.xlu1 %5048 }
 0x670   : > { %5245 = vperm.xlu1 %13429, %v16543_v63   ;;  %5058 = vmax.xlane.f32.xlu0 %v16663_v44  ;;  %v4705_v25 = vpop.f32.mrf.mxu2  ;;  %v4754_v29 = vpop.f32.mrf.mxu3  ;;  %v16670_v24 = vmax.f32 %v16665_v27, %v5049_v41  ;;  %v20387_v63 = vld [vmem:[#allocation48_spill] sm:$0xff]  ;;  %v4657_v44 = vadd.f32 %v4656_v50, %v4608_v37  ;;  %v20388_v41 = vld [vmem:[#allocation45_spill] sm:$0xff]  ;;  %v4752_v50 = vadd.f32 %v4751_v1, %v4703_v3 }
 0x671   : > { %v4658_v57 = vpop.f32.mrf.mxu1  ;;  %v4610_v2 = vadd.f32 %v20387_v63, %v16435_v52  ;;  %v4603_v27 = vadd.f32 %v20388_v41, %v16435_v52  ;;  %v20391_v3 = vpack.c.bf16 %v16580_v10, %v16562_v53 }
 0x672   : > { %6749 = vst.msk [vmem:[#allocation4 + $0x80] sm:$0xff] %vm5624_vm3, %v16670_v24  ;;  %v4706_v40 = vadd.f32 %v4705_v25, %v4657_v44 }
 0x673   : > { %v4659_v4 = vadd.f32 %v4658_v57, %v4610_v2  ;;  %v4652_v16 = vadd.f32 %v4651_v5, %v4603_v27  ;;  %v16685_v38 = vpop.eup %13439  ;;  %v16721_v10 = vpop.f32.mrf.mxu0 }
 0x674   : > { %v4755_v45 = vadd.f32 %v4754_v29, %v4706_v40  ;;  %v16714_v40 = vld [vmem:[#allocation4 + $0x88] sm:$0xff] }
 0x675   : > { %v4701_v31 = vadd.f32 %v4700_v11, %v4652_v16  ;;  %20395 = vst [vmem:[#allocation47_spill] sm:$0xff] %v16714_v40 }
 0x677   : > { %v4750_v52 = vadd.f32 %v4749_v61, %v4701_v31 }
 0x678   : > { %v4707_v21 = vpop.f32.mrf.mxu2  ;;  %v4756_v60 = vpop.f32.mrf.mxu3 }
 0x679   : > { %v4708_v9 = vadd.f32 %v4707_v21, %v4659_v4  ;;  %v6116_v2 = vpack.c.bf16 %v4752_v50, %v4750_v52  ;;  %v20393_v4 = vpack.c.bf16 %v16517_v19, %v16495_v46  ;;  %v16725_v46 = vld [vmem:[#allocation4 + $0x90] sm:$0xff] }
 0x67a   : > { %v5216_v47 = vpop.permute.xlu0 %5215 }
 0x67b   : > { %v5369_v63 = vsub.f32 %v16290_v8, %v5216_v47  ;;  %v4757_v37 = vadd.f32 %v4756_v60, %v4708_v9  ;;  %v20389_v47 = vpack.c.bf16 %v16639_v36, %v16637_v18  ;;  %v20392_v9 = vpack.c.bf16 %v16547_v32, %v16532_v13  ;;  %v16740_v36 = vld [vmem:[#allocation4 + $0x98] sm:$0xff] }
 0x67c   : > { %v20394_v60 = vpack.c.bf16 %v16478_v33, %v16461_v0 }
 0x67d   : > { %v5402_v14 = vmul.f32 1.442695, %v5369_v63  ;;  %v6120_v62 = vpack.c.bf16 %v4757_v37, %v4755_v45  ;;  %v20390_v45 = vpack.c.bf16 %v16611_v59, %v16591_v28  ;;  %v16767_v37 = vld [vmem:[#allocation4 + $0xa8] sm:$0xff] }
 0x67e   : > { %5056 = vmax.xlane.f32.xlu2 %v16653_v54 }
 0x67f   : > { %13441 = vpow2.f32 %v5402_v14  ;;  %6388 = vmatpush.bf16.msrb.mxu0 %v6120_v62 }
 0x683   : > { %6389 = vmatpush.bf16.msrb.mxu0 %v6116_v2  ;;  %v16783_v2 = vld [vmem:[#allocation4 + $0xa0] sm:$0xff] }
 0x684   : > { %5250 = vperm.xlu0 %13428, %v16557_v58   ;;  %20397 = vst [vmem:[#allocation48_spill] sm:$0xff] %v16783_v2 }
 0x685   : > { %v16688_v21 = vpop.eup %13441  ;;  %v16734_v57 = vpop.f32.mrf.mxu0 }
 0x686   : > { %v6073_v8 = vpack.c.bf16 %v16688_v21, %v16685_v38 }
 0x687   : > { %6390 = vmatpush.bf16.msrb.mxu0 %v20389_v47  ;;  %v16716_v53 = vpop.permute.xlu1 %5787 }
 0x688   : > { %6129 = vmatmul.bf16.vlgmr.msra.gmra.mxu1 %v6073_v8  ;;  %6218 = vmatmul.bf16.vlgmr.msra.gmra.mxu2 %v6073_v8 }
 0x689   : > { %6307 = vmatmul.bf16.vlgmr.msra.gmra.mxu3 %v6073_v8 }
 0x68b   : > { %6391 = vmatpush.bf16.msrb.mxu0 %v20390_v45 }
 0x68d   : > { %v16757_v42 = vpop.f32.mrf.mxu0 }
 0x68f   : > { %6392 = vmatpush.bf16.msrb.mxu0 %v20391_v3  ;;  %v5221_v28 = vpop.permute.xlu1 %5220 }
 0x690   : > { %v5370_v7 = vsub.f32 %v16300_v20, %v5221_v28 }
 0x692   : > { %v5404_v59 = vmul.f32 1.442695, %v5370_v7  ;;  %v5657_v7 = vld [vmem:[#allocation6 + $0x2a8] sm:$0xff] }
 0x693   : > { %6393 = vmatpush.bf16.msrb.mxu0 %v20392_v9 }
 0x694   : > { %13443 = vpow2.f32 %v5404_v59 }
 0x696   : > { %5240 = vperm.xlu2 %13427, %v16528_v15  }
 0x697   : > { %6394 = vmatpush.bf16.msrb.mxu0 %v20393_v4 }
 0x69a   : > { %5060 = vmax.xlane.f32.xlu1 %v16708_v56  ;;  %v16742_v44 = vpop.eup %13443 }
 0x69b   : > { %6395 = vmatpush.bf16.msrb.mxu0 %v20394_v60 }
 0x69e   : > { %6396 = vmatmul.bf16.vlgmr.msrb.gmra.mxu0 %v6073_v8 }
 0x6a0   : > { %v5051_v13 = vpop.xlane.xlu2 %5050 }
 0x6a1   : > { %v16719_v32 = vmax.f32 %v16714_v40, %v5051_v13 }
 0x6a3   : > { %20396 = vst [vmem:[#allocation46_spill] sm:$0xff] %v16719_v32 }
 0x6a4   : > { %6750 = vst.msk [vmem:[#allocation4 + $0x88] sm:$0xff] %vm5624_vm3, %v16719_v32 }
 0x6a5   : > { %v5053_v19 = vpop.xlane.xlu0 %5052 }
 0x6a6   : > { %v16728_v0 = vmax.f32 %v16725_v46, %v5053_v19 }
 0x6a8   : > { %v16730_v33 = vpop.permute.xlu2 %5792  ;;  %6751 = vst.msk [vmem:[#allocation4 + $0x90] sm:$0xff] %vm5624_vm3, %v16728_v0 }
 0x6ae   : > { %5064 = vmax.xlane.f32.xlu0 %v16734_v57 }
 0x6b0   : > { %v5226_v27 = vpop.permute.xlu2 %5225 }
 0x6b1   : > { %v5371_v5 = vsub.f32 %v16318_v35, %v5226_v27 }
 0x6b3   : > { %v5406_v18 = vmul.f32 1.442695, %v5371_v5  ;;  %5260 = vperm.xlu1 %13429, %v16587_v26  }
 0x6b5   : > { %13445 = vpow2.f32 %v5406_v18 }
 0x6b7   : > { %v16765_v63 = vpop.f32.mrf.mxu0 }
 0x6b8   : > { %v5231_v29 = vpop.permute.xlu2 %5230  ;;  %v16761_v41 = vpop.permute.xlu0 %5797 }
 0x6b9   : > { %v5372_v51 = vsub.f32 %v16331_v49, %v5231_v29  ;;  %v5659_v29 = vld [vmem:[#allocation6 + $0x310] sm:$0xff] }
 0x6ba   : > { %v5055_v11 = vpop.xlane.xlu1 %5054 }
 0x6bb   : > { %v16744_v61 = vpop.eup %13445  ;;  %v16747_v20 = vmax.f32 %v16740_v36, %v5055_v11  ;;  %v5408_v1 = vmul.f32 1.442695, %v5372_v51  ;;  %v5658_v11 = vld [vmem:[#allocation6 + $0x268] sm:$0xff] }
 0x6bc   : > { %v6074_v17 = vpack.c.bf16 %v16744_v61, %v16742_v44  ;;  %v5661_v51 = vld [vmem:[#allocation6 + $0x2c8] sm:$0xff] }
 0x6bd   : > { %6752 = vst.msk [vmem:[#allocation4 + $0x98] sm:$0xff] %vm5624_vm3, %v16747_v20  ;;  %13447 = vpow2.f32 %v5408_v1  ;;  %v5946_v1 = vmul.f32 %v16716_v53, %v5658_v11 }
 0x6be   : > { %6134 = vmatmul.bf16.gmra.mxu1 %v6074_v17  ;;  %6223 = vmatmul.bf16.gmra.mxu2 %v6074_v17 }
 0x6bf   : > { %6312 = vmatmul.bf16.gmra.mxu3 %v6074_v17  ;;  %6401 = vmatmul.bf16.gmra.mxu0 %v6074_v17  ;;  %v16780_v52 = vpop.f32.mrf.mxu0 }
 0x6c0   : > { %5062 = vmax.xlane.f32.xlu2 %v16721_v10 }
 0x6c2   : > { %5265 = vperm.xlu0 %13428, %v16607_v55  }
 0x6c3   : > { %v16769_v14 = vpop.eup %13447 }
 0x6ca   : > { %v16788_v3 = vpop.f32.mrf.mxu0 }
 0x6d2   : > { %v16755_v35 = vpop.permute.xlu1 %5802  ;;  %v16795_v28 = vpop.f32.mrf.mxu0 }
 0x6d8   : > { %5255 = vperm.xlu2 %13427, %v16573_v39  }
 0x6da   : > { %v5236_v25 = vpop.permute.xlu1 %5235  ;;  %v16806_v17 = vpop.f32.mrf.mxu0 }
 0x6db   : > { %v5373_v16 = vsub.f32 %v16346_v34, %v5236_v25  ;;  %20399 = vst [vmem:[#allocation56_spill] sm:$0xff] %v16806_v17 }
 0x6dd   : > { %v5410_v31 = vmul.f32 1.442695, %v5373_v16  ;;  %5066 = vmax.xlane.f32.xlu1 %v16757_v42  ;;  %v5947_v16 = vmul.f32 %v16716_v53, %v5659_v29 }
 0x6df   : > { %13449 = vpow2.f32 %v5410_v31  ;;  %v16810_v31 = vld [vmem:[#allocation4 + $0xb0] sm:$0xff] }
 0x6e2   : > { %v5246_v47 = vpop.permute.xlu1 %5245 }
 0x6e3   : > { %v5059_v50 = vpop.xlane.xlu0 %5058  ;;  %v5375_v9 = vsub.f32 %v16365_v43, %v5246_v47  ;;  %v5945_v43 = vmul.f32 %v16716_v53, %v5657_v7  ;;  %v5663_v7 = vld [vmem:[#allocation6 + $0x270] sm:$0xff] }
 0x6e4   : > { %v16772_v49 = vmax.f32 %v16767_v37, %v5059_v50 }
 0x6e5   : > { %v16774_v62 = vpop.eup %13449  ;;  %v5414_v4 = vmul.f32 1.442695, %v5375_v9 }
 0x6e6   : > { %v6075_v34 = vpack.c.bf16 %v16774_v62, %v16769_v14  ;;  %6754 = vst.msk [vmem:[#allocation4 + $0xa8] sm:$0xff] %vm5624_vm3, %v16772_v49 }
 0x6e7   : > { %13451 = vpow2.f32 %v5414_v4 }
 0x6e8   : > { %6139 = vmatmul.bf16.gmra.mxu1 %v6075_v34  ;;  %6228 = vmatmul.bf16.gmra.mxu2 %v6075_v34 }
 0x6e9   : > { %6317 = vmatmul.bf16.gmra.mxu3 %v6075_v34  ;;  %6406 = vmatmul.bf16.gmra.mxu0 %v6075_v34 }
 0x6ec   : > { %5070 = vmax.xlane.f32.xlu0 %v16780_v52 }
 0x6ed   : > { %v16799_v59 = vpop.eup %13451 }
 0x6f1   : > { %v5057_v8 = vpop.xlane.xlu2 %5056 }
 0x6f2   : > { %v16786_v45 = vmax.f32 %v16783_v2, %v5057_v8  ;;  %v5949_v8 = vmul.f32 %v16730_v33, %v5661_v51 }
 0x6f4   : > { %20398 = vst [vmem:[#allocation45_spill] sm:$0xff] %v16786_v45 }
 0x6f5   : > { %6753 = vst.msk [vmem:[#allocation4 + $0xa0] sm:$0xff] %vm5624_vm3, %v16786_v45 }
 0x6f6   : > { %5275 = vperm.xlu1 %13429, %v16633_v48  }
 0x6f9   : > { %v5241_v60 = vpop.permute.xlu2 %5240 }
 0x6fa   : > { %v5374_v13 = vsub.f32 %v16353_v23, %v5241_v60 }
 0x6fc   : > { %v5412_v19 = vmul.f32 1.442695, %v5374_v13 }
 0x6fe   : > { %13453 = vpow2.f32 %v5412_v19  ;;  %v5662_v19 = vld [vmem:[#allocation6 + $0x3b0] sm:$0xff] }
 0x700   : > { %5280 = vperm.xlu0 %13428, %v16648_v6  }
 0x701   : > { %5068 = vmax.xlane.f32.xlu2 %v16765_v63 }
 0x704   : > { %v16801_v27 = vpop.eup %13453 }
 0x705   : > { %v6130_v5 = vpop.f32.mrf.mxu1  ;;  %v6076_v23 = vpack.c.bf16 %v16799_v59, %v16801_v27 }
 0x706   : > { %v6477_v18 = vadd.f32 %v6130_v5, %v5945_v43  ;;  %v16816_v43 = vpop.f32.mrf.mxu0  ;;  %v5950_v5 = vmul.f32 %v16730_v33, %v5662_v19 }
 0x707   : > { %6144 = vmatmul.bf16.gmra.mxu1 %v6076_v23  ;;  %6233 = vmatmul.bf16.gmra.mxu2 %v6076_v23  ;;  %20400 = vst [vmem:[#allocation57_spill] sm:$0xff] %v16816_v43 }
 0x708   : > { %6605 = vst [vmem:[#allocation6 + $0x2a8] sm:$0xff] %v6477_v18  ;;  %6322 = vmatmul.bf16.gmra.mxu3 %v6076_v23  ;;  %6411 = vmatmul.bf16.gmra.mxu0 %v6076_v23  ;;  %v5951_v18 = vmul.f32 %v16730_v33, %v5663_v7 }
 0x70b   : > { %v6219_v25 = vpop.f32.mrf.mxu2 }
 0x70c   : > { %v6478_v50 = vadd.f32 %v6219_v25, %v5946_v1  ;;  %v6308_v34 = vpop.f32.mrf.mxu3  ;;  %v5660_v1 = vld [vmem:[#allocation6 + $0x2c0] sm:$0xff]  ;;  %v5251_v25 = vpop.permute.xlu0 %5250 }
 0x70d   : > { %v6479_v47 = vadd.f32 %v6308_v34, %v5947_v16  ;;  %v6132_v9 = vpop.f32.mrf.mxu1  ;;  %v5061_v4 = vpop.xlane.xlu1 %5060  ;;  %v5948_v16 = vmul.f32 %v16716_v53, %v5660_v1  ;;  %v16834_v53 = vld [vmem:[#allocation4 + $0xb8] sm:$0xff] }
 0x70e   : > { %6606 = vst [vmem:[#allocation6 + $0x268] sm:$0xff] %v6478_v50  ;;  %v6481_v60 = vadd.f32 %v6132_v9, %v5949_v8  ;;  %v16814_v13 = vmax.f32 %v16810_v31, %v5061_v4  ;;  %v5664_v8 = vld [vmem:[#allocation6 + $0x138] sm:$0xff] }
 0x70f   : > { %6607 = vst [vmem:[#allocation6 + $0x310] sm:$0xff] %v6479_v47  ;;  %v16824_v47 = vld [vmem:[#allocation4 + $0xc0] sm:$0xff]  ;;  %v5952_v4 = vmul.f32 %v16730_v33, %v5664_v8  ;;  %v5376_v33 = vsub.f32 %v16372_v22, %v5251_v25  ;;  %v5667_v22 = vld [vmem:[#allocation6 + $0x378] sm:$0xff] }
 0x710   : > { %6609 = vst [vmem:[#allocation6 + $0x2c8] sm:$0xff] %v6481_v60  ;;  %v5669_v25 = vld [vmem:[#allocation6 + $0x220] sm:$0xff] }
 0x711   : > { %6755 = vst.msk [vmem:[#allocation4 + $0xb0] sm:$0xff] %vm5624_vm3, %v16814_v13 }
 0x712   : > { %20401 = vst [vmem:[#allocation58_spill] sm:$0xff] %v16834_v53 }
 0x713   : > { %v6221_v23 = vpop.f32.mrf.mxu2 }
 0x714   : > { %v6482_v11 = vadd.f32 %v6221_v23, %v5950_v5  ;;  %v6310_v29 = vpop.f32.mrf.mxu3 }
 0x715   : > { %v6483_v51 = vadd.f32 %v6310_v29, %v5951_v18  ;;  %v5665_v18 = vld [vmem:[#allocation6 + $0x148] sm:$0xff] }
 0x716   : > { %6610 = vst [vmem:[#allocation6 + $0x3b0] sm:$0xff] %v6482_v11  ;;  %v5668_v11 = vld [vmem:[#allocation6 + $0x288] sm:$0xff]  ;;  %v5953_v29 = vmul.f32 %v16761_v41, %v5665_v18  ;;  %v5955_v18 = vmul.f32 %v16761_v41, %v5667_v22 }
 0x717   : > { %6611 = vst [vmem:[#allocation6 + $0x270] sm:$0xff] %v6483_v51  ;;  %v5416_v51 = vmul.f32 1.442695, %v5376_v33 }
 0x719   : > { %5270 = vperm.xlu2 %13427, %v16619_v30   ;;  %13455 = vpow2.f32 %v5416_v51 }
 0x71b   : > { %v6397_v50 = vpop.f32.mrf.mxu0 }
 0x71c   : > { %v6480_v34 = vadd.f32 %v6397_v50, %v5948_v16 }
 0x71e   : > { %6608 = vst [vmem:[#allocation6 + $0x2c0] sm:$0xff] %v6480_v34 }
 0x720   : > { %5072 = vmax.xlane.f32.xlu1 %v16788_v3 }
 0x721   : > { %v5065_v9 = vpop.xlane.xlu0 %5064 }
 0x722   : > { %v16829_v60 = vmax.f32 %v16824_v47, %v5065_v9 }
 0x723   : > { %v6399_v19 = vpop.f32.mrf.mxu0 }
 0x724   : > { %v6484_v7 = vadd.f32 %v6399_v19, %v5952_v4  ;;  %6757 = vst.msk [vmem:[#allocation4 + $0xc0] sm:$0xff] %vm5624_vm3, %v16829_v60  ;;  %v5666_v4 = vld [vmem:[#allocation6 + $0xf8] sm:$0xff] }
 0x726   : > { %6612 = vst [vmem:[#allocation6 + $0x138] sm:$0xff] %v6484_v7  ;;  %v5954_v7 = vmul.f32 %v16761_v41, %v5666_v4 }
 0x72a   : > { %5076 = vmax.xlane.f32.xlu0 %v16806_v17 }
 0x732   : > { %5528 = vadd.xlane.f32.xlu0 %v16685_v38  ;;  %v5956_v38 = vmul.f32 %v16761_v41, %v5668_v11  ;;  %v5670_v41 = vld [vmem:[#allocation6 + $0x2f8] sm:$0xff] }
 0x733   : > { %v5063_v5 = vpop.xlane.xlu2 %5062 }
 0x734   : > { %v16838_v23 = vmax.f32 %v16834_v53, %v5063_v5  ;;  %v5672_v5 = vld [vmem:[#allocation6 + $0x50] sm:$0xff] }
 0x735   : > { %v5960_v51 = vmul.f32 %v16755_v35, %v5672_v5  ;;  %v20417_v53 = vld [vmem:[#allocation33_spill] sm:$0xff] }
 0x736   : > { %20402 = vst [vmem:[#allocation59_spill] sm:$0xff] %v16838_v23 }
 0x737   : > { %6756 = vst.msk [vmem:[#allocation4 + $0xb8] sm:$0xff] %vm5624_vm3, %v16838_v23 }
 0x739   : > { %5290 = vperm.xlu1 %13429, %v16670_v24  }
 0x73b   : > { %v5256_v1 = vpop.permute.xlu2 %5255  ;;  %v6135_v16 = vpop.f32.mrf.mxu1 }
 0x73c   : > { %v5377_v50 = vsub.f32 %v16382_v12, %v5256_v1  ;;  %v6485_v34 = vadd.f32 %v6135_v16, %v5953_v29  ;;  %v6402_v8 = vpop.f32.mrf.mxu0  ;;  %v5957_v12 = vmul.f32 %v16755_v35, %v5669_v25  ;;  %v5266_v29 = vpop.permute.xlu0 %5265 }
 0x73d   : > { %v6488_v9 = vadd.f32 %v6402_v8, %v5956_v38  ;;  %v5261_v8 = vpop.permute.xlu1 %5260 }
 0x73e   : > { %v5418_v19 = vmul.f32 1.442695, %v5377_v50  ;;  %6613 = vst [vmem:[#allocation6 + $0x148] sm:$0xff] %v6485_v34  ;;  %v16852_v34 = vpop.eup %13455 }
 0x73f   : > { %6616 = vst [vmem:[#allocation6 + $0x288] sm:$0xff] %v6488_v9 }
 0x740   : > { %13457 = vpow2.f32 %v5418_v19  ;;  %v20403_v19 = vld [vmem:[#allocation50_spill] sm:$0xff] }
 0x741   : > { %v6224_v33 = vpop.f32.mrf.mxu2  ;;  %v5379_v22 = vsub.f32 %v20403_v19, %v5266_v29  ;;  %v20405_v19 = vld [vmem:[#allocation42_spill] sm:$0xff] }
 0x742   : > { %v6486_v11 = vadd.f32 %v6224_v33, %v5954_v7  ;;  %v6313_v17 = vpop.f32.mrf.mxu3  ;;  %5074 = vmax.xlane.f32.xlu2 %v16795_v28  ;;  %v20404_v7 = vld [vmem:[#allocation49_spill] sm:$0xff]  ;;  %v5958_v33 = vmul.f32 %v16755_v35, %v5670_v41 }
 0x743   : > { %v6487_v1 = vadd.f32 %v6313_v17, %v5955_v18  ;;  %v6137_v16 = vpop.f32.mrf.mxu1  ;;  %v5671_v17 = vld [vmem:[#allocation6 + $0xc8] sm:$0xff]  ;;  %v5378_v5 = vsub.f32 %v20404_v7, %v5261_v8  ;;  %v16887_v7 = vld [vmem:[#allocation4 + $0xd0] sm:$0xff] }
 0x744   : > { %6614 = vst [vmem:[#allocation6 + $0xf8] sm:$0xff] %v6486_v11  ;;  %v6489_v38 = vadd.f32 %v6137_v16, %v5957_v12  ;;  %v6404_v50 = vpop.f32.mrf.mxu0  ;;  %v5959_v11 = vmul.f32 %v16755_v35, %v5671_v17  ;;  %v5422_v12 = vmul.f32 1.442695, %v5379_v22  ;;  %v16877_v22 = vld [vmem:[#allocation4 + $0xd8] sm:$0xff] }
 0x745   : > { %6615 = vst [vmem:[#allocation6 + $0x378] sm:$0xff] %v6487_v1  ;;  %v6492_v9 = vadd.f32 %v6404_v50, %v5960_v51  ;;  %v5420_v51 = vmul.f32 1.442695, %v5378_v5 }
 0x746   : > { %v16854_v4 = vpop.eup %13457  ;;  %6617 = vst [vmem:[#allocation6 + $0x220] sm:$0xff] %v6489_v38  ;;  %5295 = vperm.xlu0 %13428, %v16719_v32   ;;  %13459 = vpow2.f32 %v5422_v12  ;;  %v16863_v38 = vld [vmem:[#allocation4 + $0xc8] sm:$0xff] }
 0x747   : > { %6620 = vst [vmem:[#allocation6 + $0x50] sm:$0xff] %v6492_v9  ;;  %v6077_v25 = vpack.c.bf16 %v16854_v4, %v16852_v34  ;;  %13461 = vpow2.f32 %v5420_v51  ;;  %v20427_v32 = vld [vmem:[#allocation36_spill] sm:$0xff] }
 0x748   : > { %20406 = vst [vmem:[#allocation50_spill] sm:$0xff] %v16887_v7 }
 0x749   : > { %6149 = vmatmul.bf16.gmra.mxu1 %v6077_v25  ;;  %6238 = vmatmul.bf16.gmra.mxu2 %v6077_v25  ;;  %v6226_v18 = vpop.f32.mrf.mxu2 }
 0x74a   : > { %6327 = vmatmul.bf16.gmra.mxu3 %v6077_v25  ;;  %6416 = vmatmul.bf16.gmra.mxu0 %v6077_v25  ;;  %v6490_v29 = vadd.f32 %v6226_v18, %v5958_v33  ;;  %v6315_v1 = vpop.f32.mrf.mxu3 }
 0x74b   : > { %v6491_v16 = vadd.f32 %v6315_v1, %v5959_v11  ;;  %v20408_v11 = vld [vmem:[#allocation52_spill] sm:$0xff] }
 0x74c   : > { %6618 = vst [vmem:[#allocation6 + $0x2f8] sm:$0xff] %v6490_v29  ;;  %v16870_v35 = vpop.eup %13459 }
 0x74d   : > { %6619 = vst [vmem:[#allocation6 + $0xc8] sm:$0xff] %v6491_v16  ;;  %v16872_v9 = vpop.eup %13461  ;;  %v20409_v16 = vld [vmem:[#allocation51_spill] sm:$0xff] }
 0x74e   : > { %v6078_v41 = vpack.c.bf16 %v16870_v35, %v16872_v9 }
 0x750   : > { %v5067_v50 = vpop.xlane.xlu1 %5066 }
 0x751   : > { %v16866_v8 = vmax.f32 %v16863_v38, %v5067_v50 }
 0x753   : > { %6758 = vst.msk [vmem:[#allocation4 + $0xc8] sm:$0xff] %vm5624_vm3, %v16866_v8 }
 0x759   : > { %6154 = vmatmul.bf16.gmra.mxu1 %v6078_v41  ;;  %6243 = vmatmul.bf16.gmra.mxu2 %v6078_v41 }
 0x75a   : > { %6332 = vmatmul.bf16.gmra.mxu3 %v6078_v41  ;;  %6421 = vmatmul.bf16.gmra.mxu0 %v6078_v41 }
 0x75b   : > { %5285 = vperm.xlu2 %13427, %v20405_v19  }
 0x75f   : > { %v5071_v17 = vpop.xlane.xlu0 %5070 }
 0x760   : > { %v16880_v25 = vmax.f32 %v16877_v22, %v5071_v17  ;;  %v16905_v17 = vld [vmem:[#allocation4 + $0xe0] sm:$0xff] }
 0x762   : > { %6760 = vst.msk [vmem:[#allocation4 + $0xd8] sm:$0xff] %vm5624_vm3, %v16880_v25 }
 0x763   : > { %5078 = vmax.xlane.f32.xlu1 %v16816_v43 }
 0x768   : > { %v5276_v33 = vpop.permute.xlu1 %5275 }
 0x769   : > { %v5381_v12 = vsub.f32 %v20408_v11, %v5276_v33  ;;  %v16912_v11 = vld [vmem:[#allocation4 + $0xf0] sm:$0xff] }
 0x76a   : > { %20410 = vst [vmem:[#allocation42_spill] sm:$0xff] %v16912_v11 }
 0x76b   : > { %5532 = vadd.xlane.f32.xlu1 %v16742_v44  ;;  %v5426_v29 = vmul.f32 1.442695, %v5381_v12 }
 0x76d   : > { %13463 = vpow2.f32 %v5426_v29 }
 0x770   : > { %5536 = vadd.xlane.f32.xlu0 %v16769_v14 }
 0x772   : > { %v5281_v33 = vpop.permute.xlu0 %5280 }
 0x773   : > { %v16899_v44 = vpop.eup %13463 }
 0x774   : > { %v5069_v5 = vpop.xlane.xlu2 %5068 }
 0x775   : > { %v16890_v18 = vmax.f32 %v16887_v7, %v5069_v5 }
 0x777   : > { %20407 = vst [vmem:[#allocation49_spill] sm:$0xff] %v16890_v18 }
 0x778   : > { %6759 = vst.msk [vmem:[#allocation4 + $0xd0] sm:$0xff] %vm5624_vm3, %v16890_v18 }
 0x77c   : > { %v5271_v1 = vpop.permute.xlu2 %5270 }
 0x77d   : > { %v5380_v51 = vsub.f32 %v20409_v16, %v5271_v1  ;;  %v5464_v1 = vld [vmem:[#allocation5] sm:$0xff]  ;;  %v20412_v16 = vld [vmem:[#allocation29_spill] sm:$0xff] }
 0x77f   : > { %v5424_v50 = vmul.f32 1.442695, %v5380_v51  ;;  %v5496_v51 = vmul.f32 %v20412_v16, %v5464_v1 }
 0x781   : > { %13465 = vpow2.f32 %v5424_v50 }
 0x784   : > { %5530 = vadd.xlane.f32.xlu2 %v16688_v21  ;;  %5310 = vperm.xlu0 %13428, %v16786_v45  }
 0x785   : > { %5305 = vperm.xlu1 %13429, %v16747_v20  }
 0x787   : > { %v16901_v14 = vpop.eup %13465 }
 0x788   : > { %v6079_v41 = vpack.c.bf16 %v16899_v44, %v16901_v14 }
 0x78a   : > { %6159 = vmatmul.bf16.gmra.mxu1 %v6079_v41  ;;  %6248 = vmatmul.bf16.gmra.mxu2 %v6079_v41 }
 0x78b   : > { %6337 = vmatmul.bf16.gmra.mxu3 %v6079_v41  ;;  %6426 = vmatmul.bf16.gmra.mxu0 %v6079_v41 }
 0x793   : > { %v5073_v5 = vpop.xlane.xlu1 %5072 }
 0x794   : > { %v16908_v21 = vmax.f32 %v16905_v17, %v5073_v5  ;;  %v16924_v5 = vld [vmem:[#allocation4 + $0xe8] sm:$0xff] }
 0x795   : > { %20413 = vst [vmem:[#allocation51_spill] sm:$0xff] %v16924_v5 }
 0x796   : > { %6761 = vst.msk [vmem:[#allocation4 + $0xe0] sm:$0xff] %vm5624_vm3, %v16908_v21 }
 0x79c   : > { %5300 = vperm.xlu2 %13427, %v16728_v0  }
 0x79d   : > { %v5077_v12 = vpop.xlane.xlu0 %5076 }
 0x79e   : > { %v16916_v29 = vmax.f32 %v16912_v11, %v5077_v12  ;;  %v20415_v11 = vld [vmem:[#allocation53_spill] sm:$0xff] }
 0x79f   : > { %v5382_v7 = vsub.f32 %v20415_v11, %v5281_v33  ;;  %v20418_v33 = vld [vmem:[#allocation55_spill] sm:$0xff] }
 0x7a0   : > { %20411 = vst [vmem:[#allocation52_spill] sm:$0xff] %v16916_v29 }
 0x7a1   : > { %6763 = vst.msk [vmem:[#allocation4 + $0xf0] sm:$0xff] %vm5624_vm3, %v16916_v29  ;;  %v5428_v1 = vmul.f32 1.442695, %v5382_v7 }
 0x7a3   : > { %13467 = vpow2.f32 %v5428_v1 }
 0x7a5   : > { %v5529_v50 = vpop.xlane.xlu0 %5528 }
 0x7a6   : > { %v5592_v41 = vadd.f32 %v5529_v50, %v5496_v51  ;;  %v20416_v51 = vld [vmem:[#allocation54_spill] sm:$0xff] }
 0x7a8   : > { %5625 = vst.msk [vmem:[#allocation5] sm:$0xff] %vm5624_vm3, %v5592_v41 }
 0x7ae   : > { %5542 = vadd.xlane.f32.xlu0 %v16799_v59  ;;  %v16935_v59 = vpop.eup %13467 }
 0x7af   : > { %5538 = vadd.xlane.f32.xlu1 %v16774_v62 }
 0x7b5   : > { %v5075_v43 = vpop.xlane.xlu2 %5074 }
 0x7b6   : > { %v16927_v12 = vmax.f32 %v16924_v5, %v5075_v43  ;;  %v5291_v43 = vpop.permute.xlu1 %5290 }
 0x7b7   : > { %v5384_v11 = vsub.f32 %v20418_v33, %v5291_v43  ;;  %v20424_v33 = vld [vmem:[#allocation23_spill] sm:$0xff] }
 0x7b8   : > { %20414 = vst [vmem:[#allocation29_spill] sm:$0xff] %v16927_v12  ;;  %v5296_v62 = vpop.permute.xlu0 %5295 }
 0x7b9   : > { %6762 = vst.msk [vmem:[#allocation4 + $0xe8] sm:$0xff] %vm5624_vm3, %v16927_v12  ;;  %v5385_v2 = vsub.f32 %v20417_v53, %v5296_v62 }
 0x7bb   : > { %v5434_v1 = vmul.f32 1.442695, %v5385_v2 }
 0x7bd   : > { %v5286_v16 = vpop.permute.xlu2 %5285 }
 0x7be   : > { %v5383_v50 = vsub.f32 %v20416_v51, %v5286_v16  ;;  %v20419_v16 = vld [vmem:[#allocation20_spill] sm:$0xff] }
 0x7bf   : > { %v20420_v51 = vld [vmem:[#allocation28_spill] sm:$0xff] }
 0x7c0   : > { %v5430_v41 = vmul.f32 1.442695, %v5383_v50  ;;  %v5116_v50 = vsub.f32 %v20420_v51, %v20419_v16  ;;  %v5468_v16 = vld [vmem:[#allocation5 + $0x20] sm:$0xff] }
 0x7c2   : > { %13469 = vpow2.f32 %v5430_v41  ;;  %5325 = vperm.xlu0 %13428, %v16838_v23   ;;  %v16946_v41 = vld [vmem:[#allocation4 + $0xf8] sm:$0xff]  ;;  %v5152_v53 = vmul.f32 1.442695, %v5116_v50 }
 0x7c3   : > { %13471 = vpow2.f32 %v5434_v1  ;;  %20421 = vst [vmem:[#allocation53_spill] sm:$0xff] %v16946_v41 }
 0x7c5   : > { %5534 = vadd.xlane.f32.xlu2 %v16744_v61  ;;  %v5432_v61 = vmul.f32 1.442695, %v5384_v11 }
 0x7c7   : > { %13473 = vpow2.f32 %v5432_v61 }
 0x7c8   : > { %v16937_v5 = vpop.eup %13469  ;;  %5320 = vperm.xlu1 %13429, %v16814_v13   ;;  %13475 = vpow2.f32 %v5152_v53 }
 0x7c9   : > { %v6080_v7 = vpack.c.bf16 %v16937_v5, %v16935_v59  ;;  %v16948_v62 = vpop.eup %13471 }
 0x7ca   : > { %20422 = vst [vmem:[#allocation54_spill] sm:$0xff] %v16948_v62 }
 0x7cb   : > { %6164 = vmatmul.bf16.gmra.mxu1 %v6080_v7  ;;  %6253 = vmatmul.bf16.gmra.mxu2 %v6080_v7 }
 0x7cc   : > { %6342 = vmatmul.bf16.gmra.mxu3 %v6080_v7  ;;  %6431 = vmatmul.bf16.gmra.mxu0 %v6080_v7  ;;  %v5466_v7 = vld [vmem:[#allocation5 + $0x10] sm:$0xff] }
 0x7cd   : > { %v16953_v43 = vpop.eup %13473  ;;  %v5498_v11 = vmul.f32 %v20424_v33, %v5466_v7 }
 0x7ce   : > { %v6081_v2 = vpack.c.bf16 %v16948_v62, %v16953_v43  ;;  %v16961_v1 = vpop.eup %13475 }
 0x7cf   : > { %v5500_v51 = vmul.f32 %v16961_v1, %v5468_v16 }
 0x7d6   : > { %v5079_v23 = vpop.xlane.xlu1 %5078 }
 0x7d7   : > { %v16951_v45 = vmax.f32 %v16946_v41, %v5079_v23  ;;  %v20425_v41 = vld [vmem:[#allocation38_spill] sm:$0xff] }
 0x7d9   : > { %20423 = vst [vmem:[#allocation33_spill] sm:$0xff] %v16951_v45 }
 0x7da   : > { %6764 = vst.msk [vmem:[#allocation4 + $0xf8] sm:$0xff] %vm5624_vm3, %v16951_v45 }
 0x7db   : > { %6169 = vmatmul.bf16.gmra.mxu1 %v6081_v2  ;;  %6258 = vmatmul.bf16.gmra.mxu2 %v6081_v2 }
 0x7dc   : > { %6347 = vmatmul.bf16.gmra.mxu3 %v6081_v2  ;;  %6436 = vmatmul.bf16.gmra.mxu0 %v6081_v2  ;;  %v5465_v2 = vld [vmem:[#allocation5 + $0x8] sm:$0xff] }
 0x7dd   : > { %5315 = vperm.xlu2 %13427, %v16772_v49   ;;  %v5497_v7 = vmul.f32 %v20425_v41, %v5465_v2  ;;  %v20430_v41 = vld [vmem:[#allocation31_spill] sm:$0xff]  ;;  %v20432_v2 = vld [vmem:[#allocation30_spill] sm:$0xff] }
 0x7de   : > { %v5533_v23 = vpop.xlane.xlu1 %5532 }
 0x7df   : > { %v5594_v61 = vadd.f32 %v5533_v23, %v5498_v11  ;;  %v20426_v11 = vld [vmem:[#allocation22_spill] sm:$0xff] }
 0x7e1   : > { %5627 = vst.msk [vmem:[#allocation5 + $0x10] sm:$0xff] %vm5624_vm3, %v5594_v61 }
 0x7e3   : > { %v5537_v50 = vpop.xlane.xlu0 %5536 }
 0x7e4   : > { %v5596_v53 = vadd.f32 %v5537_v50, %v5500_v51 }
 0x7e6   : > { %5629 = vst.msk [vmem:[#allocation5 + $0x20] sm:$0xff] %vm5624_vm3, %v5596_v53  ;;  %v20431_v53 = vld [vmem:[#allocation26_spill] sm:$0xff] }
 0x7ec   : > { %5548 = vadd.xlane.f32.xlu0 %v16872_v9 }
 0x7f2   : > { %5544 = vadd.xlane.f32.xlu1 %v16852_v34 }
 0x7f7   : > { %v5531_v33 = vpop.xlane.xlu2 %5530  ;;  %v5306_v40 = vpop.permute.xlu1 %5305 }
 0x7f8   : > { %v5593_v62 = vadd.f32 %v5531_v33, %v5497_v7  ;;  %v5387_v23 = vsub.f32 %v20426_v11, %v5306_v40  ;;  %v5117_v7 = vsub.f32 %v20432_v2, %v20431_v53  ;;  %v5311_v11 = vpop.permute.xlu0 %5310  ;;  %v20433_v53 = vld [vmem:[#allocation25_spill] sm:$0xff] }
 0x7fa   : > { %5626 = vst.msk [vmem:[#allocation5 + $0x8] sm:$0xff] %vm5624_vm3, %v5593_v62  ;;  %v5438_v61 = vmul.f32 1.442695, %v5387_v23  ;;  %v5154_v33 = vmul.f32 1.442695, %v5117_v7 }
 0x7fc   : > { %13477 = vpow2.f32 %v5438_v61  ;;  %v5471_v61 = vld [vmem:[#allocation5 + $0x38] sm:$0xff] }
 0x7ff   : > { %v5301_v16 = vpop.permute.xlu2 %5300 }
 0x800   : > { %v5386_v51 = vsub.f32 %v20427_v32, %v5301_v16  ;;  %5340 = vperm.xlu0 %13428, %v16890_v18   ;;  %v20429_v32 = vld [vmem:[#allocation35_spill] sm:$0xff] }
 0x801   : > { %v5119_v62 = vsub.f32 %v20430_v41, %v20429_v32 }
 0x802   : > { %v5436_v50 = vmul.f32 1.442695, %v5386_v51  ;;  %v16974_v34 = vpop.eup %13477  ;;  %v5469_v51 = vld [vmem:[#allocation5 + $0x28] sm:$0xff] }
 0x804   : > { %13479 = vpow2.f32 %v5436_v50 }
 0x806   : > { %5540 = vadd.xlane.f32.xlu2 %v16801_v27  ;;  %v5158_v27 = vmul.f32 1.442695, %v5119_v62  ;;  %v5467_v62 = vld [vmem:[#allocation5 + $0x18] sm:$0xff] }
 0x807   : > { %v5499_v2 = vmul.f32 %v20433_v53, %v5467_v62  ;;  %v20436_v62 = vld [vmem:[#allocation37_spill] sm:$0xff] }
 0x808   : > { %13481 = vpow2.f32 %v5158_v27  ;;  %v5122_v53 = vsub.f32 %v20436_v62, %v16587_v26 }
 0x809   : > { %13483 = vpow2.f32 %v5154_v33  ;;  %v5388_v33 = vsub.f32 %v16653_v54, %v5311_v11  ;;  %v20435_v54 = vld [vmem:[#allocation32_spill] sm:$0xff] }
 0x80a   : > { %v16976_v9 = vpop.eup %13479  ;;  %v5118_v11 = vsub.f32 %v20435_v54, %v16528_v15 }
 0x80b   : > { %20428 = vst [vmem:[#allocation55_spill] sm:$0xff] %v16976_v9  ;;  %5335 = vperm.xlu1 %13429, %v16866_v8   ;;  %v6082_v40 = vpack.c.bf16 %v16974_v34, %v16976_v9 }
 0x80d   : > { %6174 = vmatmul.bf16.gmra.mxu1 %v6082_v40  ;;  %6263 = vmatmul.bf16.gmra.mxu2 %v6082_v40 }
 0x80e   : > { %6352 = vmatmul.bf16.gmra.mxu3 %v6082_v40  ;;  %6441 = vmatmul.bf16.gmra.mxu0 %v6082_v40  ;;  %v13482_v23 = vpop.eup %13481 }
 0x80f   : > { %v16985_v16 = vpop.eup %13483  ;;  %v5503_v50 = vmul.f32 %v13482_v23, %v5471_v61 }
 0x810   : > { %v5501_v9 = vmul.f32 %v16985_v16, %v5469_v51  ;;  %v20434_v51 = vld [vmem:[#allocation43_spill] sm:$0xff] }
 0x81e   : > { %5330 = vperm.xlu2 %13427, %v16829_v60  }
 0x821   : > { %v5543_v40 = vpop.xlane.xlu0 %5542 }
 0x822   : > { %v5599_v32 = vadd.f32 %v5543_v40, %v5503_v50  ;;  %v5539_v41 = vpop.xlane.xlu1 %5538  ;;  %v16998_v40 = vpop.f32.mrf.mxu1 }
 0x823   : > { %v5597_v18 = vadd.f32 %v5539_v41, %v5501_v9  ;;  %v5440_v9 = vmul.f32 1.442695, %v5388_v33 }
 0x824   : > { %5632 = vst.msk [vmem:[#allocation5 + $0x38] sm:$0xff] %vm5624_vm3, %v5599_v32  ;;  %v17004_v32 = vpop.f32.mrf.mxu0 }
 0x825   : > { %5630 = vst.msk [vmem:[#allocation5 + $0x28] sm:$0xff] %vm5624_vm3, %v5597_v18  ;;  %13485 = vpow2.f32 %v5440_v9  ;;  %v5156_v9 = vmul.f32 1.442695, %v5118_v11  ;;  %v20442_v11 = vld [vmem:[#allocation27_spill] sm:$0xff] }
 0x82a   : > { %5554 = vadd.xlane.f32.xlu0 %v16899_v44  ;;  %v17000_v44 = vpop.f32.mrf.mxu2 }
 0x832   : > { %v17022_v15 = vpop.f32.mrf.mxu2 }
 0x835   : > { %5550 = vadd.xlane.f32.xlu1 %v16870_v35  ;;  %v17002_v35 = vpop.f32.mrf.mxu3 }
 0x838   : > { %v5535_v7 = vpop.xlane.xlu2 %5534 }
 0x839   : > { %v5595_v27 = vadd.f32 %v5535_v7, %v5499_v2  ;;  %v17012_v2 = vpop.eup %13485  ;;  %v5326_v7 = vpop.permute.xlu0 %5325 }
 0x83a   : > { %v5321_v41 = vpop.permute.xlu1 %5320  ;;  %20437 = vst [vmem:[#allocation20_spill] sm:$0xff] %v17012_v2 }
 0x83b   : > { %5628 = vst.msk [vmem:[#allocation5 + $0x18] sm:$0xff] %vm5624_vm3, %v5595_v27  ;;  %v5390_v33 = vsub.f32 %v16708_v56, %v5321_v41  ;;  %v17026_v56 = vpop.f32.mrf.mxu0  ;;  %v5120_v41 = vsub.f32 %v20442_v11, %v16557_v58  ;;  %v20443_v58 = vld [vmem:[#allocation44_spill] sm:$0xff] }
 0x83c   : > { %20440 = vst [vmem:[#allocation38_spill] sm:$0xff] %v17026_v56 }
 0x83d   : > { %v17024_v26 = vpop.f32.mrf.mxu3 }
 0x83e   : > { %5355 = vperm.xlu0 %13428, %v16927_v12   ;;  %20439 = vst [vmem:[#allocation23_spill] sm:$0xff] %v17024_v26 }
 0x840   : > { %v5316_v61 = vpop.permute.xlu2 %5315 }
 0x841   : > { %v5389_v50 = vsub.f32 %v20434_v51, %v5316_v61  ;;  %v5164_v61 = vmul.f32 1.442695, %v5122_v53  ;;  %v17020_v51 = vpop.f32.mrf.mxu1 }
 0x843   : > { %v5442_v18 = vmul.f32 1.442695, %v5389_v50  ;;  %v5444_v50 = vmul.f32 1.442695, %v5390_v33  ;;  %v17035_v33 = vpop.f32.mrf.mxu2 }
 0x845   : > { %13487 = vpow2.f32 %v5442_v18  ;;  %v17037_v12 = vpop.f32.mrf.mxu3 }
 0x846   : > { %5807 = vperm.xlu0 %13428, %v16961_v1   ;;  %13489 = vpow2.f32 %v5156_v9 }
 0x847   : > { %5546 = vadd.xlane.f32.xlu2 %v16854_v4  ;;  %v5391_v4 = vsub.f32 %v16721_v10, %v5326_v7  ;;  %13491 = vpow2.f32 %v5164_v61  ;;  %v20441_v10 = vld [vmem:[#allocation24_spill] sm:$0xff]  ;;  %v5128_v61 = vsub.f32 %v20443_v58, %v16670_v24 }
 0x848   : > { %v5125_v18 = vsub.f32 %v20441_v10, %v16633_v48  ;;  %13493 = vpow2.f32 %v5444_v50  ;;  %v5474_v50 = vld [vmem:[#allocation5 + $0x50] sm:$0xff] }
 0x849   : > { %v5446_v54 = vmul.f32 1.442695, %v5391_v4  ;;  %v17033_v7 = vpop.f32.mrf.mxu1 }
 0x84a   : > { %v5170_v62 = vmul.f32 1.442695, %v5125_v18  ;;  %v5176_v18 = vmul.f32 1.442695, %v5128_v61  ;;  %v5472_v61 = vld [vmem:[#allocation5 + $0x40] sm:$0xff] }
 0x84b   : > { %v17014_v27 = vpop.eup %13487  ;;  %13495 = vpow2.f32 %v5446_v54 }
 0x84c   : > { %20438 = vst [vmem:[#allocation28_spill] sm:$0xff] %v17014_v27  ;;  %v6083_v1 = vpack.c.bf16 %v17014_v27, %v17012_v2  ;;  %v13490_v53 = vpop.eup %13489  ;;  %13497 = vpow2.f32 %v5170_v62  ;;  %v17053_v27 = vpop.f32.mrf.mxu2 }
 0x84d   : > { %v13492_v9 = vpop.eup %13491  ;;  %v17061_v58 = vpop.f32.mrf.mxu3 }
 0x84e   : > { %6179 = vmatmul.bf16.gmra.mxu1 %v6083_v1  ;;  %6268 = vmatmul.bf16.gmra.mxu2 %v6083_v1  ;;  %v17041_v48 = vpop.eup %13493  ;;  %v5506_v54 = vmul.f32 %v13492_v9, %v5474_v50 }
 0x84f   : > { %6357 = vmatmul.bf16.gmra.mxu3 %v6083_v1  ;;  %6446 = vmatmul.bf16.gmra.mxu0 %v6083_v1  ;;  %v5160_v1 = vmul.f32 1.442695, %v5120_v41 }
 0x850   : > { %5350 = vperm.xlu1 %13429, %v16908_v21   ;;  %5822 = vperm.xlu0 %13428, %v13482_v23   ;;  %v17039_v23 = vpop.f32.mrf.mxu0 }
 0x851   : > { %v17045_v4 = vpop.eup %13495  ;;  %13499 = vpow2.f32 %v5160_v1  ;;  %v17051_v62 = vpop.f32.mrf.mxu1 }
 0x852   : > { %20444 = vst [vmem:[#allocation22_spill] sm:$0xff] %v17045_v4  ;;  %v6084_v10 = vpack.c.bf16 %v17045_v4, %v17041_v48  ;;  %v17049_v11 = vpop.eup %13497  ;;  %13501 = vpow2.f32 %v5176_v18 }
 0x854   : > { %v17071_v18 = vpop.f32.mrf.mxu2 }
 0x857   : > { %v17057_v1 = vpop.eup %13499 }
 0x858   : > { %5817 = vperm.xlu1 %13429, %v13490_v53   ;;  %5837 = vperm.xlu0 %13428, %v13492_v9   ;;  %v5131_v9 = vsub.f32 %v16740_v36, %v16747_v20  ;;  %v17063_v50 = vpop.f32.mrf.mxu0  ;;  %v17067_v26 = vpop.eup %13501  ;;  %v5134_v36 = vsub.f32 %v16810_v31, %v16814_v13 }
 0x859   : > { %20445 = vst [vmem:[#allocation36_spill] sm:$0xff] %v17067_v26  ;;  %v17077_v20 = vpop.f32.mrf.mxu3 }
 0x85a   : > { %v5182_v4 = vmul.f32 1.442695, %v5131_v9  ;;  %20446 = vst [vmem:[#allocation35_spill] sm:$0xff] %v17077_v20  ;;  %v5137_v9 = vsub.f32 %v16863_v38, %v16866_v8 }
 0x85c   : > { %13503 = vpow2.f32 %v5182_v4  ;;  %v5194_v13 = vmul.f32 1.442695, %v5137_v9 }
 0x85e   : > { %6184 = vmatmul.bf16.gmra.mxu1 %v6084_v10  ;;  %6273 = vmatmul.bf16.gmra.mxu2 %v6084_v10 }
 0x85f   : > { %6362 = vmatmul.bf16.gmra.mxu3 %v6084_v10  ;;  %6451 = vmatmul.bf16.gmra.mxu0 %v6084_v10  ;;  %v5549_v41 = vpop.xlane.xlu0 %5548  ;;  %v5504_v10 = vmul.f32 %v17057_v1, %v5472_v61  ;;  %v17088_v61 = vpop.f32.mrf.mxu2 }
 0x860   : > { %5345 = vperm.xlu2 %13427, %v16880_v25   ;;  %5852 = vperm.xlu0 %13428, %v17049_v11   ;;  %v5602_v24 = vadd.f32 %v5549_v41, %v5506_v54  ;;  %v17069_v54 = vpop.f32.mrf.mxu1  ;;  %v17079_v41 = vpop.f32.mrf.mxu0  ;;  %20450 = vst [vmem:[#allocation25_spill] sm:$0xff] %v17088_v61 }
 0x861   : > { %20447 = vst [vmem:[#allocation31_spill] sm:$0xff] %v17079_v41  ;;  %v17090_v4 = vpop.f32.mrf.mxu3 }
 0x862   : > { %5635 = vst.msk [vmem:[#allocation5 + $0x50] sm:$0xff] %vm5624_vm3, %v5602_v24  ;;  %v5188_v24 = vmul.f32 1.442695, %v5134_v36 }
 0x863   : > { %20451 = vst [vmem:[#allocation43_spill] sm:$0xff] %v17090_v4 }
 0x864   : > { %13505 = vpow2.f32 %v5188_v24  ;;  %v5140_v24 = vsub.f32 %v16905_v17, %v16908_v21 }
 0x865   : > { %v5545_v56 = vpop.xlane.xlu1 %5544  ;;  %13507 = vpow2.f32 %v5194_v13 }
 0x866   : > { %v5600_v2 = vadd.f32 %v5545_v56, %v5504_v10  ;;  %v17081_v56 = vpop.eup %13503  ;;  %v5470_v10 = vld [vmem:[#allocation5 + $0x30] sm:$0xff] }
 0x867   : > { %20448 = vst [vmem:[#allocation26_spill] sm:$0xff] %v17081_v56  ;;  %v5502_v36 = vmul.f32 %v13490_v53, %v5470_v10  ;;  %v17101_v61 = vpop.f32.mrf.mxu2 }
 0x868   : > { %5633 = vst.msk [vmem:[#allocation5 + $0x40] sm:$0xff] %vm5624_vm3, %v5600_v2  ;;  %5867 = vperm.xlu0 %13428, %v17067_v26   ;;  %v17086_v2 = vpop.f32.mrf.mxu1  ;;  %v17092_v31 = vpop.f32.mrf.mxu0 }
 0x869   : > { %20449 = vst [vmem:[#allocation30_spill] sm:$0xff] %v17086_v2  ;;  %v17104_v9 = vpop.f32.mrf.mxu3 }
 0x86a   : > { %20452 = vst [vmem:[#allocation32_spill] sm:$0xff] %v17092_v31  ;;  %v17094_v26 = vpop.eup %13505  ;;  %v5200_v31 = vmul.f32 1.442695, %v5140_v24 }
 0x86b   : > { %20453 = vst [vmem:[#allocation37_spill] sm:$0xff] %v17094_v26  ;;  %v17109_v13 = vpop.eup %13507 }
 0x86c   : > { %20454 = vst [vmem:[#allocation24_spill] sm:$0xff] %v17109_v13  ;;  %13509 = vpow2.f32 %v5200_v31 }
 0x870   : > { %5882 = vperm.xlu0 %13428, %v17081_v56   ;;  %v17099_v56 = vpop.f32.mrf.mxu1  ;;  %v17106_v2 = vpop.f32.mrf.mxu0 }
 0x878   : > { %5897 = vperm.xlu0 %13428, %v17094_v26   ;;  %v17114_v24 = vpop.f32.mrf.mxu1  ;;  %v5477_v26 = vld [vmem:[#allocation5 + $0x68] sm:$0xff] }
 0x879   : > { %v5541_v38 = vpop.xlane.xlu2 %5540  ;;  %20455 = vst [vmem:[#allocation27_spill] sm:$0xff] %v17114_v24 }
 0x87a   : > { %v5598_v8 = vadd.f32 %v5541_v38, %v5502_v36  ;;  %v17116_v38 = vpop.f32.mrf.mxu2 }
 0x87b   : > { %20456 = vst [vmem:[#allocation44_spill] sm:$0xff] %v17116_v38 }
 0x87c   : > { %5631 = vst.msk [vmem:[#allocation5 + $0x30] sm:$0xff] %vm5624_vm3, %v5598_v8  ;;  %v17118_v8 = vpop.eup %13509 }
 0x87d   : > { %v5336_v4 = vpop.permute.xlu1 %5335  ;;  %20457 = vst [vmem:[#allocation60_spill] sm:$0xff] %v17118_v8 }
 0x87e   : > { %v5393_v53 = vsub.f32 %v16757_v42, %v5336_v4  ;;  %v17120_v42 = vpop.f32.mrf.mxu3  ;;  %v17122_v4 = vpop.f32.mrf.mxu0 }
 0x87f   : > { %20458 = vst [vmem:[#allocation61_spill] sm:$0xff] %v17120_v42  ;;  %v20466_v42 = vld [vmem:[#allocation39_spill] sm:$0xff] }
 0x880   : > { %5912 = vperm.xlu0 %13428, %v17109_v13   ;;  %v5450_v17 = vmul.f32 1.442695, %v5393_v53  ;;  %20459 = vst [vmem:[#allocation62_spill] sm:$0xff] %v17122_v4  ;;  %v17132_v53 = vpop.f32.mrf.mxu1  ;;  %v17142_v4 = vpop.permute.xlu0 %5340  ;;  %v5123_v38 = vsub.f32 %v20466_v42, %v16607_v55 }
 0x881   : > { %v5331_v21 = vpop.permute.xlu2 %5330  ;;  %20461 = vst [vmem:[#allocation64_spill] sm:$0xff] %v17132_v53 }
 0x882   : > { %v5392_v10 = vsub.f32 %v16734_v57, %v5331_v21  ;;  %5556 = vadd.xlane.f32.xlu1 %v16935_v59  ;;  %13511 = vpow2.f32 %v5450_v17  ;;  %v17134_v17 = vpop.f32.mrf.mxu2 }
 0x883   : > { %20462 = vst [vmem:[#allocation65_spill] sm:$0xff] %v17134_v17 }
 0x884   : > { %v5448_v36 = vmul.f32 1.442695, %v5392_v10 }
 0x886   : > { %13513 = vpow2.f32 %v5448_v36  ;;  %v17136_v21 = vpop.f32.mrf.mxu3  ;;  %v17138_v10 = vpop.f32.mrf.mxu0 }
 0x887   : > { %20463 = vst [vmem:[#allocation66_spill] sm:$0xff] %v17136_v21  ;;  %v5166_v21 = vmul.f32 1.442695, %v5123_v38 }
 0x888   : > { %5927 = vperm.xlu0 %13428, %v17118_v8   ;;  %v17126_v57 = vpop.eup %13511  ;;  %20464 = vst [vmem:[#allocation67_spill] sm:$0xff] %v17138_v10 }
 0x889   : > { %5552 = vadd.xlane.f32.xlu2 %v16901_v14  ;;  %v20465_v14 = vld [vmem:[#allocation34_spill] sm:$0xff] }
 0x88a   : > { %v5121_v36 = vsub.f32 %v20465_v14, %v16573_v39  ;;  %v17148_v8 = vpop.f32.mrf.mxu2  ;;  %v20467_v39 = vld [vmem:[#allocation40_spill] sm:$0xff]  ;;  %v5509_v14 = vmul.f32 %v17049_v11, %v5477_v26  ;;  %v20472_v26 = vld [vmem:[#allocation41_spill] sm:$0xff] }
 0x88b   : > { %v5127_v11 = vsub.f32 %v20472_v26, %v20405_v19  ;;  %v5130_v19 = vsub.f32 %v16725_v46, %v16728_v0 }
 0x88c   : > { %v17128_v59 = vpop.eup %13513  ;;  %v5162_v24 = vmul.f32 1.442695, %v5121_v36 }
 0x88d   : > { %20460 = vst [vmem:[#allocation63_spill] sm:$0xff] %v17128_v59  ;;  %v6085_v31 = vpack.c.bf16 %v17126_v57, %v17128_v59  ;;  %v17146_v59 = vpop.f32.mrf.mxu1 }
 0x88e   : > { %v17150_v13 = vpop.f32.mrf.mxu3  ;;  %v17152_v10 = vpop.f32.mrf.mxu0  ;;  %13515 = vpow2.f32 %v5162_v24 }
 0x88f   : > { %6189 = vmatmul.bf16.gmra.mxu1 %v6085_v31  ;;  %6278 = vmatmul.bf16.gmra.mxu2 %v6085_v31  ;;  %13517 = vpow2.f32 %v5166_v21  ;;  %v5475_v21 = vld [vmem:[#allocation5 + $0x58] sm:$0xff] }
 0x890   : > { %6367 = vmatmul.bf16.gmra.mxu3 %v6085_v31  ;;  %6456 = vmatmul.bf16.gmra.mxu0 %v6085_v31  ;;  %v5124_v31 = vsub.f32 %v20467_v39, %v16619_v30 }
 0x892   : > { %v5168_v36 = vmul.f32 1.442695, %v5124_v31  ;;  %v17160_v53 = vpop.f32.mrf.mxu2  ;;  %v5174_v31 = vmul.f32 1.442695, %v5127_v11 }
 0x893   : > { %20469 = vst [vmem:[#allocation39_spill] sm:$0xff] %v17160_v53  ;;  %v5675_v53 = vld [vmem:[#allocation6 + $0x90] sm:$0xff] }
 0x894   : > { %v13516_v24 = vpop.eup %13515  ;;  %13519 = vpow2.f32 %v5168_v36 }
 0x895   : > { %v17158_v17 = vpop.f32.mrf.mxu1  ;;  %v17168_v30 = vpop.eup %13517  ;;  %13521 = vpow2.f32 %v5174_v31  ;;  %v5473_v31 = vld [vmem:[#allocation5 + $0x48] sm:$0xff] }
 0x896   : > { %20468 = vst [vmem:[#allocation34_spill] sm:$0xff] %v17158_v17  ;;  %v17163_v38 = vpop.f32.mrf.mxu3  ;;  %v5507_v39 = vmul.f32 %v17168_v30, %v5475_v21  ;;  %v5133_v21 = vsub.f32 %v16767_v37, %v16772_v49  ;;  %v5676_v17 = vld [vmem:[#allocation6 + $0x350] sm:$0xff] }
 0x897   : > { %20470 = vst [vmem:[#allocation40_spill] sm:$0xff] %v17163_v38 }
 0x89b   : > { %5365 = vperm.xlu1 %13429, %v16951_v45   ;;  %v17166_v45 = vpop.f32.mrf.mxu0 }
 0x89c   : > { %20471 = vst [vmem:[#allocation68_spill] sm:$0xff] %v17166_v45  ;;  %v17178_v45 = vpop.f32.mrf.mxu2 }
 0x89d   : > { %v5555_v55 = vpop.xlane.xlu0 %5554  ;;  %20474 = vst [vmem:[#allocation69_spill] sm:$0xff] %v17178_v45 }
 0x89e   : > { %v5605_v42 = vadd.f32 %v5555_v55, %v5509_v14  ;;  %v17180_v38 = vpop.f32.mrf.mxu3 }
 0x89f   : > { %20475 = vst [vmem:[#allocation70_spill] sm:$0xff] %v17180_v38 }
 0x8a0   : > { %5638 = vst.msk [vmem:[#allocation5 + $0x68] sm:$0xff] %vm5624_vm3, %v5605_v42  ;;  %v17174_v42 = vpop.eup %13519 }
 0x8a1   : > { %5812 = vperm.xlu2 %13427, %v16985_v16   ;;  %v17176_v16 = vpop.f32.mrf.mxu1  ;;  %v17191_v11 = vpop.eup %13521 }
 0x8a2   : > { %20473 = vst [vmem:[#allocation41_spill] sm:$0xff] %v17176_v16 }
 0x8a3   : > { %5832 = vperm.xlu1 %13429, %v13516_v24   ;;  %v17186_v36 = vpop.f32.mrf.mxu0  ;;  %20477 = vst [vmem:[#allocation72_spill] sm:$0xff] %v17191_v11 }
 0x8a4   : > { %20476 = vst [vmem:[#allocation71_spill] sm:$0xff] %v17186_v36  ;;  %v17199_v46 = vpop.f32.mrf.mxu2  ;;  %v5505_v36 = vmul.f32 %v13516_v24, %v5473_v31 }
 0x8a6   : > { %v17201_v0 = vpop.f32.mrf.mxu3 }
 0x8a8   : > { %v5551_v14 = vpop.xlane.xlu1 %5550 }
 0x8a9   : > { %5827 = vperm.xlu2 %13427, %v17057_v1   ;;  %v5603_v55 = vadd.f32 %v5551_v14, %v5507_v39  ;;  %v5180_v1 = vmul.f32 1.442695, %v5130_v19  ;;  %v17197_v39 = vpop.f32.mrf.mxu1  ;;  %v5673_v14 = vld [vmem:[#allocation6 + $0x150] sm:$0xff] }
 0x8aa   : > { %v5674_v19 = vld [vmem:[#allocation6 + $0x210] sm:$0xff] }
 0x8ab   : > { %5636 = vst.msk [vmem:[#allocation5 + $0x58] sm:$0xff] %vm5624_vm3, %v5603_v55  ;;  %5847 = vperm.xlu1 %13429, %v17174_v42   ;;  %13523 = vpow2.f32 %v5180_v1  ;;  %v17203_v55 = vpop.f32.mrf.mxu0 }
 0x8b0   : > { %v17188_v26 = vpop.permute.xlu0 %5355 }
 0x8b1   : > { %5360 = vperm.xlu2 %13427, %v16916_v29   ;;  %v17205_v49 = vpop.eup %13523 }
 0x8b2   : > { %5560 = vadd.xlane.f32.xlu0 %v16953_v43  ;;  %v5186_v43 = vmul.f32 1.442695, %v5133_v21  ;;  %v5136_v21 = vsub.f32 %v16824_v47, %v16829_v60  ;;  %v5686_v60 = vld [vmem:[#allocation6 + $0x278] sm:$0xff] }
 0x8b3   : > { %5862 = vperm.xlu1 %13429, %v17191_v11  }
 0x8b4   : > { %13525 = vpow2.f32 %v5186_v43  ;;  %v5192_v47 = vmul.f32 1.442695, %v5136_v21 }
 0x8b6   : > { %13527 = vpow2.f32 %v5192_v47 }
 0x8b8   : > { %v5808_v11 = vpop.permute.xlu0 %5807 }
 0x8b9   : > { %v5961_v1 = vmul.f32 %v5808_v11, %v5673_v14  ;;  %v5962_v29 = vmul.f32 %v5808_v11, %v5674_v19  ;;  %v5963_v38 = vmul.f32 %v5808_v11, %v5675_v53  ;;  %v5964_v37 = vmul.f32 %v5808_v11, %v5676_v17  ;;  %v17216_v17 = vpop.f32.mrf.mxu1 }
 0x8ba   : > { %v5547_v45 = vpop.xlane.xlu2 %5546  ;;  %5566 = vadd.xlane.f32.xlu0 %v16974_v34  ;;  %v17218_v34 = vpop.f32.mrf.mxu2 }
 0x8bb   : > { %v5601_v16 = vadd.f32 %v5547_v45, %v5505_v36  ;;  %v6493_v41 = vadd.f32 %v16998_v40, %v5961_v1  ;;  %v6494_v20 = vadd.f32 %v17000_v44, %v5962_v29  ;;  %5877 = vperm.xlu1 %13429, %v17205_v49   ;;  %v6495_v24 = vadd.f32 %v17002_v35, %v5963_v38  ;;  %v17220_v45 = vpop.f32.mrf.mxu3  ;;  %v17224_v40 = vpop.f32.mrf.mxu0  ;;  %v5685_v44 = vld [vmem:[#allocation6 + $0x388] sm:$0xff]  ;;  %v5687_v35 = vld [vmem:[#allocation6 + $0x258] sm:$0xff] }
 0x8bc   : > { %v6496_v53 = vadd.f32 %v17004_v32, %v5964_v37  ;;  %v5394_v29 = vsub.f32 %v16765_v63, %v17142_v4  ;;  %v5688_v32 = vld [vmem:[#allocation6 + $0x80] sm:$0xff]  ;;  %v17226_v38 = vpop.eup %13525  ;;  %v5139_v1 = vsub.f32 %v16877_v22, %v16880_v25  ;;  %v5682_v22 = vld [vmem:[#allocation6 + $0x348] sm:$0xff] }
 0x8bd   : > { %5634 = vst.msk [vmem:[#allocation5 + $0x48] sm:$0xff] %vm5624_vm3, %v5601_v16  ;;  %v5683_v25 = vld [vmem:[#allocation6 + $0xc0] sm:$0xff] }
 0x8be   : > { %6621 = vst [vmem:[#allocation6 + $0x150] sm:$0xff] %v6493_v41  ;;  %v5452_v41 = vmul.f32 1.442695, %v5394_v29  ;;  %v5681_v29 = vld [vmem:[#allocation6 + $0x390] sm:$0xff] }
 0x8bf   : > { %6622 = vst [vmem:[#allocation6 + $0x210] sm:$0xff] %v6494_v20 }
 0x8c0   : > { %6623 = vst [vmem:[#allocation6 + $0x90] sm:$0xff] %v6495_v24  ;;  %13529 = vpow2.f32 %v5452_v41 }
 0x8c1   : > { %6624 = vst [vmem:[#allocation6 + $0x350] sm:$0xff] %v6496_v53  ;;  %v17234_v37 = vpop.f32.mrf.mxu1 }
 0x8c2   : > { %v5351_v16 = vpop.permute.xlu1 %5350  ;;  %v5346_v36 = vpop.permute.xlu2 %5345  ;;  %5572 = vadd.xlane.f32.xlu0 %v17041_v48 }
 0x8c3   : > { %v5396_v11 = vsub.f32 %v16788_v3, %v5351_v16  ;;  %v5395_v63 = vsub.f32 %v16780_v52, %v5346_v36  ;;  %v5823_v20 = vpop.permute.xlu0 %5822  ;;  %5892 = vperm.xlu1 %13429, %v17226_v38   ;;  %v17236_v48 = vpop.f32.mrf.mxu2 }
 0x8c4   : > { %v5973_v4 = vmul.f32 %v5823_v20, %v5685_v44  ;;  %v5974_v31 = vmul.f32 %v5823_v20, %v5686_v60  ;;  %v5975_v14 = vmul.f32 %v5823_v20, %v5687_v35  ;;  %v5976_v19 = vmul.f32 %v5823_v20, %v5688_v32  ;;  %v17241_v21 = vpop.f32.mrf.mxu3  ;;  %v17244_v44 = vpop.f32.mrf.mxu0  ;;  %v5684_v60 = vld [vmem:[#allocation6 + $0x238] sm:$0xff]  ;;  %v5698_v35 = vld [vmem:[#allocation6 + $0x230] sm:$0xff]  ;;  %v5699_v32 = vld [vmem:[#allocation6 + $0x328] sm:$0xff] }
 0x8c5   : > { %v5454_v43 = vmul.f32 1.442695, %v5395_v63  ;;  %v5456_v47 = vmul.f32 1.442695, %v5396_v11  ;;  %v17247_v16 = vpop.eup %13527  ;;  %v5700_v63 = vld [vmem:[#allocation6 + $0x3e0] sm:$0xff] }
 0x8c6   : > { %v6505_v3 = vadd.f32 %v17051_v62, %v5973_v4  ;;  %v6506_v52 = vadd.f32 %v17053_v27, %v5974_v31  ;;  %v6507_v24 = vadd.f32 %v17061_v58, %v5975_v14  ;;  %v6508_v53 = vadd.f32 %v17063_v50, %v5976_v19  ;;  %v5697_v62 = vld [vmem:[#allocation6 + $0x1a8] sm:$0xff]  ;;  %v17250_v14 = vpop.eup %13529 }
 0x8c7   : > { %13531 = vpow2.f32 %v5454_v43  ;;  %v5198_v27 = vmul.f32 1.442695, %v5139_v1 }
 0x8c8   : > { %6633 = vst [vmem:[#allocation6 + $0x388] sm:$0xff] %v6505_v3  ;;  %13533 = vpow2.f32 %v5456_v47 }
 0x8c9   : > { %6634 = vst [vmem:[#allocation6 + $0x278] sm:$0xff] %v6506_v52  ;;  %13535 = vpow2.f32 %v5198_v27  ;;  %v17263_v47 = vpop.f32.mrf.mxu1 }
 0x8ca   : > { %6635 = vst [vmem:[#allocation6 + $0x258] sm:$0xff] %v6507_v24  ;;  %v5818_v58 = vpop.permute.xlu1 %5817  ;;  %5578 = vadd.xlane.f32.xlu0 %v17126_v57 }
 0x8cb   : > { %6636 = vst [vmem:[#allocation6 + $0x80] sm:$0xff] %v6508_v53  ;;  %v5969_v50 = vmul.f32 %v5818_v58, %v5681_v29  ;;  %v5970_v36 = vmul.f32 %v5818_v58, %v5682_v22  ;;  %v5971_v41 = vmul.f32 %v5818_v58, %v5683_v25  ;;  %v5972_v11 = vmul.f32 %v5818_v58, %v5684_v60  ;;  %v5838_v20 = vpop.permute.xlu0 %5837  ;;  %v5709_v22 = vld [vmem:[#allocation6 + $0x2e8] sm:$0xff] }
 0x8cc   : > { %v5985_v4 = vmul.f32 %v5838_v20, %v5697_v62  ;;  %v5986_v31 = vmul.f32 %v5838_v20, %v5698_v35  ;;  %5907 = vperm.xlu1 %13429, %v17247_v16   ;;  %v5987_v1 = vmul.f32 %v5838_v20, %v5699_v32  ;;  %v5988_v24 = vmul.f32 %v5838_v20, %v5700_v63  ;;  %v17268_v25 = vpop.f32.mrf.mxu3  ;;  %v17271_v62 = vpop.f32.mrf.mxu0 }
 0x8cd   : > { %v6501_v19 = vadd.f32 %v17033_v7, %v5969_v50  ;;  %v6502_v57 = vadd.f32 %v17035_v33, %v5970_v36  ;;  %v6503_v43 = vadd.f32 %v17037_v12, %v5971_v41  ;;  %v17255_v3 = vpop.eup %13531  ;;  %v6504_v52 = vadd.f32 %v17039_v23, %v5972_v11  ;;  %v17265_v33 = vpop.f32.mrf.mxu2 }
 0x8ce   : > { %v5397_v53 = vsub.f32 %v16795_v28, %v17188_v26  ;;  %v6517_v29 = vadd.f32 %v17099_v56, %v5985_v4  ;;  %v6086_v7 = vpack.c.bf16 %v17255_v3, %v17250_v14  ;;  %v6518_v12 = vadd.f32 %v17101_v61, %v5986_v31  ;;  %v5710_v28 = vld [vmem:[#allocation6 + $0xf0] sm:$0xff]  ;;  %v5711_v56 = vld [vmem:[#allocation6 + $0x260] sm:$0xff]  ;;  %v5712_v26 = vld [vmem:[#allocation6 + $0x18] sm:$0xff]  ;;  %v13534_v60 = vpop.eup %13533 }
 0x8cf   : > { %6629 = vst [vmem:[#allocation6 + $0x390] sm:$0xff] %v6501_v19  ;;  %v6519_v23 = vadd.f32 %v17104_v9, %v5987_v1  ;;  %v6520_v35 = vadd.f32 %v17106_v2, %v5988_v24  ;;  %v17274_v58 = vpop.eup %13535  ;;  %v5721_v31 = vld [vmem:[#allocation6 + $0x1d0] sm:$0xff]  ;;  %v5724_v1 = vld [vmem:[#allocation6 + $0x180] sm:$0xff] }
 0x8d0   : > { %6630 = vst [vmem:[#allocation6 + $0x348] sm:$0xff] %v6502_v57  ;;  %6194 = vmatmul.bf16.gmra.mxu1 %v6086_v7  ;;  %6283 = vmatmul.bf16.gmra.mxu2 %v6086_v7  ;;  %v5458_v61 = vmul.f32 1.442695, %v5397_v53  ;;  %v5722_v57 = vld [vmem:[#allocation6 + $0x78] sm:$0xff] }
 0x8d1   : > { %6631 = vst [vmem:[#allocation6 + $0xc0] sm:$0xff] %v6503_v43  ;;  %6372 = vmatmul.bf16.gmra.mxu3 %v6086_v7  ;;  %6461 = vmatmul.bf16.gmra.mxu0 %v6086_v7  ;;  %v17281_v20 = vpop.f32.mrf.mxu1  ;;  %v5723_v43 = vld [vmem:[#allocation6 + $0x380] sm:$0xff] }
 0x8d2   : > { %6632 = vst [vmem:[#allocation6 + $0x238] sm:$0xff] %v6504_v52  ;;  %5584 = vadd.xlane.f32.xlu0 %v13534_v60  ;;  %13537 = vpow2.f32 %v5458_v61 }
 0x8d3   : > { %6645 = vst [vmem:[#allocation6 + $0x1a8] sm:$0xff] %v6517_v29  ;;  %v5853_v27 = vpop.permute.xlu0 %5852 }
 0x8d4   : > { %6646 = vst [vmem:[#allocation6 + $0x230] sm:$0xff] %v6518_v12  ;;  %v5997_v9 = vmul.f32 %v5853_v27, %v5709_v22  ;;  %v5998_v32 = vmul.f32 %v5853_v27, %v5710_v28  ;;  %v5999_v50 = vmul.f32 %v5853_v27, %v5711_v56  ;;  %v6000_v36 = vmul.f32 %v5853_v27, %v5712_v26  ;;  %v17285_v19 = vpop.f32.mrf.mxu3  ;;  %v5734_v28 = vld [vmem:[#allocation6 + $0x2e0] sm:$0xff]  ;;  %v5735_v56 = vld [vmem:[#allocation6 + $0x338] sm:$0xff]  ;;  %v5736_v26 = vld [vmem:[#allocation6 + $0x330] sm:$0xff] }
 0x8d5   : > { %6647 = vst [vmem:[#allocation6 + $0x328] sm:$0xff] %v6519_v23  ;;  %5922 = vperm.xlu1 %13429, %v17274_v58   ;;  %v17283_v4 = vpop.f32.mrf.mxu2 }
 0x8d6   : > { %6648 = vst [vmem:[#allocation6 + $0x3e0] sm:$0xff] %v6520_v35  ;;  %v6529_v41 = vadd.f32 %v17146_v59, %v5997_v9  ;;  %v6530_v2 = vadd.f32 %v17148_v8, %v5998_v32  ;;  %v6531_v11 = vadd.f32 %v17150_v13, %v5999_v50  ;;  %v6532_v63 = vadd.f32 %v17152_v10, %v6000_v36  ;;  %v17287_v59 = vpop.f32.mrf.mxu0 }
 0x8d8   : > { %6657 = vst [vmem:[#allocation6 + $0x2e8] sm:$0xff] %v6529_v41  ;;  %v17290_v53 = vpop.eup %13537 }
 0x8d9   : > { %6658 = vst [vmem:[#allocation6 + $0xf0] sm:$0xff] %v6530_v2  ;;  %v6087_v23 = vpack.c.bf16 %v17290_v53, %v13534_v60  ;;  %v17297_v35 = vpop.f32.mrf.mxu1 }
 0x8da   : > { %6659 = vst [vmem:[#allocation6 + $0x260] sm:$0xff] %v6531_v11  ;;  %5558 = vadd.xlane.f32.xlu2 %v16937_v5  ;;  %v5733_v5 = vld [vmem:[#allocation6 + $0x1c0] sm:$0xff] }
 0x8db   : > { %6660 = vst [vmem:[#allocation6 + $0x18] sm:$0xff] %v6532_v63  ;;  %v5868_v13 = vpop.permute.xlu0 %5867 }
 0x8dc   : > { %v6009_v8 = vmul.f32 %v5868_v13, %v5721_v31  ;;  %v6010_v10 = vmul.f32 %v5868_v13, %v5722_v57  ;;  %v6011_v52 = vmul.f32 %v5868_v13, %v5723_v43  ;;  %v6012_v24 = vmul.f32 %v5868_v13, %v5724_v1  ;;  %v5746_v31 = vld [vmem:[#allocation6 + $0x98] sm:$0xff]  ;;  %v5747_v57 = vld [vmem:[#allocation6 + $0x1e0] sm:$0xff] }
 0x8dd   : > { %v17299_v61 = vpop.f32.mrf.mxu2  ;;  %v5748_v43 = vld [vmem:[#allocation6 + $0x3c0] sm:$0xff] }
 0x8de   : > { %v6541_v29 = vadd.f32 %v17197_v39, %v6009_v8  ;;  %v6542_v7 = vadd.f32 %v17199_v46, %v6010_v10  ;;  %v6543_v12 = vadd.f32 %v17201_v0, %v6011_v52  ;;  %v6544_v22 = vadd.f32 %v17203_v55, %v6012_v24  ;;  %v20478_v39 = vld [vmem:[#allocation21_spill] sm:$0xff]  ;;  %v17303_v0 = vpop.f32.mrf.mxu3  ;;  %v17305_v60 = vpop.f32.mrf.mxu0 }
 0x8df   : > { %v5126_v46 = vsub.f32 %v20478_v39, %v16648_v6  ;;  %v5745_v6 = vld [vmem:[#allocation6 + $0x58] sm:$0xff] }
 0x8e0   : > { %6669 = vst [vmem:[#allocation6 + $0x1d0] sm:$0xff] %v6541_v29  ;;  %6199 = vmatmul.bf16.gmra.mxu1 %v6087_v23  ;;  %6288 = vmatmul.bf16.gmra.mxu2 %v6087_v23 }
 0x8e1   : > { %6670 = vst [vmem:[#allocation6 + $0x78] sm:$0xff] %v6542_v7  ;;  %6377 = vmatmul.bf16.gmra.mxu3 %v6087_v23  ;;  %6466 = vmatmul.bf16.gmra.mxu0 %v6087_v23  ;;  %v5172_v11 = vmul.f32 1.442695, %v5126_v46  ;;  %v6185_v13 = vpop.f32.mrf.mxu1  ;;  %v5478_v23 = vld [vmem:[#allocation5 + $0x70] sm:$0xff] }
 0x8e2   : > { %6671 = vst [vmem:[#allocation6 + $0x380] sm:$0xff] %v6543_v12 }
 0x8e3   : > { %6672 = vst [vmem:[#allocation6 + $0x180] sm:$0xff] %v6544_v22  ;;  %v5883_v55 = vpop.permute.xlu0 %5882  ;;  %13539 = vpow2.f32 %v5172_v11  ;;  %v20483_v11 = vld [vmem:[#allocation54_spill] sm:$0xff] }
 0x8e4   : > { %v6021_v27 = vmul.f32 %v5883_v55, %v5733_v5  ;;  %v6022_v9 = vmul.f32 %v5883_v55, %v5734_v28  ;;  %v6023_v32 = vmul.f32 %v5883_v55, %v5735_v56  ;;  %v6024_v50 = vmul.f32 %v5883_v55, %v5736_v26  ;;  %v20479_v5 = vld [vmem:[#allocation46_spill] sm:$0xff]  ;;  %v20480_v28 = vld [vmem:[#allocation47_spill] sm:$0xff] }
 0x8e5   : > { %v6274_v52 = vpop.f32.mrf.mxu2  ;;  %v5129_v56 = vsub.f32 %v20480_v28, %v20479_v5  ;;  %v20488_v5 = vld [vmem:[#allocation38_spill] sm:$0xff] }
 0x8e6   : > { %v6553_v36 = vadd.f32 %v17263_v47, %v6021_v27  ;;  %v6554_v41 = vadd.f32 %v17265_v33, %v6022_v9  ;;  %v6555_v2 = vadd.f32 %v17268_v25, %v6023_v32  ;;  %v6556_v63 = vadd.f32 %v17271_v62, %v6024_v50  ;;  %v6363_v25 = vpop.f32.mrf.mxu3  ;;  %v6452_v24 = vpop.f32.mrf.mxu0  ;;  %v5476_v27 = vld [vmem:[#allocation5 + $0x60] sm:$0xff]  ;;  %v20481_v9 = vld [vmem:[#allocation45_spill] sm:$0xff] }
 0x8e7   : > { %v5178_v55 = vmul.f32 1.442695, %v5129_v56  ;;  %v20482_v32 = vld [vmem:[#allocation48_spill] sm:$0xff] }
 0x8e8   : > { %6681 = vst [vmem:[#allocation6 + $0x1c0] sm:$0xff] %v6553_v36  ;;  %v5132_v50 = vsub.f32 %v20482_v32, %v20481_v9  ;;  %v5508_v36 = vmul.f32 %v17174_v42, %v5476_v27  ;;  %v20490_v27 = vld [vmem:[#allocation50_spill] sm:$0xff] }
 0x8e9   : > { %6682 = vst [vmem:[#allocation6 + $0x2e0] sm:$0xff] %v6554_v41  ;;  %v13540_v22 = vpop.eup %13539  ;;  %13541 = vpow2.f32 %v5178_v55  ;;  %v17325_v42 = vpop.f32.mrf.mxu1  ;;  %v5691_v55 = vld [vmem:[#allocation6 + $0x300] sm:$0xff] }
 0x8ea   : > { %6683 = vst [vmem:[#allocation6 + $0x338] sm:$0xff] %v6555_v2  ;;  %v5510_v26 = vmul.f32 %v13540_v22, %v5478_v23  ;;  %v5184_v2 = vmul.f32 1.442695, %v5132_v50  ;;  %v20487_v23 = vld [vmem:[#allocation20_spill] sm:$0xff] }
 0x8eb   : > { %6684 = vst [vmem:[#allocation6 + $0x330] sm:$0xff] %v6556_v63  ;;  %v5898_v1 = vpop.permute.xlu0 %5897 }
 0x8ec   : > { %v6033_v8 = vmul.f32 %v5898_v1, %v5745_v6  ;;  %v6034_v47 = vmul.f32 %v5898_v1, %v5746_v31  ;;  %v6035_v10 = vmul.f32 %v5898_v1, %v5747_v57  ;;  %v6036_v33 = vmul.f32 %v5898_v1, %v5748_v43  ;;  %v5677_v6 = vld [vmem:[#allocation6 + $0xe8] sm:$0xff]  ;;  %v5678_v31 = vld [vmem:[#allocation6 + $0x370] sm:$0xff]  ;;  %v20484_v1 = vld [vmem:[#allocation59_spill] sm:$0xff] }
 0x8ed   : > { %v5679_v57 = vld [vmem:[#allocation6 + $0x3e8] sm:$0xff]  ;;  %v5680_v43 = vld [vmem:[#allocation6 + $0x1b0] sm:$0xff]  ;;  %13543 = vpow2.f32 %v5184_v2 }
 0x8ee   : > { %v6565_v29 = vadd.f32 %v6185_v13, %v6033_v8  ;;  %v6566_v62 = vadd.f32 %v6274_v52, %v6034_v47  ;;  %v6567_v7 = vadd.f32 %v6363_v25, %v6035_v10  ;;  %v6568_v12 = vadd.f32 %v6452_v24, %v6036_v33  ;;  %v20485_v13 = vld [vmem:[#allocation58_spill] sm:$0xff]  ;;  %v17327_v10 = vpop.f32.mrf.mxu0  ;;  %v17341_v32 = vpop.f32.mrf.mxu3 }
 0x8ef   : > { %v17320_v63 = vpop.eup %13541  ;;  %v5135_v8 = vsub.f32 %v20485_v13, %v20484_v1 }
 0x8f0   : > { %6693 = vst [vmem:[#allocation6 + $0x58] sm:$0xff] %v6565_v29 }
 0x8f1   : > { %6694 = vst [vmem:[#allocation6 + $0x98] sm:$0xff] %v6566_v62  ;;  %v5190_v29 = vmul.f32 1.442695, %v5135_v8 }
 0x8f2   : > { %6695 = vst [vmem:[#allocation6 + $0x1e0] sm:$0xff] %v6567_v7  ;;  %5842 = vperm.xlu2 %13427, %v17168_v30  }
 0x8f3   : > { %6696 = vst [vmem:[#allocation6 + $0x3c0] sm:$0xff] %v6568_v12  ;;  %v20486_v12 = vld [vmem:[#allocation23_spill] sm:$0xff]  ;;  %v17334_v56 = vpop.eup %13543  ;;  %13545 = vpow2.f32 %v5190_v29 }
 0x8f5   : > { %v5557_v39 = vpop.xlane.xlu1 %5556 }
 0x8f6   : > { %v5606_v46 = vadd.f32 %v5557_v39, %v5510_v26  ;;  %v5689_v26 = vld [vmem:[#allocation6 + $0x178] sm:$0xff]  ;;  %v17336_v39 = vpop.f32.mrf.mxu2 }
 0x8f8   : > { %5639 = vst.msk [vmem:[#allocation5 + $0x70] sm:$0xff] %vm5624_vm3, %v5606_v46  ;;  %v5690_v46 = vld [vmem:[#allocation6 + $0x188] sm:$0xff] }
 0x8fa   : > { %5857 = vperm.xlu2 %13427, %v13540_v22  }
 0x8fc   : > { %v5553_v41 = vpop.xlane.xlu2 %5552 }
 0x8fd   : > { %v5604_v30 = vadd.f32 %v5553_v41, %v5508_v36 }
 0x8ff   : > { %5637 = vst.msk [vmem:[#allocation5 + $0x60] sm:$0xff] %vm5624_vm3, %v5604_v30  ;;  %5562 = vadd.xlane.f32.xlu1 %v20483_v11 }
 0x902   : > { %5872 = vperm.xlu2 %13427, %v17320_v63  }
 0x904   : > { %v5813_v47 = vpop.permute.xlu2 %5812 }
 0x905   : > { %v5965_v33 = vmul.f32 %v5813_v47, %v5677_v6  ;;  %v5966_v52 = vmul.f32 %v5813_v47, %v5678_v31  ;;  %v5967_v25 = vmul.f32 %v5813_v47, %v5679_v57  ;;  %v5968_v24 = vmul.f32 %v5813_v47, %v5680_v43  ;;  %v20491_v57 = vld [vmem:[#allocation57_spill] sm:$0xff]  ;;  %v20492_v47 = vld [vmem:[#allocation35_spill] sm:$0xff] }
 0x907   : > { %v6497_v62 = vadd.f32 %v17020_v51, %v5965_v33  ;;  %v6498_v7 = vadd.f32 %v17022_v15, %v5966_v52  ;;  %v6499_v22 = vadd.f32 %v20486_v12, %v5967_v25  ;;  %5568 = vadd.xlane.f32.xlu1 %v20487_v23  ;;  %v6500_v28 = vadd.f32 %v20488_v5, %v5968_v24  ;;  %v5692_v51 = vld [vmem:[#allocation6 + $0x1c8] sm:$0xff]  ;;  %v20493_v52 = vld [vmem:[#allocation22_spill] sm:$0xff]  ;;  %v5913_v25 = vpop.permute.xlu0 %5912  ;;  %v20494_v24 = vld [vmem:[#allocation31_spill] sm:$0xff]  ;;  %v17353_v12 = vpop.eup %13545 }
 0x908   : > { %v20489_v15 = vld [vmem:[#allocation49_spill] sm:$0xff] }
 0x909   : > { %6625 = vst [vmem:[#allocation6 + $0xe8] sm:$0xff] %v6497_v62  ;;  %v5138_v9 = vsub.f32 %v20490_v27, %v20489_v15  ;;  %v20495_v15 = vld [vmem:[#allocation56_spill] sm:$0xff] }
 0x90a   : > { %6626 = vst [vmem:[#allocation6 + $0x370] sm:$0xff] %v6498_v7  ;;  %5887 = vperm.xlu2 %13427, %v17334_v56   ;;  %v5757_v7 = vld [vmem:[#allocation6 + $0x158] sm:$0xff] }
 0x90b   : > { %6627 = vst [vmem:[#allocation6 + $0x3e8] sm:$0xff] %v6499_v22  ;;  %v5196_v1 = vmul.f32 1.442695, %v5138_v9  ;;  %v6045_v5 = vmul.f32 %v5913_v25, %v5757_v7 }
 0x90c   : > { %6628 = vst [vmem:[#allocation6 + $0x1b0] sm:$0xff] %v6500_v28  ;;  %v5828_v50 = vpop.permute.xlu2 %5827  ;;  %v17343_v36 = vpop.f32.mrf.mxu1  ;;  %v5694_v28 = vld [vmem:[#allocation6 + $0x2d0] sm:$0xff] }
 0x90d   : > { %v5977_v41 = vmul.f32 %v5828_v50, %v5689_v26  ;;  %v5978_v30 = vmul.f32 %v5828_v50, %v5690_v46  ;;  %v5979_v2 = vmul.f32 %v5828_v50, %v5691_v55  ;;  %v5980_v11 = vmul.f32 %v5828_v50, %v5692_v51  ;;  %v5366_v6 = vpop.permute.xlu1 %5365  ;;  %v17345_v31 = vpop.f32.mrf.mxu0  ;;  %v5695_v26 = vld [vmem:[#allocation6 + $0x3a8] sm:$0xff]  ;;  %v5696_v46 = vld [vmem:[#allocation6 + $0x340] sm:$0xff] }
 0x90e   : > { %v5399_v43 = vsub.f32 %v20491_v57, %v5366_v6 }
 0x90f   : > { %v6509_v13 = vadd.f32 %v17069_v54, %v5977_v41  ;;  %v6510_v8 = vadd.f32 %v17071_v18, %v5978_v30  ;;  %v6511_v33 = vadd.f32 %v20492_v47, %v5979_v2  ;;  %5574 = vadd.xlane.f32.xlu1 %v20493_v52  ;;  %v6512_v29 = vadd.f32 %v20494_v24, %v5980_v11  ;;  %v5693_v54 = vld [vmem:[#allocation6 + $0x1d8] sm:$0xff]  ;;  %v5760_v18 = vld [vmem:[#allocation6 + $0x48] sm:$0xff] }
 0x910   : > { %v5462_v62 = vmul.f32 1.442695, %v5399_v43  ;;  %v6048_v41 = vmul.f32 %v5913_v25, %v5760_v18  ;;  %v5758_v43 = vld [vmem:[#allocation6 + $0x30] sm:$0xff] }
 0x911   : > { %6637 = vst [vmem:[#allocation6 + $0x178] sm:$0xff] %v6509_v13  ;;  %v20497_v24 = vld [vmem:[#allocation25_spill] sm:$0xff] }
 0x912   : > { %6638 = vst [vmem:[#allocation6 + $0x188] sm:$0xff] %v6510_v8  ;;  %13547 = vpow2.f32 %v5462_v62  ;;  %5902 = vperm.xlu2 %13427, %v17353_v12   ;;  %v17356_v22 = vpop.f32.mrf.mxu2  ;;  %v5759_v8 = vld [vmem:[#allocation6 + $0x320] sm:$0xff] }
 0x913   : > { %13549 = vpow2.f32 %v5196_v1  ;;  %6639 = vst [vmem:[#allocation6 + $0x300] sm:$0xff] %v6511_v33  ;;  %v17358_v23 = vpop.f32.mrf.mxu3  ;;  %v20496_v33 = vld [vmem:[#allocation30_spill] sm:$0xff]  ;;  %v20498_v62 = vld [vmem:[#allocation43_spill] sm:$0xff] }
 0x914   : > { %6640 = vst [vmem:[#allocation6 + $0x1c8] sm:$0xff] %v6512_v29  ;;  %v5361_v55 = vpop.permute.xlu2 %5360  ;;  %v6192_v51 = vpop.f32.mrf.mxu1 }
 0x915   : > { %v5398_v27 = vsub.f32 %v20495_v15, %v5361_v55  ;;  %v6577_v9 = vadd.f32 %v6192_v51, %v6045_v5  ;;  %v5833_v50 = vpop.permute.xlu1 %5832  ;;  %v6459_v30 = vpop.f32.mrf.mxu0  ;;  %v5706_v15 = vld [vmem:[#allocation6 + $0x308] sm:$0xff] }
 0x916   : > { %v5981_v2 = vmul.f32 %v5833_v50, %v5693_v54  ;;  %v5982_v11 = vmul.f32 %v5833_v50, %v5694_v28  ;;  %v5983_v6 = vmul.f32 %v5833_v50, %v5695_v26  ;;  %v5984_v57 = vmul.f32 %v5833_v50, %v5696_v46  ;;  %v20499_v54 = vld [vmem:[#allocation32_spill] sm:$0xff] }
 0x917   : > { %v5460_v1 = vmul.f32 1.442695, %v5398_v27  ;;  %5580 = vadd.xlane.f32.xlu1 %v17250_v14  ;;  %6705 = vst [vmem:[#allocation6 + $0x158] sm:$0xff] %v6577_v9  ;;  %v6580_v13 = vadd.f32 %v6459_v30, %v6048_v41  ;;  %v6046_v28 = vmul.f32 %v5913_v25, %v5758_v43  ;;  %v6047_v26 = vmul.f32 %v5913_v25, %v5759_v8  ;;  %v5705_v46 = vld [vmem:[#allocation6 + $0x60] sm:$0xff]  ;;  %v5707_v27 = vld [vmem:[#allocation6 + $0x1f8] sm:$0xff]  ;;  %v5708_v9 = vld [vmem:[#allocation6 + $0x190] sm:$0xff] }
 0x918   : > { %v13548_v47 = vpop.eup %13547  ;;  %v6513_v52 = vadd.f32 %v20496_v33, %v5981_v2  ;;  %v6514_v29 = vadd.f32 %v20497_v24, %v5982_v11  ;;  %v6515_v7 = vadd.f32 %v20498_v62, %v5983_v6  ;;  %v6516_v5 = vadd.f32 %v20499_v54, %v5984_v57  ;;  %v20500_v41 = vld [vmem:[#allocation33_spill] sm:$0xff]  ;;  %v17371_v11 = vpop.permute.xlu0 %5927  ;;  %v20502_v8 = vld [vmem:[#allocation64_spill] sm:$0xff]  ;;  %v20505_v54 = vld [vmem:[#allocation67_spill] sm:$0xff] }
 0x919   : > { %v17365_v18 = vpop.eup %13549  ;;  %13551 = vpow2.f32 %v5460_v1  ;;  %6708 = vst [vmem:[#allocation6 + $0x48] sm:$0xff] %v6580_v13  ;;  %5590 = vadd.xlane.f32.xlu0 %v13548_v47  ;;  %v20501_v30 = vld [vmem:[#allocation53_spill] sm:$0xff] }
 0x91a   : > { %6641 = vst [vmem:[#allocation6 + $0x1d8] sm:$0xff] %v6513_v52  ;;  %5917 = vperm.xlu2 %13427, %v17365_v18   ;;  %v6281_v14 = vpop.f32.mrf.mxu2  ;;  %v5143_v2 = vsub.f32 %v20501_v30, %v20500_v41  ;;  %v20503_v52 = vld [vmem:[#allocation65_spill] sm:$0xff] }
 0x91b   : > { %6642 = vst [vmem:[#allocation6 + $0x2d0] sm:$0xff] %v6514_v29  ;;  %v6578_v55 = vadd.f32 %v6281_v14, %v6046_v28  ;;  %v6370_v51 = vpop.f32.mrf.mxu3  ;;  %v20504_v29 = vld [vmem:[#allocation66_spill] sm:$0xff] }
 0x91c   : > { %6643 = vst [vmem:[#allocation6 + $0x3a8] sm:$0xff] %v6515_v7  ;;  %v6579_v50 = vadd.f32 %v6370_v51, %v6047_v26  ;;  %v5206_v7 = vmul.f32 1.442695, %v5143_v2  ;;  %v5717_v14 = vld [vmem:[#allocation6 + $0x70] sm:$0xff]  ;;  %v5480_v26 = vld [vmem:[#allocation5 + $0x80] sm:$0xff] }
 0x91d   : > { %6644 = vst [vmem:[#allocation6 + $0x340] sm:$0xff] %v6516_v5  ;;  %v5848_v6 = vpop.permute.xlu1 %5847 }
 0x91e   : > { %6706 = vst [vmem:[#allocation6 + $0x30] sm:$0xff] %v6578_v55  ;;  %v5993_v57 = vmul.f32 %v5848_v6, %v5705_v46  ;;  %v5994_v43 = vmul.f32 %v5848_v6, %v5706_v15  ;;  %v5995_v25 = vmul.f32 %v5848_v6, %v5707_v27  ;;  %v5996_v1 = vmul.f32 %v5848_v6, %v5708_v9  ;;  %v5718_v46 = vld [vmem:[#allocation6 + $0x248] sm:$0xff]  ;;  %v5719_v55 = vld [vmem:[#allocation6 + $0x120] sm:$0xff] }
 0x91f   : > { %v17373_v13 = vpop.eup %13551  ;;  %6707 = vst [vmem:[#allocation6 + $0x320] sm:$0xff] %v6579_v50  ;;  %5586 = vadd.xlane.f32.xlu1 %v17290_v53  ;;  %v5720_v53 = vld [vmem:[#allocation6 + $0x100] sm:$0xff]  ;;  %13553 = vpow2.f32 %v5206_v7  ;;  %v20507_v6 = vld [vmem:[#allocation41_spill] sm:$0xff] }
 0x920   : > { %v6525_v33 = vadd.f32 %v20502_v8, %v5993_v57  ;;  %v6526_v24 = vadd.f32 %v20503_v52, %v5994_v43  ;;  %v6527_v62 = vadd.f32 %v20504_v29, %v5995_v25  ;;  %v6528_v5 = vadd.f32 %v20505_v54, %v5996_v1  ;;  %v20506_v15 = vld [vmem:[#allocation36_spill] sm:$0xff]  ;;  %v20508_v43 = vld [vmem:[#allocation69_spill] sm:$0xff]  ;;  %v20509_v1 = vld [vmem:[#allocation70_spill] sm:$0xff] }
 0x921   : > { %v6088_v28 = vpack.c.bf16 %v13548_v47, %v17373_v13  ;;  %v5512_v27 = vmul.f32 %v20506_v15, %v5480_v26  ;;  %v20511_v52 = vld [vmem:[#allocation42_spill] sm:$0xff]  ;;  %v20512_v29 = vld [vmem:[#allocation71_spill] sm:$0xff]  ;;  %v5729_v7 = vld [vmem:[#allocation6 + $0x8] sm:$0xff] }
 0x922   : > { %6653 = vst [vmem:[#allocation6 + $0x60] sm:$0xff] %v6525_v33  ;;  %v20510_v33 = vld [vmem:[#allocation52_spill] sm:$0xff]  ;;  %v5483_v54 = vld [vmem:[#allocation5 + $0x98] sm:$0xff]  ;;  %v5732_v26 = vld [vmem:[#allocation6 + $0x130] sm:$0xff] }
 0x923   : > { %6654 = vst [vmem:[#allocation6 + $0x308] sm:$0xff] %v6526_v24  ;;  %6204 = vmatmul.bf16.gmra.mxu1 %v6088_v28  ;;  %6293 = vmatmul.bf16.gmra.mxu2 %v6088_v28  ;;  %v5142_v24 = vsub.f32 %v20511_v52, %v20510_v33  ;;  %v5744_v33 = vld [vmem:[#allocation6 + $0x88] sm:$0xff] }
 0x924   : > { %6655 = vst [vmem:[#allocation6 + $0x1f8] sm:$0xff] %v6527_v62  ;;  %6382 = vmatmul.bf16.gmra.mxu3 %v6088_v28  ;;  %6471 = vmatmul.bf16.gmra.mxu0 %v6088_v28  ;;  %v5730_v28 = vld [vmem:[#allocation6 + $0x2b8] sm:$0xff] }
 0x925   : > { %6656 = vst [vmem:[#allocation6 + $0x190] sm:$0xff] %v6528_v5  ;;  %v5863_v51 = vpop.permute.xlu1 %5862  ;;  %v5561_v9 = vpop.xlane.xlu0 %5560 }
 0x926   : > { %v6005_v50 = vmul.f32 %v5863_v51, %v5717_v14  ;;  %v6006_v47 = vmul.f32 %v5863_v51, %v5718_v46  ;;  %v6007_v41 = vmul.f32 %v5863_v51, %v5719_v55  ;;  %v6008_v30 = vmul.f32 %v5863_v51, %v5720_v53  ;;  %v17389_v5 = vpop.eup %13553  ;;  %v5731_v14 = vld [vmem:[#allocation6 + $0x208] sm:$0xff]  ;;  %v20513_v53 = vld [vmem:[#allocation26_spill] sm:$0xff] }
 0x927   : > { %v5608_v2 = vadd.f32 %v5561_v9, %v5512_v27  ;;  %v5204_v46 = vmul.f32 1.442695, %v5142_v24  ;;  %v5515_v51 = vmul.f32 %v20513_v53, %v5483_v54  ;;  %v5753_v53 = vld [vmem:[#allocation6 + $0x198] sm:$0xff] }
 0x928   : > { %v6537_v57 = vadd.f32 %v20507_v6, %v6005_v50  ;;  %v6538_v25 = vadd.f32 %v20508_v43, %v6006_v47  ;;  %v6539_v8 = vadd.f32 %v20509_v1, %v6007_v41  ;;  %v6540_v62 = vadd.f32 %v20512_v29, %v6008_v30  ;;  %v5741_v43 = vld [vmem:[#allocation6 + $0x250] sm:$0xff] }
 0x929   : > { %5641 = vst.msk [vmem:[#allocation5 + $0x80] sm:$0xff] %vm5624_vm3, %v5608_v2  ;;  %13555 = vpow2.f32 %v5204_v46  ;;  %v5742_v1 = vld [vmem:[#allocation6 + $0xb0] sm:$0xff] }
 0x92a   : > { %6665 = vst [vmem:[#allocation6 + $0x70] sm:$0xff] %v6537_v57 }
 0x92b   : > { %6666 = vst [vmem:[#allocation6 + $0x248] sm:$0xff] %v6538_v25  ;;  %v5486_v25 = vld [vmem:[#allocation5 + $0xb0] sm:$0xff] }
 0x92c   : > { %6667 = vst [vmem:[#allocation6 + $0x120] sm:$0xff] %v6539_v8  ;;  %v5743_v8 = vld [vmem:[#allocation6 + $0x228] sm:$0xff] }
 0x92d   : > { %6668 = vst [vmem:[#allocation6 + $0x100] sm:$0xff] %v6540_v62  ;;  %5942 = vperm.xlu0 %13428, %v17389_v5   ;;  %v5878_v55 = vpop.permute.xlu1 %5877  ;;  %v5567_v15 = vpop.xlane.xlu0 %5566 }
 0x92e   : > { %v6017_v27 = vmul.f32 %v5878_v55, %v5729_v7  ;;  %v6018_v9 = vmul.f32 %v5878_v55, %v5730_v28  ;;  %v6019_v50 = vmul.f32 %v5878_v55, %v5731_v14  ;;  %v6020_v47 = vmul.f32 %v5878_v55, %v5732_v26  ;;  %v5489_v55 = vld [vmem:[#allocation5 + $0xc8] sm:$0xff] }
 0x92f   : > { %v5611_v41 = vadd.f32 %v5567_v15, %v5515_v51  ;;  %v5754_v51 = vld [vmem:[#allocation6 + $0x2b0] sm:$0xff]  ;;  %v5755_v15 = vld [vmem:[#allocation6 + $0x3a0] sm:$0xff] }
 0x930   : > { %v6549_v30 = vadd.f32 %v17234_v37, %v6017_v27  ;;  %v6550_v2 = vadd.f32 %v17236_v48, %v6018_v9  ;;  %v6551_v6 = vadd.f32 %v17241_v21, %v6019_v50  ;;  %v6552_v57 = vadd.f32 %v17244_v44, %v6020_v47  ;;  %v20514_v37 = vld [vmem:[#allocation37_spill] sm:$0xff]  ;;  %v17399_v44 = vpop.eup %13555  ;;  %v5756_v27 = vld [vmem:[#allocation6 + $0x1b8] sm:$0xff]  ;;  %v20515_v9 = vld [vmem:[#allocation24_spill] sm:$0xff] }
 0x931   : > { %5644 = vst.msk [vmem:[#allocation5 + $0x98] sm:$0xff] %vm5624_vm3, %v5611_v41  ;;  %v5518_v24 = vmul.f32 %v20514_v37, %v5486_v25  ;;  %v5492_v25 = vld [vmem:[#allocation5 + $0xe0] sm:$0xff] }
 0x932   : > { %6677 = vst [vmem:[#allocation6 + $0x8] sm:$0xff] %v6549_v30 }
 0x933   : > { %6678 = vst [vmem:[#allocation6 + $0x2b8] sm:$0xff] %v6550_v2 }
 0x934   : > { %6679 = vst [vmem:[#allocation6 + $0x208] sm:$0xff] %v6551_v6 }
 0x935   : > { %6680 = vst [vmem:[#allocation6 + $0x130] sm:$0xff] %v6552_v57  ;;  %v5893_v52 = vpop.permute.xlu1 %5892  ;;  %v5573_v48 = vpop.xlane.xlu0 %5572 }
 0x936   : > { %v6029_v29 = vmul.f32 %v5893_v52, %v5741_v43  ;;  %v6030_v21 = vmul.f32 %v5893_v52, %v5742_v1  ;;  %v6031_v62 = vmul.f32 %v5893_v52, %v5743_v8  ;;  %v6032_v7 = vmul.f32 %v5893_v52, %v5744_v33  ;;  %v20516_v1 = vld [vmem:[#allocation55_spill] sm:$0xff]  ;;  %v20517_v8 = vld [vmem:[#allocation60_spill] sm:$0xff] }
 0x937   : > { %v5614_v54 = vadd.f32 %v5573_v48, %v5518_v24  ;;  %v5524_v33 = vmul.f32 %v20517_v8, %v5492_v25  ;;  %v20518_v24 = vld [vmem:[#allocation28_spill] sm:$0xff]  ;;  %v20524_v8 = vld [vmem:[#allocation62_spill] sm:$0xff] }
 0x938   : > { %v6561_v28 = vadd.f32 %v17297_v35, %v6029_v29  ;;  %v6562_v14 = vadd.f32 %v17299_v61, %v6030_v21  ;;  %v6563_v26 = vadd.f32 %v17303_v0, %v6031_v62  ;;  %5937 = vperm.xlu1 %13429, %v17399_v44   ;;  %v6564_v46 = vadd.f32 %v17305_v60, %v6032_v7  ;;  %v5701_v7 = vld [vmem:[#allocation6 + $0x298] sm:$0xff] }
 0x939   : > { %5647 = vst.msk [vmem:[#allocation5 + $0xb0] sm:$0xff] %vm5624_vm3, %v5614_v54  ;;  %v5521_v35 = vmul.f32 %v20515_v9, %v5489_v55  ;;  %v5765_v54 = vld [vmem:[#allocation6 + $0x318] sm:$0xff] }
 0x93a   : > { %6689 = vst [vmem:[#allocation6 + $0x250] sm:$0xff] %v6561_v28  ;;  %v20520_v28 = vld [vmem:[#allocation63_spill] sm:$0xff] }
 0x93b   : > { %6690 = vst [vmem:[#allocation6 + $0xb0] sm:$0xff] %v6562_v14  ;;  %v5702_v14 = vld [vmem:[#allocation6 + $0x3d0] sm:$0xff] }
 0x93c   : > { %6691 = vst [vmem:[#allocation6 + $0x228] sm:$0xff] %v6563_v26  ;;  %v5703_v26 = vld [vmem:[#allocation6 + $0x3c8] sm:$0xff] }
 0x93d   : > { %6692 = vst [vmem:[#allocation6 + $0x88] sm:$0xff] %v6564_v46  ;;  %v5579_v61 = vpop.xlane.xlu0 %5578  ;;  %v5704_v46 = vld [vmem:[#allocation6 + $0x10] sm:$0xff] }
 0x93e   : > { %v5908_v50 = vpop.permute.xlu1 %5907  ;;  %v5617_v0 = vadd.f32 %v5579_v61, %v5521_v35 }
 0x93f   : > { %v6041_v47 = vmul.f32 %v5908_v50, %v5753_v53  ;;  %v6042_v41 = vmul.f32 %v5908_v50, %v5754_v51  ;;  %v6043_v30 = vmul.f32 %v5908_v50, %v5755_v15  ;;  %v6044_v60 = vmul.f32 %v5908_v50, %v5756_v27  ;;  %v5768_v27 = vld [vmem:[#allocation6 + $0x28] sm:$0xff] }
 0x940   : > { %5650 = vst.msk [vmem:[#allocation5 + $0xc8] sm:$0xff] %vm5624_vm3, %v5617_v0 }
 0x941   : > { %v6573_v2 = vadd.f32 %v17343_v36, %v6041_v47  ;;  %v6574_v6 = vadd.f32 %v17356_v22, %v6042_v41  ;;  %v6575_v57 = vadd.f32 %v17358_v23, %v6043_v30  ;;  %v6576_v43 = vadd.f32 %v17345_v31, %v6044_v60  ;;  %v5479_v36 = vld [vmem:[#allocation5 + $0x78] sm:$0xff]  ;;  %v20519_v22 = vld [vmem:[#allocation72_spill] sm:$0xff] }
 0x942   : > { %v5511_v23 = vmul.f32 %v20519_v22, %v5479_v36  ;;  %v20521_v30 = vld [vmem:[#allocation27_spill] sm:$0xff]  ;;  %v5713_v22 = vld [vmem:[#allocation6 + $0x170] sm:$0xff] }
 0x943   : > { %6701 = vst [vmem:[#allocation6 + $0x198] sm:$0xff] %v6573_v2  ;;  %5564 = vadd.xlane.f32.xlu2 %v20516_v1  ;;  %v20522_v2 = vld [vmem:[#allocation44_spill] sm:$0xff]  ;;  %v5766_v1 = vld [vmem:[#allocation6 + $0x3b8] sm:$0xff] }
 0x944   : > { %6702 = vst [vmem:[#allocation6 + $0x2b0] sm:$0xff] %v6574_v6  ;;  %v5769_v36 = vld [vmem:[#allocation6 + $0x2d8] sm:$0xff] }
 0x945   : > { %6703 = vst [vmem:[#allocation6 + $0x3a0] sm:$0xff] %v6575_v57  ;;  %v5585_v52 = vpop.xlane.xlu0 %5584  ;;  %v20523_v57 = vld [vmem:[#allocation61_spill] sm:$0xff] }
 0x946   : > { %6704 = vst [vmem:[#allocation6 + $0x1b8] sm:$0xff] %v6576_v43  ;;  %v5620_v37 = vadd.f32 %v5585_v52, %v5524_v33  ;;  %v5767_v52 = vld [vmem:[#allocation6 + $0x1a0] sm:$0xff] }
 0x947   : > { %v5923_v62 = vpop.permute.xlu1 %5922 }
 0x948   : > { %5653 = vst.msk [vmem:[#allocation5 + $0xe0] sm:$0xff] %vm5624_vm3, %v5620_v37  ;;  %v6053_v15 = vmul.f32 %v5923_v62, %v5765_v54  ;;  %v6056_v25 = vmul.f32 %v5923_v62, %v5768_v27  ;;  %v5716_v54 = vld [vmem:[#allocation6 + $0x3f0] sm:$0xff] }
 0x94b   : > { %5570 = vadd.xlane.f32.xlu2 %v20518_v24  ;;  %v6054_v24 = vmul.f32 %v5923_v62, %v5766_v1  ;;  %v5771_v1 = vld [vmem:[#allocation6 + $0x168] sm:$0xff] }
 0x94d   : > { %v5559_v48 = vpop.xlane.xlu2 %5558  ;;  %v17418_v29 = vpop.f32.mrf.mxu1 }
 0x94e   : > { %v5607_v31 = vadd.f32 %v5559_v48, %v5511_v23  ;;  %v17420_v21 = vpop.f32.mrf.mxu0  ;;  %v5714_v23 = vld [vmem:[#allocation6 + $0x2a0] sm:$0xff]  ;;  %v5715_v48 = vld [vmem:[#allocation6 + $0x398] sm:$0xff] }
 0x950   : > { %5640 = vst.msk [vmem:[#allocation5 + $0x78] sm:$0xff] %vm5624_vm3, %v5607_v31 }
 0x953   : > { %5576 = vadd.xlane.f32.xlu2 %v20520_v28  ;;  %v17424_v55 = vpop.f32.mrf.mxu2 }
 0x954   : > { %v17426_v53 = vpop.f32.mrf.mxu3 }
 0x955   : > { %v5843_v51 = vpop.permute.xlu2 %5842  ;;  %v6197_v0 = vpop.f32.mrf.mxu1 }
 0x956   : > { %v5989_v9 = vmul.f32 %v5843_v51, %v5701_v7  ;;  %v5990_v35 = vmul.f32 %v5843_v51, %v5702_v14  ;;  %v5991_v61 = vmul.f32 %v5843_v51, %v5703_v26  ;;  %v5992_v50 = vmul.f32 %v5843_v51, %v5704_v46  ;;  %v6464_v41 = vpop.f32.mrf.mxu0  ;;  %v5772_v51 = vld [vmem:[#allocation6 + $0xa8] sm:$0xff] }
 0x957   : > { %v6585_v47 = vadd.f32 %v6197_v0, %v6053_v15  ;;  %v6588_v37 = vadd.f32 %v6464_v41, %v6056_v25  ;;  %v6055_v7 = vmul.f32 %v5923_v62, %v5767_v52  ;;  %v6057_v46 = vmul.f32 %v17371_v11, %v5769_v36  ;;  %v20525_v62 = vld [vmem:[#allocation34_spill] sm:$0xff]  ;;  %v20526_v41 = vld [vmem:[#allocation39_spill] sm:$0xff] }
 0x958   : > { %v6521_v60 = vadd.f32 %v20521_v30, %v5989_v9  ;;  %v6522_v6 = vadd.f32 %v20522_v2, %v5990_v35  ;;  %v6523_v43 = vadd.f32 %v20523_v57, %v5991_v61  ;;  %v6524_v33 = vadd.f32 %v20524_v8, %v5992_v50  ;;  %v5770_v57 = vld [vmem:[#allocation6 + $0x358] sm:$0xff]  ;;  %v5727_v36 = vld [vmem:[#allocation6 + $0x200] sm:$0xff] }
 0x959   : > { %6713 = vst [vmem:[#allocation6 + $0x318] sm:$0xff] %v6585_v47  ;;  %v5725_v52 = vld [vmem:[#allocation6 + $0x38] sm:$0xff] }
 0x95a   : > { %6649 = vst [vmem:[#allocation6 + $0x298] sm:$0xff] %v6521_v60  ;;  %v20527_v60 = vld [vmem:[#allocation40_spill] sm:$0xff] }
 0x95b   : > { %6650 = vst [vmem:[#allocation6 + $0x3d0] sm:$0xff] %v6522_v6  ;;  %5582 = vadd.xlane.f32.xlu2 %v17255_v3  ;;  %v6286_v31 = vpop.f32.mrf.mxu2  ;;  %v6060_v6 = vmul.f32 %v17371_v11, %v5772_v51 }
 0x95c   : > { %6651 = vst [vmem:[#allocation6 + $0x3c8] sm:$0xff] %v6523_v43  ;;  %v6586_v28 = vadd.f32 %v6286_v31, %v6054_v24  ;;  %v6375_v14 = vpop.f32.mrf.mxu3  ;;  %v20528_v43 = vld [vmem:[#allocation68_spill] sm:$0xff] }
 0x95d   : > { %6652 = vst [vmem:[#allocation6 + $0x10] sm:$0xff] %v6524_v33  ;;  %v5858_v26 = vpop.permute.xlu2 %5857  ;;  %v6587_v15 = vadd.f32 %v6375_v14, %v6055_v7  ;;  %v6200_v35 = vpop.f32.mrf.mxu1  ;;  %v6058_v33 = vmul.f32 %v17371_v11, %v5770_v57 }
 0x95e   : > { %6716 = vst [vmem:[#allocation6 + $0x28] sm:$0xff] %v6588_v37  ;;  %v6001_v27 = vmul.f32 %v5858_v26, %v5713_v22  ;;  %v6002_v9 = vmul.f32 %v5858_v26, %v5714_v23  ;;  %v6003_v3 = vmul.f32 %v5858_v26, %v5715_v48  ;;  %v6004_v61 = vmul.f32 %v5858_v26, %v5716_v54  ;;  %v6467_v0 = vpop.f32.mrf.mxu0  ;;  %v5726_v37 = vld [vmem:[#allocation6 + $0x360] sm:$0xff]  ;;  %v5728_v23 = vld [vmem:[#allocation6 + $0x290] sm:$0xff] }
 0x95f   : > { %6714 = vst [vmem:[#allocation6 + $0x3b8] sm:$0xff] %v6586_v28  ;;  %v6589_v50 = vadd.f32 %v6200_v35, %v6057_v46  ;;  %v6592_v8 = vadd.f32 %v6467_v0, %v6060_v6  ;;  %v6059_v22 = vmul.f32 %v17371_v11, %v5771_v1  ;;  %v5740_v35 = vld [vmem:[#allocation6 + $0x68] sm:$0xff] }
 0x960   : > { %6715 = vst [vmem:[#allocation6 + $0x1a0] sm:$0xff] %v6587_v15  ;;  %v6533_v47 = vadd.f32 %v20525_v62, %v6001_v27  ;;  %v6534_v30 = vadd.f32 %v20526_v41, %v6002_v9  ;;  %v6535_v2 = vadd.f32 %v20527_v60, %v6003_v3  ;;  %v6536_v25 = vadd.f32 %v20528_v43, %v6004_v61  ;;  %v5737_v27 = vld [vmem:[#allocation6 + $0x280] sm:$0xff]  ;;  %v5738_v9 = vld [vmem:[#allocation6 + $0x3d8] sm:$0xff]  ;;  %v5739_v3 = vld [vmem:[#allocation6 + $0x108] sm:$0xff] }
 0x961   : > { %6717 = vst [vmem:[#allocation6 + $0x2d8] sm:$0xff] %v6589_v50  ;;  %v20529_v61 = vld [vmem:[#allocation29_spill] sm:$0xff]  ;;  %v20530_v50 = vld [vmem:[#allocation51_spill] sm:$0xff] }
 0x962   : > { %6661 = vst [vmem:[#allocation6 + $0x170] sm:$0xff] %v6533_v47  ;;  %v5141_v0 = vsub.f32 %v20530_v50, %v20529_v61  ;;  %v5490_v61 = vld [vmem:[#allocation5 + $0xd0] sm:$0xff]  ;;  %v5495_v50 = vld [vmem:[#allocation5 + $0xf8] sm:$0xff] }
 0x963   : > { %6662 = vst [vmem:[#allocation6 + $0x2a0] sm:$0xff] %v6534_v30  ;;  %5588 = vadd.xlane.f32.xlu2 %v17373_v13  ;;  %v6289_v24 = vpop.f32.mrf.mxu2  ;;  %v5481_v30 = vld [vmem:[#allocation5 + $0x88] sm:$0xff] }
 0x964   : > { %6663 = vst [vmem:[#allocation6 + $0x398] sm:$0xff] %v6535_v2  ;;  %v6590_v48 = vadd.f32 %v6289_v24, %v6058_v33  ;;  %v6378_v31 = vpop.f32.mrf.mxu3  ;;  %v5513_v57 = vmul.f32 %v17320_v63, %v5481_v30  ;;  %v5751_v33 = vld [vmem:[#allocation6 + $0xd8] sm:$0xff] }
 0x965   : > { %6664 = vst [vmem:[#allocation6 + $0x3f0] sm:$0xff] %v6536_v25  ;;  %v5873_v7 = vpop.permute.xlu2 %5872  ;;  %v6591_v54 = vadd.f32 %v6378_v31, %v6059_v22  ;;  %v5749_v25 = vld [vmem:[#allocation6 + $0x240] sm:$0xff] }
 0x966   : > { %6720 = vst [vmem:[#allocation6 + $0xa8] sm:$0xff] %v6592_v8  ;;  %v6013_v28 = vmul.f32 %v5873_v7, %v5725_v52  ;;  %v6014_v14 = vmul.f32 %v5873_v7, %v5726_v37  ;;  %v6015_v26 = vmul.f32 %v5873_v7, %v5727_v36  ;;  %v6016_v13 = vmul.f32 %v5873_v7, %v5728_v23  ;;  %v5750_v8 = vld [vmem:[#allocation6 + $0x110] sm:$0xff]  ;;  %v5752_v52 = vld [vmem:[#allocation6 + $0x20] sm:$0xff]  ;;  %v17473_v30 = vpop.f32.mrf.mxu0 }
 0x967   : > { %6718 = vst [vmem:[#allocation6 + $0x358] sm:$0xff] %v6590_v48  ;;  %v5484_v36 = vld [vmem:[#allocation5 + $0xa0] sm:$0xff] }
 0x968   : > { %6719 = vst [vmem:[#allocation6 + $0x168] sm:$0xff] %v6591_v54  ;;  %v6545_v46 = vadd.f32 %v17216_v17, %v6013_v28  ;;  %v6546_v51 = vadd.f32 %v17218_v34, %v6014_v14  ;;  %v6547_v15 = vadd.f32 %v17220_v45, %v6015_v26  ;;  %v6548_v11 = vadd.f32 %v17224_v40, %v6016_v13  ;;  %v5761_v54 = vld [vmem:[#allocation6 + $0x118] sm:$0xff]  ;;  %v5762_v14 = vld [vmem:[#allocation6 + $0x1f0] sm:$0xff]  ;;  %v5763_v26 = vld [vmem:[#allocation6 + $0x40] sm:$0xff] }
 0x969   : > { %v5202_v45 = vmul.f32 1.442695, %v5141_v0  ;;  %v5516_v48 = vmul.f32 %v17334_v56, %v5484_v36  ;;  %v5764_v13 = vld [vmem:[#allocation6 + $0x368] sm:$0xff]  ;;  %v5487_v56 = vld [vmem:[#allocation5 + $0xb8] sm:$0xff] }
 0x96a   : > { %6673 = vst [vmem:[#allocation6 + $0x38] sm:$0xff] %v6545_v46 }
 0x96b   : > { %6674 = vst [vmem:[#allocation6 + $0x360] sm:$0xff] %v6546_v51  ;;  %13557 = vpow2.f32 %v5202_v45 }
 0x96c   : > { %6675 = vst [vmem:[#allocation6 + $0x200] sm:$0xff] %v6547_v15  ;;  %v17477_v45 = vpop.f32.mrf.mxu3 }
 0x96d   : > { %6676 = vst [vmem:[#allocation6 + $0x290] sm:$0xff] %v6548_v11  ;;  %v5888_v62 = vpop.permute.xlu2 %5887 }
 0x96e   : > { %v6025_v47 = vmul.f32 %v5888_v62, %v5737_v27  ;;  %v6026_v17 = vmul.f32 %v5888_v62, %v5738_v9  ;;  %v6027_v41 = vmul.f32 %v5888_v62, %v5739_v3  ;;  %v6028_v34 = vmul.f32 %v5888_v62, %v5740_v35 }
 0x96f   : > { %v5519_v9 = vmul.f32 %v17353_v12, %v5487_v56 }
 0x970   : > { %v6557_v40 = vadd.f32 %v17281_v20, %v6025_v47  ;;  %v6558_v60 = vadd.f32 %v17283_v4, %v6026_v17  ;;  %v6559_v2 = vadd.f32 %v17285_v19, %v6027_v41  ;;  %v6560_v6 = vadd.f32 %v17287_v59, %v6028_v34  ;;  %v17471_v34 = vpop.f32.mrf.mxu1 }
 0x971   : > { %v13558_v31 = vpop.eup %13557 }
 0x972   : > { %6685 = vst [vmem:[#allocation6 + $0x280] sm:$0xff] %v6557_v40  ;;  %v5563_v43 = vpop.xlane.xlu1 %5562 }
 0x973   : > { %6686 = vst [vmem:[#allocation6 + $0x3d8] sm:$0xff] %v6558_v60  ;;  %v5609_v1 = vadd.f32 %v5563_v43, %v5513_v57 }
 0x974   : > { %6687 = vst [vmem:[#allocation6 + $0x108] sm:$0xff] %v6559_v2  ;;  %v5781_v2 = vld [vmem:[#allocation6] sm:$0xff] }
 0x975   : > { %6688 = vst [vmem:[#allocation6 + $0x68] sm:$0xff] %v6560_v6  ;;  %v5903_v20 = vpop.permute.xlu2 %5902  ;;  %v5784_v6 = vld [vmem:[#allocation6 + $0x140] sm:$0xff] }
 0x976   : > { %5642 = vst.msk [vmem:[#allocation5 + $0x88] sm:$0xff] %vm5624_vm3, %v5609_v1  ;;  %v6037_v4 = vmul.f32 %v5903_v20, %v5749_v25  ;;  %v6038_v19 = vmul.f32 %v5903_v20, %v5750_v8  ;;  %v6039_v37 = vmul.f32 %v5903_v20, %v5751_v33  ;;  %v6040_v59 = vmul.f32 %v5903_v20, %v5752_v52  ;;  %v5777_v1 = vld [vmem:[#allocation6 + $0xa0] sm:$0xff]  ;;  %v5778_v52 = vld [vmem:[#allocation6 + $0x218] sm:$0xff] }
 0x977   : > { %v5779_v20 = vld [vmem:[#allocation6 + $0x160] sm:$0xff] }
 0x978   : > { %v6569_v63 = vadd.f32 %v17325_v42, %v6037_v4  ;;  %v6570_v24 = vadd.f32 %v17336_v39, %v6038_v19  ;;  %v6571_v22 = vadd.f32 %v17341_v32, %v6039_v37  ;;  %v6572_v23 = vadd.f32 %v17327_v10, %v6040_v59  ;;  %v5780_v4 = vld [vmem:[#allocation6 + $0x3f8] sm:$0xff] }
 0x97a   : > { %6697 = vst [vmem:[#allocation6 + $0x240] sm:$0xff] %v6569_v63  ;;  %v5569_v7 = vpop.xlane.xlu1 %5568  ;;  %v5782_v63 = vld [vmem:[#allocation6 + $0x128] sm:$0xff] }
 0x97b   : > { %6698 = vst [vmem:[#allocation6 + $0x110] sm:$0xff] %v6570_v24  ;;  %v5612_v28 = vadd.f32 %v5569_v7, %v5516_v48  ;;  %5932 = vperm.xlu2 %13427, %v13558_v31  }
 0x97c   : > { %6699 = vst [vmem:[#allocation6 + $0xd8] sm:$0xff] %v6571_v22 }
 0x97d   : > { %6700 = vst [vmem:[#allocation6 + $0x20] sm:$0xff] %v6572_v23  ;;  %v5918_v42 = vpop.permute.xlu2 %5917 }
 0x97e   : > { %5645 = vst.msk [vmem:[#allocation5 + $0xa0] sm:$0xff] %vm5624_vm3, %v5612_v28  ;;  %v6049_v39 = vmul.f32 %v5918_v42, %v5761_v54  ;;  %v6050_v32 = vmul.f32 %v5918_v42, %v5762_v14  ;;  %v6051_v10 = vmul.f32 %v5918_v42, %v5763_v26  ;;  %v6052_v46 = vmul.f32 %v5918_v42, %v5764_v13 }
 0x980   : > { %v6581_v51 = vadd.f32 %v17418_v29, %v6049_v39  ;;  %v6582_v15 = vadd.f32 %v17424_v55, %v6050_v32  ;;  %v6583_v11 = vadd.f32 %v17426_v53, %v6051_v10  ;;  %v6584_v27 = vadd.f32 %v17420_v21, %v6052_v46  ;;  %v5493_v21 = vld [vmem:[#allocation5 + $0xe8] sm:$0xff]  ;;  %v5482_v46 = vld [vmem:[#allocation5 + $0x90] sm:$0xff] }
 0x981   : > { %v5522_v29 = vmul.f32 %v17365_v18, %v5490_v61  ;;  %v5527_v53 = vmul.f32 %v17389_v5, %v5495_v50  ;;  %v5525_v47 = vmul.f32 %v13558_v31, %v5493_v21  ;;  %v17475_v18 = vpop.f32.mrf.mxu2  ;;  %v5783_v31 = vld [vmem:[#allocation6 + $0xb8] sm:$0xff]  ;;  %v5514_v56 = vmul.f32 %v17205_v49, %v5482_v46 }
 0x982   : > { %6709 = vst [vmem:[#allocation6 + $0x118] sm:$0xff] %v6581_v51  ;;  %v5575_v3 = vpop.xlane.xlu1 %5574 }
 0x983   : > { %6710 = vst [vmem:[#allocation6 + $0x1f0] sm:$0xff] %v6582_v15  ;;  %v5615_v35 = vadd.f32 %v5575_v3, %v5519_v9 }
 0x984   : > { %6711 = vst [vmem:[#allocation6 + $0x40] sm:$0xff] %v6583_v11  ;;  %v5485_v11 = vld [vmem:[#allocation5 + $0xa8] sm:$0xff] }
 0x985   : > { %6712 = vst [vmem:[#allocation6 + $0x368] sm:$0xff] %v6584_v27  ;;  %v5517_v27 = vmul.f32 %v17226_v38, %v5485_v11 }
 0x986   : > { %5648 = vst.msk [vmem:[#allocation5 + $0xb8] sm:$0xff] %vm5624_vm3, %v5615_v35  ;;  %v5488_v35 = vld [vmem:[#allocation5 + $0xc0] sm:$0xff] }
 0x987   : > { %v5520_v61 = vmul.f32 %v17247_v16, %v5488_v35  ;;  %v5774_v16 = vld [vmem:[#allocation6 + $0xe0] sm:$0xff] }
 0x98a   : > { %v5581_v0 = vpop.xlane.xlu1 %5580 }
 0x98b   : > { %v5618_v55 = vadd.f32 %v5581_v0, %v5522_v29  ;;  %v5491_v0 = vld [vmem:[#allocation5 + $0xd8] sm:$0xff] }
 0x98c   : > { %v5591_v62 = vpop.xlane.xlu0 %5590  ;;  %v5523_v49 = vmul.f32 %v17274_v58, %v5491_v0 }
 0x98d   : > { %5651 = vst.msk [vmem:[#allocation5 + $0xd0] sm:$0xff] %vm5624_vm3, %v5618_v55  ;;  %v5623_v12 = vadd.f32 %v5591_v62, %v5527_v53  ;;  %v5494_v62 = vld [vmem:[#allocation5 + $0xf0] sm:$0xff] }
 0x98e   : > { %v5526_v38 = vmul.f32 %v17399_v44, %v5494_v62 }
 0x98f   : > { %5656 = vst.msk [vmem:[#allocation5 + $0xf8] sm:$0xff] %vm5624_vm3, %v5623_v12 }
 0x992   : > { %v5587_v17 = vpop.xlane.xlu1 %5586 }
 0x993   : > { %v5621_v41 = vadd.f32 %v5587_v17, %v5525_v47  ;;  %v5773_v47 = vld [vmem:[#allocation6 + $0x1e8] sm:$0xff]  ;;  %v5775_v17 = vld [vmem:[#allocation6 + $0x2f0] sm:$0xff] }
 0x995   : > { %5654 = vst.msk [vmem:[#allocation5 + $0xe8] sm:$0xff] %vm5624_vm3, %v5621_v41  ;;  %v5776_v41 = vld [vmem:[#allocation6 + $0xd0] sm:$0xff] }
 0x99f   : > { %v5943_v60 = vpop.permute.xlu0 %5942 }
 0x9a0   : > { %v6205_v5 = vpop.f32.mrf.mxu1  ;;  %v6069_v25 = vmul.f32 %v5943_v60, %v5781_v2  ;;  %v6072_v33 = vmul.f32 %v5943_v60, %v5784_v6  ;;  %v6070_v14 = vmul.f32 %v5943_v60, %v5782_v63  ;;  %v6071_v42 = vmul.f32 %v5943_v60, %v5783_v31 }
 0x9a1   : > { %v6472_v40 = vpop.f32.mrf.mxu0 }
 0x9a6   : > { %v6294_v57 = vpop.f32.mrf.mxu2 }
 0x9a7   : > { %v6383_v43 = vpop.f32.mrf.mxu3 }
 0x9a8   : > { %v6207_v8 = vpop.f32.mrf.mxu1 }
 0x9a9   : > { %v6601_v19 = vadd.f32 %v6207_v8, %v6069_v25  ;;  %v6474_v37 = vpop.f32.mrf.mxu0 }
 0x9aa   : > { %v6604_v59 = vadd.f32 %v6474_v37, %v6072_v33  ;;  %v5938_v36 = vpop.permute.xlu1 %5937 }
 0x9ab   : > { %6729 = vst [vmem:[#allocation6] sm:$0xff] %v6601_v19  ;;  %v6065_v24 = vmul.f32 %v5938_v36, %v5777_v1  ;;  %v6066_v22 = vmul.f32 %v5938_v36, %v5778_v52  ;;  %v6067_v23 = vmul.f32 %v5938_v36, %v5779_v20  ;;  %v6068_v48 = vmul.f32 %v5938_v36, %v5780_v4 }
 0x9ac   : > { %6732 = vst [vmem:[#allocation6 + $0x140] sm:$0xff] %v6604_v59 }
 0x9ad   : > { %v6597_v7 = vadd.f32 %v6205_v5, %v6065_v24  ;;  %v6598_v54 = vadd.f32 %v6294_v57, %v6066_v22  ;;  %v6599_v28 = vadd.f32 %v6383_v43, %v6067_v23  ;;  %v6600_v26 = vadd.f32 %v6472_v40, %v6068_v48 }
 0x9ae   : > { %v6296_v13 = vpop.f32.mrf.mxu2 }
 0x9af   : > { %6725 = vst [vmem:[#allocation6 + $0xa0] sm:$0xff] %v6597_v7  ;;  %v6602_v39 = vadd.f32 %v6296_v13, %v6070_v14  ;;  %v6385_v32 = vpop.f32.mrf.mxu3 }
 0x9b0   : > { %6726 = vst [vmem:[#allocation6 + $0x218] sm:$0xff] %v6598_v54  ;;  %v6603_v10 = vadd.f32 %v6385_v32, %v6071_v42 }
 0x9b1   : > { %6727 = vst [vmem:[#allocation6 + $0x160] sm:$0xff] %v6599_v28 }
 0x9b2   : > { %6728 = vst [vmem:[#allocation6 + $0x3f8] sm:$0xff] %v6600_v26 }
 0x9b3   : > { %6730 = vst [vmem:[#allocation6 + $0x128] sm:$0xff] %v6602_v39 }
 0x9b4   : > { %6731 = vst [vmem:[#allocation6 + $0xb8] sm:$0xff] %v6603_v10 }
 0x9b6   : > { %v5565_v51 = vpop.xlane.xlu2 %5564 }
 0x9b7   : > { %v5610_v15 = vadd.f32 %v5565_v51, %v5514_v56 }
 0x9b9   : > { %5643 = vst.msk [vmem:[#allocation5 + $0x90] sm:$0xff] %vm5624_vm3, %v5610_v15 }
 0x9be   : > { %v5571_v9 = vpop.xlane.xlu2 %5570 }
 0x9bf   : > { %v5613_v3 = vadd.f32 %v5571_v9, %v5517_v27 }
 0x9c1   : > { %5646 = vst.msk [vmem:[#allocation5 + $0xa8] sm:$0xff] %vm5624_vm3, %v5613_v3 }
 0x9c6   : > { %v5577_v50 = vpop.xlane.xlu2 %5576 }
 0x9c7   : > { %v5616_v29 = vadd.f32 %v5577_v50, %v5520_v61 }
 0x9c9   : > { %5649 = vst.msk [vmem:[#allocation5 + $0xc0] sm:$0xff] %vm5624_vm3, %v5616_v29 }
 0x9ce   : > { %v5583_v55 = vpop.xlane.xlu2 %5582 }
 0x9cf   : > { %v5619_v53 = vadd.f32 %v5583_v55, %v5523_v49 }
 0x9d1   : > { %5652 = vst.msk [vmem:[#allocation5 + $0xd8] sm:$0xff] %vm5624_vm3, %v5619_v53 }
 0x9d6   : > { %v5589_v12 = vpop.xlane.xlu2 %5588 }
 0x9d7   : > { %v5622_v21 = vadd.f32 %v5589_v12, %v5526_v38 }
 0x9d9   : > { %5655 = vst.msk [vmem:[#allocation5 + $0xf0] sm:$0xff] %vm5624_vm3, %v5622_v21 }
 0x9de   : > { %v5933_v5 = vpop.permute.xlu2 %5932 }
 0x9df   : > { %v6061_v40 = vmul.f32 %v5933_v5, %v5773_v47  ;;  %v6062_v60 = vmul.f32 %v5933_v5, %v5774_v16  ;;  %v6063_v2 = vmul.f32 %v5933_v5, %v5775_v17  ;;  %v6064_v58 = vmul.f32 %v5933_v5, %v5776_v41 }
 0x9e1   : > { %v6593_v6 = vadd.f32 %v17471_v34, %v6061_v40  ;;  %v6594_v57 = vadd.f32 %v17475_v18, %v6062_v60  ;;  %v6595_v43 = vadd.f32 %v17477_v45, %v6063_v2  ;;  %v6596_v44 = vadd.f32 %v17473_v30, %v6064_v58 }
 0x9e2   : > { %6768 = sbr.rel (%p11553_p0) target bundleno = 3345 (0xd11), region = 80 }
 0x9e3   : > { %6721 = vst [vmem:[#allocation6 + $0x1e8] sm:$0xff] %v6593_v6 }
 0x9e4   : > { %6722 = vst [vmem:[#allocation6 + $0xe0] sm:$0xff] %v6594_v57 }
 0x9e5   : > { %6723 = vst [vmem:[#allocation6 + $0x2f0] sm:$0xff] %v6595_v43 }
 0x9e6   : > { %6724 = vst [vmem:[#allocation6 + $0xd0] sm:$0xff] %v6596_v44 }
 0x9e7   : > { %v7114_v25 = vld [vmem:[#allocation5 + $0x20] sm:$0xff]  ;;  %v7112_v1 = vld [vmem:[#allocation5 + $0x10] sm:$0xff]  ;;  %v13732_v33 = vmov 0   ;;  %v7115_v34 = vld [vmem:[#allocation5 + $0x28] sm:$0xff]  ;;  %s6769_s18 = sld [smem:[#allocation7]]  ;;  %vm10010_vm9 = vcmask 1040384  }
 0x9e8   : > { %v7110_v8 = vld [vmem:[#allocation5] sm:$0xff]  ;;  %13562 = vset.pattern.permute.xlu2 %v13732_v33  ;;  %13561 = vset.pattern.permute.xlu1 %v13732_v33  ;;  %13563 = vrcp.f32 %v7114_v25  ;;  %v7113_v18 = vld [vmem:[#allocation5 + $0x18] sm:$0xff]  ;;  %v7111_v30 = vld [vmem:[#allocation5 + $0x8] sm:$0xff]  ;;  %vm10012_vm10 = vcmask 1042434   ;;  %vm10014_vm11 = vcmask 1041408   ;;  %vm10335_vm13 = vcmask 8192  }
 0x9e9   : > { %13560 = vset.pattern.permute.xlu0 %v13732_v33  ;;  %13565 = vrcp.f32 %v7112_v1  ;;  %v7118_v4 = vld [vmem:[#allocation5 + $0x40] sm:$0xff]  ;;  %v7117_v37 = vld [vmem:[#allocation5 + $0x38] sm:$0xff]  ;;  %v7116_v36 = vld [vmem:[#allocation5 + $0x30] sm:$0xff] }
 0x9ea   : > { %13567 = vrcp.f32 %v7110_v8  ;;  %v7121_v24 = vld [vmem:[#allocation5 + $0x58] sm:$0xff]  ;;  %v7120_v23 = vld [vmem:[#allocation5 + $0x50] sm:$0xff]  ;;  %v7119_v31 = vld [vmem:[#allocation5 + $0x48] sm:$0xff] }
 0x9eb   : > { %13569 = vrcp.f32 %v7115_v34  ;;  %v7124_v54 = vld [vmem:[#allocation5 + $0x70] sm:$0xff]  ;;  %v7123_v14 = vld [vmem:[#allocation5 + $0x68] sm:$0xff]  ;;  %v7122_v13 = vld [vmem:[#allocation5 + $0x60] sm:$0xff] }
 0x9ec   : > { %13571 = vrcp.f32 %v7113_v18  ;;  %v7127_v39 = vld [vmem:[#allocation5 + $0x88] sm:$0xff]  ;;  %v7126_v10 = vld [vmem:[#allocation5 + $0x80] sm:$0xff]  ;;  %v7125_v56 = vld [vmem:[#allocation5 + $0x78] sm:$0xff] }
 0x9ed   : > { %13573 = vrcp.f32 %v7111_v30  ;;  %v7130_v15 = vld [vmem:[#allocation5 + $0xa0] sm:$0xff]  ;;  %v7129_v27 = vld [vmem:[#allocation5 + $0x98] sm:$0xff]  ;;  %v7128_v3 = vld [vmem:[#allocation5 + $0x90] sm:$0xff]  ;;  %v6770_v47 = vstv %s6769_s18 }
 0x9ee   : > { %v13564_v45 = vpop.eup %13563  ;;  %13575 = vrcp.f32 %v7118_v4  ;;  %v7133_v61 = vld [vmem:[#allocation5 + $0xb8] sm:$0xff]  ;;  %v7132_v29 = vld [vmem:[#allocation5 + $0xb0] sm:$0xff]  ;;  %v7131_v49 = vld [vmem:[#allocation5 + $0xa8] sm:$0xff]  ;;  %v11554_v17 = vmul.f32 -1.442695, %v6770_v47 }
 0x9ef   : > { %v13566_v52 = vpop.eup %13565  ;;  %7196 = vperm.xlu2 %13562, %v13564_v45   ;;  %13577 = vrcp.f32 %v7117_v37  ;;  %v7136_v53 = vld [vmem:[#allocation5 + $0xd0] sm:$0xff]  ;;  %v7135_v62 = vld [vmem:[#allocation5 + $0xc8] sm:$0xff]  ;;  %v7134_v12 = vld [vmem:[#allocation5 + $0xc0] sm:$0xff] }
 0x9f0   : > { %v13568_v20 = vpop.eup %13567  ;;  %7186 = vperm.xlu1 %13561, %v13566_v52   ;;  %13579 = vrcp.f32 %v7116_v36  ;;  %v7139_v5 = vld [vmem:[#allocation5 + $0xe8] sm:$0xff]  ;;  %v7138_v60 = vld [vmem:[#allocation5 + $0xe0] sm:$0xff]  ;;  %v7137_v58 = vld [vmem:[#allocation5 + $0xd8] sm:$0xff] }
 0x9f1   : > { %7176 = vperm.xlu0 %13560, %v13568_v20   ;;  %v13570_v19 = vpop.eup %13569  ;;  %13581 = vrcp.f32 %v7121_v24  ;;  %v7141_v44 = vld [vmem:[#allocation5 + $0xf8] sm:$0xff]  ;;  %v7140_v1 = vld [vmem:[#allocation5 + $0xf0] sm:$0xff] }
 0x9f2   : > { %v13572_v59 = vpop.eup %13571  ;;  %13583 = vrcp.f32 %v7120_v23  ;;  %v7000_v24 = vld [vmem:[#allocation6 + $0x90] sm:$0xff] }
 0x9f3   : > { %v13574_v63 = vpop.eup %13573  ;;  %13585 = vrcp.f32 %v7119_v31  ;;  %v6798_v31 = vld [vmem:[#allocation2 + $0x40] sm:$0xff] }
 0x9f4   : > { %v13576_v22 = vpop.eup %13575  ;;  %13587 = vrcp.f32 %v7124_v54 }
 0x9f5   : > { %v13578_v48 = vpop.eup %13577  ;;  %13589 = vrcp.f32 %v7123_v14 }
 0x9f6   : > { %v13580_v7 = vpop.eup %13579  ;;  %13591 = vrcp.f32 %v7122_v13  ;;  %v6800_v13 = vld [vmem:[#allocation2 + $0x50] sm:$0xff] }
 0x9f7   : > { %7201 = vperm.xlu2 %13562, %v13570_v19   ;;  %v13582_v28 = vpop.eup %13581  ;;  %13593 = vrcp.f32 %v7127_v39 }
 0x9f8   : > { %7191 = vperm.xlu1 %13561, %v13572_v59   ;;  %v13584_v26 = vpop.eup %13583  ;;  %13595 = vrcp.f32 %v7126_v10  ;;  %v6998_v59 = vld [vmem:[#allocation6 + $0x150] sm:$0xff]  ;;  %v6871_v10 = vunpack.c.h.bf16 %v6798_v31 }
 0x9f9   : > { %7181 = vperm.xlu0 %13560, %v13574_v63   ;;  %v13586_v42 = vpop.eup %13585  ;;  %13597 = vrcp.f32 %v7125_v56  ;;  %v6999_v63 = vld [vmem:[#allocation6 + $0x210] sm:$0xff] }
 0x9fa   : > { %v13588_v32 = vpop.eup %13587  ;;  %13599 = vrcp.f32 %v7130_v15  ;;  %v17504_v15 = vld [vmem:[#allocation2 + $0x88] sm:$0xff] }
 0x9fb   : > { %v13590_v46 = vpop.eup %13589  ;;  %13601 = vrcp.f32 %v7129_v27  ;;  %v6875_v27 = vunpack.c.h.bf16 %v6800_v13  ;;  %v6888_v47 = vunpack.c.l.bf16 %v17504_v15 }
 0x9fc   : > { %v13592_v51 = vpop.eup %13591  ;;  %13603 = vrcp.f32 %v7128_v3 }
 0x9fd   : > { %v13594_v11 = vpop.eup %13593  ;;  %13605 = vrcp.f32 %v7133_v61  ;;  %v17506_v61 = vld [vmem:[#allocation2 + $0xb0] sm:$0xff] }
 0x9fe   : > { %v13596_v9 = vpop.eup %13595  ;;  %13607 = vrcp.f32 %v7132_v29 }
 0x9ff   : > { %7216 = vperm.xlu2 %13562, %v13576_v22   ;;  %v13598_v35 = vpop.eup %13597  ;;  %13609 = vrcp.f32 %v7131_v49  ;;  %v7001_v22 = vld [vmem:[#allocation6 + $0x350] sm:$0xff] }
 0xa00   : > { %7211 = vperm.xlu1 %13561, %v13578_v48   ;;  %v13600_v50 = vpop.eup %13599  ;;  %13611 = vrcp.f32 %v7136_v53  ;;  %v7003_v53 = vld [vmem:[#allocation6 + $0x370] sm:$0xff] }
 0xa01   : > { %7206 = vperm.xlu0 %13560, %v13580_v7   ;;  %v13602_v0 = vpop.eup %13601  ;;  %13613 = vrcp.f32 %v7135_v62  ;;  %v6799_v7 = vld [vmem:[#allocation2 + $0x48] sm:$0xff] }
 0xa02   : > { %v13604_v55 = vpop.eup %13603  ;;  %13615 = vrcp.f32 %v7134_v12  ;;  %v6873_v56 = vunpack.c.h.bf16 %v6799_v7  ;;  %v7004_v62 = vld [vmem:[#allocation6 + $0x3e8] sm:$0xff] }
 0xa03   : > { %v13606_v38 = vpop.eup %13605  ;;  %13617 = vpow2.f32 %v11554_v17 }
 0xa04   : > { %v13608_v21 = vpop.eup %13607  ;;  %13619 = vrcp.f32 %v7139_v5  ;;  %v6899_v5 = vunpack.c.h.bf16 %v17506_v61 }
 0xa05   : > { %v13610_v16 = vpop.eup %13609  ;;  %13621 = vrcp.f32 %v7138_v60 }
 0xa06   : > { %v13612_v41 = vpop.eup %13611  ;;  %13623 = vrcp.f32 %v7137_v58 }
 0xa07   : > { %7231 = vperm.xlu2 %13562, %v13582_v28   ;;  %v13614_v40 = vpop.eup %13613 }
 0xa08   : > { %7226 = vperm.xlu1 %13561, %v13584_v26   ;;  %v13616_v2 = vpop.eup %13615 }
 0xa09   : > { %7221 = vperm.xlu0 %13560, %v13586_v42   ;;  %v13618_v6 = vpop.eup %13617  ;;  %v6801_v42 = vld [vmem:[#allocation2 + $0x58] sm:$0xff] }
 0xa0a   : > { %v6774_v57 = vadd.f32 1.0, %v13618_v6  ;;  %v13620_v43 = vpop.eup %13619  ;;  %v6877_v3 = vunpack.c.h.bf16 %v6801_v42 }
 0xa0b   : > { %v13622_v25 = vpop.eup %13621 }
 0xa0c   : > { %13625 = vrcp.f32 %v6774_v57  ;;  %v13624_v8 = vpop.eup %13623  ;;  %vm6780_vm4 = vweird.f32 %v6774_v57  ;;  %v6786_v20 = vand.u32 2147483648, %v6774_v57  ;;  %v6784_v19 = vand.u32 2147483647, %v6774_v57 }
 0xa0d   : > { %13627 = vrcp.f32 %v7141_v44  ;;  %v17524_v44 = vld [vmem:[#allocation2 + $0x8] sm:$0xff] }
 0xa0e   : > { %13629 = vrcp.f32 %v7140_v1  ;;  %v6787_v36 = vor.u32 1.1754944e-38, %v6786_v20  ;;  %vm6785_vm7 = vcmp.eq.f32.partialorder %v6784_v19, 8.507059e+37  ;;  %v17540_v20 = vld [vmem:[#allocation2 + $0x28] sm:$0xff] }
 0xa0f   : > { %7246 = vperm.xlu2 %13562, %v13588_v32   ;;  %v6870_v32 = vunpack.c.l.bf16 %v6798_v31  ;;  %v17556_v31 = vld [vmem:[#allocation2 + $0xe8] sm:$0xff] }
 0xa10   : > { %7241 = vperm.xlu1 %13561, %v13590_v46   ;;  %v6872_v46 = vunpack.c.l.bf16 %v6799_v7  ;;  %v7015_v7 = vld [vmem:[#allocation6 + $0x188] sm:$0xff] }
 0xa11   : > { %7236 = vperm.xlu0 %13560, %v13592_v51   ;;  %v17502_v51 = vld [vmem:[#allocation2 + $0x80] sm:$0xff] }
 0xa12   : > { %v13626_v33 = vpop.eup %13625  ;;  %v6886_v12 = vunpack.c.l.bf16 %v17502_v51 }
 0xa13   : > { %v6776_v34 = vmul.f32 %v13626_v33, %v6774_v57  ;;  %v13628_v18 = vpop.eup %13627  ;;  %vm6781_vm5 = vweird.f32 %v13626_v33 }
 0xa14   : > { %v13630_v45 = vpop.eup %13629  ;;  %vm17494_vm6 = vmor %vm6780_vm4, %vm6781_vm5 }
 0xa15   : > { %v6777_v30 = vsub.f32 1.0, %v6776_v34 }
 0xa17   : > { %7261 = vperm.xlu2 %13562, %v13594_v11   ;;  %v6778_v52 = vmul.f32 %v13626_v33, %v6777_v30  ;;  %v6874_v11 = vunpack.c.l.bf16 %v6800_v13  ;;  %v6864_v13 = vunpack.c.l.bf16 %v17540_v20 }
 0xa18   : > { %7256 = vperm.xlu1 %13561, %v13596_v9   ;;  %v6876_v9 = vunpack.c.l.bf16 %v6801_v42 }
 0xa19   : > { %7251 = vperm.xlu0 %13560, %v13598_v35   ;;  %v6779_v4 = vadd.f32 %v13626_v33, %v6778_v52  ;;  %v7002_v35 = vld [vmem:[#allocation6 + $0xe8] sm:$0xff]  ;;  %v17538_v52 = vld [vmem:[#allocation2 + $0x20] sm:$0xff] }
 0xa1b   : > { %v6783_v48 = vsel %vm17494_vm6, %v13626_v33, %v6779_v4 }
 0xa1c   : > { %v17500_v39 = vsel %vm6785_vm7, %v6787_v36, %v6783_v48  ;;  %v17554_v48 = vld [vmem:[#allocation2 + $0xe0] sm:$0xff] }
 0xa1f   : > { %7276 = vperm.xlu2 %13562, %v13600_v50   ;;  %v17508_v50 = vld [vmem:[#allocation2 + $0xb8] sm:$0xff] }
 0xa20   : > { %7271 = vperm.xlu1 %13561, %v13602_v0   ;;  %v6901_v60 = vunpack.c.h.bf16 %v17508_v50 }
 0xa21   : > { %7266 = vperm.xlu0 %13560, %v13604_v55  }
 0xa27   : > { %7291 = vperm.xlu2 %13562, %v13606_v38   ;;  %v7005_v38 = vld [vmem:[#allocation6 + $0x1b0] sm:$0xff] }
 0xa28   : > { %7286 = vperm.xlu1 %13561, %v13608_v21   ;;  %v6887_v21 = vunpack.c.h.bf16 %v17502_v51 }
 0xa29   : > { %7281 = vperm.xlu0 %13560, %v13610_v16   ;;  %v6889_v16 = vunpack.c.h.bf16 %v17504_v15 }
 0xa2f   : > { %7306 = vperm.xlu2 %13562, %v13612_v41   ;;  %v6898_v41 = vunpack.c.l.bf16 %v17506_v61 }
 0xa30   : > { %7301 = vperm.xlu1 %13561, %v13614_v40   ;;  %v6900_v40 = vunpack.c.l.bf16 %v17508_v50  ;;  %v20533_v50 = vunpack.c.h.bf16 %v17540_v20 }
 0xa31   : > { %7296 = vperm.xlu0 %13560, %v13616_v2  }
 0xa37   : > { %7321 = vperm.xlu2 %13562, %v13620_v43   ;;  %v17522_v43 = vld [vmem:[#allocation2] sm:$0xff] }
 0xa38   : > { %7316 = vperm.xlu1 %13561, %v13622_v25  }
 0xa39   : > { %7311 = vperm.xlu0 %13560, %v13624_v8  }
 0xa40   : > { %7331 = vperm.xlu1 %13561, %v13628_v18  }
 0xa41   : > { %7326 = vperm.xlu0 %13560, %v13630_v45  }
 0xa49   : > { %v7197_v23 = vpop.permute.xlu2 %7196 }
 0xa4a   : > { %v7350_v54 = vmul.f32 %v7197_v23, %v6998_v59  ;;  %v7351_v28 = vmul.f32 %v7197_v23, %v6999_v63  ;;  %v7352_v14 = vmul.f32 %v7197_v23, %v7000_v24  ;;  %v7353_v26 = vmul.f32 %v7197_v23, %v7001_v22  ;;  %v7014_v23 = vld [vmem:[#allocation6 + $0x178] sm:$0xff] }
 0xa4c   : > { %v7478_v29 = vmul.f32 %v7350_v54, %v17500_v39  ;;  %v7479_v0 = vmul.f32 %v7351_v28, %v17500_v39  ;;  %v7480_v49 = vmul.f32 %v7352_v14, %v17500_v39  ;;  %v7481_v55 = vmul.f32 %v7353_v26, %v17500_v39  ;;  %v7016_v54 = vld [vmem:[#allocation6 + $0x300] sm:$0xff]  ;;  %v7017_v28 = vld [vmem:[#allocation6 + $0x1c8] sm:$0xff] }
 0xa4d   : > { %v6862_v14 = vunpack.c.l.bf16 %v17538_v52  ;;  %v6863_v26 = vunpack.c.h.bf16 %v17538_v52 }
 0xa4e   : > { %v17526_v25 = vadd.f32 %v7478_v29, %v6870_v32  ;;  %v17528_v1 = vadd.f32 %v7479_v0, %v6871_v10  ;;  %v17530_v8 = vadd.f32 %v7480_v49, %v6872_v46  ;;  %v17532_v33 = vadd.f32 %v7481_v55, %v6873_v56  ;;  %v6993_v0 = vld [vmem:[#allocation6 + $0x288] sm:$0xff] }
 0xa51   : > { %v7202_v17 = vpop.permute.xlu2 %7201 }
 0xa52   : > { %v7354_v2 = vmul.f32 %v7202_v17, %v7002_v35  ;;  %v7355_v58 = vmul.f32 %v7202_v17, %v7003_v53  ;;  %v7356_v6 = vmul.f32 %v7202_v17, %v7004_v62  ;;  %v7357_v57 = vmul.f32 %v7202_v17, %v7005_v38  ;;  %v17578_v38 = vld [vmem:[#allocation2 + $0x10] sm:$0xff]  ;;  %v17580_v17 = vld [vmem:[#allocation2 + $0x18] sm:$0xff] }
 0xa54   : > { %v7482_v34 = vmul.f32 %v7354_v2, %v17500_v39  ;;  %v7483_v18 = vmul.f32 %v7355_v58, %v17500_v39  ;;  %v7484_v30 = vmul.f32 %v7356_v6, %v17500_v39  ;;  %v7485_v45 = vmul.f32 %v7357_v57, %v17500_v39  ;;  %v17612_v58 = vld [vmem:[#allocation2 + $0x118] sm:$0xff]  ;;  %v17614_v6 = vld [vmem:[#allocation2 + $0x70] sm:$0xff] }
 0xa55   : > { %v6991_v57 = vld [vmem:[#allocation6 + $0xf8] sm:$0xff] }
 0xa56   : > { %v17546_v36 = vadd.f32 %v7482_v34, %v6874_v11  ;;  %v17548_v63 = vadd.f32 %v7483_v18, %v6875_v27  ;;  %v17550_v24 = vadd.f32 %v7484_v30, %v6876_v9  ;;  %v17552_v22 = vadd.f32 %v7485_v45, %v6877_v3  ;;  %v17570_v11 = vld [vmem:[#allocation2 + $0x30] sm:$0xff]  ;;  %v17572_v27 = vld [vmem:[#allocation2 + $0x38] sm:$0xff] }
 0xa57   : > { %v6992_v2 = vld [vmem:[#allocation6 + $0x378] sm:$0xff] }
 0xa58   : > { %v7718_v32 = vmax.f32 %v17546_v36, %v17526_v25  ;;  %v7755_v10 = vmax.f32 %v17548_v63, %v17528_v1  ;;  %v7792_v46 = vmax.f32 %v17550_v24, %v17530_v8  ;;  %v7829_v56 = vmax.f32 %v17552_v22, %v17532_v33 }
 0xa59   : > { %v7217_v9 = vpop.permute.xlu2 %7216 }
 0xa5a   : > { %v7366_v49 = vmul.f32 %v7217_v9, %v7014_v23  ;;  %v7367_v55 = vmul.f32 %v7217_v9, %v7015_v7  ;;  %v7368_v53 = vmul.f32 %v7217_v9, %v7016_v54  ;;  %v7369_v62 = vmul.f32 %v7217_v9, %v7017_v28  ;;  %v7026_v23 = vld [vmem:[#allocation6 + $0x298] sm:$0xff]  ;;  %v7027_v7 = vld [vmem:[#allocation6 + $0x3d0] sm:$0xff]  ;;  %v7028_v54 = vld [vmem:[#allocation6 + $0x3c8] sm:$0xff] }
 0xa5b   : > { %v17610_v9 = vld [vmem:[#allocation2 + $0x110] sm:$0xff] }
 0xa5c   : > { %v7494_v34 = vmul.f32 %v7366_v49, %v17500_v39  ;;  %v7495_v18 = vmul.f32 %v7367_v55, %v17500_v39  ;;  %v7496_v30 = vmul.f32 %v7368_v53, %v17500_v39  ;;  %v7497_v45 = vmul.f32 %v7369_v62, %v17500_v39 }
 0xa5e   : > { %v17596_v49 = vadd.f32 %v7494_v34, %v6886_v12  ;;  %v17600_v55 = vadd.f32 %v7495_v18, %v6887_v21  ;;  %v17604_v53 = vadd.f32 %v7496_v30, %v6888_v47  ;;  %v17608_v62 = vadd.f32 %v7497_v45, %v6889_v16  ;;  %v7029_v12 = vld [vmem:[#allocation6 + $0x10] sm:$0xff]  ;;  %v6990_v34 = vld [vmem:[#allocation6 + $0x148] sm:$0xff]  ;;  %v17620_v30 = vld [vmem:[#allocation2 + $0x78] sm:$0xff] }
 0xa60   : > { %v7719_v15 = vmax.f32 %v7718_v32, %v17596_v49  ;;  %v7756_v16 = vmax.f32 %v7755_v10, %v17600_v55  ;;  %v7793_v45 = vmax.f32 %v7792_v46, %v17604_v53  ;;  %v7830_v28 = vmax.f32 %v7829_v56, %v17608_v62 }
 0xa61   : > { %v7232_v51 = vpop.permute.xlu2 %7231 }
 0xa62   : > { %v7378_v35 = vmul.f32 %v7232_v51, %v7026_v23  ;;  %v7379_v32 = vmul.f32 %v7232_v51, %v7027_v7  ;;  %v7380_v3 = vmul.f32 %v7232_v51, %v7028_v54  ;;  %v7381_v10 = vmul.f32 %v7232_v51, %v7029_v12  ;;  %v7187_v59 = vpop.permute.xlu1 %7186  ;;  %v6982_v12 = vld [vmem:[#allocation6 + $0x2a8] sm:$0xff] }
 0xa63   : > { %v7342_v46 = vmul.f32 %v7187_v59, %v6990_v34  ;;  %v7343_v37 = vmul.f32 %v7187_v59, %v6991_v57  ;;  %v7344_v56 = vmul.f32 %v7187_v59, %v6992_v2  ;;  %v7345_v19 = vmul.f32 %v7187_v59, %v6993_v0  ;;  %v7177_v0 = vpop.permute.xlu0 %7176  ;;  %v6983_v2 = vld [vmem:[#allocation6 + $0x268] sm:$0xff]  ;;  %v6985_v57 = vld [vmem:[#allocation6 + $0x2c0] sm:$0xff]  ;;  %v7038_v34 = vld [vmem:[#allocation6 + $0x170] sm:$0xff] }
 0xa64   : > { %v7506_v4 = vmul.f32 %v7378_v35, %v17500_v39  ;;  %v7507_v42 = vmul.f32 %v7379_v32, %v17500_v39  ;;  %v7508_v21 = vmul.f32 %v7380_v3, %v17500_v39  ;;  %v7509_v18 = vmul.f32 %v7381_v10, %v17500_v39  ;;  %v7041_v32 = vld [vmem:[#allocation6 + $0x3f0] sm:$0xff] }
 0xa65   : > { %v7470_v47 = vmul.f32 %v7342_v46, %v17500_v39  ;;  %v7471_v23 = vmul.f32 %v7343_v37, %v17500_v39  ;;  %v7472_v7 = vmul.f32 %v7344_v56, %v17500_v39  ;;  %v7473_v54 = vmul.f32 %v7345_v19, %v17500_v39  ;;  %v6984_v19 = vld [vmem:[#allocation6 + $0x310] sm:$0xff] }
 0xa66   : > { %v17640_v59 = vadd.f32 %v7506_v4, %v6898_v41  ;;  %v17644_v35 = vadd.f32 %v7507_v42, %v6899_v5  ;;  %v17648_v3 = vadd.f32 %v7508_v21, %v6900_v40  ;;  %v17652_v37 = vadd.f32 %v7509_v18, %v6901_v60 }
 0xa67   : > { %v17656_v41 = vadd.f32 %v7470_v47, %v6862_v14  ;;  %v17660_v61 = vadd.f32 %v7471_v23, %v6863_v26  ;;  %v17664_v5 = vadd.f32 %v7472_v7, %v6864_v13  ;;  %v17668_v40 = vadd.f32 %v7473_v54, %v20533_v50  ;;  %v7039_v13 = vld [vmem:[#allocation6 + $0x2a0] sm:$0xff]  ;;  %v7040_v47 = vld [vmem:[#allocation6 + $0x398] sm:$0xff] }
 0xa68   : > { %v7720_v60 = vmax.f32 %v7719_v15, %v17640_v59  ;;  %v7757_v4 = vmax.f32 %v7756_v16, %v17644_v35  ;;  %v7794_v42 = vmax.f32 %v7793_v45, %v17648_v3  ;;  %v7831_v14 = vmax.f32 %v7830_v28, %v17652_v37 }
 0xa69   : > { %v7334_v52 = vmul.f32 %v7177_v0, %v6982_v12  ;;  %v7335_v26 = vmul.f32 %v7177_v0, %v6983_v2  ;;  %v7336_v51 = vmul.f32 %v7177_v0, %v6984_v19  ;;  %v7337_v21 = vmul.f32 %v7177_v0, %v6985_v57  ;;  %v7247_v18 = vpop.permute.xlu2 %7246 }
 0xa6a   : > { %v7721_v20 = vmax.f32 %v7720_v60, %v17656_v41  ;;  %v7758_v10 = vmax.f32 %v7757_v4, %v17660_v61  ;;  %v7795_v15 = vmax.f32 %v7794_v42, %v17664_v5  ;;  %v7832_v16 = vmax.f32 %v7831_v14, %v17668_v40  ;;  %v6994_v14 = vld [vmem:[#allocation6 + $0x220] sm:$0xff] }
 0xa6b   : > { %v7462_v45 = vmul.f32 %v7334_v52, %v17500_v39  ;;  %v7463_v28 = vmul.f32 %v7335_v26, %v17500_v39  ;;  %v7464_v46 = vmul.f32 %v7336_v51, %v17500_v39  ;;  %v7465_v56 = vmul.f32 %v7337_v21, %v17500_v39  ;;  %v6995_v21 = vld [vmem:[#allocation6 + $0x2f8] sm:$0xff] }
 0xa6c   : > { %v7390_v23 = vmul.f32 %v7247_v18, %v7038_v34  ;;  %v7391_v7 = vmul.f32 %v7247_v18, %v7039_v13  ;;  %v7392_v54 = vmul.f32 %v7247_v18, %v7040_v47  ;;  %v7393_v12 = vmul.f32 %v7247_v18, %v7041_v32  ;;  %v6996_v18 = vld [vmem:[#allocation6 + $0xc8] sm:$0xff]  ;;  %v6997_v13 = vld [vmem:[#allocation6 + $0x50] sm:$0xff] }
 0xa6d   : > { %v20534_v0 = vunpack.c.l.bf16 %v17522_v43  ;;  %v20535_v19 = vunpack.c.h.bf16 %v17522_v43  ;;  %v20536_v50 = vunpack.c.l.bf16 %v17524_v44  ;;  %v20537_v4 = vunpack.c.h.bf16 %v17524_v44  ;;  %v7192_v43 = vpop.permute.xlu1 %7191 }
 0xa6e   : > { %v7518_v34 = vmul.f32 %v7390_v23, %v17500_v39  ;;  %v7519_v52 = vmul.f32 %v7391_v7, %v17500_v39  ;;  %v7520_v26 = vmul.f32 %v7392_v54, %v17500_v39  ;;  %v7521_v51 = vmul.f32 %v7393_v12, %v17500_v39 }
 0xa6f   : > { %v17684_v2 = vadd.f32 %v7462_v45, %v20534_v0  ;;  %v17688_v57 = vadd.f32 %v7463_v28, %v20535_v19  ;;  %v17692_v60 = vadd.f32 %v7464_v46, %v20536_v50  ;;  %v17696_v42 = vadd.f32 %v7465_v56, %v20537_v4  ;;  %v7182_v50 = vpop.permute.xlu0 %7181  ;;  %v6987_v4 = vld [vmem:[#allocation6 + $0x3b0] sm:$0xff] }
 0xa70   : > { %v20538_v28 = vunpack.c.l.bf16 %v17554_v48  ;;  %v20540_v56 = vunpack.c.h.bf16 %v17554_v48  ;;  %v20542_v7 = vunpack.c.l.bf16 %v17556_v31  ;;  %v7347_v0 = vmul.f32 %v7192_v43, %v6995_v21 }
 0xa71   : > { %v7722_v47 = vmax.f32 %v7721_v20, %v17684_v2  ;;  %v7759_v32 = vmax.f32 %v7758_v10, %v17688_v57  ;;  %v7796_v44 = vmax.f32 %v7795_v15, %v17692_v60  ;;  %v7833_v45 = vmax.f32 %v7832_v16, %v17696_v42  ;;  %v6986_v10 = vld [vmem:[#allocation6 + $0x2c8] sm:$0xff] }
 0xa72   : > { %v17708_v46 = vadd.f32 %v7518_v34, %v20538_v28  ;;  %v17712_v23 = vadd.f32 %v7519_v52, %v20540_v56  ;;  %v17716_v54 = vadd.f32 %v7520_v26, %v20542_v7  ;;  %v20544_v20 = vunpack.c.h.bf16 %v17556_v31  ;;  %v6988_v34 = vld [vmem:[#allocation6 + $0x270] sm:$0xff]  ;;  %v6989_v28 = vld [vmem:[#allocation6 + $0x138] sm:$0xff] }
 0xa73   : > { %v7346_v15 = vmul.f32 %v7192_v43, %v6994_v14  ;;  %v7348_v16 = vmul.f32 %v7192_v43, %v6996_v18  ;;  %v7349_v19 = vmul.f32 %v7192_v43, %v6997_v13  ;;  %v7338_v21 = vmul.f32 %v7182_v50, %v6986_v10 }
 0xa74   : > { %20539 = vst [vmem:[#allocation73_spill] sm:$0xff] %v17708_v46  ;;  %v17720_v12 = vadd.f32 %v7521_v51, %v20544_v20  ;;  %v7723_v48 = vmax.f32 %v7722_v47, %v17708_v46  ;;  %v7760_v52 = vmax.f32 %v7759_v32, %v17712_v23  ;;  %v7797_v26 = vmax.f32 %v7796_v44, %v17716_v54 }
 0xa75   : > { %20541 = vst [vmem:[#allocation74_spill] sm:$0xff] %v17712_v23  ;;  %v7474_v31 = vmul.f32 %v7346_v15, %v17500_v39  ;;  %v7475_v51 = vmul.f32 %v7347_v0, %v17500_v39  ;;  %v7476_v14 = vmul.f32 %v7348_v16, %v17500_v39  ;;  %v7477_v43 = vmul.f32 %v7349_v19, %v17500_v39 }
 0xa76   : > { %20543 = vst [vmem:[#allocation75_spill] sm:$0xff] %v17716_v54  ;;  %v7834_v56 = vmax.f32 %v7833_v45, %v17720_v12  ;;  %v7339_v18 = vmul.f32 %v7182_v50, %v6987_v4  ;;  %v7340_v13 = vmul.f32 %v7182_v50, %v6988_v34  ;;  %v7341_v7 = vmul.f32 %v7182_v50, %v6989_v28  ;;  %v7262_v4 = vpop.permute.xlu2 %7261  ;;  %v7051_v34 = vld [vmem:[#allocation6 + $0x360] sm:$0xff] }
 0xa77   : > { %20545 = vst [vmem:[#allocation76_spill] sm:$0xff] %v17720_v12  ;;  %v20546_v47 = vunpack.c.l.bf16 %v17570_v11  ;;  %v20547_v32 = vunpack.c.h.bf16 %v17570_v11  ;;  %v20548_v45 = vunpack.c.l.bf16 %v17572_v27  ;;  %v20549_v15 = vunpack.c.h.bf16 %v17572_v27  ;;  %v7050_v12 = vld [vmem:[#allocation6 + $0x38] sm:$0xff]  ;;  %v7052_v28 = vld [vmem:[#allocation6 + $0x200] sm:$0xff]  ;;  %v7053_v11 = vld [vmem:[#allocation6 + $0x290] sm:$0xff] }
 0xa78   : > { %v7466_v16 = vmul.f32 %v7338_v21, %v17500_v39  ;;  %v7467_v10 = vmul.f32 %v7339_v18, %v17500_v39  ;;  %v7468_v19 = vmul.f32 %v7340_v13, %v17500_v39  ;;  %v7469_v50 = vmul.f32 %v7341_v7, %v17500_v39 }
 0xa79   : > { %v7602_v20 = vadd.f32 %v7474_v31, %v20546_v47  ;;  %v7603_v44 = vadd.f32 %v7475_v51, %v20547_v32  ;;  %v7604_v29 = vadd.f32 %v7476_v14, %v20548_v45  ;;  %v7605_v0 = vadd.f32 %v7477_v43, %v20549_v15 }
 0xa7a   : > { %v20550_v27 = vunpack.c.l.bf16 %v17578_v38  ;;  %v20551_v32 = vunpack.c.h.bf16 %v17578_v38  ;;  %v20552_v18 = vunpack.c.l.bf16 %v17580_v17  ;;  %v20553_v13 = vunpack.c.h.bf16 %v17580_v17 }
 0xa7b   : > { %v7724_v31 = vmax.f32 %v7723_v48, %v7602_v20  ;;  %v7761_v51 = vmax.f32 %v7760_v52, %v7603_v44  ;;  %v7798_v47 = vmax.f32 %v7797_v26, %v7604_v29  ;;  %v7835_v14 = vmax.f32 %v7834_v56, %v7605_v0 }
 0xa7c   : > { %v7594_v43 = vadd.f32 %v7466_v16, %v20550_v27  ;;  %v7595_v21 = vadd.f32 %v7467_v10, %v20551_v32  ;;  %v7596_v45 = vadd.f32 %v7468_v19, %v20552_v18  ;;  %v7597_v7 = vadd.f32 %v7469_v50, %v20553_v13 }
 0xa7d   : > { %v7402_v15 = vmul.f32 %v7262_v4, %v7050_v12  ;;  %v7403_v54 = vmul.f32 %v7262_v4, %v7051_v34  ;;  %v7404_v23 = vmul.f32 %v7262_v4, %v7052_v28  ;;  %v7405_v46 = vmul.f32 %v7262_v4, %v7053_v11  ;;  %v7010_v11 = vld [vmem:[#allocation6 + $0x388] sm:$0xff] }
 0xa7e   : > { %v17750_v48 = vmax.f32 %v7724_v31, %v7594_v43  ;;  %v17752_v52 = vmax.f32 %v7761_v51, %v7595_v21  ;;  %v17754_v26 = vmax.f32 %v7798_v47, %v7596_v45  ;;  %v17756_v56 = vmax.f32 %v7835_v14, %v7597_v7  ;;  %v7011_v51 = vld [vmem:[#allocation6 + $0x278] sm:$0xff]  ;;  %v7013_v47 = vld [vmem:[#allocation6 + $0x80] sm:$0xff] }
 0xa7f   : > { %v7866_v38 = vadd.f32 %v7594_v43, %v17684_v2  ;;  %v7903_v16 = vadd.f32 %v7595_v21, %v17688_v57  ;;  %v7940_v10 = vadd.f32 %v7596_v45, %v17692_v60  ;;  %v7977_v17 = vadd.f32 %v7597_v7, %v17696_v42  ;;  %v6802_v21 = vld [vmem:[#allocation2 + $0x60] sm:$0xff]  ;;  %v7006_v7 = vld [vmem:[#allocation6 + $0x390] sm:$0xff] }
 0xa80   : > { %v7530_v12 = vmul.f32 %v7402_v15, %v17500_v39  ;;  %v7531_v19 = vmul.f32 %v7403_v54, %v17500_v39  ;;  %v7532_v50 = vmul.f32 %v7404_v23, %v17500_v39  ;;  %v7533_v4 = vmul.f32 %v7405_v46, %v17500_v39 }
 0xa81   : > { %v7867_v34 = vadd.f32 %v7866_v38, %v17656_v41  ;;  %v7904_v28 = vadd.f32 %v7903_v16, %v17660_v61  ;;  %v7941_v2 = vadd.f32 %v7940_v10, %v17664_v5  ;;  %v7978_v57 = vadd.f32 %v7977_v17, %v17668_v40  ;;  %v7212_v5 = vpop.permute.xlu1 %7211  ;;  %v7012_v40 = vld [vmem:[#allocation6 + $0x258] sm:$0xff]  ;;  %v7007_v38 = vld [vmem:[#allocation6 + $0x348] sm:$0xff]  ;;  %v7008_v16 = vld [vmem:[#allocation6 + $0xc0] sm:$0xff] }
 0xa82   : > { %v20554_v60 = vunpack.c.l.bf16 %v17610_v9  ;;  %v20555_v31 = vunpack.c.h.bf16 %v17610_v9  ;;  %v20556_v23 = vunpack.c.l.bf16 %v17612_v58  ;;  %v20557_v41 = vunpack.c.h.bf16 %v17612_v58  ;;  %v6803_v9 = vld [vmem:[#allocation2 + $0x68] sm:$0xff]  ;;  %v7009_v10 = vld [vmem:[#allocation6 + $0x238] sm:$0xff] }
 0xa83   : > { %v7868_v14 = vadd.f32 %v7867_v34, %v7602_v20  ;;  %v7905_v27 = vadd.f32 %v7904_v28, %v7603_v44  ;;  %v7942_v43 = vadd.f32 %v7941_v2, %v7604_v29  ;;  %v7979_v32 = vadd.f32 %v7978_v57, %v7605_v0  ;;  %v7207_v0 = vpop.permute.xlu0 %7206 }
 0xa84   : > { %v17772_v42 = vadd.f32 %v7530_v12, %v20554_v60  ;;  %v17776_v54 = vadd.f32 %v7531_v19, %v20555_v31  ;;  %v17780_v46 = vadd.f32 %v7532_v50, %v20556_v23  ;;  %v17784_v61 = vadd.f32 %v7533_v4, %v20557_v41 }
 0xa85   : > { %v7362_v15 = vmul.f32 %v7212_v5, %v7010_v11  ;;  %v7363_v20 = vmul.f32 %v7212_v5, %v7011_v51  ;;  %v7364_v44 = vmul.f32 %v7212_v5, %v7012_v40  ;;  %v7365_v29 = vmul.f32 %v7212_v5, %v7013_v47 }
 0xa86   : > { %v7726_v18 = vmax.f32 %v17750_v48, %v17772_v42  ;;  %v7763_v45 = vmax.f32 %v17752_v52, %v17776_v54  ;;  %v7800_v58 = vmax.f32 %v17754_v26, %v17780_v46  ;;  %v7837_v13 = vmax.f32 %v17756_v56, %v17784_v61 }
 0xa87   : > { %v6878_v17 = vunpack.c.l.bf16 %v6802_v21  ;;  %v6879_v48 = vunpack.c.h.bf16 %v6802_v21  ;;  %v6880_v12 = vunpack.c.l.bf16 %v6803_v9  ;;  %v6881_v19 = vunpack.c.h.bf16 %v6803_v9 }
 0xa88   : > { %v7490_v52 = vmul.f32 %v7362_v15, %v17500_v39  ;;  %v7491_v26 = vmul.f32 %v7363_v20, %v17500_v39  ;;  %v7492_v50 = vmul.f32 %v7364_v44, %v17500_v39  ;;  %v7493_v56 = vmul.f32 %v7365_v29, %v17500_v39 }
 0xa89   : > { %v7358_v4 = vmul.f32 %v7207_v0, %v7006_v7  ;;  %v7359_v34 = vmul.f32 %v7207_v0, %v7007_v38  ;;  %v7360_v28 = vmul.f32 %v7207_v0, %v7008_v16  ;;  %v7361_v2 = vmul.f32 %v7207_v0, %v7009_v10  ;;  %v6831_v10 = vld [vmem:[#allocation2 + $0x148] sm:$0xff] }
 0xa8a   : > { %v20558_v57 = vunpack.c.l.bf16 %v17614_v6  ;;  %v20559_v60 = vunpack.c.h.bf16 %v17614_v6  ;;  %v20560_v23 = vunpack.c.l.bf16 %v17620_v30  ;;  %v20561_v5 = vunpack.c.h.bf16 %v17620_v30 }
 0xa8b   : > { %v7486_v40 = vmul.f32 %v7358_v4, %v17500_v39  ;;  %v7487_v47 = vmul.f32 %v7359_v34, %v17500_v39  ;;  %v7488_v21 = vmul.f32 %v7360_v28, %v17500_v39  ;;  %v7489_v9 = vmul.f32 %v7361_v2, %v17500_v39 }
 0xa8c   : > { %v7618_v11 = vadd.f32 %v7490_v52, %v20558_v57  ;;  %v7619_v31 = vadd.f32 %v7491_v26, %v20559_v60  ;;  %v7620_v41 = vadd.f32 %v7492_v50, %v20560_v23  ;;  %v7621_v51 = vadd.f32 %v7493_v56, %v20561_v5  ;;  %v6810_v57 = vld [vmem:[#allocation2 + $0xa0] sm:$0xff]  ;;  %v6811_v60 = vld [vmem:[#allocation2 + $0xa8] sm:$0xff] }
 0xa8d   : > { %v17818_v44 = vadd.f32 %v7486_v40, %v6878_v17  ;;  %v17820_v30 = vadd.f32 %v7487_v47, %v6879_v48  ;;  %v17822_v29 = vadd.f32 %v7488_v21, %v6880_v12  ;;  %v17824_v0 = vadd.f32 %v7489_v9, %v6881_v19  ;;  %v7064_v12 = vld [vmem:[#allocation6 + $0x108] sm:$0xff] }
 0xa8e   : > { %v17810_v7 = vmax.f32 %v7726_v18, %v7618_v11  ;;  %v17812_v15 = vmax.f32 %v7763_v45, %v7619_v31  ;;  %v17814_v6 = vmax.f32 %v7800_v58, %v7620_v41  ;;  %v17816_v20 = vmax.f32 %v7837_v13, %v7621_v51  ;;  %v6830_v58 = vld [vmem:[#allocation2 + $0x140] sm:$0xff]  ;;  %v7065_v19 = vld [vmem:[#allocation6 + $0x68] sm:$0xff] }
 0xa8f   : > { %v7869_v38 = vadd.f32 %v7868_v14, %v17526_v25  ;;  %v7906_v16 = vadd.f32 %v7905_v27, %v17528_v1  ;;  %v7943_v18 = vadd.f32 %v7942_v43, %v17530_v8  ;;  %v7980_v45 = vadd.f32 %v7979_v32, %v17532_v33  ;;  %v7062_v14 = vld [vmem:[#allocation6 + $0x280] sm:$0xff]  ;;  %v7277_v43 = vpop.permute.xlu2 %7276  ;;  %v7063_v32 = vld [vmem:[#allocation6 + $0x3d8] sm:$0xff]  ;;  %v7022_v21 = vld [vmem:[#allocation6 + $0x1a8] sm:$0xff] }
 0xa90   : > { %v7728_v13 = vmax.f32 %v17810_v7, %v17818_v44  ;;  %v7765_v17 = vmax.f32 %v17812_v15, %v17820_v30  ;;  %v7802_v48 = vmax.f32 %v17814_v6, %v17822_v29  ;;  %v7839_v25 = vmax.f32 %v17816_v20, %v17824_v0  ;;  %v7227_v20 = vpop.permute.xlu1 %7226 }
 0xa91   : > { %v7870_v1 = vadd.f32 %v7869_v38, %v17546_v36  ;;  %v7907_v8 = vadd.f32 %v7906_v16, %v17548_v63  ;;  %v7944_v33 = vadd.f32 %v7943_v18, %v17550_v24  ;;  %v7981_v27 = vadd.f32 %v7980_v45, %v17552_v22 }
 0xa92   : > { %v6934_v52 = vunpack.c.l.bf16 %v6830_v58  ;;  %v6935_v26 = vunpack.c.h.bf16 %v6830_v58  ;;  %v6936_v50 = vunpack.c.l.bf16 %v6831_v10  ;;  %v6937_v56 = vunpack.c.h.bf16 %v6831_v10 }
 0xa93   : > { %v7871_v4 = vadd.f32 %v7870_v1, %v17818_v44  ;;  %v7908_v34 = vadd.f32 %v7907_v8, %v17820_v30  ;;  %v7945_v36 = vadd.f32 %v7944_v33, %v17822_v29  ;;  %v7982_v63 = vadd.f32 %v7981_v27, %v17824_v0  ;;  %v7023_v44 = vld [vmem:[#allocation6 + $0x230] sm:$0xff]  ;;  %v7024_v30 = vld [vmem:[#allocation6 + $0x328] sm:$0xff]  ;;  %v7025_v29 = vld [vmem:[#allocation6 + $0x3e0] sm:$0xff] }
 0xa94   : > { %v7414_v28 = vmul.f32 %v7277_v43, %v7062_v14  ;;  %v7415_v24 = vmul.f32 %v7277_v43, %v7063_v32  ;;  %v7416_v2 = vmul.f32 %v7277_v43, %v7064_v12  ;;  %v7417_v22 = vmul.f32 %v7277_v43, %v7065_v19  ;;  %v6808_v1 = vld [vmem:[#allocation2 + $0x90] sm:$0xff]  ;;  %v6809_v8 = vld [vmem:[#allocation2 + $0x98] sm:$0xff] }
 0xa95   : > { %v7872_v23 = vadd.f32 %v7871_v4, %v7618_v11  ;;  %v7909_v5 = vadd.f32 %v7908_v34, %v7619_v31  ;;  %v7946_v40 = vadd.f32 %v7945_v36, %v7620_v41  ;;  %v7983_v47 = vadd.f32 %v7982_v63, %v7621_v51  ;;  %v7018_v12 = vld [vmem:[#allocation6 + $0x1d8] sm:$0xff]  ;;  %v7019_v4 = vld [vmem:[#allocation6 + $0x2d0] sm:$0xff]  ;;  %v7020_v34 = vld [vmem:[#allocation6 + $0x3a8] sm:$0xff] }
 0xa96   : > { %v7542_v9 = vmul.f32 %v7414_v28, %v17500_v39  ;;  %v7543_v7 = vmul.f32 %v7415_v24, %v17500_v39  ;;  %v7544_v15 = vmul.f32 %v7416_v2, %v17500_v39  ;;  %v7545_v6 = vmul.f32 %v7417_v22, %v17500_v39  ;;  %v7021_v36 = vld [vmem:[#allocation6 + $0x340] sm:$0xff] }
 0xa97   : > { %v6894_v0 = vunpack.c.l.bf16 %v6810_v57  ;;  %v6895_v38 = vunpack.c.h.bf16 %v6810_v57  ;;  %v6896_v16 = vunpack.c.l.bf16 %v6811_v60  ;;  %v6897_v11 = vunpack.c.h.bf16 %v6811_v60 }
 0xa98   : > { %v17850_v31 = vadd.f32 %v7542_v9, %v6934_v52  ;;  %v17852_v41 = vadd.f32 %v7543_v7, %v6935_v26  ;;  %v17854_v51 = vadd.f32 %v7544_v15, %v6936_v50  ;;  %v17856_v18 = vadd.f32 %v7545_v6, %v6937_v56  ;;  %v7222_v56 = vpop.permute.xlu0 %7221 }
 0xa99   : > { %v7374_v45 = vmul.f32 %v7227_v20, %v7022_v21  ;;  %v7375_v58 = vmul.f32 %v7227_v20, %v7023_v44  ;;  %v7376_v10 = vmul.f32 %v7227_v20, %v7024_v30  ;;  %v7377_v14 = vmul.f32 %v7227_v20, %v7025_v29 }
 0xa9a   : > { %v7729_v33 = vmax.f32 %v7728_v13, %v17850_v31  ;;  %v7766_v27 = vmax.f32 %v7765_v17, %v17852_v41  ;;  %v7803_v43 = vmax.f32 %v7802_v48, %v17854_v51  ;;  %v7840_v32 = vmax.f32 %v7839_v25, %v17856_v18 }
 0xa9b   : > { %v7502_v19 = vmul.f32 %v7374_v45, %v17500_v39  ;;  %v7503_v52 = vmul.f32 %v7375_v58, %v17500_v39  ;;  %v7504_v26 = vmul.f32 %v7376_v10, %v17500_v39  ;;  %v7505_v50 = vmul.f32 %v7377_v14, %v17500_v39 }
 0xa9c   : > { %v6890_v13 = vunpack.c.l.bf16 %v6808_v1  ;;  %v6891_v63 = vunpack.c.h.bf16 %v6808_v1  ;;  %v6892_v17 = vunpack.c.l.bf16 %v6809_v8  ;;  %v6893_v28 = vunpack.c.h.bf16 %v6809_v8 }
 0xa9d   : > { %v7630_v48 = vadd.f32 %v7502_v19, %v6894_v0  ;;  %v7631_v24 = vadd.f32 %v7503_v52, %v6895_v38  ;;  %v7632_v25 = vadd.f32 %v7504_v26, %v6896_v16  ;;  %v7633_v2 = vadd.f32 %v7505_v50, %v6897_v11  ;;  %v6836_v0 = vld [vmem:[#allocation2 + $0x170] sm:$0xff]  ;;  %v6837_v38 = vld [vmem:[#allocation2 + $0x178] sm:$0xff]  ;;  %v7077_v50 = vld [vmem:[#allocation6 + $0x20] sm:$0xff] }
 0xa9e   : > { %v7370_v22 = vmul.f32 %v7222_v56, %v7018_v12  ;;  %v7371_v57 = vmul.f32 %v7222_v56, %v7019_v4  ;;  %v7372_v60 = vmul.f32 %v7222_v56, %v7020_v34  ;;  %v7373_v21 = vmul.f32 %v7222_v56, %v7021_v36  ;;  %v7075_v52 = vld [vmem:[#allocation6 + $0x110] sm:$0xff]  ;;  %v7076_v26 = vld [vmem:[#allocation6 + $0xd8] sm:$0xff] }
 0xa9f   : > { %v7730_v9 = vmax.f32 %v7729_v33, %v7630_v48  ;;  %v7767_v7 = vmax.f32 %v7766_v27, %v7631_v24  ;;  %v7804_v15 = vmax.f32 %v7803_v43, %v7632_v25  ;;  %v7841_v6 = vmax.f32 %v7840_v32, %v7633_v2  ;;  %v7074_v33 = vld [vmem:[#allocation6 + $0x240] sm:$0xff]  ;;  %v7292_v27 = vpop.permute.xlu2 %7291 }
 0xaa0   : > { %v7498_v20 = vmul.f32 %v7370_v22, %v17500_v39  ;;  %v7499_v44 = vmul.f32 %v7371_v57, %v17500_v39  ;;  %v7500_v30 = vmul.f32 %v7372_v60, %v17500_v39  ;;  %v7501_v29 = vmul.f32 %v7373_v21, %v17500_v39  ;;  %v7034_v60 = vld [vmem:[#allocation6 + $0x2e8] sm:$0xff] }
 0xaa1   : > { %v7873_v16 = vadd.f32 %v7872_v23, %v17596_v49  ;;  %v7910_v11 = vadd.f32 %v7909_v5, %v17600_v55  ;;  %v7947_v45 = vadd.f32 %v7946_v40, %v17604_v53  ;;  %v7984_v58 = vadd.f32 %v7983_v47, %v17608_v62 }
 0xaa2   : > { %v7626_v10 = vadd.f32 %v7498_v20, %v6890_v13  ;;  %v7627_v14 = vadd.f32 %v7499_v44, %v6891_v63  ;;  %v7628_v1 = vadd.f32 %v7500_v30, %v6892_v17  ;;  %v7629_v8 = vadd.f32 %v7501_v29, %v6893_v28  ;;  %v6816_v13 = vld [vmem:[#allocation2 + $0xd0] sm:$0xff]  ;;  %v6817_v63 = vld [vmem:[#allocation2 + $0xd8] sm:$0xff]  ;;  %v7036_v44 = vld [vmem:[#allocation6 + $0x260] sm:$0xff] }
 0xaa3   : > { %v6946_v43 = vunpack.c.l.bf16 %v6836_v0  ;;  %v6947_v32 = vunpack.c.h.bf16 %v6836_v0  ;;  %v6948_v12 = vunpack.c.l.bf16 %v6837_v38  ;;  %v6949_v19 = vunpack.c.h.bf16 %v6837_v38  ;;  %v7035_v20 = vld [vmem:[#allocation6 + $0xf0] sm:$0xff]  ;;  %v7037_v30 = vld [vmem:[#allocation6 + $0x18] sm:$0xff] }
 0xaa4   : > { %v17874_v49 = vmax.f32 %v7730_v9, %v7626_v10  ;;  %v17876_v55 = vmax.f32 %v7767_v7, %v7627_v14  ;;  %v17878_v53 = vmax.f32 %v7804_v15, %v7628_v1  ;;  %v17880_v62 = vmax.f32 %v7841_v6, %v7629_v8  ;;  %v7242_v6 = vpop.permute.xlu1 %7241 }
 0xaa5   : > { %v7874_v23 = vadd.f32 %v7873_v16, %v7626_v10  ;;  %v7911_v5 = vadd.f32 %v7910_v11, %v7627_v14  ;;  %v7948_v40 = vadd.f32 %v7947_v45, %v7628_v1  ;;  %v7985_v47 = vadd.f32 %v7984_v58, %v7629_v8  ;;  %v6814_v14 = vld [vmem:[#allocation2 + $0xc0] sm:$0xff]  ;;  %v6815_v1 = vld [vmem:[#allocation2 + $0xc8] sm:$0xff] }
 0xaa6   : > { %v7426_v56 = vmul.f32 %v7292_v27, %v7074_v33  ;;  %v7427_v4 = vmul.f32 %v7292_v27, %v7075_v52  ;;  %v7428_v34 = vmul.f32 %v7292_v27, %v7076_v26  ;;  %v7429_v36 = vmul.f32 %v7292_v27, %v7077_v50  ;;  %v7237_v50 = vpop.permute.xlu0 %7236 }
 0xaa7   : > { %v7875_v17 = vadd.f32 %v7874_v23, %v7630_v48  ;;  %v7912_v28 = vadd.f32 %v7911_v5, %v7631_v24  ;;  %v7949_v22 = vadd.f32 %v7948_v40, %v7632_v25  ;;  %v7986_v57 = vadd.f32 %v7985_v47, %v7633_v2  ;;  %v7032_v23 = vld [vmem:[#allocation6 + $0x1f8] sm:$0xff]  ;;  %v7033_v5 = vld [vmem:[#allocation6 + $0x190] sm:$0xff] }
 0xaa8   : > { %v7554_v21 = vmul.f32 %v7426_v56, %v17500_v39  ;;  %v7555_v9 = vmul.f32 %v7427_v4, %v17500_v39  ;;  %v7556_v7 = vmul.f32 %v7428_v34, %v17500_v39  ;;  %v7557_v15 = vmul.f32 %v7429_v36, %v17500_v39 }
 0xaa9   : > { %v6906_v29 = vunpack.c.l.bf16 %v6816_v13  ;;  %v6907_v0 = vunpack.c.h.bf16 %v6816_v13  ;;  %v6908_v38 = vunpack.c.l.bf16 %v6817_v63  ;;  %v6909_v48 = vunpack.c.h.bf16 %v6817_v63 }
 0xaaa   : > { %v17886_v24 = vadd.f32 %v7554_v21, %v6946_v43  ;;  %v17888_v25 = vadd.f32 %v7555_v9, %v6947_v32  ;;  %v17890_v2 = vadd.f32 %v7556_v7, %v6948_v12  ;;  %v17892_v16 = vadd.f32 %v7557_v15, %v6949_v19  ;;  %v7030_v32 = vld [vmem:[#allocation6 + $0x60] sm:$0xff] }
 0xaab   : > { %v7386_v11 = vmul.f32 %v7242_v6, %v7034_v60  ;;  %v7387_v45 = vmul.f32 %v7242_v6, %v7035_v20  ;;  %v7388_v58 = vmul.f32 %v7242_v6, %v7036_v44  ;;  %v7389_v10 = vmul.f32 %v7242_v6, %v7037_v30 }
 0xaac   : > { %v7732_v8 = vmax.f32 %v17874_v49, %v17886_v24  ;;  %v7769_v33 = vmax.f32 %v17876_v55, %v17888_v25  ;;  %v7806_v27 = vmax.f32 %v17878_v53, %v17890_v2  ;;  %v7843_v43 = vmax.f32 %v17880_v62, %v17892_v16  ;;  %v7031_v49 = vld [vmem:[#allocation6 + $0x308] sm:$0xff] }
 0xaad   : > { %v7514_v12 = vmul.f32 %v7386_v11, %v17500_v39  ;;  %v7515_v19 = vmul.f32 %v7387_v45, %v17500_v39  ;;  %v7516_v52 = vmul.f32 %v7388_v58, %v17500_v39  ;;  %v7517_v26 = vmul.f32 %v7389_v10, %v17500_v39 }
 0xaae   : > { %v6902_v55 = vunpack.c.l.bf16 %v6814_v14  ;;  %v6903_v40 = vunpack.c.h.bf16 %v6814_v14  ;;  %v6904_v47 = vunpack.c.l.bf16 %v6815_v1  ;;  %v6905_v53 = vunpack.c.h.bf16 %v6815_v1 }
 0xaaf   : > { %v7642_v56 = vadd.f32 %v7514_v12, %v6906_v29  ;;  %v7643_v4 = vadd.f32 %v7515_v19, %v6907_v0  ;;  %v7644_v62 = vadd.f32 %v7516_v52, %v6908_v38  ;;  %v7645_v34 = vadd.f32 %v7517_v26, %v6909_v48  ;;  %v6842_v29 = vld [vmem:[#allocation2 + $0x1a0] sm:$0xff]  ;;  %v6843_v0 = vld [vmem:[#allocation2 + $0x1a8] sm:$0xff]  ;;  %v7087_v19 = vld [vmem:[#allocation6 + $0x1f0] sm:$0xff] }
 0xab0   : > { %v7382_v36 = vmul.f32 %v7237_v50, %v7030_v32  ;;  %v7383_v13 = vmul.f32 %v7237_v50, %v7031_v49  ;;  %v7384_v63 = vmul.f32 %v7237_v50, %v7032_v23  ;;  %v7385_v60 = vmul.f32 %v7237_v50, %v7033_v5  ;;  %v7088_v52 = vld [vmem:[#allocation6 + $0x40] sm:$0xff]  ;;  %v7089_v26 = vld [vmem:[#allocation6 + $0x368] sm:$0xff] }
 0xab1   : > { %v17906_v21 = vmax.f32 %v7732_v8, %v7642_v56  ;;  %v17908_v9 = vmax.f32 %v7769_v33, %v7643_v4  ;;  %v17910_v7 = vmax.f32 %v7806_v27, %v7644_v62  ;;  %v17912_v15 = vmax.f32 %v7843_v43, %v7645_v34  ;;  %v7086_v8 = vld [vmem:[#allocation6 + $0x118] sm:$0xff]  ;;  %v7307_v33 = vpop.permute.xlu2 %7306 }
 0xab2   : > { %v7510_v6 = vmul.f32 %v7382_v36, %v17500_v39  ;;  %v7511_v20 = vmul.f32 %v7383_v13, %v17500_v39  ;;  %v7512_v44 = vmul.f32 %v7384_v63, %v17500_v39  ;;  %v7513_v30 = vmul.f32 %v7385_v60, %v17500_v39  ;;  %v7046_v63 = vld [vmem:[#allocation6 + $0x1d0] sm:$0xff] }
 0xab3   : > { %v7876_v38 = vadd.f32 %v7875_v17, %v17640_v59  ;;  %v7913_v48 = vadd.f32 %v7912_v28, %v17644_v35  ;;  %v7950_v11 = vadd.f32 %v7949_v22, %v17648_v3  ;;  %v7987_v45 = vadd.f32 %v7986_v57, %v17652_v37 }
 0xab4   : > { %v7638_v58 = vadd.f32 %v7510_v6, %v6902_v55  ;;  %v7639_v10 = vadd.f32 %v7511_v20, %v6903_v40  ;;  %v7640_v14 = vadd.f32 %v7512_v44, %v6904_v47  ;;  %v7641_v1 = vadd.f32 %v7513_v30, %v6905_v53  ;;  %v6822_v55 = vld [vmem:[#allocation2 + $0x100] sm:$0xff]  ;;  %v6823_v40 = vld [vmem:[#allocation2 + $0x108] sm:$0xff]  ;;  %v7047_v6 = vld [vmem:[#allocation6 + $0x78] sm:$0xff] }
 0xab5   : > { %v6958_v27 = vunpack.c.l.bf16 %v6842_v29  ;;  %v6959_v43 = vunpack.c.h.bf16 %v6842_v29  ;;  %v6960_v32 = vunpack.c.l.bf16 %v6843_v0  ;;  %v6961_v12 = vunpack.c.h.bf16 %v6843_v0  ;;  %v7048_v20 = vld [vmem:[#allocation6 + $0x380] sm:$0xff] }
 0xab6   : > { %v7734_v59 = vmax.f32 %v17906_v21, %v7638_v58  ;;  %v7771_v35 = vmax.f32 %v17908_v9, %v7639_v10  ;;  %v7808_v3 = vmax.f32 %v17910_v7, %v7640_v14  ;;  %v7845_v37 = vmax.f32 %v17912_v15, %v7641_v1  ;;  %v7257_v15 = vpop.permute.xlu1 %7256  ;;  %v7049_v44 = vld [vmem:[#allocation6 + $0x180] sm:$0xff] }
 0xab7   : > { %v7877_v17 = vadd.f32 %v7876_v38, %v7638_v58  ;;  %v7914_v28 = vadd.f32 %v7913_v48, %v7639_v10  ;;  %v7951_v22 = vadd.f32 %v7950_v11, %v7640_v14  ;;  %v7988_v57 = vadd.f32 %v7987_v45, %v7641_v1  ;;  %v6820_v10 = vld [vmem:[#allocation2 + $0xf0] sm:$0xff]  ;;  %v6821_v14 = vld [vmem:[#allocation2 + $0xf8] sm:$0xff] }
 0xab8   : > { %v7438_v50 = vmul.f32 %v7307_v33, %v7086_v8  ;;  %v7439_v49 = vmul.f32 %v7307_v33, %v7087_v19  ;;  %v7440_v23 = vmul.f32 %v7307_v33, %v7088_v52  ;;  %v7441_v5 = vmul.f32 %v7307_v33, %v7089_v26  ;;  %v7252_v26 = vpop.permute.xlu0 %7251 }
 0xab9   : > { %v7878_v47 = vadd.f32 %v7877_v17, %v7642_v56  ;;  %v7915_v53 = vadd.f32 %v7914_v28, %v7643_v4  ;;  %v7952_v36 = vadd.f32 %v7951_v22, %v7644_v62  ;;  %v7989_v13 = vadd.f32 %v7988_v57, %v7645_v34  ;;  %v7043_v17 = vld [vmem:[#allocation6 + $0x248] sm:$0xff]  ;;  %v7044_v28 = vld [vmem:[#allocation6 + $0x120] sm:$0xff] }
 0xaba   : > { %v7566_v60 = vmul.f32 %v7438_v50, %v17500_v39  ;;  %v7567_v21 = vmul.f32 %v7439_v49, %v17500_v39  ;;  %v7568_v9 = vmul.f32 %v7440_v23, %v17500_v39  ;;  %v7569_v7 = vmul.f32 %v7441_v5, %v17500_v39  ;;  %v7045_v22 = vld [vmem:[#allocation6 + $0x100] sm:$0xff] }
 0xabb   : > { %v6918_v30 = vunpack.c.l.bf16 %v6822_v55  ;;  %v6919_v29 = vunpack.c.h.bf16 %v6822_v55  ;;  %v6920_v0 = vunpack.c.l.bf16 %v6823_v40  ;;  %v6921_v56 = vunpack.c.h.bf16 %v6823_v40 }
 0xabc   : > { %v17930_v4 = vadd.f32 %v7566_v60, %v6958_v27  ;;  %v17932_v62 = vadd.f32 %v7567_v21, %v6959_v43  ;;  %v17934_v34 = vadd.f32 %v7568_v9, %v6960_v32  ;;  %v17936_v38 = vadd.f32 %v7569_v7, %v6961_v12  ;;  %v7042_v43 = vld [vmem:[#allocation6 + $0x70] sm:$0xff] }
 0xabd   : > { %v7398_v48 = vmul.f32 %v7257_v15, %v7046_v63  ;;  %v7399_v11 = vmul.f32 %v7257_v15, %v7047_v6  ;;  %v7400_v45 = vmul.f32 %v7257_v15, %v7048_v20  ;;  %v7401_v58 = vmul.f32 %v7257_v15, %v7049_v44 }
 0xabe   : > { %v7735_v1 = vmax.f32 %v7734_v59, %v17930_v4  ;;  %v7772_v8 = vmax.f32 %v7771_v35, %v17932_v62  ;;  %v7809_v33 = vmax.f32 %v7808_v3, %v17934_v34  ;;  %v7846_v27 = vmax.f32 %v7845_v37, %v17936_v38 }
 0xabf   : > { %v7526_v32 = vmul.f32 %v7398_v48, %v17500_v39  ;;  %v7527_v12 = vmul.f32 %v7399_v11, %v17500_v39  ;;  %v7528_v19 = vmul.f32 %v7400_v45, %v17500_v39  ;;  %v7529_v52 = vmul.f32 %v7401_v58, %v17500_v39  ;;  %v20563_v48 = vld [vmem:[#allocation74_spill] sm:$0xff]  ;;  %v20564_v45 = vld [vmem:[#allocation75_spill] sm:$0xff] }
 0xac0   : > { %v6914_v59 = vunpack.c.l.bf16 %v6820_v10  ;;  %v6915_v57 = vunpack.c.h.bf16 %v6820_v10  ;;  %v6916_v35 = vunpack.c.l.bf16 %v6821_v14  ;;  %v6917_v50 = vunpack.c.h.bf16 %v6821_v14  ;;  %v20565_v10 = vld [vmem:[#allocation76_spill] sm:$0xff] }
 0xac1   : > { %v7654_v3 = vadd.f32 %v7526_v32, %v6918_v30  ;;  %v7655_v49 = vadd.f32 %v7527_v12, %v6919_v29  ;;  %v7656_v37 = vadd.f32 %v7528_v19, %v6920_v0  ;;  %v7657_v23 = vadd.f32 %v7529_v52, %v6921_v56  ;;  %v6848_v30 = vld [vmem:[#allocation2 + $0x1d0] sm:$0xff]  ;;  %v6849_v29 = vld [vmem:[#allocation2 + $0x1d8] sm:$0xff]  ;;  %v7322_v32 = vpop.permute.xlu2 %7321 }
 0xac2   : > { %v7394_v5 = vmul.f32 %v7252_v26, %v7042_v43  ;;  %v7395_v55 = vmul.f32 %v7252_v26, %v7043_v17  ;;  %v7396_v40 = vmul.f32 %v7252_v26, %v7044_v28  ;;  %v7397_v63 = vmul.f32 %v7252_v26, %v7045_v22  ;;  %v20562_v0 = vld [vmem:[#allocation73_spill] sm:$0xff]  ;;  %v7099_v17 = vld [vmem:[#allocation6 + $0xe0] sm:$0xff] }
 0xac3   : > { %v7736_v60 = vmax.f32 %v7735_v1, %v7654_v3  ;;  %v7773_v21 = vmax.f32 %v7772_v8, %v7655_v49  ;;  %v7810_v9 = vmax.f32 %v7809_v33, %v7656_v37  ;;  %v7847_v7 = vmax.f32 %v7846_v27, %v7657_v23  ;;  %v7098_v43 = vld [vmem:[#allocation6 + $0x1e8] sm:$0xff]  ;;  %v7100_v28 = vld [vmem:[#allocation6 + $0x2f0] sm:$0xff] }
 0xac4   : > { %v7522_v15 = vmul.f32 %v7394_v5, %v17500_v39  ;;  %v7523_v6 = vmul.f32 %v7395_v55, %v17500_v39  ;;  %v7524_v20 = vmul.f32 %v7396_v40, %v17500_v39  ;;  %v7525_v44 = vmul.f32 %v7397_v63, %v17500_v39  ;;  %v7101_v22 = vld [vmem:[#allocation6 + $0xd0] sm:$0xff] }
 0xac5   : > { %v7879_v56 = vadd.f32 %v7878_v47, %v20562_v0  ;;  %v7916_v11 = vadd.f32 %v7915_v53, %v20563_v48  ;;  %v7953_v58 = vadd.f32 %v7952_v36, %v20564_v45  ;;  %v7990_v14 = vadd.f32 %v7989_v13, %v20565_v10  ;;  %v7059_v48 = vld [vmem:[#allocation6 + $0x2e0] sm:$0xff] }
 0xac6   : > { %v7650_v1 = vadd.f32 %v7522_v15, %v6914_v59  ;;  %v7651_v8 = vadd.f32 %v7523_v6, %v6915_v57  ;;  %v7652_v33 = vadd.f32 %v7524_v20, %v6916_v35  ;;  %v7653_v27 = vadd.f32 %v7525_v44, %v6917_v50  ;;  %v6828_v15 = vld [vmem:[#allocation2 + $0x130] sm:$0xff]  ;;  %v6829_v6 = vld [vmem:[#allocation2 + $0x138] sm:$0xff] }
 0xac7   : > { %v6970_v12 = vunpack.c.l.bf16 %v6848_v30  ;;  %v6971_v19 = vunpack.c.h.bf16 %v6848_v30  ;;  %v6972_v52 = vunpack.c.l.bf16 %v6849_v29  ;;  %v6973_v26 = vunpack.c.h.bf16 %v6849_v29 }
 0xac8   : > { %v17954_v47 = vmax.f32 %v7736_v60, %v7650_v1  ;;  %v17956_v53 = vmax.f32 %v7773_v21, %v7651_v8  ;;  %v17958_v36 = vmax.f32 %v7810_v9, %v7652_v33  ;;  %v17960_v13 = vmax.f32 %v7847_v7, %v7653_v27  ;;  %v7058_v7 = vld [vmem:[#allocation6 + $0x1c0] sm:$0xff] }
 0xac9   : > { %v7880_v59 = vadd.f32 %v7879_v56, %v7650_v1  ;;  %v7917_v57 = vadd.f32 %v7916_v11, %v7651_v8  ;;  %v7954_v35 = vadd.f32 %v7953_v58, %v7652_v33  ;;  %v7991_v50 = vadd.f32 %v7990_v14, %v7653_v27  ;;  %v7272_v56 = vpop.permute.xlu1 %7271  ;;  %v7060_v11 = vld [vmem:[#allocation6 + $0x338] sm:$0xff] }
 0xaca   : > { %v7450_v5 = vmul.f32 %v7322_v32, %v7098_v43  ;;  %v7451_v55 = vmul.f32 %v7322_v32, %v7099_v17  ;;  %v7452_v40 = vmul.f32 %v7322_v32, %v7100_v28  ;;  %v7453_v63 = vmul.f32 %v7322_v32, %v7101_v22  ;;  %v6826_v32 = vld [vmem:[#allocation2 + $0x120] sm:$0xff]  ;;  %v6827_v17 = vld [vmem:[#allocation2 + $0x128] sm:$0xff] }
 0xacb   : > { %v17962_v20 = vadd.f32 %v7880_v59, %v7654_v3  ;;  %v17964_v60 = vadd.f32 %v7917_v57, %v7655_v49  ;;  %v17966_v21 = vadd.f32 %v7954_v35, %v7656_v37  ;;  %v17968_v9 = vadd.f32 %v7991_v50, %v7657_v23  ;;  %v7061_v3 = vld [vmem:[#allocation6 + $0x330] sm:$0xff]  ;;  %v7267_v50 = vpop.permute.xlu0 %7266 }
 0xacc   : > { %v7578_v44 = vmul.f32 %v7450_v5, %v17500_v39  ;;  %v7579_v30 = vmul.f32 %v7451_v55, %v17500_v39  ;;  %v7580_v29 = vmul.f32 %v7452_v40, %v17500_v39  ;;  %v7581_v0 = vmul.f32 %v7453_v63, %v17500_v39  ;;  %v7056_v5 = vld [vmem:[#allocation6 + $0x208] sm:$0xff]  ;;  %v7057_v55 = vld [vmem:[#allocation6 + $0x130] sm:$0xff] }
 0xacd   : > { %v6930_v45 = vunpack.c.l.bf16 %v6828_v15  ;;  %v6931_v49 = vunpack.c.h.bf16 %v6828_v15  ;;  %v6932_v58 = vunpack.c.l.bf16 %v6829_v6  ;;  %v6933_v37 = vunpack.c.h.bf16 %v6829_v6 }
 0xace   : > { %v17974_v10 = vadd.f32 %v7578_v44, %v6970_v12  ;;  %v17976_v23 = vadd.f32 %v7579_v30, %v6971_v19  ;;  %v17978_v14 = vadd.f32 %v7580_v29, %v6972_v52  ;;  %v17980_v1 = vadd.f32 %v7581_v0, %v6973_v26  ;;  %v7054_v52 = vld [vmem:[#allocation6 + $0x8] sm:$0xff] }
 0xacf   : > { %v7410_v8 = vmul.f32 %v7272_v56, %v7058_v7  ;;  %v7411_v33 = vmul.f32 %v7272_v56, %v7059_v48  ;;  %v7412_v27 = vmul.f32 %v7272_v56, %v7060_v11  ;;  %v7413_v43 = vmul.f32 %v7272_v56, %v7061_v3  ;;  %v11669_v56 = vld [vmem:[%s20100_s8 + $0x4e0] sm:$0xf]  ;;  %v13109_v48 = vld [vmem:[%s20100_s8 + $0x4ec] sm:$0xf0] }
 0xad0   : > { %v7738_v28 = vmax.f32 %v17954_v47, %v17974_v10  ;;  %v7775_v22 = vmax.f32 %v17956_v53, %v17976_v23  ;;  %v7812_v12 = vmax.f32 %v17958_v36, %v17978_v14  ;;  %v7849_v19 = vmax.f32 %v17960_v13, %v17980_v1  ;;  %v7055_v47 = vld [vmem:[#allocation6 + $0x2b8] sm:$0xff] }
 0xad1   : > { %v7538_v26 = vmul.f32 %v7410_v8, %v17500_v39  ;;  %v7539_v59 = vmul.f32 %v7411_v33, %v17500_v39  ;;  %v7540_v57 = vmul.f32 %v7412_v27, %v17500_v39  ;;  %v7541_v35 = vmul.f32 %v7413_v43, %v17500_v39  ;;  %v11925_v8 = vld [vmem:[%s20100_s8 + $0x6e0] sm:$0xf] }
 0xad2   : > { %v6926_v53 = vunpack.c.l.bf16 %v6826_v32  ;;  %v6927_v40 = vunpack.c.h.bf16 %v6826_v32  ;;  %v6928_v63 = vunpack.c.l.bf16 %v6827_v17  ;;  %v6929_v36 = vunpack.c.h.bf16 %v6827_v17  ;;  %v13173_v17 = vld [vmem:[%s20100_s8 + $0x6ec] sm:$0xf0] }
 0xad3   : > { %v17994_v15 = vadd.f32 %v7538_v26, %v6930_v45  ;;  %v17996_v13 = vadd.f32 %v7539_v59, %v6931_v49  ;;  %v17998_v6 = vadd.f32 %v7540_v57, %v6932_v58  ;;  %v18000_v7 = vadd.f32 %v7541_v35, %v6933_v37  ;;  %v11797_v58 = vld [vmem:[%s20100_s8 + $0x5e0] sm:$0xf]  ;;  %v13141_v37 = vld [vmem:[%s20100_s8 + $0x5ec] sm:$0xf0] }
 0xad4   : > { %v7406_v44 = vmul.f32 %v7267_v50, %v7054_v52  ;;  %v7407_v30 = vmul.f32 %v7267_v50, %v7055_v47  ;;  %v7408_v29 = vmul.f32 %v7267_v50, %v7056_v5  ;;  %v7409_v0 = vmul.f32 %v7267_v50, %v7057_v55  ;;  %v11653_v59 = vld [vmem:[%s20100_s8 + $0x4c0] sm:$0xf]  ;;  %v13169_v5 = vld [vmem:[%s20100_s8 + $0x6cc] sm:$0xf0]  ;;  %v6834_v55 = vld [vmem:[#allocation2 + $0x160] sm:$0xff] }
 0xad5   : > { %v18009_v11 = vmax.f32 %v7738_v28, %v17994_v15  ;;  %v18012_v3 = vmax.f32 %v7775_v22, %v17996_v13  ;;  %v18015_v45 = vmax.f32 %v7812_v12, %v17998_v6  ;;  %v18018_v49 = vmax.f32 %v7849_v19, %v18000_v7  ;;  %v12053_v28 = vld [vmem:[%s20100_s8 + $0x7e0] sm:$0xf]  ;;  %v13205_v22 = vld [vmem:[%s20100_s8 + $0x7ec] sm:$0xf0] }
 0xad6   : > { %v7534_v33 = vmul.f32 %v7406_v44, %v17500_v39  ;;  %v7535_v27 = vmul.f32 %v7407_v30, %v17500_v39  ;;  %v7536_v43 = vmul.f32 %v7408_v29, %v17500_v39  ;;  %v7537_v32 = vmul.f32 %v7409_v0, %v17500_v39  ;;  %v11909_v47 = vld [vmem:[%s20100_s8 + $0x6c0] sm:$0xf] }
 0xad7   : > { %v7882_v12 = vadd.f32 %v17962_v20, %v17772_v42  ;;  %v7919_v19 = vadd.f32 %v17964_v60, %v17776_v54  ;;  %v7956_v52 = vadd.f32 %v17966_v21, %v17780_v46  ;;  %v7993_v26 = vadd.f32 %v17968_v9, %v17784_v61  ;;  %v13105_v54 = vld [vmem:[%s20100_s8 + $0x4cc] sm:$0xf0]  ;;  %v11781_v46 = vld [vmem:[%s20100_s8 + $0x5c0] sm:$0xf] }
 0xad8   : > { %v18053_v57 = vadd.f32 %v7534_v33, %v6926_v53  ;;  %v18055_v35 = vadd.f32 %v7535_v27, %v6927_v40  ;;  %v18057_v50 = vadd.f32 %v7536_v43, %v6928_v63  ;;  %v18059_v42 = vadd.f32 %v7537_v32, %v6929_v36  ;;  %v13137_v61 = vld [vmem:[%s20100_s8 + $0x5cc] sm:$0xf0]  ;;  %v12037_v44 = vld [vmem:[%s20100_s8 + $0x7c0] sm:$0xf]  ;;  %v7287_v43 = vpop.permute.xlu1 %7286 }
 0xad9   : > { %v11670_v20 = vor.u32 %v13109_v48, %v11669_v56  ;;  %v11798_v60 = vor.u32 %v13141_v37, %v11797_v58  ;;  %v11926_v21 = vor.u32 %v13173_v17, %v11925_v8  ;;  %v12054_v9 = vor.u32 %v13205_v22, %v12053_v28  ;;  %v13201_v48 = vld [vmem:[%s20100_s8 + $0x7cc] sm:$0xf0]  ;;  %v7070_v37 = vld [vmem:[#allocation6 + $0x58] sm:$0xff]  ;;  %v7072_v28 = vld [vmem:[#allocation6 + $0x1e0] sm:$0xff] }
 0xada   : > { %v7740_v53 = vmax.f32 %v18009_v11, %v18053_v57  ;;  %v7777_v40 = vmax.f32 %v18012_v3, %v18055_v35  ;;  %v7883_v30 = vadd.f32 %v7882_v12, %v18053_v57  ;;  %v7920_v29 = vadd.f32 %v7919_v19, %v18055_v35  ;;  %v6835_v58 = vld [vmem:[#allocation2 + $0x168] sm:$0xff]  ;;  %v7071_v17 = vld [vmem:[#allocation6 + $0x98] sm:$0xff]  ;;  %v7073_v22 = vld [vmem:[#allocation6 + $0x3c0] sm:$0xff] }
 0xadb   : > { %v7957_v0 = vadd.f32 %v7956_v52, %v18057_v50  ;;  %v7994_v56 = vadd.f32 %v7993_v26, %v18059_v42  ;;  %8929 = vmatpush.bf16.msra.mxu0 %v11670_v20  ;;  %8942 = vmatpush.bf16.msra.mxu1 %v11798_v60  ;;  %v11654_v8 = vor.u32 %v13105_v54, %v11653_v59  ;;  %v6942_v32 = vunpack.c.l.bf16 %v6834_v55  ;;  %v6832_v20 = vld [vmem:[#allocation2 + $0x150] sm:$0xff]  ;;  %v6833_v60 = vld [vmem:[#allocation2 + $0x158] sm:$0xff]  ;;  %v13101_v3 = vld [vmem:[%s20100_s8 + $0x4ac] sm:$0xf0] }
 0xadc   : > { %8955 = vmatpush.bf16.msra.mxu2 %v11926_v21  ;;  %v11782_v33 = vor.u32 %v13137_v61, %v11781_v46  ;;  %v11910_v27 = vor.u32 %v13169_v5, %v11909_v47  ;;  %v7884_v12 = vadd.f32 %v7883_v30, %v17994_v15  ;;  %v7921_v19 = vadd.f32 %v7920_v29, %v17996_v13  ;;  %v7066_v61 = vld [vmem:[#allocation6 + $0x250] sm:$0xff]  ;;  %v7282_v15 = vpop.permute.xlu0 %7281  ;;  %v7068_v13 = vld [vmem:[#allocation6 + $0x228] sm:$0xff]  ;;  %v11637_v11 = vld [vmem:[%s20100_s8 + $0x4a0] sm:$0xf] }
 0xadd   : > { %v7958_v52 = vadd.f32 %v7957_v0, %v17998_v6  ;;  %v7995_v26 = vadd.f32 %v7994_v56, %v18000_v7  ;;  %8968 = vmatpush.bf16.msra.mxu3 %v12054_v9  ;;  %v12038_v21 = vor.u32 %v13201_v48, %v12037_v44  ;;  %v6943_v59 = vunpack.c.h.bf16 %v6834_v55  ;;  %v7067_v30 = vld [vmem:[#allocation6 + $0xb0] sm:$0xff]  ;;  %v7069_v29 = vld [vmem:[#allocation6 + $0x88] sm:$0xff]  ;;  %v11765_v57 = vld [vmem:[%s20100_s8 + $0x5a0] sm:$0xf] }
 0xade   : > { %v6944_v54 = vunpack.c.l.bf16 %v6835_v58  ;;  %v6945_v46 = vunpack.c.h.bf16 %v6835_v58  ;;  %v7422_v47 = vmul.f32 %v7287_v43, %v7070_v37  ;;  %v7423_v5 = vmul.f32 %v7287_v43, %v7071_v17 }
 0xadf   : > { %8930 = vmatpush.bf16.msra.mxu0 %v11654_v8  ;;  %v7424_v36 = vmul.f32 %v7287_v43, %v7072_v28  ;;  %v7425_v63 = vmul.f32 %v7287_v43, %v7073_v22  ;;  %8943 = vmatpush.bf16.msra.mxu1 %v11782_v33  ;;  %v6938_v6 = vunpack.c.l.bf16 %v6832_v20  ;;  %v6939_v7 = vunpack.c.h.bf16 %v6832_v20 }
 0xae0   : > { %8956 = vmatpush.bf16.msra.mxu2 %v11910_v27  ;;  %v6940_v9 = vunpack.c.l.bf16 %v6833_v60  ;;  %v6941_v0 = vunpack.c.h.bf16 %v6833_v60  ;;  %v7550_v55 = vmul.f32 %v7422_v47, %v17500_v39  ;;  %v7551_v44 = vmul.f32 %v7423_v5, %v17500_v39 }
 0xae1   : > { %8969 = vmatpush.bf16.msra.mxu3 %v12038_v21  ;;  %v7552_v56 = vmul.f32 %v7424_v36, %v17500_v39  ;;  %v7553_v48 = vmul.f32 %v7425_v63, %v17500_v39  ;;  %v7418_v58 = vmul.f32 %v7282_v15, %v7066_v61  ;;  %v7419_v37 = vmul.f32 %v7282_v15, %v7067_v30  ;;  %v12021_v61 = vld [vmem:[%s20100_s8 + $0x7a0] sm:$0xf] }
 0xae2   : > { %v7420_v8 = vmul.f32 %v7282_v15, %v7068_v13  ;;  %v7421_v43 = vmul.f32 %v7282_v15, %v7069_v29  ;;  %v7678_v17 = vadd.f32 %v7550_v55, %v6942_v32  ;;  %v7679_v33 = vadd.f32 %v7551_v44, %v6943_v59  ;;  %v13197_v13 = vld [vmem:[%s20100_s8 + $0x7ac] sm:$0xf0]  ;;  %v11621_v29 = vld [vmem:[%s20100_s8 + $0x480] sm:$0xf] }
 0xae3   : > { %v7680_v27 = vadd.f32 %v7552_v56, %v6944_v54  ;;  %v7681_v28 = vadd.f32 %v7553_v48, %v6945_v46  ;;  %v7546_v22 = vmul.f32 %v7418_v58, %v17500_v39  ;;  %v7547_v20 = vmul.f32 %v7419_v37, %v17500_v39  ;;  %v13161_v55 = vld [vmem:[%s20100_s8 + $0x68c] sm:$0xf0]  ;;  %v12005_v44 = vld [vmem:[%s20100_s8 + $0x780] sm:$0xf] }
 0xae4   : > { %v7548_v60 = vmul.f32 %v7420_v8, %v17500_v39  ;;  %v7549_v21 = vmul.f32 %v7421_v43, %v17500_v39  ;;  %v18109_v63 = vmax.f32 %v7740_v53, %v7678_v17  ;;  %v18114_v36 = vmax.f32 %v7777_v40, %v7679_v33  ;;  %v11893_v53 = vld [vmem:[%s20100_s8 + $0x6a0] sm:$0xf]  ;;  %v13165_v40 = vld [vmem:[%s20100_s8 + $0x6ac] sm:$0xf0]  ;;  %v6840_v43 = vld [vmem:[#allocation2 + $0x190] sm:$0xff] }
 0xae5   : > { %v20566_v32 = vmax.f32 %v18015_v45, %v18057_v50  ;;  %v20567_v54 = vmax.f32 %v18018_v49, %v18059_v42  ;;  %v13133_v45 = vld [vmem:[%s20100_s8 + $0x5ac] sm:$0xf0]  ;;  %v18138_v35 = vadd.f32 %v7546_v22, %v6938_v6  ;;  %v18140_v49 = vadd.f32 %v7547_v20, %v6939_v7  ;;  %v6841_v22 = vld [vmem:[#allocation2 + $0x198] sm:$0xff] }
 0xae6   : > { %v18142_v50 = vadd.f32 %v7548_v60, %v6940_v9  ;;  %v18144_v42 = vadd.f32 %v7549_v21, %v6941_v0  ;;  %v7885_v47 = vadd.f32 %v7884_v12, %v17850_v31  ;;  %v7922_v5 = vadd.f32 %v7921_v19, %v17852_v41  ;;  %v13097_v6 = vld [vmem:[%s20100_s8 + $0x48c] sm:$0xf0]  ;;  %v11749_v12 = vld [vmem:[%s20100_s8 + $0x580] sm:$0xf] }
 0xae7   : > { %v18119_v59 = vmax.f32 %v20566_v32, %v7680_v27  ;;  %v18124_v46 = vmax.f32 %v20567_v54, %v7681_v28  ;;  %v7959_v15 = vadd.f32 %v7958_v52, %v17854_v51  ;;  %v7996_v30 = vadd.f32 %v7995_v26, %v17856_v18  ;;  %v13129_v19 = vld [vmem:[%s20100_s8 + $0x58c] sm:$0xf0]  ;;  %v11877_v52 = vld [vmem:[%s20100_s8 + $0x680] sm:$0xf] }
 0xae8   : > { %v7742_v31 = vmax.f32 %v18109_v63, %v18138_v35  ;;  %v7779_v41 = vmax.f32 %v18114_v36, %v18140_v49  ;;  %v7886_v26 = vadd.f32 %v7885_v47, %v18138_v35  ;;  %v7923_v7 = vadd.f32 %v7922_v5, %v18140_v49  ;;  %v13193_v56 = vld [vmem:[%s20100_s8 + $0x78c] sm:$0xf0]  ;;  %v7082_v20 = vld [vmem:[#allocation6 + $0x158] sm:$0xff]  ;;  %v7302_v47 = vpop.permute.xlu1 %7301  ;;  %v7083_v5 = vld [vmem:[#allocation6 + $0x30] sm:$0xff] }
 0xae9   : > { %v7816_v51 = vmax.f32 %v18119_v59, %v18142_v50  ;;  %v7853_v18 = vmax.f32 %v18124_v46, %v18144_v42  ;;  %v7960_v9 = vadd.f32 %v7959_v15, %v18142_v50  ;;  %v7997_v0 = vadd.f32 %v7996_v30, %v18144_v42  ;;  %v7084_v15 = vld [vmem:[#allocation6 + $0x320] sm:$0xff]  ;;  %v7085_v30 = vld [vmem:[#allocation6 + $0x48] sm:$0xff]  ;;  %v11733_v36 = vld [vmem:[%s20100_s8 + $0x560] sm:$0xf] }
 0xaea   : > { %v11638_v48 = vor.u32 %v13101_v3, %v11637_v11  ;;  %v11766_v58 = vor.u32 %v13133_v45, %v11765_v57  ;;  %v11894_v37 = vor.u32 %v13165_v40, %v11893_v53  ;;  %v12022_v8 = vor.u32 %v13197_v13, %v12021_v61  ;;  %v6838_v45 = vld [vmem:[#allocation2 + $0x180] sm:$0xff]  ;;  %v18206_v53 = vld [vmem:[#allocation2 + $0x188] sm:$0xff] }
 0xaeb   : > { %v18198_v60 = vadd.f32 %v7886_v26, %v7678_v17  ;;  %v18200_v21 = vadd.f32 %v7923_v7, %v7679_v33  ;;  %v18202_v32 = vadd.f32 %v7960_v9, %v7680_v27  ;;  %v18204_v54 = vadd.f32 %v7997_v0, %v7681_v28  ;;  %v7297_v7 = vpop.permute.xlu0 %7296  ;;  %v7078_v9 = vld [vmem:[#allocation6 + $0x198] sm:$0xff]  ;;  %v7079_v0 = vld [vmem:[#allocation6 + $0x2b0] sm:$0xff]  ;;  %v13093_v63 = vld [vmem:[%s20100_s8 + $0x46c] sm:$0xf0] }
 0xaec   : > { %8931 = vmatpush.bf16.msra.mxu0 %v11638_v48  ;;  %8944 = vmatpush.bf16.msra.mxu1 %v11766_v58  ;;  %v11622_v11 = vor.u32 %v13097_v6, %v11621_v29  ;;  %v11750_v3 = vor.u32 %v13129_v19, %v11749_v12  ;;  %v11878_v57 = vor.u32 %v13161_v55, %v11877_v52  ;;  %v6954_v33 = vunpack.c.l.bf16 %v6840_v43  ;;  %v18208_v48 = vld [vmem:[#allocation2 + $0x1c0] sm:$0xff]  ;;  %v13157_v46 = vld [vmem:[%s20100_s8 + $0x66c] sm:$0xf0] }
 0xaed   : > { %8957 = vmatpush.bf16.msra.mxu2 %v11894_v37  ;;  %8970 = vmatpush.bf16.msra.mxu3 %v12022_v8  ;;  %v12006_v17 = vor.u32 %v13193_v56, %v12005_v44  ;;  %v6955_v27 = vunpack.c.h.bf16 %v6840_v43  ;;  %v6956_v40 = vunpack.c.l.bf16 %v6841_v22  ;;  %v7434_v28 = vmul.f32 %v7302_v47, %v7082_v20  ;;  %v7080_v52 = vld [vmem:[#allocation6 + $0x3a0] sm:$0xff]  ;;  %v7081_v37 = vld [vmem:[#allocation6 + $0x1b8] sm:$0xff] }
 0xaee   : > { %v7435_v61 = vmul.f32 %v7302_v47, %v7083_v5  ;;  %v7436_v13 = vmul.f32 %v7302_v47, %v7084_v15  ;;  %v7437_v26 = vmul.f32 %v7302_v47, %v7085_v30  ;;  %v6957_v29 = vunpack.c.h.bf16 %v6841_v22 }
 0xaef   : > { %v6950_v6 = vunpack.c.l.bf16 %v6838_v45  ;;  %v6951_v12 = vunpack.c.h.bf16 %v6838_v45  ;;  %v6952_v19 = vunpack.c.l.bf16 %v18206_v53  ;;  %v7562_v55 = vmul.f32 %v7434_v28, %v17500_v39 }
 0xaf0   : > { %8932 = vmatpush.bf16.msra.mxu0 %v11622_v11  ;;  %8945 = vmatpush.bf16.msra.mxu1 %v11750_v3  ;;  %v7563_v44 = vmul.f32 %v7435_v61, %v17500_v39  ;;  %v7564_v56 = vmul.f32 %v7436_v13, %v17500_v39  ;;  %v6953_v58 = vunpack.c.h.bf16 %v18206_v53  ;;  %v7565_v8 = vmul.f32 %v7437_v26, %v17500_v39  ;;  %v11989_v61 = vld [vmem:[%s20100_s8 + $0x760] sm:$0xf]  ;;  %v13189_v13 = vld [vmem:[%s20100_s8 + $0x76c] sm:$0xf0] }
 0xaf1   : > { %8958 = vmatpush.bf16.msra.mxu2 %v11878_v57  ;;  %8971 = vmatpush.bf16.msra.mxu3 %v12006_v17  ;;  %v7430_v43 = vmul.f32 %v7297_v7, %v7078_v9  ;;  %v7431_v22 = vmul.f32 %v7297_v7, %v7079_v0  ;;  %v6966_v20 = vunpack.c.l.bf16 %v18208_v48  ;;  %v7690_v47 = vadd.f32 %v7562_v55, %v6954_v33  ;;  %v11589_v26 = vld [vmem:[%s20100_s8 + $0x440] sm:$0xf] }
 0xaf2   : > { %v7691_v5 = vadd.f32 %v7563_v44, %v6955_v27  ;;  %v7692_v15 = vadd.f32 %v7564_v56, %v6956_v40  ;;  %v7432_v30 = vmul.f32 %v7297_v7, %v7080_v52  ;;  %v7693_v11 = vadd.f32 %v7565_v8, %v6957_v29  ;;  %v11605_v27 = vld [vmem:[%s20100_s8 + $0x460] sm:$0xf]  ;;  %v13185_v56 = vld [vmem:[%s20100_s8 + $0x74c] sm:$0xf0] }
 0xaf3   : > { %v7433_v3 = vmul.f32 %v7297_v7, %v7081_v37  ;;  %v7558_v45 = vmul.f32 %v7430_v43, %v17500_v39  ;;  %v7559_v28 = vmul.f32 %v7431_v22, %v17500_v39  ;;  %v18222_v57 = vmax.f32 %v7742_v31, %v7690_v47  ;;  %v13125_v31 = vld [vmem:[%s20100_s8 + $0x56c] sm:$0xf0]  ;;  %v7094_v37 = vld [vmem:[#allocation6 + $0x2d8] sm:$0xff] }
 0xaf4   : > { %v18227_v53 = vmax.f32 %v7779_v41, %v7691_v5  ;;  %v18232_v17 = vmax.f32 %v7816_v51, %v7692_v15  ;;  %v7560_v33 = vmul.f32 %v7432_v30, %v17500_v39  ;;  %v18247_v59 = vmax.f32 %v7853_v18, %v7693_v11  ;;  %v11861_v41 = vld [vmem:[%s20100_s8 + $0x660] sm:$0xf]  ;;  %v13121_v7 = vld [vmem:[%s20100_s8 + $0x54c] sm:$0xf0] }
 0xaf5   : > { %v7561_v35 = vmul.f32 %v7433_v3, %v17500_v39  ;;  %v18250_v49 = vadd.f32 %v7558_v45, %v6950_v6  ;;  %v18252_v50 = vadd.f32 %v7559_v28, %v6951_v12  ;;  %v7888_v51 = vadd.f32 %v18198_v60, %v17886_v24  ;;  %v13153_v6 = vld [vmem:[%s20100_s8 + $0x64c] sm:$0xf0]  ;;  %v11973_v12 = vld [vmem:[%s20100_s8 + $0x740] sm:$0xf]  ;;  %v7317_v3 = vpop.permute.xlu1 %7316 }
 0xaf6   : > { %v18263_v42 = vadd.f32 %v7560_v33, %v6952_v19  ;;  %v7925_v18 = vadd.f32 %v18200_v21, %v17888_v25  ;;  %v7962_v40 = vadd.f32 %v18202_v32, %v17890_v2  ;;  %v7999_v2 = vadd.f32 %v18204_v54, %v17892_v16  ;;  %v13089_v21 = vld [vmem:[%s20100_s8 + $0x44c] sm:$0xf0]  ;;  %v11717_v32 = vld [vmem:[%s20100_s8 + $0x540] sm:$0xf] }
 0xaf7   : > { %v7744_v24 = vmax.f32 %v18222_v57, %v18250_v49  ;;  %v7781_v25 = vmax.f32 %v18227_v53, %v18252_v50  ;;  %v18284_v60 = vadd.f32 %v7561_v35, %v6953_v58  ;;  %v7889_v0 = vadd.f32 %v7888_v51, %v18250_v49  ;;  %v11845_v54 = vld [vmem:[%s20100_s8 + $0x640] sm:$0xf]  ;;  %v6847_v58 = vld [vmem:[#allocation2 + $0x1c8] sm:$0xff] }
 0xaf8   : > { %v7818_v9 = vmax.f32 %v18232_v17, %v18263_v42  ;;  %v7926_v29 = vadd.f32 %v7925_v18, %v18252_v50  ;;  %v7963_v16 = vadd.f32 %v7962_v40, %v18263_v42  ;;  %v11606_v55 = vor.u32 %v13093_v63, %v11605_v27  ;;  %v7095_v45 = vld [vmem:[#allocation6 + $0x358] sm:$0xff]  ;;  %v7096_v28 = vld [vmem:[#allocation6 + $0x168] sm:$0xff] }
 0xaf9   : > { %v7855_v19 = vmax.f32 %v18247_v59, %v18284_v60  ;;  %v8000_v52 = vadd.f32 %v7999_v2, %v18284_v60  ;;  %v11734_v44 = vor.u32 %v13125_v31, %v11733_v36  ;;  %v18317_v8 = vadd.f32 %v7889_v0, %v7690_v47  ;;  %v7097_v33 = vld [vmem:[#allocation6 + $0xa8] sm:$0xff]  ;;  %v6844_v31 = vld [vmem:[#allocation2 + $0x1b0] sm:$0xff]  ;;  %v6845_v47 = vld [vmem:[#allocation2 + $0x1b8] sm:$0xff] }
 0xafa   : > { %v18319_v43 = vadd.f32 %v7926_v29, %v7691_v5  ;;  %v18321_v22 = vadd.f32 %v7963_v16, %v7692_v15  ;;  %v11862_v30 = vor.u32 %v13157_v46, %v11861_v41  ;;  %8933 = vmatpush.bf16.msra.mxu0 %v11606_v55  ;;  %v11990_v27 = vor.u32 %v13189_v13, %v11989_v61  ;;  %v7090_v0 = vld [vmem:[#allocation6 + $0x318] sm:$0xff]  ;;  %v7092_v16 = vld [vmem:[#allocation6 + $0x1a0] sm:$0xff]  ;;  %v13085_v49 = vld [vmem:[%s20100_s8 + $0x42c] sm:$0xf0] }
 0xafb   : > { %v18323_v35 = vadd.f32 %v8000_v52, %v7693_v11  ;;  %8946 = vmatpush.bf16.msra.mxu1 %v11734_v44  ;;  %v11590_v63 = vor.u32 %v13089_v21, %v11589_v26  ;;  %v6967_v36 = vunpack.c.h.bf16 %v18208_v48  ;;  %v11718_v5 = vor.u32 %v13121_v7, %v11717_v32  ;;  %v7312_v11 = vpop.permute.xlu0 %7311  ;;  %v7091_v29 = vld [vmem:[#allocation6 + $0x3b8] sm:$0xff]  ;;  %v7093_v52 = vld [vmem:[#allocation6 + $0x28] sm:$0xff] }
 0xafc   : > { %8959 = vmatpush.bf16.msra.mxu2 %v11862_v30  ;;  %v11846_v51 = vor.u32 %v13153_v6, %v11845_v54  ;;  %v11974_v15 = vor.u32 %v13185_v56, %v11973_v12  ;;  %v6968_v18 = vunpack.c.l.bf16 %v6847_v58  ;;  %8972 = vmatpush.bf16.msra.mxu3 %v11990_v27  ;;  %v7446_v41 = vmul.f32 %v7317_v3, %v7094_v37  ;;  %v11573_v57 = vld [vmem:[%s20100_s8 + $0x420] sm:$0xf]  ;;  %v13117_v17 = vld [vmem:[%s20100_s8 + $0x52c] sm:$0xf0] }
 0xafd   : > { %v7447_v46 = vmul.f32 %v7317_v3, %v7095_v45  ;;  %v7448_v40 = vmul.f32 %v7317_v3, %v7096_v28  ;;  %v7449_v2 = vmul.f32 %v7317_v3, %v7097_v33  ;;  %v6969_v61 = vunpack.c.h.bf16 %v6847_v58  ;;  %v11701_v53 = vld [vmem:[%s20100_s8 + $0x520] sm:$0xf]  ;;  %v13149_v42 = vld [vmem:[%s20100_s8 + $0x62c] sm:$0xf0] }
 0xafe   : > { %v6962_v13 = vunpack.c.l.bf16 %v6844_v31  ;;  %v6963_v26 = vunpack.c.h.bf16 %v6844_v31  ;;  %v6964_v21 = vunpack.c.l.bf16 %v6845_v47  ;;  %8934 = vmatpush.bf16.msra.mxu0 %v11590_v63  ;;  %v7574_v32 = vmul.f32 %v7446_v41, %v17500_v39  ;;  %v11829_v50 = vld [vmem:[%s20100_s8 + $0x620] sm:$0xf]  ;;  %v18406_v60 = vld [vmem:[%s20100_s8 + $0x40c] sm:$0xf0] }
 0xaff   : > { %8947 = vmatpush.bf16.msra.mxu1 %v11718_v5  ;;  %v7575_v7 = vmul.f32 %v7447_v46, %v17500_v39  ;;  %v7576_v54 = vmul.f32 %v7448_v40, %v17500_v39  ;;  %v6965_v6 = vunpack.c.h.bf16 %v6845_v47  ;;  %v7577_v12 = vmul.f32 %v7449_v2, %v17500_v39  ;;  %v11957_v47 = vld [vmem:[%s20100_s8 + $0x720] sm:$0xf]  ;;  %v13181_v5 = vld [vmem:[%s20100_s8 + $0x72c] sm:$0xf0] }
 0xb00   : > { %8960 = vmatpush.bf16.msra.mxu2 %v11846_v51  ;;  %v7442_v55 = vmul.f32 %v7312_v11, %v7090_v0  ;;  %v7443_v44 = vmul.f32 %v7312_v11, %v7091_v29  ;;  %v7444_v56 = vmul.f32 %v7312_v11, %v7092_v16  ;;  %8973 = vmatpush.bf16.msra.mxu3 %v11974_v15  ;;  %v18401_v59 = vld [vmem:[%s20100_s8 + $0x400] sm:$0xf]  ;;  %v18428_v46 = vld [vmem:[%s20100_s8 + $0x60c] sm:$0xf0]  ;;  %v18449_v29 = vld [vmem:[%s20100_s8 + $0x4e4] sm:$0xf] }
 0xb01   : > { %v18332_v58 = vadd.f32 %v7574_v32, %v6966_v20  ;;  %v18334_v37 = vadd.f32 %v7575_v7, %v6967_v36  ;;  %v18336_v30 = vadd.f32 %v7576_v54, %v6968_v18  ;;  %v7445_v3 = vmul.f32 %v7312_v11, %v7093_v52  ;;  %v18415_v15 = vld [vmem:[%s20100_s8 + $0x500] sm:$0xf]  ;;  %v13113_v18 = vld [vmem:[%s20100_s8 + $0x50c] sm:$0xf0]  ;;  %v18454_v16 = vld [vmem:[%s20100_s8 + $0x4f0] sm:$0xf0] }
 0xb02   : > { %v18338_v45 = vadd.f32 %v7577_v12, %v6969_v61  ;;  %v7570_v28 = vmul.f32 %v7442_v55, %v17500_v39  ;;  %v7571_v33 = vmul.f32 %v7443_v44, %v17500_v39  ;;  %v7572_v27 = vmul.f32 %v7444_v56, %v17500_v39  ;;  %v18423_v41 = vld [vmem:[%s20100_s8 + $0x600] sm:$0xf]  ;;  %v13177_v0 = vld [vmem:[%s20100_s8 + $0x70c] sm:$0xf0]  ;;  %v6852_v52 = vld [vmem:[#allocation2 + $0x1f0] sm:$0xff] }
 0xb03   : > { %v18347_v48 = vmax.f32 %v7744_v24, %v18332_v58  ;;  %v18353_v20 = vmax.f32 %v7781_v25, %v18334_v37  ;;  %v18359_v63 = vmax.f32 %v7818_v9, %v18336_v30  ;;  %v7573_v36 = vmul.f32 %v7445_v3, %v17500_v39  ;;  %v7332_v3 = vpop.permute.xlu1 %7331 }
 0xb04   : > { %v18384_v24 = vmax.f32 %v7855_v19, %v18338_v45  ;;  %v18386_v25 = vadd.f32 %v7570_v28, %v6962_v13  ;;  %v18388_v9 = vadd.f32 %v7571_v33, %v6963_v26  ;;  %v18390_v31 = vadd.f32 %v7572_v27, %v6964_v21  ;;  %v13139_v26 = vld [vmem:[%s20100_s8 + $0x5e4] sm:$0xf]  ;;  %v11799_v21 = vld [vmem:[%s20100_s8 + $0x5f0] sm:$0xf0]  ;;  %v7109_v27 = vld [vmem:[#allocation6 + $0x140] sm:$0xff] }
 0xb05   : > { %v18408_v19 = vadd.f32 %v7573_v36, %v6965_v6  ;;  %v7891_v51 = vadd.f32 %v18317_v8, %v17930_v4  ;;  %v18433_v4 = vld [vmem:[%s20100_s8 + $0x700] sm:$0xf]  ;;  %v7928_v11 = vadd.f32 %v18319_v43, %v17932_v62  ;;  %v7965_v62 = vadd.f32 %v18321_v22, %v17934_v34  ;;  %v13171_v34 = vld [vmem:[%s20100_s8 + $0x6e4] sm:$0xf]  ;;  %v7107_v28 = vld [vmem:[#allocation6 + $0x128] sm:$0xff] }
 0xb06   : > { %v7746_v8 = vmax.f32 %v18347_v48, %v18386_v25  ;;  %v7783_v40 = vmax.f32 %v18353_v20, %v18388_v9  ;;  %v7820_v2 = vmax.f32 %v18359_v63, %v18390_v31  ;;  %v8002_v43 = vadd.f32 %v18323_v35, %v17936_v38  ;;  %v11927_v38 = vld [vmem:[%s20100_s8 + $0x6f0] sm:$0xf0]  ;;  %v6853_v22 = vld [vmem:[#allocation2 + $0x1f8] sm:$0xff]  ;;  %v7106_v35 = vld [vmem:[#allocation6] sm:$0xff] }
 0xb07   : > { %v7857_v61 = vmax.f32 %v18384_v24, %v18408_v19  ;;  %v18459_v13 = vadd.f32 %v7891_v51, %v18386_v25  ;;  %v18472_v32 = vadd.f32 %v7928_v11, %v18388_v9  ;;  %v11574_v7 = vor.u32 %v13085_v49, %v11573_v57  ;;  %v7108_v33 = vld [vmem:[#allocation6 + $0xb8] sm:$0xff]  ;;  %v7102_v11 = vld [vmem:[#allocation6 + $0xa0] sm:$0xff] }
 0xb08   : > { %v11702_v54 = vor.u32 %v13117_v17, %v11701_v53  ;;  %v11830_v6 = vor.u32 %v13149_v42, %v11829_v50  ;;  %v18481_v12 = vadd.f32 %v7965_v62, %v18390_v31  ;;  %v18484_v55 = vadd.f32 %v8002_v43, %v18408_v19  ;;  %v13203_v53 = vld [vmem:[%s20100_s8 + $0x7e4] sm:$0xf]  ;;  %v12055_v17 = vld [vmem:[%s20100_s8 + $0x7f0] sm:$0xf0]  ;;  %v6850_v42 = vld [vmem:[#allocation2 + $0x1e0] sm:$0xff] }
 0xb09   : > { %v11958_v44 = vor.u32 %v13181_v5, %v11957_v47  ;;  %v11558_v56 = vor.u32 %v18406_v60, %v18401_v59  ;;  %8935 = vmatpush.bf16.msra.mxu0 %v11574_v7  ;;  %v11686_v36 = vor.u32 %v13113_v18, %v18415_v15  ;;  %v11814_v57 = vor.u32 %v18428_v46, %v18423_v41  ;;  %v7327_v46 = vpop.permute.xlu0 %7326 }
 0xb0a   : > { %8948 = vmatpush.bf16.msra.mxu1 %v11702_v54  ;;  %v11942_v49 = vor.u32 %v13177_v0, %v18433_v4  ;;  %v6978_v50 = vunpack.c.l.bf16 %v6852_v52  ;;  %8961 = vmatpush.bf16.msra.mxu2 %v11830_v6  ;;  %v11674_v47 = vor.u32 %v18449_v29, %v18454_v16  ;;  %v11802_v5 = vor.u32 %v13139_v26, %v11799_v21  ;;  %v6851_v4 = vld [vmem:[#allocation2 + $0x1e8] sm:$0xff]  ;;  %v7103_v0 = vld [vmem:[#allocation6 + $0x218] sm:$0xff]  ;;  %v7104_v21 = vld [vmem:[#allocation6 + $0x160] sm:$0xff] }
 0xb0b   : > { %8974 = vmatpush.bf16.msra.mxu3 %v11958_v44  ;;  %v6979_v59 = vunpack.c.h.bf16 %v6852_v52  ;;  %v6980_v60 = vunpack.c.l.bf16 %v6853_v22  ;;  %v7458_v51 = vmul.f32 %v7332_v3, %v7106_v35  ;;  %v7459_v15 = vmul.f32 %v7332_v3, %v7107_v28  ;;  %v7105_v52 = vld [vmem:[#allocation6 + $0x3f8] sm:$0xff] }
 0xb0c   : > { %v7460_v18 = vmul.f32 %v7332_v3, %v7108_v33  ;;  %v7461_v41 = vmul.f32 %v7332_v3, %v7109_v27  ;;  %v11930_v62 = vor.u32 %v13171_v34, %v11927_v38  ;;  %v12058_v43 = vor.u32 %v13203_v53, %v12055_v17 }
 0xb0d   : > { %v6981_v7 = vunpack.c.h.bf16 %v6853_v22  ;;  %v6974_v54 = vunpack.c.l.bf16 %v6850_v42  ;;  %8936 = vmatpush.bf16.msra.mxu0 %v11558_v56  ;;  %v7586_v6 = vmul.f32 %v7458_v51, %v17500_v39  ;;  %v7587_v29 = vmul.f32 %v7459_v15, %v17500_v39  ;;  %v13099_v15 = vld [vmem:[%s20100_s8 + $0x4a4] sm:$0xf] }
 0xb0e   : > { %8949 = vmatpush.bf16.msra.mxu1 %v11686_v36  ;;  %v7588_v16 = vmul.f32 %v7460_v18, %v17500_v39  ;;  %v6975_v26 = vunpack.c.h.bf16 %v6850_v42  ;;  %8962 = vmatpush.bf16.msra.mxu2 %v11814_v57  ;;  %v7589_v35 = vmul.f32 %v7461_v41, %v17500_v39  ;;  %v6976_v44 = vunpack.c.l.bf16 %v6851_v4  ;;  %v11639_v18 = vld [vmem:[%s20100_s8 + $0x4b0] sm:$0xf0]  ;;  %v13131_v41 = vld [vmem:[%s20100_s8 + $0x5a4] sm:$0xf] }
 0xb0f   : > { %8975 = vmatpush.bf16.msra.mxu3 %v11942_v49  ;;  %v7454_v34 = vmul.f32 %v7327_v46, %v7102_v11  ;;  %v7455_v38 = vmul.f32 %v7327_v46, %v7103_v0  ;;  %v7714_v22 = vadd.f32 %v7586_v6, %v6978_v50  ;;  %v7715_v56 = vadd.f32 %v7587_v29, %v6979_v59  ;;  %v11911_v59 = vld [vmem:[%s20100_s8 + $0x6d0] sm:$0xf0] }
 0xb10   : > { %v7716_v3 = vadd.f32 %v7588_v16, %v6980_v60  ;;  %v6977_v28 = vunpack.c.h.bf16 %v6851_v4  ;;  %v7717_v33 = vadd.f32 %v7589_v35, %v6981_v7  ;;  %v7456_v27 = vmul.f32 %v7327_v46, %v7104_v21  ;;  %v12039_v60 = vld [vmem:[%s20100_s8 + $0x7d0] sm:$0xf0]  ;;  %v13163_v7 = vld [vmem:[%s20100_s8 + $0x6a4] sm:$0xf] }
 0xb11   : > { %8981 = vmatpush.bf16.msrb.mxu0 %v11674_v47  ;;  %v7457_v36 = vmul.f32 %v7327_v46, %v7105_v52  ;;  %v7747_v57 = vmax.f32 %v7746_v8, %v7714_v22  ;;  %v7784_v49 = vmax.f32 %v7783_v40, %v7715_v56  ;;  %v7582_v17 = vmul.f32 %v7454_v34, %v17500_v39  ;;  %v13195_v21 = vld [vmem:[%s20100_s8 + $0x7a4] sm:$0xf]  ;;  %v12023_v52 = vld [vmem:[%s20100_s8 + $0x7b0] sm:$0xf0] }
 0xb12   : > { %8994 = vmatpush.bf16.msrb.mxu1 %v11802_v5  ;;  %9007 = vmatpush.bf16.msrb.mxu2 %v11930_v62  ;;  %v7821_v53 = vmax.f32 %v7820_v2, %v7716_v3  ;;  %v7858_v50 = vmax.f32 %v7857_v61, %v7717_v33  ;;  %v7583_v42 = vmul.f32 %v7455_v38, %v17500_v39  ;;  %v13733_v46 = vmov 256.0  }
 0xb13   : > { %9020 = vmatpush.bf16.msrb.mxu3 %v12058_v43  ;;  %v7584_v47 = vmul.f32 %v7456_v27, %v17500_v39  ;;  %v7585_v48 = vmul.f32 %v7457_v36, %v17500_v39  ;;  %v7710_v25 = vadd.f32 %v7582_v17, %v6974_v54  ;;  %v7893_v20 = vadd.f32 %v18459_v13, %v18332_v58  ;;  %v11767_v43 = vld [vmem:[%s20100_s8 + $0x5b0] sm:$0xf0]  ;;  %v13127_v27 = vld [vmem:[%s20100_s8 + $0x584] sm:$0xf] }
 0xb14   : > { %v7930_v63 = vadd.f32 %v18472_v32, %v18334_v37  ;;  %v7967_v9 = vadd.f32 %v18481_v12, %v18336_v30  ;;  %v7711_v31 = vadd.f32 %v7583_v42, %v6975_v26  ;;  %v8004_v19 = vadd.f32 %v18484_v55, %v18338_v45  ;;  %v13103_v37 = vld [vmem:[%s20100_s8 + $0x4c4] sm:$0xf]  ;;  %v11655_v30 = vld [vmem:[%s20100_s8 + $0x4d0] sm:$0xf0] }
 0xb15   : > { %v7712_v8 = vadd.f32 %v7584_v47, %v6976_v44  ;;  %v7713_v24 = vadd.f32 %v7585_v48, %v6977_v28  ;;  %v18528_v40 = vmax.f32 %v7747_v57, %v7710_v25  ;;  %v7894_v39 = vadd.f32 %v7893_v20, %v17974_v10  ;;  %v13167_v32 = vld [vmem:[%s20100_s8 + $0x6c4] sm:$0xf]  ;;  %v11895_v54 = vld [vmem:[%s20100_s8 + $0x6b0] sm:$0xf0] }
 0xb16   : > { %v7931_v2 = vadd.f32 %v7930_v63, %v17976_v23  ;;  %v7968_v58 = vadd.f32 %v7967_v9, %v17978_v14  ;;  %v18539_v61 = vmax.f32 %v7784_v49, %v7711_v31  ;;  %v8005_v10 = vadd.f32 %v8004_v19, %v17980_v1  ;;  %v13135_v23 = vld [vmem:[%s20100_s8 + $0x5c4] sm:$0xf]  ;;  %v11783_v14 = vld [vmem:[%s20100_s8 + $0x5d0] sm:$0xf0] }
 0xb17   : > { %v18541_v13 = vmax.f32 %v7821_v53, %v7712_v8  ;;  %v18543_v45 = vmax.f32 %v7858_v50, %v7713_v24  ;;  %v7895_v12 = vadd.f32 %v7894_v39, %v7710_v25  ;;  %v13199_v1 = vld [vmem:[%s20100_s8 + $0x7c4] sm:$0xf]  ;;  %13631 = vrcp.f32 %v13733_v46  ;;  %v11751_v49 = vld [vmem:[%s20100_s8 + $0x590] sm:$0xf0] }
 0xb18   : > { %v7932_v55 = vadd.f32 %v7931_v2, %v7711_v31  ;;  %v7969_v5 = vadd.f32 %v7968_v58, %v7712_v8  ;;  %v8006_v51 = vadd.f32 %v8005_v10, %v7713_v24  ;;  %v11658_v62 = vor.u32 %v13103_v37, %v11655_v30  ;;  %v13159_v53 = vld [vmem:[%s20100_s8 + $0x684] sm:$0xf]  ;;  %v11879_v17 = vld [vmem:[%s20100_s8 + $0x690] sm:$0xf0] }
 0xb19   : > { %v7896_v4 = vadd.f32 %v7895_v12, %v7714_v22  ;;  %v11786_v29 = vor.u32 %v13135_v23, %v11783_v14  ;;  %v11914_v16 = vor.u32 %v13167_v32, %v11911_v59  ;;  %v12042_v26 = vor.u32 %v13199_v1, %v12039_v60  ;;  %v13095_v22 = vld [vmem:[%s20100_s8 + $0x484] sm:$0xf]  ;;  %v12007_v47 = vld [vmem:[%s20100_s8 + $0x790] sm:$0xf0] }
 0xb1a   : > { %v7933_v11 = vadd.f32 %v7932_v55, %v7715_v56  ;;  %v7970_v0 = vadd.f32 %v7969_v5, %v7716_v3  ;;  %v8007_v6 = vadd.f32 %v8006_v51, %v7717_v33  ;;  %8982 = vmatpush.bf16.msrb.mxu0 %v11658_v62  ;;  %v11642_v38 = vor.u32 %v13099_v15, %v11639_v18  ;;  %v11623_v33 = vld [vmem:[%s20100_s8 + $0x490] sm:$0xf0]  ;;  %v13191_v42 = vld [vmem:[%s20100_s8 + $0x784] sm:$0xf] }
 0xb1b   : > { %v7897_v35 = vrot.slane %v7896_v4, 4  ;;  %8995 = vmatpush.bf16.msrb.mxu1 %v11786_v29  ;;  %9008 = vmatpush.bf16.msrb.mxu2 %v11914_v16  ;;  %v11770_v3 = vor.u32 %v13131_v41, %v11767_v43  ;;  %v11898_v28 = vor.u32 %v13163_v7, %v11895_v54  ;;  %v12026_v57 = vor.u32 %v13195_v21, %v12023_v52  ;;  %v13091_v63 = vld [vmem:[%s20100_s8 + $0x464] sm:$0xf]  ;;  %v11607_v9 = vld [vmem:[%s20100_s8 + $0x470] sm:$0xf0] }
 0xb1c   : > { %v7934_v44 = vrot.slane %v7933_v11, 4  ;;  %v7971_v34 = vrot.slane %v7970_v0, 4  ;;  %v8008_v56 = vrot.slane %v8007_v6, 4  ;;  %9021 = vmatpush.bf16.msrb.mxu3 %v12042_v26  ;;  %v11626_v20 = vor.u32 %v13095_v22, %v11623_v33  ;;  %v13123_v31 = vld [vmem:[%s20100_s8 + $0x564] sm:$0xf] }
 0xb1d   : > { %v7898_v36 = vadd.f32 %v7897_v35, %v7896_v4  ;;  %v18606_v50 = vpop.eup %13631  ;;  %v11754_v24 = vor.u32 %v13127_v27, %v11751_v49  ;;  %v11882_v19 = vor.u32 %v13159_v53, %v11879_v17  ;;  %v11735_v39 = vld [vmem:[%s20100_s8 + $0x570] sm:$0xf0]  ;;  %v13155_v2 = vld [vmem:[%s20100_s8 + $0x664] sm:$0xf]  ;;  %v12010_v37 = vor.u32 %v13191_v42, %v12007_v47 }
 0xb1e   : > { %v7935_v48 = vadd.f32 %v7934_v44, %v7933_v11  ;;  %v7972_v25 = vadd.f32 %v7971_v34, %v7970_v0  ;;  %8983 = vmatpush.bf16.msrb.mxu0 %v11642_v38  ;;  %v8009_v8 = vadd.f32 %v8008_v56, %v8007_v6  ;;  %v11863_v30 = vld [vmem:[%s20100_s8 + $0x670] sm:$0xf0]  ;;  %v13187_v10 = vld [vmem:[%s20100_s8 + $0x764] sm:$0xf]  ;;  %v11610_v55 = vor.u32 %v13091_v63, %v11607_v9 }
 0xb1f   : > { %8996 = vmatpush.bf16.msrb.mxu1 %v11770_v3  ;;  %9009 = vmatpush.bf16.msrb.mxu2 %v11898_v28  ;;  %v7899_v58 = vrot.slane %v7898_v36, 2  ;;  %v11991_v23 = vld [vmem:[%s20100_s8 + $0x770] sm:$0xf0]  ;;  %v13087_v14 = vld [vmem:[%s20100_s8 + $0x444] sm:$0xf]  ;;  %v11738_v5 = vor.u32 %v13123_v31, %v11735_v39  ;;  %v8015_v51 = vmul.f32 256.0, %v18606_v50  ;;  %v11866_v15 = vor.u32 %v13155_v2, %v11863_v30 }
 0xb20   : > { %9022 = vmatpush.bf16.msrb.mxu3 %v12026_v57  ;;  %v11591_v32 = vld [vmem:[%s20100_s8 + $0x450] sm:$0xf0]  ;;  %v13119_v12 = vld [vmem:[%s20100_s8 + $0x544] sm:$0xf]  ;;  %v7936_v41 = vrot.slane %v7935_v48, 2  ;;  %v7973_v46 = vrot.slane %v7972_v25, 2  ;;  %v11994_v11 = vor.u32 %v13187_v10, %v11991_v23  ;;  %vm8019_vm8 = vweird.f32 %v18606_v50 }
 0xb21   : > { %v11719_v59 = vld [vmem:[%s20100_s8 + $0x550] sm:$0xf0]  ;;  %v13151_v1 = vld [vmem:[%s20100_s8 + $0x644] sm:$0xf]  ;;  %v7900_v60 = vadd.f32 %v7899_v58, %v7898_v36  ;;  %v8010_v4 = vrot.slane %v8009_v8, 2  ;;  %v8016_v43 = vsub.f32 1.0, %v8015_v51  ;;  %v11594_v7 = vor.u32 %v13087_v14, %v11591_v32 }
 0xb22   : > { %8984 = vmatpush.bf16.msrb.mxu0 %v11626_v20  ;;  %v11847_v18 = vld [vmem:[%s20100_s8 + $0x650] sm:$0xf0]  ;;  %v13183_v0 = vld [vmem:[%s20100_s8 + $0x744] sm:$0xf]  ;;  %v7937_v16 = vadd.f32 %v7936_v41, %v7935_v48  ;;  %v7974_v26 = vadd.f32 %v7973_v46, %v7972_v25  ;;  %v11722_v52 = vor.u32 %v13119_v12, %v11719_v59  ;;  %v11805_v59 = vld [vmem:[%s20100_s8 + $0x5e8] sm:$0xf] }
 0xb23   : > { %8997 = vmatpush.bf16.msrb.mxu1 %v11754_v24  ;;  %9010 = vmatpush.bf16.msrb.mxu2 %v11882_v19  ;;  %v7901_v62 = vrot.slane %v7900_v60, 1  ;;  %v11975_v54 = vld [vmem:[%s20100_s8 + $0x750] sm:$0xf0]  ;;  %v13083_v6 = vld [vmem:[%s20100_s8 + $0x424] sm:$0xf]  ;;  %v8011_v21 = vadd.f32 %v8010_v4, %v8009_v8  ;;  %v11850_v35 = vor.u32 %v13151_v1, %v11847_v18  ;;  %v8017_v22 = vmul.f32 %v18606_v50, %v8016_v43 }
 0xb24   : > { %9023 = vmatpush.bf16.msrb.mxu3 %v12010_v37  ;;  %v11575_v29 = vld [vmem:[%s20100_s8 + $0x430] sm:$0xf0]  ;;  %v13115_v44 = vld [vmem:[%s20100_s8 + $0x524] sm:$0xf]  ;;  %v7938_v28 = vrot.slane %v7937_v16, 1  ;;  %v7975_v33 = vrot.slane %v7974_v26, 1  ;;  %v11978_v36 = vor.u32 %v13183_v0, %v11975_v54 }
 0xb25   : > { %v11703_v34 = vld [vmem:[%s20100_s8 + $0x530] sm:$0xf0]  ;;  %v13147_v38 = vld [vmem:[%s20100_s8 + $0x624] sm:$0xf]  ;;  %v7902_v3 = vadd.f32 %v7901_v62, %v7900_v60  ;;  %v8012_v27 = vrot.slane %v8011_v21, 1  ;;  %v8018_v57 = vadd.f32 %v18606_v50, %v8017_v22  ;;  %v11578_v48 = vor.u32 %v13083_v6, %v11575_v29 }
 0xb26   : > { %8985 = vmatpush.bf16.msrb.mxu0 %v11610_v55  ;;  %v11831_v56 = vld [vmem:[%s20100_s8 + $0x630] sm:$0xf0]  ;;  %v13179_v49 = vld [vmem:[%s20100_s8 + $0x724] sm:$0xf]  ;;  %v7939_v17 = vadd.f32 %v7938_v28, %v7937_v16  ;;  %v7976_v42 = vadd.f32 %v7975_v33, %v7974_v26  ;;  %v11706_v25 = vor.u32 %v13115_v44, %v11703_v34  ;;  %v11677_v55 = vld [vmem:[%s20100_s8 + $0x4e8] sm:$0xf] }
 0xb27   : > { %8998 = vmatpush.bf16.msrb.mxu1 %v11738_v5  ;;  %9011 = vmatpush.bf16.msrb.mxu2 %v11866_v15  ;;  %v11959_v53 = vld [vmem:[%s20100_s8 + $0x730] sm:$0xf0]  ;;  %v8013_v47 = vadd.f32 %v8012_v27, %v8011_v21  ;;  %v11834_v20 = vor.u32 %v13147_v38, %v11831_v56  ;;  %v13079_v63 = vld [vmem:[%s20100_s8 + $0x404] sm:$0xf]  ;;  %v8020_v31 = vsel %vm8019_vm8, %v18606_v50, %v8018_v57  ;;  %v13110_v5 = vld [vmem:[%s20100_s8 + $0x4f4] sm:$0xf0] }
 0xb28   : > { %9024 = vmatpush.bf16.msrb.mxu3 %v11994_v11  ;;  %v11559_v9 = vld [vmem:[%s20100_s8 + $0x410] sm:$0xf0]  ;;  %v13111_v8 = vld [vmem:[%s20100_s8 + $0x504] sm:$0xf]  ;;  %v8021_v39 = vmul.f32 %v8020_v31, %v7902_v3  ;;  %v8022_v2 = vmul.f32 %v8020_v31, %v7939_v17  ;;  %v8023_v58 = vmul.f32 %v8020_v31, %v7976_v42  ;;  %v11962_v37 = vor.u32 %v13179_v49, %v11959_v53  ;;  %v13142_v51 = vld [vmem:[%s20100_s8 + $0x5f4] sm:$0xf0] }
 0xb29   : > { %v11687_v24 = vld [vmem:[%s20100_s8 + $0x510] sm:$0xf0]  ;;  %v13143_v19 = vld [vmem:[%s20100_s8 + $0x604] sm:$0xf]  ;;  %v8024_v23 = vmul.f32 %v8020_v31, %v8013_v47  ;;  %v11562_v1 = vor.u32 %v13079_v63, %v11559_v9  ;;  %v11933_v15 = vld [vmem:[%s20100_s8 + $0x6e8] sm:$0xf]  ;;  %v11678_v62 = vor.u32 %v13110_v5, %v11677_v55  ;;  %v11806_v43 = vor.u32 %v13142_v51, %v11805_v59 }
 0xb2a   : > { %8986 = vmatpush.bf16.msrb.mxu0 %v11594_v7  ;;  %v11815_v50 = vld [vmem:[%s20100_s8 + $0x610] sm:$0xf0]  ;;  %v13175_v30 = vld [vmem:[%s20100_s8 + $0x704] sm:$0xf]  ;;  %v18717_v14 = vpack.c.bf16 %v8021_v39, %v8021_v39  ;;  %v18719_v32 = vpack.c.bf16 %v8022_v2, %v8022_v2  ;;  %v18721_v12 = vpack.c.bf16 %v8023_v58, %v8023_v58  ;;  %v13174_v18 = vld [vmem:[%s20100_s8 + $0x6f4] sm:$0xf0]  ;;  %v11690_v41 = vor.u32 %v13111_v8, %v11687_v24 }
 0xb2b   : > { %8999 = vmatpush.bf16.msrb.mxu1 %v11722_v52  ;;  %9012 = vmatpush.bf16.msrb.mxu2 %v11850_v35  ;;  %v11943_v10 = vld [vmem:[%s20100_s8 + $0x710] sm:$0xf0]  ;;  %v18732_v60 = vpack.c.bf16 %v8024_v23, %v8024_v23  ;;  %v11818_v46 = vor.u32 %v13143_v19, %v11815_v50  ;;  %v12061_v4 = vld [vmem:[%s20100_s8 + $0x7e8] sm:$0xf]  ;;  %v13206_v11 = vld [vmem:[%s20100_s8 + $0x7f4] sm:$0xf0]  ;;  %v11934_v7 = vor.u32 %v13174_v18, %v11933_v15 }
 0xb2c   : > { %9025 = vmatpush.bf16.msrb.mxu3 %v11978_v36  ;;  %v11946_v0 = vor.u32 %v13175_v30, %v11943_v10  ;;  %8937 = vmatmul.bf16.vlgmr.msra.gmra.mxu0 %v18717_v14  ;;  %v11661_v54 = vld [vmem:[%s20100_s8 + $0x4c8] sm:$0xf]  ;;  %v13106_v6 = vld [vmem:[%s20100_s8 + $0x4d4] sm:$0xf0]  ;;  %v12062_v16 = vor.u32 %v13206_v11, %v12061_v4 }
 0xb2d   : > { %8950 = vmatmul.bf16.vlgmr.msra.gmra.mxu1 %v18719_v32  ;;  %8963 = vmatmul.bf16.vlgmr.msra.gmra.mxu2 %v18721_v12  ;;  %v11789_v29 = vld [vmem:[%s20100_s8 + $0x5c8] sm:$0xf]  ;;  %v13138_v26 = vld [vmem:[%s20100_s8 + $0x5d4] sm:$0xf0]  ;;  %v11662_v34 = vor.u32 %v13106_v6, %v11661_v54 }
 0xb2e   : > { %8987 = vmatpush.bf16.msrb.mxu0 %v11578_v48  ;;  %8976 = vmatmul.bf16.vlgmr.msra.gmra.mxu3 %v18732_v60  ;;  %v11917_v21 = vld [vmem:[%s20100_s8 + $0x6c8] sm:$0xf]  ;;  %v13170_v52 = vld [vmem:[%s20100_s8 + $0x6d4] sm:$0xf0]  ;;  %v11790_v38 = vor.u32 %v13138_v26, %v11789_v29 }
 0xb2f   : > { %9000 = vmatpush.bf16.msrb.mxu1 %v11706_v25  ;;  %9013 = vmatpush.bf16.msrb.mxu2 %v11834_v20  ;;  %v12045_v35 = vld [vmem:[%s20100_s8 + $0x7c8] sm:$0xf]  ;;  %v13202_v44 = vld [vmem:[%s20100_s8 + $0x7d4] sm:$0xf0]  ;;  %v11918_v22 = vor.u32 %v13170_v52, %v11917_v21 }
 0xb30   : > { %9026 = vmatpush.bf16.msrb.mxu3 %v11962_v37  ;;  %v11645_v56 = vld [vmem:[%s20100_s8 + $0x4a8] sm:$0xf]  ;;  %v13102_v3 = vld [vmem:[%s20100_s8 + $0x4b4] sm:$0xf0]  ;;  %v12046_v33 = vor.u32 %v13202_v44, %v12045_v35 }
 0xb31   : > { %v11773_v28 = vld [vmem:[%s20100_s8 + $0x5a8] sm:$0xf]  ;;  %v13134_v27 = vld [vmem:[%s20100_s8 + $0x5b4] sm:$0xf0]  ;;  %v11646_v17 = vor.u32 %v13102_v3, %v11645_v56 }
 0xb32   : > { %8988 = vmatpush.bf16.msrb.mxu0 %v11562_v1  ;;  %v11901_v36 = vld [vmem:[%s20100_s8 + $0x6a8] sm:$0xf]  ;;  %v13166_v57 = vld [vmem:[%s20100_s8 + $0x6b4] sm:$0xf0]  ;;  %v11774_v42 = vor.u32 %v13134_v27, %v11773_v28 }
 0xb33   : > { %9001 = vmatpush.bf16.msrb.mxu1 %v11690_v41  ;;  %9014 = vmatpush.bf16.msrb.mxu2 %v11818_v46  ;;  %v12029_v49 = vld [vmem:[%s20100_s8 + $0x7a8] sm:$0xf]  ;;  %v13198_v53 = vld [vmem:[%s20100_s8 + $0x7b4] sm:$0xf0]  ;;  %v11902_v47 = vor.u32 %v13166_v57, %v11901_v36 }
 0xb34   : > { %9027 = vmatpush.bf16.msrb.mxu3 %v11946_v0  ;;  %v11629_v48 = vld [vmem:[%s20100_s8 + $0x488] sm:$0xf]  ;;  %v13098_v25 = vld [vmem:[%s20100_s8 + $0x494] sm:$0xf0]  ;;  %v12030_v63 = vor.u32 %v13198_v53, %v12029_v49 }
 0xb35   : > { %v11757_v20 = vld [vmem:[%s20100_s8 + $0x588] sm:$0xf]  ;;  %v13130_v9 = vld [vmem:[%s20100_s8 + $0x594] sm:$0xf0]  ;;  %v11630_v39 = vor.u32 %v13098_v25, %v11629_v48  ;;  %v13108_v25 = vld [vmem:[%s20100_s8 + $0x4ec] sm:$0xf] }
 0xb36   : > { %9033 = vmatpush.bf16.msra.mxu0 %v11678_v62  ;;  %v11885_v31 = vld [vmem:[%s20100_s8 + $0x688] sm:$0xf]  ;;  %v13162_v8 = vld [vmem:[%s20100_s8 + $0x694] sm:$0xf0]  ;;  %v11758_v2 = vor.u32 %v13130_v9, %v11757_v20  ;;  %v11679_v20 = vld [vmem:[%s20100_s8 + $0x4f8] sm:$0xf0] }
 0xb37   : > { %9046 = vmatpush.bf16.msra.mxu1 %v11806_v43  ;;  %9059 = vmatpush.bf16.msra.mxu2 %v11934_v7  ;;  %v12013_v24 = vld [vmem:[%s20100_s8 + $0x788] sm:$0xf]  ;;  %v13194_v19 = vld [vmem:[%s20100_s8 + $0x794] sm:$0xf0]  ;;  %v11886_v58 = vor.u32 %v13162_v8, %v11885_v31  ;;  %v11807_v31 = vld [vmem:[%s20100_s8 + $0x5f8] sm:$0xf0] }
 0xb38   : > { %9072 = vmatpush.bf16.msra.mxu3 %v12062_v16  ;;  %v11613_v37 = vld [vmem:[%s20100_s8 + $0x468] sm:$0xf]  ;;  %v13094_v50 = vld [vmem:[%s20100_s8 + $0x474] sm:$0xf0]  ;;  %v12014_v10 = vor.u32 %v13194_v19, %v12013_v24  ;;  %v13172_v8 = vld [vmem:[%s20100_s8 + $0x6ec] sm:$0xf] }
 0xb39   : > { %v11741_v30 = vld [vmem:[%s20100_s8 + $0x568] sm:$0xf]  ;;  %v13126_v23 = vld [vmem:[%s20100_s8 + $0x574] sm:$0xf0]  ;;  %v11614_v51 = vor.u32 %v13094_v50, %v11613_v37  ;;  %v11935_v24 = vld [vmem:[%s20100_s8 + $0x6f8] sm:$0xf0]  ;;  %v11682_v50 = vor.u32 %v13108_v25, %v11679_v20 }
 0xb3a   : > { %9034 = vmatpush.bf16.msra.mxu0 %v11662_v34  ;;  %v11869_v55 = vld [vmem:[%s20100_s8 + $0x668] sm:$0xf]  ;;  %v13158_v5 = vld [vmem:[%s20100_s8 + $0x674] sm:$0xf0]  ;;  %v11742_v15 = vor.u32 %v13126_v23, %v11741_v30  ;;  %v13104_v23 = vld [vmem:[%s20100_s8 + $0x4cc] sm:$0xf] }
 0xb3b   : > { %9047 = vmatpush.bf16.msra.mxu1 %v11790_v38  ;;  %9060 = vmatpush.bf16.msra.mxu2 %v11918_v22  ;;  %v11997_v59 = vld [vmem:[%s20100_s8 + $0x768] sm:$0xf]  ;;  %v13190_v1 = vld [vmem:[%s20100_s8 + $0x774] sm:$0xf0]  ;;  %v11870_v18 = vor.u32 %v13158_v5, %v11869_v55  ;;  %v11663_v55 = vld [vmem:[%s20100_s8 + $0x4d8] sm:$0xf0] }
 0xb3c   : > { %9073 = vmatpush.bf16.msra.mxu3 %v12046_v33  ;;  %v11597_v41 = vld [vmem:[%s20100_s8 + $0x448] sm:$0xf]  ;;  %v13090_v46 = vld [vmem:[%s20100_s8 + $0x454] sm:$0xf0]  ;;  %8989 = vmatmul.bf16.vlgmr.msrb.gmra.mxu0 %v18717_v14  ;;  %v11998_v11 = vor.u32 %v13190_v1, %v11997_v59  ;;  %v13136_v5 = vld [vmem:[%s20100_s8 + $0x5cc] sm:$0xf] }
 0xb3d   : > { %v11725_v4 = vld [vmem:[%s20100_s8 + $0x548] sm:$0xf]  ;;  %v13122_v0 = vld [vmem:[%s20100_s8 + $0x554] sm:$0xf0]  ;;  %9002 = vmatmul.bf16.vlgmr.msrb.gmra.mxu1 %v18719_v32  ;;  %9015 = vmatmul.bf16.vlgmr.msrb.gmra.mxu2 %v18721_v12  ;;  %v11598_v6 = vor.u32 %v13090_v46, %v11597_v41  ;;  %v11791_v1 = vld [vmem:[%s20100_s8 + $0x5d8] sm:$0xf0]  ;;  %v11666_v46 = vor.u32 %v13104_v23, %v11663_v55 }
 0xb3e   : > { %9035 = vmatpush.bf16.msra.mxu0 %v11646_v17  ;;  %v11853_v62 = vld [vmem:[%s20100_s8 + $0x648] sm:$0xf]  ;;  %v13154_v43 = vld [vmem:[%s20100_s8 + $0x654] sm:$0xf0]  ;;  %9028 = vmatmul.bf16.vlgmr.msrb.gmra.mxu3 %v18732_v60  ;;  %v11726_v29 = vor.u32 %v13122_v0, %v11725_v4  ;;  %v12047_v41 = vld [vmem:[%s20100_s8 + $0x7d8] sm:$0xf0]  ;;  %v11794_v4 = vor.u32 %v13136_v5, %v11791_v1 }
 0xb3f   : > { %9048 = vmatpush.bf16.msra.mxu1 %v11774_v42  ;;  %9061 = vmatpush.bf16.msra.mxu2 %v11902_v47  ;;  %v11981_v7 = vld [vmem:[%s20100_s8 + $0x748] sm:$0xf]  ;;  %v13186_v54 = vld [vmem:[%s20100_s8 + $0x754] sm:$0xf0]  ;;  %v11854_v16 = vor.u32 %v13154_v43, %v11853_v62  ;;  %v13100_v0 = vld [vmem:[%s20100_s8 + $0x4ac] sm:$0xf] }
 0xb40   : > { %9074 = vmatpush.bf16.msra.mxu3 %v12030_v63  ;;  %v11581_v26 = vld [vmem:[%s20100_s8 + $0x428] sm:$0xf]  ;;  %v13086_v21 = vld [vmem:[%s20100_s8 + $0x434] sm:$0xf0]  ;;  %v11982_v35 = vor.u32 %v13186_v54, %v11981_v7  ;;  %v13140_v63 = vld [vmem:[%s20100_s8 + $0x5ec] sm:$0xf] }
 0xb41   : > { %v11709_v52 = vld [vmem:[%s20100_s8 + $0x528] sm:$0xf]  ;;  %v13118_v44 = vld [vmem:[%s20100_s8 + $0x534] sm:$0xf0]  ;;  %v11582_v3 = vor.u32 %v13086_v21, %v11581_v26  ;;  %v11810_v30 = vor.u32 %v13140_v63, %v11807_v31  ;;  %v11647_v62 = vld [vmem:[%s20100_s8 + $0x4b8] sm:$0xf0] }
 0xb42   : > { %9036 = vmatpush.bf16.msra.mxu0 %v11630_v39  ;;  %v11837_v34 = vld [vmem:[%s20100_s8 + $0x628] sm:$0xf]  ;;  %v13150_v38 = vld [vmem:[%s20100_s8 + $0x634] sm:$0xf0]  ;;  %v11710_v27 = vor.u32 %v13118_v44, %v11709_v52  ;;  %v13132_v43 = vld [vmem:[%s20100_s8 + $0x5ac] sm:$0xf]  ;;  %v11650_v21 = vor.u32 %v13100_v0, %v11647_v62 }
 0xb43   : > { %9049 = vmatpush.bf16.msra.mxu1 %v11758_v2  ;;  %9062 = vmatpush.bf16.msra.mxu2 %v11886_v58  ;;  %v11965_v22 = vld [vmem:[%s20100_s8 + $0x728] sm:$0xf]  ;;  %v13182_v56 = vld [vmem:[%s20100_s8 + $0x734] sm:$0xf0]  ;;  %v11838_v36 = vor.u32 %v13150_v38, %v11837_v34  ;;  %v13204_v2 = vld [vmem:[%s20100_s8 + $0x7ec] sm:$0xf] }
 0xb44   : > { %9075 = vmatpush.bf16.msra.mxu3 %v12014_v10  ;;  %v11565_v28 = vld [vmem:[%s20100_s8 + $0x408] sm:$0xf]  ;;  %v13082_v33 = vld [vmem:[%s20100_s8 + $0x414] sm:$0xf0]  ;;  %v11966_v17 = vor.u32 %v13182_v56, %v11965_v22  ;;  %v12063_v58 = vld [vmem:[%s20100_s8 + $0x7f8] sm:$0xf0]  ;;  %v11938_v10 = vor.u32 %v13172_v8, %v11935_v24 }
 0xb45   : > { %v11693_v57 = vld [vmem:[%s20100_s8 + $0x508] sm:$0xf]  ;;  %v13114_v49 = vld [vmem:[%s20100_s8 + $0x514] sm:$0xf0]  ;;  %v11566_v9 = vor.u32 %v13082_v33, %v11565_v28  ;;  %v12066_v59 = vor.u32 %v13204_v2, %v12063_v58  ;;  %v11775_v54 = vld [vmem:[%s20100_s8 + $0x5b8] sm:$0xf0] }
 0xb46   : > { %9037 = vmatpush.bf16.msra.mxu0 %v11614_v51  ;;  %v11821_v53 = vld [vmem:[%s20100_s8 + $0x608] sm:$0xf]  ;;  %v13146_v42 = vld [vmem:[%s20100_s8 + $0x614] sm:$0xf0]  ;;  %v11694_v19 = vor.u32 %v13114_v49, %v11693_v57  ;;  %v13168_v51 = vld [vmem:[%s20100_s8 + $0x6cc] sm:$0xf]  ;;  %v11778_v52 = vor.u32 %v13132_v43, %v11775_v54 }
 0xb47   : > { %9050 = vmatpush.bf16.msra.mxu1 %v11742_v15  ;;  %9063 = vmatpush.bf16.msra.mxu2 %v11870_v18  ;;  %v11949_v47 = vld [vmem:[%s20100_s8 + $0x708] sm:$0xf]  ;;  %v13178_v48 = vld [vmem:[%s20100_s8 + $0x714] sm:$0xf0]  ;;  %v11822_v39 = vor.u32 %v13146_v42, %v11821_v53  ;;  %v11919_v15 = vld [vmem:[%s20100_s8 + $0x6d8] sm:$0xf0] }
 0xb48   : > { %9076 = vmatpush.bf16.msra.mxu3 %v11998_v11  ;;  %v11950_v37 = vor.u32 %v13178_v48, %v11949_v47  ;;  %v13200_v18 = vld [vmem:[%s20100_s8 + $0x7cc] sm:$0xf]  ;;  %v11922_v11 = vor.u32 %v13168_v51, %v11919_v15  ;;  %v12031_v26 = vld [vmem:[%s20100_s8 + $0x7b8] sm:$0xf0] }
 0xb49   : > { %v12050_v7 = vor.u32 %v13200_v18, %v12047_v41  ;;  %v13096_v44 = vld [vmem:[%s20100_s8 + $0x48c] sm:$0xf]  ;;  %v11631_v34 = vld [vmem:[%s20100_s8 + $0x498] sm:$0xf0] }
 0xb4a   : > { %9038 = vmatpush.bf16.msra.mxu0 %v11598_v6  ;;  %v13164_v6 = vld [vmem:[%s20100_s8 + $0x6ac] sm:$0xf]  ;;  %v11759_v56 = vld [vmem:[%s20100_s8 + $0x598] sm:$0xf0] }
 0xb4b   : > { %9051 = vmatpush.bf16.msra.mxu1 %v11726_v29  ;;  %9064 = vmatpush.bf16.msra.mxu2 %v11854_v16  ;;  %v11903_v29 = vld [vmem:[%s20100_s8 + $0x6b8] sm:$0xf0]  ;;  %v13196_v16 = vld [vmem:[%s20100_s8 + $0x7ac] sm:$0xf] }
 0xb4c   : > { %9077 = vmatpush.bf16.msra.mxu3 %v11982_v35  ;;  %v11906_v35 = vor.u32 %v13164_v6, %v11903_v29  ;;  %v13128_v38 = vld [vmem:[%s20100_s8 + $0x58c] sm:$0xf]  ;;  %v12034_v22 = vor.u32 %v13196_v16, %v12031_v26  ;;  %v11887_v28 = vld [vmem:[%s20100_s8 + $0x698] sm:$0xf0] }
 0xb4d   : > { %v13192_v33 = vld [vmem:[%s20100_s8 + $0x78c] sm:$0xf]  ;;  %v11762_v57 = vor.u32 %v13128_v38, %v11759_v56  ;;  %v11743_v48 = vld [vmem:[%s20100_s8 + $0x578] sm:$0xf0]  ;;  %v12981_v38 = vld [vmem:[%s20100_s8 + $0xec] sm:$0xf0] }
 0xb4e   : > { %9039 = vmatpush.bf16.msra.mxu0 %v11582_v3  ;;  %v13160_v3 = vld [vmem:[%s20100_s8 + $0x68c] sm:$0xf]  ;;  %v11871_v20 = vld [vmem:[%s20100_s8 + $0x678] sm:$0xf0] }
 0xb4f   : > { %9052 = vmatpush.bf16.msra.mxu1 %v11710_v27  ;;  %9065 = vmatpush.bf16.msra.mxu2 %v11838_v36  ;;  %v12015_v27 = vld [vmem:[%s20100_s8 + $0x798] sm:$0xf0]  ;;  %v11634_v36 = vor.u32 %v13096_v44, %v11631_v34  ;;  %v11890_v49 = vor.u32 %v13160_v3, %v11887_v28  ;;  %v13092_v53 = vld [vmem:[%s20100_s8 + $0x46c] sm:$0xf]  ;;  %v12181_v34 = vld [vmem:[%s20100_s8 + $0xe0] sm:$0xf] }
 0xb50   : > { %9078 = vmatpush.bf16.msra.mxu3 %v11966_v17  ;;  %v11615_v17 = vld [vmem:[%s20100_s8 + $0x478] sm:$0xf0]  ;;  %v13124_v42 = vld [vmem:[%s20100_s8 + $0x56c] sm:$0xf]  ;;  %v12018_v47 = vor.u32 %v13192_v33, %v12015_v27  ;;  %v13013_v3 = vld [vmem:[%s20100_s8 + $0x1ec] sm:$0xf0] }
 0xb51   : > { %v13156_v25 = vld [vmem:[%s20100_s8 + $0x66c] sm:$0xf]  ;;  %v11618_v31 = vor.u32 %v13092_v53, %v11615_v17  ;;  %v11746_v8 = vor.u32 %v13124_v42, %v11743_v48  ;;  %v11983_v23 = vld [vmem:[%s20100_s8 + $0x758] sm:$0xf0]  ;;  %v12437_v28 = vld [vmem:[%s20100_s8 + $0x2e0] sm:$0xf]  ;;  %v12182_v17 = vor.u32 %v12981_v38, %v12181_v34 }
 0xb52   : > { %9040 = vmatpush.bf16.msra.mxu0 %v11566_v9  ;;  %v13188_v63 = vld [vmem:[%s20100_s8 + $0x76c] sm:$0xf]  ;;  %v11999_v9 = vld [vmem:[%s20100_s8 + $0x778] sm:$0xf0]  ;;  %v11874_v24 = vor.u32 %v13156_v25, %v11871_v20  ;;  %v13045_v33 = vld [vmem:[%s20100_s8 + $0x2ec] sm:$0xf0] }
 0xb53   : > { %9053 = vmatpush.bf16.msra.mxu1 %v11694_v19  ;;  %9066 = vmatpush.bf16.msra.mxu2 %v11822_v39  ;;  %v13088_v19 = vld [vmem:[%s20100_s8 + $0x44c] sm:$0xf]  ;;  %v11599_v39 = vld [vmem:[%s20100_s8 + $0x458] sm:$0xf0]  ;;  %v12002_v58 = vor.u32 %v13188_v63, %v11999_v9  ;;  %v12165_v48 = vld [vmem:[%s20100_s8 + $0xc0] sm:$0xf] }
 0xb54   : > { %9079 = vmatpush.bf16.msra.mxu3 %v11950_v37  ;;  %v13120_v2 = vld [vmem:[%s20100_s8 + $0x54c] sm:$0xf]  ;;  %v11727_v37 = vld [vmem:[%s20100_s8 + $0x558] sm:$0xf0]  ;;  %v11602_v55 = vor.u32 %v13088_v19, %v11599_v39  ;;  %v12977_v25 = vld [vmem:[%s20100_s8 + $0xcc] sm:$0xf0] }
 0xb55   : > { %9041 = vmatmul.bf16.vlgmr.msra.gmra.mxu0 %v18717_v14  ;;  %v11730_v5 = vor.u32 %v13120_v2, %v11727_v37  ;;  %v13084_v1 = vld [vmem:[%s20100_s8 + $0x42c] sm:$0xf]  ;;  %v11583_v51 = vld [vmem:[%s20100_s8 + $0x438] sm:$0xf0]  ;;  %v12293_v20 = vld [vmem:[%s20100_s8 + $0x1c0] sm:$0xf]  ;;  %v12166_v39 = vor.u32 %v12977_v25, %v12165_v48 }
 0xb56   : > { %9085 = vmatpush.bf16.msrb.mxu0 %v11682_v50  ;;  %9054 = vmatmul.bf16.vlgmr.msra.gmra.mxu1 %v18719_v32  ;;  %v13152_v50 = vld [vmem:[%s20100_s8 + $0x64c] sm:$0xf]  ;;  %v11711_v41 = vld [vmem:[%s20100_s8 + $0x538] sm:$0xf0]  ;;  %v11586_v62 = vor.u32 %v13084_v1, %v11583_v51  ;;  %v13009_v9 = vld [vmem:[%s20100_s8 + $0x1cc] sm:$0xf0] }
 0xb57   : > { %9098 = vmatpush.bf16.msrb.mxu1 %v11810_v30  ;;  %9111 = vmatpush.bf16.msrb.mxu2 %v11938_v10  ;;  %v11855_v30 = vld [vmem:[%s20100_s8 + $0x658] sm:$0xf0]  ;;  %v13184_v10 = vld [vmem:[%s20100_s8 + $0x74c] sm:$0xf]  ;;  %v13073_v19 = vld [vmem:[%s20100_s8 + $0x3cc] sm:$0xf0]  ;;  %v12294_v2 = vor.u32 %v13009_v9, %v12293_v20 }
 0xb58   : > { %9124 = vmatpush.bf16.msrb.mxu3 %v12066_v59  ;;  %9067 = vmatmul.bf16.vlgmr.msra.gmra.mxu2 %v18721_v12  ;;  %v11858_v59 = vor.u32 %v13152_v50, %v11855_v30  ;;  %v13116_v15 = vld [vmem:[%s20100_s8 + $0x52c] sm:$0xf]  ;;  %v11986_v18 = vor.u32 %v13184_v10, %v11983_v23  ;;  %v11967_v0 = vld [vmem:[%s20100_s8 + $0x738] sm:$0xf0]  ;;  %v12149_v37 = vld [vmem:[%s20100_s8 + $0xa0] sm:$0xf] }
 0xb59   : > { %9080 = vmatmul.bf16.vlgmr.msra.gmra.mxu3 %v18732_v60  ;;  %v13080_v43 = vld [vmem:[%s20100_s8 + $0x40c] sm:$0xf]  ;;  %v11714_v54 = vor.u32 %v13116_v15, %v11711_v41  ;;  %v11695_v16 = vld [vmem:[%s20100_s8 + $0x518] sm:$0xf0]  ;;  %v12973_v50 = vld [vmem:[%s20100_s8 + $0xac] sm:$0xf0] }
 0xb5a   : > { %9086 = vmatpush.bf16.msrb.mxu0 %v11666_v46  ;;  %v13148_v46 = vld [vmem:[%s20100_s8 + $0x62c] sm:$0xf]  ;;  %v11951_v44 = vld [vmem:[%s20100_s8 + $0x718] sm:$0xf0]  ;;  %v12277_v30 = vld [vmem:[%s20100_s8 + $0x1a0] sm:$0xf]  ;;  %v12150_v41 = vor.u32 %v12973_v50, %v12149_v37 }
 0xb5b   : > { %9099 = vmatpush.bf16.msrb.mxu1 %v11794_v4  ;;  %9112 = vmatpush.bf16.msrb.mxu2 %v11922_v11  ;;  %v11839_v4 = vld [vmem:[%s20100_s8 + $0x638] sm:$0xf0]  ;;  %v13180_v11 = vld [vmem:[%s20100_s8 + $0x72c] sm:$0xf]  ;;  %v13005_v23 = vld [vmem:[%s20100_s8 + $0x1ac] sm:$0xf0] }
 0xb5c   : > { %9125 = vmatpush.bf16.msrb.mxu3 %v12050_v7  ;;  %v11567_v7 = vld [vmem:[%s20100_s8 + $0x418] sm:$0xf0]  ;;  %v11842_v6 = vor.u32 %v13148_v46, %v11839_v4  ;;  %v13112_v29 = vld [vmem:[%s20100_s8 + $0x50c] sm:$0xf]  ;;  %v7786_v1 = vrot.slane %v18539_v61, 4  ;;  %v7823_v15 = vrot.slane %v18541_v13, 4 }
 0xb5d   : > { %v13144_v26 = vld [vmem:[%s20100_s8 + $0x60c] sm:$0xf]  ;;  %v11570_v56 = vor.u32 %v13080_v43, %v11567_v7  ;;  %v11698_v27 = vor.u32 %v13112_v29, %v11695_v16  ;;  %v13069_v51 = vld [vmem:[%s20100_s8 + $0x3ac] sm:$0xf0]  ;;  %v12133_v46 = vld [vmem:[%s20100_s8 + $0x80] sm:$0xf] }
 0xb5e   : > { %9087 = vmatpush.bf16.msrb.mxu0 %v11650_v21  ;;  %v11970_v21 = vor.u32 %v13180_v11, %v11967_v0  ;;  %v12969_v4 = vld [vmem:[%s20100_s8 + $0x8c] sm:$0xf0]  ;;  %v12261_v11 = vld [vmem:[%s20100_s8 + $0x180] sm:$0xf]  ;;  %v7787_v29 = vmax.f32 %v18539_v61, %v7786_v1 }
 0xb5f   : > { %9100 = vmatpush.bf16.msrb.mxu1 %v11778_v52  ;;  %9113 = vmatpush.bf16.msrb.mxu2 %v11906_v35  ;;  %v11823_v52 = vld [vmem:[%s20100_s8 + $0x618] sm:$0xf0]  ;;  %v13176_v35 = vld [vmem:[%s20100_s8 + $0x70c] sm:$0xf]  ;;  %v13001_v0 = vld [vmem:[%s20100_s8 + $0x18c] sm:$0xf0]  ;;  %v12134_v16 = vor.u32 %v12969_v4, %v12133_v46 }
 0xb60   : > { %9126 = vmatpush.bf16.msrb.mxu3 %v12034_v22  ;;  %v12309_v22 = vld [vmem:[%s20100_s8 + $0x1e0] sm:$0xf]  ;;  %v11954_v53 = vor.u32 %v13176_v35, %v11951_v44  ;;  %v13033_v43 = vld [vmem:[%s20100_s8 + $0x28c] sm:$0xf0] }
 0xb61   : > { %v12310_v42 = vor.u32 %v13013_v3, %v12309_v22  ;;  %v12517_v7 = vld [vmem:[%s20100_s8 + $0x380] sm:$0xf]  ;;  %v13029_v38 = vld [vmem:[%s20100_s8 + $0x26c] sm:$0xf0] }
 0xb62   : > { %9088 = vmatpush.bf16.msrb.mxu0 %v11634_v36  ;;  %v11826_v36 = vor.u32 %v13144_v26, %v11823_v52  ;;  %v7824_v26 = vmax.f32 %v18541_v13, %v7823_v15  ;;  %v12262_v52 = vor.u32 %v13001_v0, %v12261_v11  ;;  %v12117_v44 = vld [vmem:[%s20100_s8 + $0x60] sm:$0xf]  ;;  %v12993_v48 = vld [vmem:[%s20100_s8 + $0x14c] sm:$0xf0] }
 0xb63   : > { %9101 = vmatpush.bf16.msrb.mxu1 %v11762_v57  ;;  %9114 = vmatpush.bf16.msrb.mxu2 %v11890_v49  ;;  %v12565_v57 = vld [vmem:[%s20100_s8 + $0x3e0] sm:$0xf]  ;;  %v13077_v49 = vld [vmem:[%s20100_s8 + $0x3ec] sm:$0xf0] }
 0xb64   : > { %9127 = vmatpush.bf16.msrb.mxu3 %v12018_v47  ;;  %v12438_v47 = vor.u32 %v13045_v33, %v12437_v28  ;;  %v12566_v63 = vor.u32 %v13077_v49, %v12565_v57  ;;  %v12245_v61 = vld [vmem:[%s20100_s8 + $0x160] sm:$0xf]  ;;  %v7788_v28 = vrot.slane %v7787_v29, 2  ;;  %v13025_v20 = vld [vmem:[%s20100_s8 + $0x24c] sm:$0xf0] }
 0xb65   : > { %v12373_v34 = vld [vmem:[%s20100_s8 + $0x260] sm:$0xf]  ;;  %v13057_v9 = vld [vmem:[%s20100_s8 + $0x34c] sm:$0xf0] }
 0xb66   : > { %9089 = vmatpush.bf16.msrb.mxu0 %v11618_v31  ;;  %v12421_v31 = vld [vmem:[%s20100_s8 + $0x2c0] sm:$0xf]  ;;  %v12374_v49 = vor.u32 %v13029_v38, %v12373_v34  ;;  %v12957_v50 = vld [vmem:[%s20100_s8 + $0x2c] sm:$0xf0] }
 0xb67   : > { %9102 = vmatpush.bf16.msrb.mxu1 %v11746_v8  ;;  %9115 = vmatpush.bf16.msrb.mxu2 %v11874_v24  ;;  %v13041_v8 = vld [vmem:[%s20100_s8 + $0x2cc] sm:$0xf0]  ;;  %v12549_v24 = vld [vmem:[%s20100_s8 + $0x3c0] sm:$0xf] }
 0xb68   : > { %9128 = vmatpush.bf16.msrb.mxu3 %v12002_v58  ;;  %v12422_v58 = vor.u32 %v13041_v8, %v12421_v31  ;;  %v12550_v10 = vor.u32 %v13073_v19, %v12549_v24  ;;  %v12501_v22 = vld [vmem:[%s20100_s8 + $0x360] sm:$0xf]  ;;  %v7789_v8 = vmax.f32 %v7787_v29, %v7788_v28  ;;  %v13053_v1 = vld [vmem:[%s20100_s8 + $0x32c] sm:$0xf0]  ;;  %v12183_v29 = vld [vmem:[%s20100_s8 + $0xf0] sm:$0xf0] }
 0xb69   : > { %v12357_v25 = vld [vmem:[%s20100_s8 + $0x240] sm:$0xf] }
 0xb6a   : > { %9090 = vmatpush.bf16.msrb.mxu0 %v11602_v55  ;;  %v12405_v55 = vld [vmem:[%s20100_s8 + $0x2a0] sm:$0xf] }
 0xb6b   : > { %9103 = vmatpush.bf16.msrb.mxu1 %v11730_v5  ;;  %9116 = vmatpush.bf16.msrb.mxu2 %v11858_v59  ;;  %v13037_v5 = vld [vmem:[%s20100_s8 + $0x2ac] sm:$0xf0]  ;;  %v7749_v59 = vrot.slane %v18528_v40, 4  ;;  %v12085_v37 = vld [vmem:[%s20100_s8 + $0x20] sm:$0xf] }
 0xb6c   : > { %9129 = vmatpush.bf16.msrb.mxu3 %v11986_v18  ;;  %v7860_v18 = vrot.slane %v18543_v45, 4  ;;  %v12086_v15 = vor.u32 %v12957_v50, %v12085_v37  ;;  %v12197_v11 = vld [vmem:[%s20100_s8 + $0x100] sm:$0xf]  ;;  %v12279_v37 = vld [vmem:[%s20100_s8 + $0x1b0] sm:$0xf0] }
 0xb6d   : > { %v12325_v0 = vld [vmem:[%s20100_s8 + $0x200] sm:$0xf]  ;;  %v13035_v50 = vld [vmem:[%s20100_s8 + $0x2a4] sm:$0xf] }
 0xb6e   : > { %9091 = vmatpush.bf16.msrb.mxu0 %v11586_v62  ;;  %v12389_v62 = vld [vmem:[%s20100_s8 + $0x280] sm:$0xf] }
 0xb6f   : > { %9104 = vmatpush.bf16.msrb.mxu1 %v11714_v54  ;;  %9117 = vmatpush.bf16.msrb.mxu2 %v11842_v6  ;;  %v13065_v54 = vld [vmem:[%s20100_s8 + $0x38c] sm:$0xf0]  ;;  %v7750_v6 = vmax.f32 %v18528_v40, %v7749_v59  ;;  %v12390_v35 = vor.u32 %v13033_v43, %v12389_v62  ;;  %v12469_v59 = vld [vmem:[%s20100_s8 + $0x320] sm:$0xf] }
 0xb70   : > { %9130 = vmatpush.bf16.msrb.mxu3 %v11970_v21  ;;  %v7861_v21 = vmax.f32 %v18543_v45, %v7860_v18  ;;  %v12965_v40 = vld [vmem:[%s20100_s8 + $0x6c] sm:$0xf0]  ;;  %v12518_v13 = vor.u32 %v13065_v54, %v12517_v7  ;;  %v12069_v18 = vld [vmem:[%s20100_s8] sm:$0xf]  ;;  %v12470_v62 = vor.u32 %v13053_v1, %v12469_v59  ;;  %v12967_v1 = vld [vmem:[%s20100_s8 + $0x84] sm:$0xf] }
 0xb71   : > { %v12997_v45 = vld [vmem:[%s20100_s8 + $0x16c] sm:$0xf0]  ;;  %v7751_v3 = vrot.slane %v7750_v6, 2  ;;  %v12118_v33 = vor.u32 %v12965_v40, %v12117_v44  ;;  %v12453_v7 = vld [vmem:[%s20100_s8 + $0x300] sm:$0xf] }
 0xb72   : > { %9092 = vmatpush.bf16.msrb.mxu0 %v11570_v56  ;;  %v13061_v56 = vld [vmem:[%s20100_s8 + $0x36c] sm:$0xf0]  ;;  %v12246_v57 = vor.u32 %v12997_v45, %v12245_v61  ;;  %v13075_v61 = vld [vmem:[%s20100_s8 + $0x3e4] sm:$0xf] }
 0xb73   : > { %9105 = vmatpush.bf16.msrb.mxu1 %v11698_v27  ;;  %9118 = vmatpush.bf16.msrb.mxu2 %v11826_v36  ;;  %v7825_v27 = vrot.slane %v7824_v26, 2  ;;  %v7862_v36 = vrot.slane %v7861_v21, 2  ;;  %v7752_v31 = vmax.f32 %v7750_v6, %v7751_v3  ;;  %v13017_v43 = vld [vmem:[%s20100_s8 + $0x20c] sm:$0xf0]  ;;  %v12979_v6 = vld [vmem:[%s20100_s8 + $0xe4] sm:$0xf] }
 0xb74   : > { %9131 = vmatpush.bf16.msrb.mxu3 %v11954_v53  ;;  %v12101_v53 = vld [vmem:[%s20100_s8 + $0x40] sm:$0xf]  ;;  %v13049_v54 = vld [vmem:[%s20100_s8 + $0x30c] sm:$0xf0]  ;;  %v12326_v40 = vor.u32 %v13017_v43, %v12325_v0  ;;  %v12186_v34 = vor.u32 %v12979_v6, %v12183_v29  ;;  %v12963_v0 = vld [vmem:[%s20100_s8 + $0x64] sm:$0xf] }
 0xb75   : > { %9093 = vmatmul.bf16.vlgmr.msrb.gmra.mxu0 %v18717_v14  ;;  %v12533_v14 = vld [vmem:[%s20100_s8 + $0x3a0] sm:$0xf]  ;;  %v7826_v19 = vmax.f32 %v7824_v26, %v7825_v27  ;;  %v12454_v45 = vor.u32 %v13049_v54, %v12453_v7  ;;  %v12167_v27 = vld [vmem:[%s20100_s8 + $0xd0] sm:$0xf0]  ;;  %v12995_v43 = vld [vmem:[%s20100_s8 + $0x164] sm:$0xf] }
 0xb76   : > { %9777 = vmatpush.bf16.msra.mxu0 %v12182_v17  ;;  %9106 = vmatmul.bf16.vlgmr.msrb.gmra.mxu1 %v18719_v32  ;;  %v12278_v32 = vor.u32 %v13005_v23, %v12277_v30  ;;  %v12961_v17 = vld [vmem:[%s20100_s8 + $0x4c] sm:$0xf0]  ;;  %v12213_v30 = vld [vmem:[%s20100_s8 + $0x120] sm:$0xf]  ;;  %v12247_v54 = vld [vmem:[%s20100_s8 + $0x170] sm:$0xf0] }
 0xb77   : > { %9790 = vmatpush.bf16.msra.mxu1 %v12310_v42  ;;  %9803 = vmatpush.bf16.msra.mxu2 %v12438_v47  ;;  %v12229_v42 = vld [vmem:[%s20100_s8 + $0x140] sm:$0xf]  ;;  %v12502_v47 = vor.u32 %v13061_v56, %v12501_v22  ;;  %v12102_v24 = vor.u32 %v12961_v17, %v12101_v53  ;;  %v12989_v23 = vld [vmem:[%s20100_s8 + $0x12c] sm:$0xf0]  ;;  %v12295_v53 = vld [vmem:[%s20100_s8 + $0x1d0] sm:$0xf0] }
 0xb78   : > { %9816 = vmatpush.bf16.msra.mxu3 %v12566_v63  ;;  %9119 = vmatmul.bf16.vlgmr.msrb.gmra.mxu2 %v18721_v12  ;;  %v12406_v12 = vor.u32 %v13037_v5, %v12405_v55  ;;  %v12485_v63 = vld [vmem:[%s20100_s8 + $0x340] sm:$0xf]  ;;  %v13021_v5 = vld [vmem:[%s20100_s8 + $0x22c] sm:$0xf0]  ;;  %v12214_v46 = vor.u32 %v12989_v23, %v12213_v30  ;;  %v13039_v17 = vld [vmem:[%s20100_s8 + $0x2c4] sm:$0xf] }
 0xb79   : > { %9132 = vmatmul.bf16.vlgmr.msrb.gmra.mxu3 %v18732_v60  ;;  %v12534_v60 = vor.u32 %v13069_v51, %v12533_v14  ;;  %v12341_v55 = vld [vmem:[%s20100_s8 + $0x220] sm:$0xf]  ;;  %v7753_v14 = vrot.slane %v7752_v31, 1  ;;  %v7790_v51 = vrot.slane %v7789_v8, 1  ;;  %v12407_v30 = vld [vmem:[%s20100_s8 + $0x2b0] sm:$0xf0] }
 0xb7a   : > { %9778 = vmatpush.bf16.msra.mxu0 %v12166_v39  ;;  %v7863_v39 = vmax.f32 %v7861_v21, %v7862_v36  ;;  %v12342_v4 = vor.u32 %v13021_v5, %v12341_v55  ;;  %v12311_v21 = vld [vmem:[%s20100_s8 + $0x1f0] sm:$0xf0]  ;;  %v13007_v36 = vld [vmem:[%s20100_s8 + $0x1c4] sm:$0xf]  ;;  %v12410_v59 = vor.u32 %v13035_v50, %v12407_v30 }
 0xb7b   : > { %9791 = vmatpush.bf16.msra.mxu1 %v12294_v2  ;;  %9804 = vmatpush.bf16.msra.mxu2 %v12422_v58  ;;  %v12230_v2 = vor.u32 %v12993_v48, %v12229_v42  ;;  %v12358_v58 = vor.u32 %v13025_v20, %v12357_v25  ;;  %v7754_v38 = vmax.f32 %v7752_v31, %v7753_v14  ;;  %v12423_v42 = vld [vmem:[%s20100_s8 + $0x2d0] sm:$0xf0]  ;;  %v13027_v6 = vld [vmem:[%s20100_s8 + $0x264] sm:$0xf] }
 0xb7c   : > { %9817 = vmatpush.bf16.msra.mxu3 %v12550_v10  ;;  %v12486_v10 = vor.u32 %v13057_v9, %v12485_v63  ;;  %v7791_v22 = vmax.f32 %v7789_v8, %v7790_v51  ;;  %v12551_v48 = vld [vmem:[%s20100_s8 + $0x3d0] sm:$0xf0]  ;;  %v12298_v31 = vor.u32 %v13007_v36, %v12295_v53  ;;  %v12426_v8 = vor.u32 %v13039_v17, %v12423_v42  ;;  %v12999_v51 = vld [vmem:[%s20100_s8 + $0x184] sm:$0xf] }
 0xb7d   : > { %v19373_v25 = vpack.c.bf16 %v7754_v38, %v7754_v38  ;;  %v12535_v23 = vld [vmem:[%s20100_s8 + $0x3b0] sm:$0xf0]  ;;  %v13019_v17 = vld [vmem:[%s20100_s8 + $0x224] sm:$0xf] }
 0xb7e   : > { %9779 = vmatpush.bf16.msra.mxu0 %v12150_v41  ;;  %v12953_v41 = vld [vmem:[%s20100_s8 + $0xc] sm:$0xf0]  ;;  %v19375_v20 = vpack.c.bf16 %v7791_v22, %v7791_v22  ;;  %v12135_v14 = vld [vmem:[%s20100_s8 + $0x90] sm:$0xf0]  ;;  %v13055_v22 = vld [vmem:[%s20100_s8 + $0x344] sm:$0xf] }
 0xb7f   : > { %9792 = vmatpush.bf16.msra.mxu1 %v12278_v32  ;;  %9805 = vmatpush.bf16.msra.mxu2 %v12406_v12  ;;  %v7827_v32 = vrot.slane %v7826_v19, 1  ;;  %v7864_v12 = vrot.slane %v7863_v39, 1  ;;  %v12070_v26 = vor.u32 %v12953_v41, %v12069_v18  ;;  %v12263_v18 = vld [vmem:[%s20100_s8 + $0x190] sm:$0xf0]  ;;  %v13031_v41 = vld [vmem:[%s20100_s8 + $0x284] sm:$0xf] }
 0xb80   : > { %9818 = vmatpush.bf16.msra.mxu3 %v12534_v60  ;;  %v12985_v60 = vld [vmem:[%s20100_s8 + $0x10c] sm:$0xf0]  ;;  %v12375_v29 = vld [vmem:[%s20100_s8 + $0x270] sm:$0xf0] }
 0xb81   : > { %v12198_v44 = vor.u32 %v12985_v60, %v12197_v11  ;;  %v7828_v28 = vmax.f32 %v7826_v19, %v7827_v32  ;;  %v12151_v19 = vld [vmem:[%s20100_s8 + $0xb0] sm:$0xf0]  ;;  %v12266_v11 = vor.u32 %v12999_v51, %v12263_v18  ;;  %v12445_v51 = vld [vmem:[%s20100_s8 + $0x2e8] sm:$0xf] }
 0xb82   : > { %9780 = vmatpush.bf16.msra.mxu0 %v12134_v16  ;;  %v13011_v16 = vld [vmem:[%s20100_s8 + $0x1e4] sm:$0xf]  ;;  %v12391_v32 = vld [vmem:[%s20100_s8 + $0x290] sm:$0xf0] }
 0xb83   : > { %9793 = vmatpush.bf16.msra.mxu1 %v12262_v52  ;;  %9806 = vmatpush.bf16.msra.mxu2 %v12390_v35  ;;  %v13043_v52 = vld [vmem:[%s20100_s8 + $0x2e4] sm:$0xf]  ;;  %v12439_v35 = vld [vmem:[%s20100_s8 + $0x2f0] sm:$0xf0]  ;;  %v12314_v56 = vor.u32 %v13011_v16, %v12311_v21  ;;  %v19377_v9 = vpack.c.bf16 %v7828_v28, %v7828_v28  ;;  %v12394_v60 = vor.u32 %v13031_v41, %v12391_v32  ;;  %v12573_v32 = vld [vmem:[%s20100_s8 + $0x3e8] sm:$0xf] }
 0xb84   : > { %9819 = vmatpush.bf16.msra.mxu3 %v12518_v13  ;;  %v12567_v13 = vld [vmem:[%s20100_s8 + $0x3f0] sm:$0xf0]  ;;  %v12442_v3 = vor.u32 %v13043_v52, %v12439_v35  ;;  %v13059_v16 = vld [vmem:[%s20100_s8 + $0x364] sm:$0xf]  ;;  %v12250_v52 = vor.u32 %v12995_v43, %v12247_v54  ;;  %v12378_v35 = vor.u32 %v13027_v6, %v12375_v29  ;;  %v12301_v43 = vld [vmem:[%s20100_s8 + $0x1c8] sm:$0xf] }
 0xb85   : > { %v12359_v38 = vld [vmem:[%s20100_s8 + $0x250] sm:$0xf0]  ;;  %v13010_v54 = vld [vmem:[%s20100_s8 + $0x1d4] sm:$0xf0]  ;;  %v12429_v6 = vld [vmem:[%s20100_s8 + $0x2c8] sm:$0xf] }
 0xb86   : > { %9781 = vmatpush.bf16.msra.mxu0 %v12118_v33  ;;  %v12975_v33 = vld [vmem:[%s20100_s8 + $0xc4] sm:$0xf]  ;;  %v12087_v36 = vld [vmem:[%s20100_s8 + $0x30] sm:$0xf0]  ;;  %v13042_v29 = vld [vmem:[%s20100_s8 + $0x2d4] sm:$0xf0] }
 0xb87   : > { %9794 = vmatpush.bf16.msra.mxu1 %v12246_v57  ;;  %9807 = vmatpush.bf16.msra.mxu2 %v12374_v49  ;;  %v12570_v57 = vor.u32 %v13075_v61, %v12567_v13  ;;  %v7865_v49 = vmax.f32 %v7863_v39, %v7864_v12  ;;  %v12170_v63 = vor.u32 %v12975_v33, %v12167_v27  ;;  %v13003_v39 = vld [vmem:[%s20100_s8 + $0x1a4] sm:$0xf]  ;;  %v12215_v53 = vld [vmem:[%s20100_s8 + $0x130] sm:$0xf0] }
 0xb88   : > { %9820 = vmatpush.bf16.msra.mxu3 %v12502_v47  ;;  %v13071_v47 = vld [vmem:[%s20100_s8 + $0x3c4] sm:$0xf]  ;;  %v12282_v5 = vor.u32 %v13003_v39, %v12279_v37  ;;  %v12343_v42 = vld [vmem:[%s20100_s8 + $0x230] sm:$0xf0] }
 0xb89   : > { %v13063_v12 = vld [vmem:[%s20100_s8 + $0x384] sm:$0xf]  ;;  %v12327_v30 = vld [vmem:[%s20100_s8 + $0x210] sm:$0xf0] }
 0xb8a   : > { %9782 = vmatpush.bf16.msra.mxu0 %v12102_v24  ;;  %v12971_v24 = vld [vmem:[%s20100_s8 + $0xa4] sm:$0xf] }
 0xb8b   : > { %9795 = vmatpush.bf16.msra.mxu1 %v12230_v2  ;;  %9808 = vmatpush.bf16.msra.mxu2 %v12358_v58  ;;  %v19389_v2 = vpack.c.bf16 %v7865_v49, %v7865_v49  ;;  %v12554_v58 = vor.u32 %v13071_v47, %v12551_v48  ;;  %v12154_v55 = vor.u32 %v12971_v24, %v12151_v19  ;;  %v12991_v61 = vld [vmem:[%s20100_s8 + $0x144] sm:$0xf]  ;;  %v12471_v48 = vld [vmem:[%s20100_s8 + $0x330] sm:$0xf0] }
 0xb8c   : > { %9821 = vmatpush.bf16.msra.mxu3 %v12486_v10  ;;  %v13067_v10 = vld [vmem:[%s20100_s8 + $0x3a4] sm:$0xf]  ;;  %v12346_v19 = vor.u32 %v13019_v17, %v12343_v42  ;;  %v12269_v17 = vld [vmem:[%s20100_s8 + $0x188] sm:$0xf] }
 0xb8d   : > { %v12955_v27 = vld [vmem:[%s20100_s8 + $0x24] sm:$0xf] }
 0xb8e   : > { %9783 = vmatpush.bf16.msra.mxu0 %v12086_v15  ;;  %v12538_v15 = vor.u32 %v13067_v10, %v12535_v23  ;;  %v13051_v47 = vld [vmem:[%s20100_s8 + $0x324] sm:$0xf]  ;;  %v12455_v23 = vld [vmem:[%s20100_s8 + $0x310] sm:$0xf0] }
 0xb8f   : > { %9796 = vmatpush.bf16.msra.mxu1 %v12214_v46  ;;  %9809 = vmatpush.bf16.msra.mxu2 %v12342_v4  ;;  %v12519_v46 = vld [vmem:[%s20100_s8 + $0x390] sm:$0xf0]  ;;  %v12138_v4 = vor.u32 %v12967_v1, %v12135_v14  ;;  %v12983_v39 = vld [vmem:[%s20100_s8 + $0x104] sm:$0xf]  ;;  %v12474_v50 = vor.u32 %v13051_v47, %v12471_v48  ;;  %v13014_v14 = vld [vmem:[%s20100_s8 + $0x1f4] sm:$0xf0] }
 0xb90   : > { %9822 = vmatpush.bf16.msra.mxu3 %v12470_v62  ;;  %v12119_v62 = vld [vmem:[%s20100_s8 + $0x70] sm:$0xf0]  ;;  %v12522_v7 = vor.u32 %v13063_v12, %v12519_v46  ;;  %v13015_v37 = vld [vmem:[%s20100_s8 + $0x204] sm:$0xf]  ;;  %v13078_v12 = vld [vmem:[%s20100_s8 + $0x3f4] sm:$0xf0] }
 0xb91   : > { %v12122_v21 = vor.u32 %v12963_v0, %v12119_v62  ;;  %v13047_v10 = vld [vmem:[%s20100_s8 + $0x304] sm:$0xf]  ;;  %v12330_v41 = vor.u32 %v13015_v37, %v12327_v30  ;;  %v12173_v0 = vld [vmem:[%s20100_s8 + $0xc8] sm:$0xf]  ;;  %v12978_v62 = vld [vmem:[%s20100_s8 + $0xd4] sm:$0xf0] }
 0xb92   : > { %9784 = vmatpush.bf16.msra.mxu0 %v12070_v26  ;;  %v12503_v26 = vld [vmem:[%s20100_s8 + $0x370] sm:$0xf0]  ;;  %v12458_v46 = vor.u32 %v13047_v10, %v12455_v23  ;;  %v13002_v47 = vld [vmem:[%s20100_s8 + $0x194] sm:$0xf0]  ;;  %v12397_v48 = vld [vmem:[%s20100_s8 + $0x288] sm:$0xf] }
 0xb93   : > { %9797 = vmatpush.bf16.msra.mxu1 %v12198_v44  ;;  %9810 = vmatpush.bf16.msra.mxu2 %v12326_v40  ;;  %v12959_v44 = vld [vmem:[%s20100_s8 + $0x44] sm:$0xf]  ;;  %v12103_v40 = vld [vmem:[%s20100_s8 + $0x50] sm:$0xf0]  ;;  %v12506_v13 = vor.u32 %v13059_v16, %v12503_v26  ;;  %v12557_v16 = vld [vmem:[%s20100_s8 + $0x3c8] sm:$0xf] }
 0xb94   : > { %9823 = vmatpush.bf16.msra.mxu3 %v12454_v45  ;;  %v12231_v45 = vld [vmem:[%s20100_s8 + $0x150] sm:$0xf0]  ;;  %v13074_v26 = vld [vmem:[%s20100_s8 + $0x3d4] sm:$0xf0]  ;;  %v12125_v30 = vld [vmem:[%s20100_s8 + $0x68] sm:$0xf] }
 0xb95   : > { %9785 = vmatmul.bf16.vlgmr.msra.gmra.mxu0 %v19373_v25  ;;  %v12234_v28 = vor.u32 %v12991_v61, %v12231_v45  ;;  %v12285_v61 = vld [vmem:[%s20100_s8 + $0x1a8] sm:$0xf]  ;;  %v12558_v45 = vor.u32 %v13074_v26, %v12557_v16  ;;  %v12966_v10 = vld [vmem:[%s20100_s8 + $0x74] sm:$0xf0] }
 0xb96   : > { %9829 = vmatpush.bf16.msrb.mxu0 %v12186_v34  ;;  %9798 = vmatmul.bf16.vlgmr.msra.gmra.mxu1 %v19375_v20  ;;  %v13023_v34 = vld [vmem:[%s20100_s8 + $0x244] sm:$0xf]  ;;  %v12253_v23 = vld [vmem:[%s20100_s8 + $0x168] sm:$0xf] }
 0xb97   : > { %9842 = vmatpush.bf16.msrb.mxu1 %v12314_v56  ;;  %9855 = vmatpush.bf16.msrb.mxu2 %v12442_v3  ;;  %v12487_v56 = vld [vmem:[%s20100_s8 + $0x350] sm:$0xf0]  ;;  %v12106_v3 = vor.u32 %v12959_v44, %v12103_v40  ;;  %v12362_v33 = vor.u32 %v13023_v34, %v12359_v38  ;;  %v12157_v44 = vld [vmem:[%s20100_s8 + $0xa8] sm:$0xf]  ;;  %v12974_v40 = vld [vmem:[%s20100_s8 + $0xb4] sm:$0xf0] }
 0xb98   : > { %9868 = vmatpush.bf16.msrb.mxu3 %v12570_v57  ;;  %9811 = vmatmul.bf16.vlgmr.msra.gmra.mxu2 %v19377_v9  ;;  %v12987_v57 = vld [vmem:[%s20100_s8 + $0x124] sm:$0xf]  ;;  %v12490_v49 = vor.u32 %v13055_v22, %v12487_v56  ;;  %v13006_v34 = vld [vmem:[%s20100_s8 + $0x1b4] sm:$0xf0]  ;;  %v12413_v38 = vld [vmem:[%s20100_s8 + $0x2a8] sm:$0xf] }
 0xb99   : > { %9824 = vmatmul.bf16.vlgmr.msra.gmra.mxu3 %v19389_v2  ;;  %v12218_v24 = vor.u32 %v12987_v57, %v12215_v53  ;;  %v13038_v22 = vld [vmem:[%s20100_s8 + $0x2b4] sm:$0xf0] }
 0xb9a   : > { %9830 = vmatpush.bf16.msrb.mxu0 %v12170_v63  ;;  %v12090_v63 = vor.u32 %v12955_v27, %v12087_v36  ;;  %v12158_v27 = vor.u32 %v12974_v40, %v12157_v44  ;;  %v12286_v36 = vor.u32 %v13006_v34, %v12285_v61  ;;  %v12414_v57 = vor.u32 %v13038_v22, %v12413_v38  ;;  %v12970_v53 = vld [vmem:[%s20100_s8 + $0x94] sm:$0xf0]  ;;  %v12221_v40 = vld [vmem:[%s20100_s8 + $0x128] sm:$0xf] }
 0xb9b   : > { %9843 = vmatpush.bf16.msrb.mxu1 %v12298_v31  ;;  %9856 = vmatpush.bf16.msrb.mxu2 %v12426_v8  ;;  %v12951_v31 = vld [vmem:[%s20100_s8 + $0x4] sm:$0xf]  ;;  %v12071_v8 = vld [vmem:[%s20100_s8 + $0x10] sm:$0xf0]  ;;  %v12958_v44 = vld [vmem:[%s20100_s8 + $0x34] sm:$0xf0] }
 0xb9c   : > { %9869 = vmatpush.bf16.msrb.mxu3 %v12554_v58  ;;  %v12199_v58 = vld [vmem:[%s20100_s8 + $0x110] sm:$0xf0]  ;;  %v12074_v1 = vor.u32 %v12951_v31, %v12071_v8  ;;  %v12525_v31 = vld [vmem:[%s20100_s8 + $0x388] sm:$0xf]  ;;  %v13066_v8 = vld [vmem:[%s20100_s8 + $0x394] sm:$0xf0] }
 0xb9d   : > { %v12202_v18 = vor.u32 %v12983_v39, %v12199_v58  ;;  %v12270_v39 = vor.u32 %v13002_v47, %v12269_v17  ;;  %v13022_v34 = vld [vmem:[%s20100_s8 + $0x234] sm:$0xf0]  ;;  %v12477_v38 = vld [vmem:[%s20100_s8 + $0x328] sm:$0xf] }
 0xb9e   : > { %9831 = vmatpush.bf16.msrb.mxu0 %v12154_v55  ;;  %v12189_v55 = vld [vmem:[%s20100_s8 + $0xe8] sm:$0xf]  ;;  %v13054_v22 = vld [vmem:[%s20100_s8 + $0x334] sm:$0xf0] }
 0xb9f   : > { %9844 = vmatpush.bf16.msrb.mxu1 %v12282_v5  ;;  %9857 = vmatpush.bf16.msrb.mxu2 %v12410_v59  ;;  %v12982_v5 = vld [vmem:[%s20100_s8 + $0xf4] sm:$0xf0]  ;;  %v12317_v59 = vld [vmem:[%s20100_s8 + $0x1e8] sm:$0xf]  ;;  %v12478_v47 = vor.u32 %v13054_v22, %v12477_v38 }
 0xba0   : > { %9870 = vmatpush.bf16.msrb.mxu3 %v12538_v15  ;;  %v13046_v15 = vld [vmem:[%s20100_s8 + $0x2f4] sm:$0xf0] }
 0xba1   : > { %v12986_v17 = vld [vmem:[%s20100_s8 + $0x114] sm:$0xf0] }
 0xba2   : > { %9832 = vmatpush.bf16.msrb.mxu0 %v12138_v4  ;;  %v12190_v4 = vor.u32 %v12982_v5, %v12189_v55  ;;  %v12526_v5 = vor.u32 %v13066_v8, %v12525_v31  ;;  %v13050_v31 = vld [vmem:[%s20100_s8 + $0x314] sm:$0xf0]  ;;  %v12980_v8 = vld [vmem:[%s20100_s8 + $0xec] sm:$0xf] }
 0xba3   : > { %9845 = vmatpush.bf16.msrb.mxu1 %v12266_v11  ;;  %9858 = vmatpush.bf16.msrb.mxu2 %v12394_v60  ;;  %v12318_v11 = vor.u32 %v13014_v14, %v12317_v59  ;;  %v12446_v60 = vor.u32 %v13046_v15, %v12445_v51  ;;  %v12998_v59 = vld [vmem:[%s20100_s8 + $0x174] sm:$0xf0] }
 0xba4   : > { %9871 = vmatpush.bf16.msrb.mxu3 %v12522_v7  ;;  %v12574_v7 = vor.u32 %v13078_v12, %v12573_v32  ;;  %v13030_v14 = vld [vmem:[%s20100_s8 + $0x274] sm:$0xf0]  ;;  %v12126_v32 = vor.u32 %v12966_v10, %v12125_v30  ;;  %v12254_v12 = vor.u32 %v12998_v59, %v12253_v23  ;;  %v13076_v23 = vld [vmem:[%s20100_s8 + $0x3ec] sm:$0xf] }
 0xba6   : > { %9833 = vmatpush.bf16.msrb.mxu0 %v12122_v21  ;;  %v12174_v21 = vor.u32 %v12978_v62, %v12173_v0  ;;  %v12994_v62 = vld [vmem:[%s20100_s8 + $0x154] sm:$0xf0] }
 0xba7   : > { %9846 = vmatpush.bf16.msrb.mxu1 %v12250_v52  ;;  %9859 = vmatpush.bf16.msrb.mxu2 %v12378_v35  ;;  %v12302_v52 = vor.u32 %v13010_v54, %v12301_v43  ;;  %v12430_v35 = vor.u32 %v13042_v29, %v12429_v6  ;;  %v12365_v43 = vld [vmem:[%s20100_s8 + $0x248] sm:$0xf]  ;;  %v13058_v6 = vld [vmem:[%s20100_s8 + $0x354] sm:$0xf0] }
 0xba8   : > { %9872 = vmatpush.bf16.msrb.mxu3 %v12506_v13  ;;  %v12493_v54 = vld [vmem:[%s20100_s8 + $0x348] sm:$0xf] }
 0xba9   : > { %v8938_v13 = vpop.f32.mrf.mxu0  ;;  %v12494_v61 = vor.u32 %v13058_v6, %v12493_v54  ;;  %v13072_v54 = vld [vmem:[%s20100_s8 + $0x3cc] sm:$0xf]  ;;  %v12559_v6 = vld [vmem:[%s20100_s8 + $0x3d8] sm:$0xf0] }
 0xbaa   : > { %9834 = vmatpush.bf16.msrb.mxu0 %v12106_v3  ;;  %v8951_v56 = vpop.f32.mrf.mxu1  ;;  %v12541_v3 = vld [vmem:[%s20100_s8 + $0x3a8] sm:$0xf] }
 0xbab   : > { %9847 = vmatpush.bf16.msrb.mxu1 %v12234_v28  ;;  %9860 = vmatpush.bf16.msrb.mxu2 %v12362_v33  ;;  %v13070_v28 = vld [vmem:[%s20100_s8 + $0x3b4] sm:$0xf0]  ;;  %v8952_v33 = vadd.f32 %v8951_v56, %v8938_v13 }
 0xbac   : > { %9873 = vmatpush.bf16.msrb.mxu3 %v12490_v49  ;;  %v12141_v49 = vld [vmem:[%s20100_s8 + $0x88] sm:$0xf]  ;;  %v12542_v42 = vor.u32 %v13070_v28, %v12541_v3  ;;  %v12990_v13 = vld [vmem:[%s20100_s8 + $0x134] sm:$0xf0] }
 0xbae   : > { %9835 = vmatpush.bf16.msrb.mxu0 %v12090_v63  ;;  %v13034_v63 = vld [vmem:[%s20100_s8 + $0x294] sm:$0xf0] }
 0xbaf   : > { %9848 = vmatpush.bf16.msrb.mxu1 %v12218_v24  ;;  %9861 = vmatpush.bf16.msrb.mxu2 %v12346_v19  ;;  %v12142_v24 = vor.u32 %v12970_v53, %v12141_v49  ;;  %v12398_v58 = vor.u32 %v13034_v63, %v12397_v48  ;;  %v12205_v53 = vld [vmem:[%s20100_s8 + $0x108] sm:$0xf]  ;;  %v13018_v48 = vld [vmem:[%s20100_s8 + $0x214] sm:$0xf0] }
 0xbb0   : > { %9874 = vmatpush.bf16.msrb.mxu3 %v12474_v50  ;;  %v8964_v19 = vpop.f32.mrf.mxu2  ;;  %v12461_v63 = vld [vmem:[%s20100_s8 + $0x308] sm:$0xf]  ;;  %v12206_v30 = vor.u32 %v12986_v17, %v12205_v53  ;;  %v13032_v53 = vld [vmem:[%s20100_s8 + $0x28c] sm:$0xf]  ;;  %v12399_v17 = vld [vmem:[%s20100_s8 + $0x298] sm:$0xf0] }
 0xbb1   : > { %v8965_v37 = vadd.f32 %v8964_v19, %v8952_v33  ;;  %v8977_v50 = vpop.f32.mrf.mxu3  ;;  %v8940_v55 = vpop.f32.mrf.mxu0  ;;  %v12077_v33 = vld [vmem:[%s20100_s8 + $0x8] sm:$0xf]  ;;  %v13012_v19 = vld [vmem:[%s20100_s8 + $0x1ec] sm:$0xf] }
 0xbb2   : > { %9836 = vmatpush.bf16.msrb.mxu0 %v12074_v1  ;;  %v12381_v1 = vld [vmem:[%s20100_s8 + $0x268] sm:$0xf]  ;;  %v8953_v51 = vpop.f32.mrf.mxu1  ;;  %v12575_v55 = vld [vmem:[%s20100_s8 + $0x3f8] sm:$0xf0] }
 0xbb3   : > { %9849 = vmatpush.bf16.msrb.mxu1 %v12202_v18  ;;  %9862 = vmatpush.bf16.msrb.mxu2 %v12330_v41  ;;  %v19647_v15 = vadd.f32 %v8977_v50, %v8965_v37  ;;  %v12509_v18 = vld [vmem:[%s20100_s8 + $0x368] sm:$0xf]  ;;  %v13062_v41 = vld [vmem:[%s20100_s8 + $0x374] sm:$0xf0]  ;;  %v13044_v37 = vld [vmem:[%s20100_s8 + $0x2ec] sm:$0xf] }
 0xbb4   : > { %9875 = vmatpush.bf16.msrb.mxu3 %v12458_v46  ;;  %v12382_v46 = vor.u32 %v13030_v14, %v12381_v1  ;;  %v12510_v0 = vor.u32 %v13062_v41, %v12509_v18  ;;  %v12447_v50 = vld [vmem:[%s20100_s8 + $0x2f8] sm:$0xf0] }
 0xbb5   : > { %9837 = vmatmul.bf16.vlgmr.msrb.gmra.mxu0 %v19373_v25  ;;  %v12450_v51 = vor.u32 %v13044_v37, %v12447_v50  ;;  %v12996_v37 = vld [vmem:[%s20100_s8 + $0x16c] sm:$0xf] }
 0xbb6   : > { %9881 = vmatpush.bf16.msra.mxu0 %v12190_v4  ;;  %9850 = vmatmul.bf16.vlgmr.msrb.gmra.mxu1 %v19375_v20  ;;  %v12109_v4 = vld [vmem:[%s20100_s8 + $0x48] sm:$0xf] }
 0xbb7   : > { %9894 = vmatpush.bf16.msra.mxu1 %v12318_v11  ;;  %9907 = vmatpush.bf16.msra.mxu2 %v12446_v60  ;;  %v12962_v11 = vld [vmem:[%s20100_s8 + $0x54] sm:$0xf0]  ;;  %v12237_v60 = vld [vmem:[%s20100_s8 + $0x148] sm:$0xf] }
 0xbb8   : > { %9920 = vmatpush.bf16.msra.mxu3 %v12574_v7  ;;  %9863 = vmatmul.bf16.vlgmr.msrb.gmra.mxu2 %v19377_v9  ;;  %v13026_v7 = vld [vmem:[%s20100_s8 + $0x254] sm:$0xf0]  ;;  %v12110_v29 = vor.u32 %v12962_v11, %v12109_v4  ;;  %v8966_v16 = vpop.f32.mrf.mxu2  ;;  %v12238_v26 = vor.u32 %v12994_v62, %v12237_v60  ;;  %v13008_v4 = vld [vmem:[%s20100_s8 + $0x1cc] sm:$0xf]  ;;  %v12578_v11 = vor.u32 %v13076_v23, %v12575_v55  ;;  %v12383_v23 = vld [vmem:[%s20100_s8 + $0x278] sm:$0xf0] }
 0xbb9   : > { %9876 = vmatmul.bf16.vlgmr.msrb.gmra.mxu3 %v19389_v2  ;;  %v8990_v56 = vpop.f32.mrf.mxu0  ;;  %v13040_v62 = vld [vmem:[%s20100_s8 + $0x2cc] sm:$0xf] }
 0xbba   : > { %9882 = vmatpush.bf16.msra.mxu0 %v12174_v21  ;;  %v12366_v21 = vor.u32 %v13026_v7, %v12365_v43  ;;  %v9003_v28 = vpop.f32.mrf.mxu1  ;;  %v12431_v43 = vld [vmem:[%s20100_s8 + $0x2d8] sm:$0xf0]  ;;  %v13060_v55 = vld [vmem:[%s20100_s8 + $0x36c] sm:$0xf] }
 0xbbb   : > { %9895 = vmatpush.bf16.msra.mxu1 %v12302_v52  ;;  %9908 = vmatpush.bf16.msra.mxu2 %v12430_v35  ;;  %v8979_v52 = vpop.f32.mrf.mxu3  ;;  %v12093_v35 = vld [vmem:[%s20100_s8 + $0x28] sm:$0xf]  ;;  %v9004_v49 = vadd.f32 %v9003_v28, %v8990_v56 }
 0xbbc   : > { %9921 = vmatpush.bf16.msra.mxu3 %v12558_v45  ;;  %v12349_v45 = vld [vmem:[%s20100_s8 + $0x228] sm:$0xf]  ;;  %v12094_v3 = vor.u32 %v12958_v44, %v12093_v35  ;;  %v12159_v52 = vld [vmem:[%s20100_s8 + $0xb8] sm:$0xf0]  ;;  %v13004_v35 = vld [vmem:[%s20100_s8 + $0x1ac] sm:$0xf]  ;;  %v12562_v44 = vor.u32 %v13072_v54, %v12559_v6 }
 0xbbd   : > { %v12495_v54 = vld [vmem:[%s20100_s8 + $0x358] sm:$0xf0] }
 0xbbe   : > { %9883 = vmatpush.bf16.msra.mxu0 %v12158_v27  ;;  %v12954_v27 = vld [vmem:[%s20100_s8 + $0x14] sm:$0xf0] }
 0xbbf   : > { %9896 = vmatpush.bf16.msra.mxu1 %v12286_v36  ;;  %9909 = vmatpush.bf16.msra.mxu2 %v12414_v57  ;;  %v12222_v36 = vor.u32 %v12990_v13, %v12221_v40  ;;  %v12350_v57 = vor.u32 %v13022_v34, %v12349_v45  ;;  %v12287_v40 = vld [vmem:[%s20100_s8 + $0x1b8] sm:$0xf0]  ;;  %v13068_v45 = vld [vmem:[%s20100_s8 + $0x3ac] sm:$0xf] }
 0xbc0   : > { %9922 = vmatpush.bf16.msra.mxu3 %v12542_v42  ;;  %v12333_v42 = vld [vmem:[%s20100_s8 + $0x208] sm:$0xf]  ;;  %v9016_v1 = vpop.f32.mrf.mxu2  ;;  %v12415_v13 = vld [vmem:[%s20100_s8 + $0x2b8] sm:$0xf0]  ;;  %v12290_v56 = vor.u32 %v13004_v35, %v12287_v40 }
 0xbc1   : > { %v12334_v10 = vor.u32 %v13018_v48, %v12333_v42  ;;  %v9017_v18 = vadd.f32 %v9016_v1, %v9004_v49  ;;  %v12543_v34 = vld [vmem:[%s20100_s8 + $0x3b8] sm:$0xf0] }
 0xbc2   : > { %9884 = vmatpush.bf16.msra.mxu0 %v12142_v24  ;;  %v12191_v24 = vld [vmem:[%s20100_s8 + $0xf8] sm:$0xf0]  ;;  %v9005_v60 = vpop.f32.mrf.mxu1 }
 0xbc3   : > { %9897 = vmatpush.bf16.msra.mxu1 %v12270_v39  ;;  %9910 = vmatpush.bf16.msra.mxu2 %v12398_v58  ;;  %v12078_v39 = vor.u32 %v12954_v27, %v12077_v33  ;;  %v12319_v58 = vld [vmem:[%s20100_s8 + $0x1f8] sm:$0xf0]  ;;  %v12194_v59 = vor.u32 %v12980_v8, %v12191_v24  ;;  %v9029_v41 = vpop.f32.mrf.mxu3  ;;  %v12968_v33 = vld [vmem:[%s20100_s8 + $0x8c] sm:$0xf] }
 0xbc4   : > { %9923 = vmatpush.bf16.msra.mxu3 %v12526_v5  ;;  %v12462_v5 = vor.u32 %v13050_v31, %v12461_v63  ;;  %v12322_v14 = vor.u32 %v13012_v19, %v12319_v58  ;;  %v19769_v7 = vadd.f32 %v9029_v41, %v9017_v18  ;;  %v12143_v27 = vld [vmem:[%s20100_s8 + $0x98] sm:$0xf0]  ;;  %v12402_v19 = vor.u32 %v13032_v53, %v12399_v17  ;;  %v12992_v41 = vld [vmem:[%s20100_s8 + $0x14c] sm:$0xf] }
 0xbc5   : > { %v12271_v49 = vld [vmem:[%s20100_s8 + $0x198] sm:$0xf0]  ;;  %v12146_v31 = vor.u32 %v12968_v33, %v12143_v27  ;;  %v12984_v27 = vld [vmem:[%s20100_s8 + $0x10c] sm:$0xf] }
 0xbc6   : > { %9885 = vmatpush.bf16.msra.mxu0 %v12126_v32  ;;  %v8992_v32 = vpop.f32.mrf.mxu0  ;;  %v12527_v48 = vld [vmem:[%s20100_s8 + $0x398] sm:$0xf0]  ;;  %v13016_v53 = vld [vmem:[%s20100_s8 + $0x20c] sm:$0xf] }
 0xbc7   : > { %9898 = vmatpush.bf16.msra.mxu1 %v12254_v12  ;;  %9911 = vmatpush.bf16.msra.mxu2 %v12382_v46  ;;  %v12976_v12 = vld [vmem:[%s20100_s8 + $0xcc] sm:$0xf]  ;;  %v12175_v46 = vld [vmem:[%s20100_s8 + $0xd8] sm:$0xf0] }
 0xbc8   : > { %9924 = vmatpush.bf16.msra.mxu3 %v12510_v0  ;;  %v12303_v0 = vld [vmem:[%s20100_s8 + $0x1d8] sm:$0xf0]  ;;  %v9018_v22 = vpop.f32.mrf.mxu2 }
 0xbc9   : > { %v12306_v16 = vor.u32 %v13008_v4, %v12303_v0  ;;  %v12127_v58 = vld [vmem:[%s20100_s8 + $0x78] sm:$0xf0]  ;;  %v13024_v4 = vld [vmem:[%s20100_s8 + $0x24c] sm:$0xf] }
 0xbca   : > { %9886 = vmatpush.bf16.msra.mxu0 %v12110_v29  ;;  %v12178_v29 = vor.u32 %v12976_v12, %v12175_v46  ;;  %v12111_v18 = vld [vmem:[%s20100_s8 + $0x58] sm:$0xf0] }
 0xbcb   : > { %9899 = vmatpush.bf16.msra.mxu1 %v12238_v26  ;;  %9912 = vmatpush.bf16.msra.mxu2 %v12366_v21  ;;  %v12434_v26 = vor.u32 %v13040_v62, %v12431_v43  ;;  %v12972_v21 = vld [vmem:[%s20100_s8 + $0xac] sm:$0xf]  ;;  %v9031_v28 = vpop.f32.mrf.mxu3  ;;  %v12239_v46 = vld [vmem:[%s20100_s8 + $0x158] sm:$0xf0] }
 0xbcc   : > { %9925 = vmatpush.bf16.msra.mxu3 %v12494_v61  ;;  %v13036_v61 = vld [vmem:[%s20100_s8 + $0x2ac] sm:$0xf]  ;;  %v12162_v38 = vor.u32 %v12972_v21, %v12159_v52  ;;  %v12095_v35 = vld [vmem:[%s20100_s8 + $0x38] sm:$0xf0] }
 0xbcd   : > { %v13056_v43 = vld [vmem:[%s20100_s8 + $0x34c] sm:$0xf]  ;;  %v12079_v33 = vld [vmem:[%s20100_s8 + $0x18] sm:$0xf0] }
 0xbce   : > { %9887 = vmatpush.bf16.msra.mxu0 %v12094_v3  ;;  %v12418_v3 = vor.u32 %v13036_v61, %v12415_v13  ;;  %v12956_v52 = vld [vmem:[%s20100_s8 + $0x2c] sm:$0xf]  ;;  %v12498_v40 = vor.u32 %v13056_v43, %v12495_v54  ;;  %v12223_v61 = vld [vmem:[%s20100_s8 + $0x138] sm:$0xf0] }
 0xbcf   : > { %9900 = vmatpush.bf16.msra.mxu1 %v12222_v36  ;;  %9913 = vmatpush.bf16.msra.mxu2 %v12350_v57  ;;  %v13000_v36 = vld [vmem:[%s20100_s8 + $0x18c] sm:$0xf]  ;;  %v12546_v57 = vor.u32 %v13068_v45, %v12543_v34  ;;  %v12351_v45 = vld [vmem:[%s20100_s8 + $0x238] sm:$0xf0]  ;;  %v12098_v22 = vor.u32 %v12956_v52, %v12095_v35 }
 0xbd0   : > { %9926 = vmatpush.bf16.msra.mxu3 %v12478_v47  ;;  %v13064_v47 = vld [vmem:[%s20100_s8 + $0x38c] sm:$0xf]  ;;  %v12274_v24 = vor.u32 %v13000_v36, %v12271_v49  ;;  %v12207_v49 = vld [vmem:[%s20100_s8 + $0x118] sm:$0xf0] }
 0xbd1   : > { %v12530_v50 = vor.u32 %v13064_v47, %v12527_v48  ;;  %v13020_v13 = vld [vmem:[%s20100_s8 + $0x22c] sm:$0xf]  ;;  %v12335_v17 = vld [vmem:[%s20100_s8 + $0x218] sm:$0xf0] }
 0xbd2   : > { %9888 = vmatpush.bf16.msra.mxu0 %v12078_v39  ;;  %v9042_v42 = vpop.f32.mrf.mxu0  ;;  %v12964_v39 = vld [vmem:[%s20100_s8 + $0x6c] sm:$0xf]  ;;  %v12463_v48 = vld [vmem:[%s20100_s8 + $0x318] sm:$0xf0] }
 0xbd3   : > { %9901 = vmatpush.bf16.msra.mxu1 %v12206_v30  ;;  %9914 = vmatpush.bf16.msra.mxu2 %v12334_v10  ;;  %v9055_v63 = vpop.f32.mrf.mxu1  ;;  %v12255_v30 = vld [vmem:[%s20100_s8 + $0x178] sm:$0xf0]  ;;  %v13028_v10 = vld [vmem:[%s20100_s8 + $0x26c] sm:$0xf] }
 0xbd4   : > { %9927 = vmatpush.bf16.msra.mxu3 %v12462_v5  ;;  %v9056_v8 = vadd.f32 %v9055_v63, %v9042_v42  ;;  %v12511_v5 = vld [vmem:[%s20100_s8 + $0x378] sm:$0xf0]  ;;  %v12258_v1 = vor.u32 %v12996_v37, %v12255_v30  ;;  %v13052_v34 = vld [vmem:[%s20100_s8 + $0x32c] sm:$0xf]  ;;  %v13211_v30 = vld [vmem:[%s20102_s10 + $0x20] sm:$0xff] }
 0xbd5   : > { %9889 = vmatmul.bf16.vlgmr.msra.gmra.mxu0 %v19373_v25  ;;  %v12514_v32 = vor.u32 %v13060_v55, %v12511_v5  ;;  %v12952_v28 = vld [vmem:[%s20100_s8 + $0xc] sm:$0xf] }
 0xbd6   : > { %9933 = vmatpush.bf16.msrb.mxu0 %v12194_v59  ;;  %9902 = vmatmul.bf16.vlgmr.msra.gmra.mxu1 %v19375_v20  ;;  %v12130_v59 = vor.u32 %v12964_v39, %v12127_v58  ;;  %v13048_v47 = vld [vmem:[%s20100_s8 + $0x30c] sm:$0xf]  ;;  %v12082_v63 = vor.u32 %v12952_v28, %v12079_v33  ;;  %v13213_v39 = vld [vmem:[%s20102_s10 + $0x30] sm:$0xff]  ;;  %v13227_v28 = vld [vmem:[%s20102_s10 + $0xa0] sm:$0xff] }
 0xbd7   : > { %9946 = vmatpush.bf16.msrb.mxu1 %v12322_v14  ;;  %9959 = vmatpush.bf16.msrb.mxu2 %v12450_v51  ;;  %v12386_v14 = vor.u32 %v13028_v10, %v12383_v23  ;;  %v12960_v51 = vld [vmem:[%s20100_s8 + $0x4c] sm:$0xf] }
 0xbd8   : > { %9972 = vmatpush.bf16.msrb.mxu3 %v12578_v11  ;;  %9915 = vmatmul.bf16.vlgmr.msra.gmra.mxu2 %v19377_v9  ;;  %v12367_v11 = vld [vmem:[%s20100_s8 + $0x258] sm:$0xf0]  ;;  %v13212_v58 = vld [vmem:[%s20102_s10 + $0x28] sm:$0xff] }
 0xbd9   : > { %9928 = vmatmul.bf16.vlgmr.msra.gmra.mxu3 %v19389_v2  ;;  %v12370_v21 = vor.u32 %v13024_v4, %v12367_v11 }
 0xbda   : > { %9934 = vmatpush.bf16.msrb.mxu0 %v12178_v29  ;;  %v9044_v62 = vpop.f32.mrf.mxu0  ;;  %v12114_v29 = vor.u32 %v12960_v51, %v12111_v18  ;;  %v13208_v18 = vld [vmem:[%s20102_s10 + $0x8] sm:$0xff] }
 0xbdb   : > { %9947 = vmatpush.bf16.msrb.mxu1 %v12306_v16  ;;  %9960 = vmatpush.bf16.msrb.mxu2 %v12434_v26  ;;  %v9068_v12 = vpop.f32.mrf.mxu2  ;;  %v9057_v6 = vpop.f32.mrf.mxu1  ;;  %v12242_v26 = vor.u32 %v12992_v41, %v12239_v46  ;;  %v13221_v41 = vld [vmem:[%s20102_s10 + $0x70] sm:$0xff]  ;;  %v13219_v46 = vld [vmem:[%s20102_s10 + $0x60] sm:$0xff] }
 0xbdc   : > { %9973 = vmatpush.bf16.msrb.mxu3 %v12562_v44  ;;  %v9069_v60 = vadd.f32 %v9068_v12, %v9056_v8  ;;  %v9081_v0 = vpop.f32.mrf.mxu3  ;;  %v12988_v44 = vld [vmem:[%s20100_s8 + $0x12c] sm:$0xf]  ;;  %v12338_v8 = vor.u32 %v13016_v53, %v12335_v17  ;;  %v19976_v62 = vld [vmem:[%s20101_s9] sm:$0xf] }
 0xbdd   : > { %v13220_v12 = vld [vmem:[%s20102_s10 + $0x68] sm:$0xff] }
 0xbde   : > { %9935 = vmatpush.bf16.msrb.mxu0 %v12162_v38  ;;  %v19877_v16 = vadd.f32 %v9081_v0, %v9069_v60  ;;  %v12479_v38 = vld [vmem:[%s20100_s8 + $0x338] sm:$0xf0] }
 0xbdf   : > { %9948 = vmatpush.bf16.msrb.mxu1 %v12290_v56  ;;  %9961 = vmatpush.bf16.msrb.mxu2 %v12418_v3  ;;  %v12226_v56 = vor.u32 %v12988_v44, %v12223_v61  ;;  %v12354_v3 = vor.u32 %v13020_v13, %v12351_v45  ;;  %v12482_v36 = vor.u32 %v13052_v34, %v12479_v38  ;;  %v13218_v60 = vld [vmem:[%s20102_s10 + $0x58] sm:$0xff]  ;;  %v13216_v34 = vld [vmem:[%s20102_s10 + $0x48] sm:$0xff] }
 0xbe0   : > { %9974 = vmatpush.bf16.msrb.mxu3 %v12546_v57  ;;  %v13230_v38 = vld [vmem:[%s20102_s10 + $0xb8] sm:$0xff] }
 0xbe2   : > { %9936 = vmatpush.bf16.msrb.mxu0 %v12146_v31  ;;  %v12210_v31 = vor.u32 %v12984_v27, %v12207_v49 }
 0xbe3   : > { %9949 = vmatpush.bf16.msrb.mxu1 %v12274_v24  ;;  %9962 = vmatpush.bf16.msrb.mxu2 %v12402_v19  ;;  %v9070_v57 = vpop.f32.mrf.mxu2  ;;  %v12466_v24 = vor.u32 %v13048_v47, %v12463_v48  ;;  %v13214_v19 = vld [vmem:[%s20102_s10 + $0x38] sm:$0xff]  ;;  %v9988_v47 = vperm.slane %v19976_v62, 1 }
 0xbe4   : > { %9975 = vmatpush.bf16.msrb.mxu3 %v12530_v50  ;;  %v9083_v42 = vpop.f32.mrf.mxu3 }
 0xbe6   : > { %9937 = vmatpush.bf16.msrb.mxu0 %v12130_v59  ;;  %v13209_v59 = vld [vmem:[%s20102_s10 + $0x10] sm:$0xff] }
 0xbe7   : > { %9950 = vmatpush.bf16.msrb.mxu1 %v12258_v1  ;;  %9963 = vmatpush.bf16.msrb.mxu2 %v12386_v14  ;;  %v13222_v14 = vld [vmem:[%s20102_s10 + $0x78] sm:$0xff] }
 0xbe8   : > { %9976 = vmatpush.bf16.msrb.mxu3 %v12514_v32  ;;  %v13207_v32 = vld [vmem:[%s20102_s10] sm:$0xff] }
 0xbea   : > { %9938 = vmatpush.bf16.msrb.mxu0 %v12114_v29 }
 0xbeb   : > { %9951 = vmatpush.bf16.msrb.mxu1 %v12242_v26  ;;  %9964 = vmatpush.bf16.msrb.mxu2 %v12370_v21  ;;  %v9987_v26 = vperm.slane %v19976_v62, 0 }
 0xbec   : > { %9977 = vmatpush.bf16.msrb.mxu3 %v12498_v40 }
 0xbee   : > { %9939 = vmatpush.bf16.msrb.mxu0 %v12098_v22  ;;  %v13229_v22 = vld [vmem:[%s20102_s10 + $0xb0] sm:$0xff] }
 0xbef   : > { %9952 = vmatpush.bf16.msrb.mxu1 %v12226_v56  ;;  %9965 = vmatpush.bf16.msrb.mxu2 %v12354_v3  ;;  %v13215_v56 = vld [vmem:[%s20102_s10 + $0x40] sm:$0xff]  ;;  %v13228_v3 = vld [vmem:[%s20102_s10 + $0xa8] sm:$0xff] }
 0xbf0   : > { %9978 = vmatpush.bf16.msrb.mxu3 %v12482_v36  ;;  %v13226_v36 = vld [vmem:[%s20102_s10 + $0x98] sm:$0xff] }
 0xbf2   : > { %9940 = vmatpush.bf16.msrb.mxu0 %v12082_v63  ;;  %v9094_v37 = vpop.f32.mrf.mxu0 }
 0xbf3   : > { %9953 = vmatpush.bf16.msrb.mxu1 %v12210_v31  ;;  %9966 = vmatpush.bf16.msrb.mxu2 %v12338_v8  ;;  %v9107_v50 = vpop.f32.mrf.mxu1 }
 0xbf4   : > { %9979 = vmatpush.bf16.msrb.mxu3 %v12466_v24  ;;  %v9108_v10 = vadd.f32 %v9107_v50, %v9094_v37  ;;  %v13225_v24 = vld [vmem:[%s20102_s10 + $0x90] sm:$0xff] }
 0xbf5   : > { %9941 = vmatmul.bf16.vlgmr.msrb.gmra.mxu0 %v19373_v25  ;;  %v13210_v25 = vld [vmem:[%s20102_s10 + $0x18] sm:$0xff] }
 0xbf6   : > { %10283 = vmatpush.bf16.msra.mxu0 %v13214_v19  ;;  %9954 = vmatmul.bf16.vlgmr.msrb.gmra.mxu1 %v19375_v20 }
 0xbf7   : > { %9967 = vmatmul.bf16.vlgmr.msrb.gmra.mxu2 %v19377_v9  ;;  %9980 = vmatmul.bf16.vlgmr.msrb.gmra.mxu3 %v19389_v2 }
 0xbf8   : > { %10296 = vmatpush.bf16.msra.mxu1 %v13222_v14  ;;  %10309 = vmatpush.bf16.msra.mxu2 %v13230_v38 }
 0xbfa   : > { %10284 = vmatpush.bf16.msra.mxu0 %v13213_v39  ;;  %v9096_v23 = vpop.f32.mrf.mxu0 }
 0xbfb   : > { %v9120_v20 = vpop.f32.mrf.mxu2  ;;  %v9109_v55 = vpop.f32.mrf.mxu1 }
 0xbfc   : > { %v9121_v9 = vadd.f32 %v9120_v20, %v9108_v10  ;;  %v9133_v2 = vpop.f32.mrf.mxu3  ;;  %10297 = vmatpush.bf16.msra.mxu1 %v13221_v41  ;;  %10310 = vmatpush.bf16.msra.mxu2 %v13229_v22  ;;  %v13237_v10 = vld [vmem:[%s20102_s10 + $0xf0] sm:$0xff]  ;;  %v13223_v20 = vld [vmem:[%s20102_s10 + $0x80] sm:$0xff]  ;;  %v13234_v55 = vld [vmem:[%s20102_s10 + $0xd8] sm:$0xff]  ;;  %v10017_v22 = vlaneseq }
 0xbfe   : > { %10285 = vmatpush.bf16.msra.mxu0 %v13212_v58  ;;  %v19946_v5 = vadd.f32 %v9133_v2, %v9121_v9  ;;  %v13224_v58 = vld [vmem:[%s20102_s10 + $0x88] sm:$0xff]  ;;  %v13235_v2 = vld [vmem:[%s20102_s10 + $0xe0] sm:$0xff]  ;;  %vm10019_vm12 = vcmp.lt.s32.totalorder %v10017_v22, 512 }
 0xbff   : > { %v13236_v9 = vld [vmem:[%s20102_s10 + $0xe8] sm:$0xff] }
 0xc00   : > { %10298 = vmatpush.bf16.msra.mxu1 %v13220_v12  ;;  %10311 = vmatpush.bf16.msra.mxu2 %v13228_v3 }
 0xc02   : > { %10286 = vmatpush.bf16.msra.mxu0 %v13211_v30 }
 0xc03   : > { %v9122_v1 = vpop.f32.mrf.mxu2 }
 0xc04   : > { %v9135_v51 = vpop.f32.mrf.mxu3  ;;  %10299 = vmatpush.bf16.msra.mxu1 %v13219_v46  ;;  %10312 = vmatpush.bf16.msra.mxu2 %v13227_v28 }
 0xc06   : > { %10287 = vmatpush.bf16.msra.mxu0 %v13210_v25 }
 0xc08   : > { %10300 = vmatpush.bf16.msra.mxu1 %v13218_v60  ;;  %10313 = vmatpush.bf16.msra.mxu2 %v13226_v36  ;;  %v13233_v60 = vld [vmem:[%s20102_s10 + $0xd0] sm:$0xff] }
 0xc0a   : > { %10288 = vmatpush.bf16.msra.mxu0 %v13209_v59 }
 0xc0c   : > { %10314 = vmatpush.bf16.msra.mxu2 %v13225_v24 }
 0xc0e   : > { %10289 = vmatpush.bf16.msra.mxu0 %v13208_v18 }
 0xc10   : > { %10315 = vmatpush.bf16.msra.mxu2 %v13224_v58 }
 0xc12   : > { %10290 = vmatpush.bf16.msra.mxu0 %v13207_v32  ;;  %v9786_v4 = vpop.f32.mrf.mxu0  ;;  %v9989_v32 = vperm.slane %v19976_v62, 2 }
 0xc13   : > { %v9799_v11 = vpop.f32.mrf.mxu1  ;;  %v9787_v0 = vadd.f32 %v9786_v4, %v19647_v15  ;;  %v13217_v15 = vld [vmem:[%s20102_s10 + $0x50] sm:$0xff] }
 0xc14   : > { %10301 = vmatpush.bf16.msra.mxu1 %v13217_v15  ;;  %10316 = vmatpush.bf16.msra.mxu2 %v13223_v20 }
 0xc15   : > { %v9800_v43 = vadd.f32 %v9799_v11, %v9787_v0 }
 0xc18   : > { %10302 = vmatpush.bf16.msra.mxu1 %v13216_v34 }
 0xc1a   : > { %v9788_v21 = vpop.f32.mrf.mxu0 }
 0xc1b   : > { %v9812_v54 = vpop.f32.mrf.mxu2  ;;  %v9801_v52 = vpop.f32.mrf.mxu1 }
 0xc1c   : > { %v9813_v6 = vadd.f32 %v9812_v54, %v9800_v43  ;;  %v9825_v29 = vpop.f32.mrf.mxu3  ;;  %10303 = vmatpush.bf16.msra.mxu1 %v13215_v56 }
 0xc1e   : > { %v9826_v35 = vadd.f32 %v9825_v29, %v9813_v6  ;;  %v13232_v6 = vld [vmem:[%s20102_s10 + $0xc8] sm:$0xff]  ;;  %v13231_v29 = vld [vmem:[%s20102_s10 + $0xc0] sm:$0xff] }
 0xc20   : > { %v9995_v44 = vadd.f32 %v9987_v26, %v9826_v35 }
 0xc22   : > { %v9999_v40 = vmax.f32 %v9995_v44, 0.0 }
 0xc23   : > { %v9814_v61 = vpop.f32.mrf.mxu2 }
 0xc24   : > { %v10022_v13 = vpack.c.bf16 %v9999_v40, %v9999_v40  ;;  %v9827_v45 = vpop.f32.mrf.mxu3  ;;  %v9990_v61 = vperm.slane %v19976_v62, 3 }
 0xc26   : > { %10291 = vmatmul.bf16.vlgmr.msra.gmra.mxu0 %v10022_v13 }
 0xc32   : > { %v9838_v33 = vpop.f32.mrf.mxu0 }
 0xc33   : > { %v9851_v27 = vpop.f32.mrf.mxu1  ;;  %v9839_v57 = vadd.f32 %v9838_v33, %v19769_v7  ;;  %v13238_v7 = vld [vmem:[%s20102_s10 + $0xf8] sm:$0xff] }
 0xc34   : > { %10322 = vmatpush.bf16.msra.mxu3 %v13238_v7 }
 0xc35   : > { %v9852_v49 = vadd.f32 %v9851_v27, %v9839_v57 }
 0xc38   : > { %10323 = vmatpush.bf16.msra.mxu3 %v13237_v10 }
 0xc3a   : > { %v9840_v48 = vpop.f32.mrf.mxu0 }
 0xc3b   : > { %v9864_v53 = vpop.f32.mrf.mxu2  ;;  %v9853_v63 = vpop.f32.mrf.mxu1  ;;  %v10090_v48 = vld [vmem:[%s20103_s11] sm:$0x1] }
 0xc3c   : > { %v9865_v17 = vadd.f32 %v9864_v53, %v9852_v49  ;;  %v9877_v42 = vpop.f32.mrf.mxu3  ;;  %10324 = vmatpush.bf16.msra.mxu3 %v13236_v9 }
 0xc3e   : > { %v9878_v31 = vadd.f32 %v9877_v42, %v9865_v17 }
 0xc40   : > { %v9996_v8 = vadd.f32 %v9988_v47, %v9878_v31  ;;  %10325 = vmatpush.bf16.msra.mxu3 %v13235_v2 }
 0xc42   : > { %v10000_v19 = vmax.f32 %v9996_v8, 0.0 }
 0xc43   : > { %v9866_v39 = vpop.f32.mrf.mxu2 }
 0xc44   : > { %v10007_v37 = vrot.slane %v10000_v19, 7  ;;  %v10023_v50 = vpack.c.bf16 %v10000_v19, %v10000_v19  ;;  %v9879_v30 = vpop.f32.mrf.mxu3  ;;  %10326 = vmatpush.bf16.msra.mxu3 %v13234_v55 }
 0xc46   : > { %v10011_v25 = vsel %vm10010_vm9, %v9999_v40, %v10007_v37  ;;  %10304 = vmatmul.bf16.vlgmr.msra.gmra.mxu1 %v10023_v50 }
 0xc48   : > { %10327 = vmatpush.bf16.msra.mxu3 %v13233_v60 }
 0xc4c   : > { %10328 = vmatpush.bf16.msra.mxu3 %v13232_v6 }
 0xc50   : > { %10329 = vmatpush.bf16.msra.mxu3 %v13231_v29 }
 0xc52   : > { %v9890_v23 = vpop.f32.mrf.mxu0 }
 0xc53   : > { %v9903_v59 = vpop.f32.mrf.mxu1  ;;  %v9891_v1 = vadd.f32 %v9890_v23, %v19877_v16 }
 0xc55   : > { %v9904_v14 = vadd.f32 %v9903_v59, %v9891_v1 }
 0xc5a   : > { %v9892_v12 = vpop.f32.mrf.mxu0 }
 0xc5b   : > { %v9916_v51 = vpop.f32.mrf.mxu2  ;;  %v9905_v46 = vpop.f32.mrf.mxu1 }
 0xc5c   : > { %v9917_v18 = vadd.f32 %v9916_v51, %v9904_v14  ;;  %v9929_v41 = vpop.f32.mrf.mxu3 }
 0xc5e   : > { %v9930_v4 = vadd.f32 %v9929_v41, %v9917_v18 }
 0xc60   : > { %v9997_v11 = vadd.f32 %v9989_v32, %v9930_v4 }
 0xc62   : > { %v10001_v0 = vmax.f32 %v9997_v11, 0.0 }
 0xc63   : > { %v9918_v43 = vpop.f32.mrf.mxu2 }
 0xc64   : > { %v10024_v54 = vpack.c.bf16 %v10001_v0, %v10001_v0  ;;  %v9931_v16 = vpop.f32.mrf.mxu3  ;;  %v10008_v28 = vrot.slane %v10001_v0, 6 }
 0xc66   : > { %10317 = vmatmul.bf16.vlgmr.msra.gmra.mxu2 %v10024_v54 }
 0xc72   : > { %v9942_v26 = vpop.f32.mrf.mxu0 }
 0xc73   : > { %v9955_v21 = vpop.f32.mrf.mxu1  ;;  %v9943_v52 = vadd.f32 %v9942_v26, %v19946_v5 }
 0xc75   : > { %v9956_v35 = vadd.f32 %v9955_v21, %v9943_v52 }
 0xc7a   : > { %v9968_v44 = vpop.f32.mrf.mxu2  ;;  %v9981_v15 = vpop.f32.mrf.mxu3 }
 0xc7b   : > { %v9969_v40 = vadd.f32 %v9968_v44, %v9956_v35  ;;  %v9944_v13 = vpop.f32.mrf.mxu0  ;;  %v9957_v45 = vpop.f32.mrf.mxu1 }
 0xc7d   : > { %v9982_v34 = vadd.f32 %v9981_v15, %v9969_v40 }
 0xc7f   : > { %v9998_v38 = vadd.f32 %v9990_v61, %v9982_v34 }
 0xc81   : > { %v10002_v56 = vmax.f32 %v9998_v38, 0.0 }
 0xc82   : > { %v9970_v3 = vpop.f32.mrf.mxu2  ;;  %v9983_v5 = vpop.f32.mrf.mxu3 }
 0xc83   : > { %v10009_v33 = vrot.slane %v10002_v56, 5  ;;  %v10025_v27 = vpack.c.bf16 %v10002_v56, %v10002_v56 }
 0xc85   : > { %v10013_v36 = vsel %vm10012_vm10, %v10008_v28, %v10009_v33  ;;  %10330 = vmatmul.bf16.vlgmr.msra.gmra.mxu3 %v10025_v27 }
 0xc86   : > { %v10015_v57 = vsel %vm10014_vm11, %v10011_v25, %v10013_v36 }
 0xc87   : > { %10021 = vst.msk [vmem:[%s13892_s28] sm:$0xf] %vm10019_vm12, %v10015_v57 }
 0xca3   : > { %v10292_v62 = vpop.f32.mrf.mxu0 }
 0xca4   : > { %v10293_v63 = vadd.f32 %v10292_v62, %v10090_v48 }
 0xcab   : > { %v10294_v49 = vpop.f32.mrf.mxu0 }
 0xcc3   : > { %v10305_v53 = vpop.f32.mrf.mxu1 }
 0xcc4   : > { %v10306_v31 = vadd.f32 %v10305_v53, %v10293_v63 }
 0xccb   : > { %v10307_v17 = vpop.f32.mrf.mxu1 }
 0xce9   : > { %v10318_v42 = vpop.f32.mrf.mxu2 }
 0xcea   : > { %v10319_v8 = vadd.f32 %v10318_v42, %v10306_v31 }
 0xcf1   : > { %v10320_v47 = vpop.f32.mrf.mxu2 }
 0xd08   : > { %v10331_v24 = vpop.f32.mrf.mxu3 }
 0xd09   : > { %v10332_v19 = vadd.f32 %v10331_v24, %v10319_v8 }
 0xd0b   : > { %10336 = vst.msk [vmem:[%s13896_s29] sm:$0x1] %vm10335_vm13, %v10332_v19 }
 0xd10   : > { %v10333_v7 = vpop.f32.mrf.mxu3 }
 0xd11 PF: > { %s10353_s27 = scalar_lea.hbm %s20106_s14, %s13715_s19  ;;  %s10355_s21 = sshll.u32 %s13896_s29, 4  ;;  %s10356_s21 = int_to_ptr.vmem [resolvable:$true] %s10355_s21 }
 0xd12   : > { %s10357_s12 = sshll.u32 %s10353_s27, 4  ;;  %s20568_s15 = sand.u32 1, %s13703_s16   ;;  %s10358_s12 = int_to_ptr.hbm [resolvable:$true] %s10357_s12 }
 0xd13   : > { %s10342_s22 = scalar_lea.sflag [#allocation9], %s20568_s15  ;;  %s13647_s17 = sshra.s32 %s10358_s12, 4  ;;  %s13648_s17 = int_to_ptr.hbm [resolvable:$true] %s13647_s17 }
 0xd14   : > { %s13649_s25 = scalar_lea.hbm %s13648_s17, 1  ;;  %s13653_s23 = scalar_lea.hbm %s20106_s14, 2 }
 0xd15   : > { %p13650_p1 = scmp.ne.s32.totalorder %s13648_s17, %s13649_s25  ;;  %p13654_p5 = scmp.lt.s32.totalorder %s13648_s17, %s20106_s14 }
 0xd16   : > { %p13655_p6 = scmp.lt.s32.totalorder %s13653_s23, %s13649_s25 }
 0xd17   : > { %p13651_p2 = pnand %p13650_p1, %p13861_p3 }
 0xd18   : > { %p13656_p7 = por %p13655_p6, %p13654_p5 }
 0xd19   : > { %p13652_p4 = pneg %p13651_p2 }
 0xd1b   : > { %p13657_p8 = pnand %p13656_p7, %p13652_p4 }
 0xd1d   : > { %13660 = shalt.err (!%p13657_p8)
}
 0xd1e   : > { %13350 = dma.vmem_to_hbm [thread:$0]  (%p13861_p3), %s10356_s21, 16, %s10358_s12, %s10342_s22  }
 0xd1f PF: > { %s20569_s19 = sld [smem:[#allocation15_spill]] }
 0xd20   : > { %s20570_s29 = sld [smem:[#allocation11_spill]] }
 0xd25   : > { %p13356_p10 = scmp.ge.s32.totalorder %s20569_s19, 2 }
 0xd26   : > { %s10376_s27 = sand.u32 1, %s20570_s29  }
 0xd27   : > { %p13353_p11 = pnand %p13356_p10, %p13871_p9  ;;  %s10377_s15 = scalar_lea.sflag [#allocation9], %s10376_s27 }
 0xd29   : > { %p13354_p12 = pneg %p13353_p11 }
 0xd2b   : > { %13694 = dma.done.wait (%p13354_p12), %s10377_s15, 16  }
 0xd2c   : > { %13696 = vsyncadd (%p13354_p12), %s10377_s15, 4294967280  ;;  %s29_s22 = sadd.s32 1, %s20569_s19   ;;  %s20572_s17 = sld [smem:[#allocation12_spill]] }
 0xd2d   : > { %p26_p13 = scmp.ge.s32.totalorder %s29_s22, 6   ;;  %s20573_s25 = sld [smem:[#allocation19_spill]] }
 0xd2e   : > { %s20574_s18 = sld [smem:[#allocation13_spill]]  ;;  %s20578_s15 = smov %s13703_s16 }
 0xd2f   : > { %s20575_s19 = sld [smem:[#allocation14_spill]]  ;;  %28 = sbr.rel (!%p26_p13) target bundleno = 7 (0x7), region = 129 }
 0xd30   : > { %s20576_s20 = sld [smem:[#allocation16_spill]] }
 0xd31   : > { %s20577_s21 = sld [smem:[#allocation17_spill]] }
 0xd32   : > { %s20579_s16 = smov %s20572_s17 }
 0xd33   : > { %s20580_s17 = smov %s20573_s25 }
 0xd34   :  { %10382 = vsyncpa [#allocation9], 1 }
 0xd35   :  { %10384 = vsyncpa [#allocation9 + $0x1], 1 }

</bundles_post_ra>
